<compile_context>
chip_gen: v7x
topology: tpu7x:2x2x1
jax: 0.10.0
libtpu: 0.0.40
codegen_flags: <defaults>
</compile_context>

<pallas_src>
import jax
import jax.numpy as jnp
from jax.experimental import pallas as pl
from jax.experimental.pallas import tpu as pltpu


# --------------------------------------------------------------------------
# helpers
# --------------------------------------------------------------------------
def _full_spec(shape):
    # Whole-array block (every tensor here is a few KB .. few hundred KB).
    # TODO(synk): at RAFT/Inception scale, (a) tile the pixel axis with
    # >=512-lane blocks on a "parallel" grid axis (v7x megacore + pipelined
    # HBM), (b) K-tile the FID weight with an "arbitrary" axis + f32 VMEM
    # accumulator and set pltpu.CompilerParams(vmem_limit_bytes=...) -- v7x
    # has only 64 MiB physical VMEM.
    rank = len(shape)
    return pl.BlockSpec(shape, lambda i, _r=rank: (0,) * _r)


_COMPILER_PARAMS = pltpu.CompilerParams(dimension_semantics=("arbitrary",))


# --------------------------------------------------------------------------
# fused Pallas kernel: preprocess -> flow (pred & gt) -> RMSE loss -> FID feats
# --------------------------------------------------------------------------
def _fused_eval_kernel(base_ref, pred_ref, gt_ref,
                       w1_ref, b1_ref, w2t_ref, b2_ref, wf_ref,
                       flow_ref, feats_ref, loss_ref):
    """Inputs  : base/pred/gt [B, C, HW]  (channels on sublanes, pixels on lanes)
                 w1 [hidden, k_pad] (= [W1a | W1b | 0-pad]), b1 [hidden, 1]
                 w2t [2, hidden],  b2 [2, 1],  wf [C*HW, F]
       Outputs : flow  [B, 4, HW]   rows = (u_pred, v_pred, u_gt, v_gt)
                 feats [2B, F]      FID features, pred rows then gt rows
                 loss  [1, 1]       optical-flow loss (mean per-sample RMSE)
    """
    B, C, HW = base_ref.shape
    hidden, k_pad = w1_ref.shape
    npix = 2 * B * HW                     # lane blocks: pred stream (B) then gt stream (B)

    def preprocess(x):
        # image = clamp(2 * (x - 0.5), -1, 1)
        return jnp.clip(2.0 * (x - 0.5), -1.0, 1.0)

    def quantize(x):
        # clamp(0,1) * 255 -> uint8 (truncation == floor for non-negative);
        # kept in f32 so it feeds the MXU directly. F = fid_feature_dim (128 here).
        return jnp.floor(jnp.clip(x, 0.0, 1.0) * 255.0)

    base_p = preprocess(base_ref[...])    # [B, C, HW]
    pred_p = preprocess(pred_ref[...])
    gt_p = preprocess(gt_ref[...])

    # ---------------- flow model: two MXU matmuls over all (b, stream) -----
    # Operand X[k_pad, 2B*HW]: top C rows = base (repeated for both streams),
    # next C rows = pred_b / gt_b, remaining rows = zero padding (matching
    # zero columns in w1, so semantics are unchanged).
    x_top = jnp.concatenate([base_p[b] for b in range(B)] * 2, axis=1)        # [C, npix]
    x_bot = jnp.concatenate([pred_p[b] for b in range(B)]
                            + [gt_p[b] for b in range(B)], axis=1)            # [C, npix]
    parts = [x_top, x_bot]
    if k_pad > 2 * C:
        parts.append(jnp.zeros((k_pad - 2 * C, npix), jnp.float32))
    x_all = jnp.concatenate(parts, axis=0)                                    # [k_pad, npix]

    # Bias broadcasts hoisted & done exactly once (JAX does not CSE them).
    b1_full = jnp.broadcast_to(b1_ref[...], (hidden, npix))                   # [hidden, npix]
    b2_full = jnp.broadcast_to(b2_ref[...], (2, npix))                        # [2, npix]

    h = jnp.dot(w1_ref[...], x_all, preferred_element_type=jnp.float32) + b1_full
    h = jnp.maximum(h, 0.0)                                                   # [hidden, npix]
    flows = jnp.dot(w2t_ref[...], h, preferred_element_type=jnp.float32) + b2_full  # [2, npix]

    # ---------------- flow outputs + per-sample RMSE loss ------------------
    # torch: mean((pf-gf)^2.sum(dim=1), dim=(1,2)).sqrt().mean()
    #      = mean_b sqrt( (1/HW) * sum_{c,p} (pf-gf)^2 )
    # The remaining Python loop over B only slices lanes, stores one 4-sublane
    # slab and reduces [2,HW] -> (1,1): tiny live ranges.
    # TODO(synk): for large B, move b onto a grid axis (enables v7x megacore
    # sharding) or use lax.fori_loop(unroll=True).
    inv_hw = 1.0 / HW
    loss_acc = jnp.zeros((1, 1), jnp.float32)
    for b in range(B):
        pf = flows[:, b * HW:(b + 1) * HW]                 # [2, HW]  pred-stream flow
        gf = flows[:, (B + b) * HW:(B + b + 1) * HW]       # [2, HW]  gt-stream flow
        flow_ref[b, :, :] = jnp.concatenate([pf, gf], axis=0)   # one [4, HW] store per b
        d = pf - gf
        ssum = jnp.sum(d * d, axis=0, keepdims=True)       # [1, HW] sum over flow channels
        mse = jnp.sum(ssum, axis=1, keepdims=True) * inv_hw  # [1, 1] mean over pixels
        loss_acc = loss_acc + jnp.sqrt(mse)
    # TODO(synk): an SMEM scalar output (pl.BlockSpec(memory_space=
    # pltpu.MemorySpace.SMEM)) would drop this padded (1,1) VMEM tile; kept in
    # VMEM for proven lowering robustness (cost: one masked 4-byte store).
    loss_ref[...] = loss_acc * (1.0 / B)

    # ---------------- FID features (fused; no second dispatch) -------------
    # Quantize the RAW images (already resident in VMEM), lay every image out
    # as one lane-dense row [1, C*HW] and project with a single MXU matmul.
    # TODO(synk): the stateful fid_calculator.update() accumulation across
    # calls is not modeled; FID uses the current batch only.
    pred_q = quantize(pred_ref[...])                       # [B, C, HW]
    gt_q = quantize(gt_ref[...])
    rows = []
    for q in (pred_q, gt_q):                               # pred rows 0..B-1, gt rows B..2B-1
        for b in range(B):
            rows.append(jnp.concatenate([q[b, c:c + 1, :] for c in range(C)], axis=1))  # [1, C*HW]
    xq = jnp.concatenate(rows, axis=0)                     # [2B, C*HW]
    feats_ref[...] = jnp.dot(xq, wf_ref[...], preferred_element_type=jnp.float32)  # [2B, F]


# --------------------------------------------------------------------------
# pallas_call wrapper (ONE call for the whole evaluator compute)
# --------------------------------------------------------------------------
def _fused_eval_call(base3, pred3, gt3, w1, b1, w2_t, b2, wf):
    B, C, HW = base3.shape
    F = wf.shape[1]
    args = (base3, pred3, gt3, w1, b1, w2_t, b2, wf)
    out_shapes = (
        jax.ShapeDtypeStruct((B, 4, HW), jnp.float32),     # (u_pred, v_pred, u_gt, v_gt)
        jax.ShapeDtypeStruct((2 * B, F), jnp.float32),     # FID features
        jax.ShapeDtypeStruct((1, 1), jnp.float32),         # optical-flow loss
    )
    return pl.pallas_call(
        _fused_eval_kernel,
        out_shape=out_shapes,
        grid=(1,),
        in_specs=[_full_spec(a.shape) for a in args],
        out_specs=tuple(_full_spec(s.shape) for s in out_shapes),
        compiler_params=_COMPILER_PARAMS,
    )(*args)


# --------------------------------------------------------------------------
# evaluator
# --------------------------------------------------------------------------
class OpticalFlowEvaluatorPallas:
    def __init__(self, key, image_size=(3, 16, 16), hidden=32, fid_feature_dim=128):
        C, H, W = image_size
        self.C, self.H, self.W = C, H, W
        self.hidden = hidden
        self.fid_feature_dim = fid_feature_dim

        k1, k2, k3, k4 = jax.random.split(key, 4)
        # Flow-model parameters stored pre-transposed / pre-stacked for the
        # lane-dense [channels, pixels] kernel layout.
        w1a = 0.1 * jax.random.normal(k1, (hidden, C), jnp.float32)   # acts on base
        w1b = 0.1 * jax.random.normal(k2, (hidden, C), jnp.float32)   # acts on pred/gt
        k_pad = ((2 * C + 7) // 8) * 8                                 # sublane-align K
        w1 = jnp.concatenate([w1a, w1b], axis=1)                       # [hidden, 2C]
        if k_pad > 2 * C:
            w1 = jnp.concatenate(
                [w1, jnp.zeros((hidden, k_pad - 2 * C), jnp.float32)], axis=1)
        self.w1 = w1                                                   # [hidden, k_pad]
        self.b1 = jnp.zeros((hidden, 1), jnp.float32)
        self.w2_t = 0.1 * jax.random.normal(k3, (2, hidden), jnp.float32)
        self.b2 = jnp.zeros((2, 1), jnp.float32)
        # TODO(synk): real InceptionV3 FID features are not reproducible; use a
        # fixed linear projection of the uint8-quantized images instead.
        self.wf = (1.0 / (C * H * W)) * jax.random.normal(
            k4, (C * H * W, fid_feature_dim), jnp.float32)

        # Single jitted forward: one Pallas dispatch, no mid-pipeline host syncs.
        self._forward = jax.jit(self._forward_impl)

    # ---- Fréchet distance (eigh has no Pallas equivalent; plain JAX) ------
    @staticmethod
    def _frechet_distance(f1, f2):
        mu1, mu2 = jnp.mean(f1, axis=0), jnp.mean(f2, axis=0)
        c1 = f1 - mu1
        c2 = f2 - mu2
        n1 = max(f1.shape[0] - 1, 1)   # NOTE: degenerate/biased for B == 1
        n2 = max(f2.shape[0] - 1, 1)
        s1 = (c1.T @ c1) / n1
        s2 = (c2.T @ c2) / n2
        diff = mu1 - mu2
        # tr(sqrtm(s1 @ s2)) via symmetric eigendecompositions (small feat dim)
        e, v = jnp.linalg.eigh(s1)
        e = jnp.maximum(e, 0.0)
        s1h = (v * jnp.sqrt(e)) @ v.T
        m = s1h @ s2 @ s1h
        e2 = jnp.linalg.eigvalsh((m + m.T) * 0.5)
        tr_covmean = jnp.sum(jnp.sqrt(jnp.maximum(e2, 0.0)))
        return diff @ diff + jnp.trace(s1) + jnp.trace(s2) - 2.0 * tr_covmean

    # ---- jitted forward ----------------------------------------------------
    def _forward_impl(self, base_images, pred_images, gt_images):
        B, C, H, W = base_images.shape
        HW = H * W
        # NCHW -> [B, C, H*W]: pure reshape (row-major), no transpose/copy.
        base3 = base_images.reshape(B, C, HW)
        pred3 = pred_images.reshape(B, C, HW)
        gt3 = gt_images.reshape(B, C, HW)

        flow4, feats, loss11 = _fused_eval_call(
            base3, pred3, gt3, self.w1, self.b1, self.w2_t, self.b2, self.wf)

        pred_flow = flow4[:, 0:2, :].reshape(B, 2, H, W)
        gt_flow = flow4[:, 2:4, :].reshape(B, 2, H, W)
        fid_score = self._frechet_distance(feats[:B], feats[B:])
        return loss11[0, 0], fid_score, pred_flow, gt_flow

    # ---- forward (single host sync at the very end) ------------------------
    def __call__(self, base_images, pred_images, gt_images):
        of_loss, fid_score, pred_flow, gt_flow = self._forward(
            base_images, pred_images, gt_images)
        of_loss, fid_score, pred_flow, gt_flow = jax.block_until_ready(
            (of_loss, fid_score, pred_flow, gt_flow))
        return {
            "optical_flow_loss": float(of_loss),   # .item() semantics
            "fid_score": float(fid_score),
            "pred_flow": pred_flow,
            "gt_flow": gt_flow,
        }


# --------------------------------------------------------------------------
# main
# --------------------------------------------------------------------------
if __name__ == "__main__":
    key = jax.random.PRNGKey(0)
    k_params, k_base, k_pred, k_gt = jax.random.split(key, 4)

    B, C, H, W = 2, 3, 16, 16
    base_images = jax.random.uniform(k_base, (B, C, H, W), jnp.float32)
    pred_images = jax.random.uniform(k_pred, (B, C, H, W), jnp.float32)
    gt_images = jax.random.uniform(k_gt, (B, C, H, W), jnp.float32)

    evaluator = OpticalFlowEvaluatorPallas(
        k_params, image_size=(C, H, W), hidden=32, fid_feature_dim=128
    )
    out = evaluator(base_images, pred_images, gt_images)

    jax.block_until_ready(out["pred_flow"])
    jax.block_until_ready(out["gt_flow"])
    assert out["pred_flow"].shape == (B, 2, H, W)
    assert out["gt_flow"].shape == (B, 2, H, W)
    assert isinstance(out["optical_flow_loss"], float)
    assert isinstance(out["fid_score"], float)

    print("KERNEL_OK")
</pallas_src>

<mosaic_0001>
module attributes {stable_mosaic.version = 11 : i64} {
  func.func @_fused_eval_kernel(%arg0: i32, %arg1: memref<2x3x256xf32, #tpu.memory_space<vmem>>, %arg2: memref<2x3x256xf32, #tpu.memory_space<vmem>>, %arg3: memref<2x3x256xf32, #tpu.memory_space<vmem>>, %arg4: memref<32x8xf32, #tpu.memory_space<vmem>>, %arg5: memref<32x1xf32, #tpu.memory_space<vmem>>, %arg6: memref<2x32xf32, #tpu.memory_space<vmem>>, %arg7: memref<2x1xf32, #tpu.memory_space<vmem>>, %arg8: memref<768x128xf32, #tpu.memory_space<vmem>>, %arg9: memref<2x4x256xf32, #tpu.memory_space<vmem>>, %arg10: memref<4x128xf32, #tpu.memory_space<vmem>>, %arg11: memref<1x1xf32, #tpu.memory_space<vmem>>) attributes {dimension_semantics = [#tpu.dimension_semantics<arbitrary>], iteration_bounds = array<i64: 1>, scalar_prefetch = 0 : i64, scratch_operands = 0 : i64, tpu.core_type = #tpu.core_type<tc>, window_params = [{pipeline_mode = #tpu.pipeline_mode<synchronous>, transform_indices = @transform_0, window_bounds = array<i64: 2, 3, 256>}, {pipeline_mode = #tpu.pipeline_mode<synchronous>, transform_indices = @transform_1, window_bounds = array<i64: 2, 3, 256>}, {pipeline_mode = #tpu.pipeline_mode<synchronous>, transform_indices = @transform_2, window_bounds = array<i64: 2, 3, 256>}, {pipeline_mode = #tpu.pipeline_mode<synchronous>, transform_indices = @transform_3, window_bounds = array<i64: 32, 8>}, {pipeline_mode = #tpu.pipeline_mode<synchronous>, transform_indices = @transform_4, window_bounds = array<i64: 32, 1>}, {pipeline_mode = #tpu.pipeline_mode<synchronous>, transform_indices = @transform_5, window_bounds = array<i64: 2, 32>}, {pipeline_mode = #tpu.pipeline_mode<synchronous>, transform_indices = @transform_6, window_bounds = array<i64: 2, 1>}, {pipeline_mode = #tpu.pipeline_mode<synchronous>, transform_indices = @transform_7, window_bounds = array<i64: 768, 128>}, {pipeline_mode = #tpu.pipeline_mode<synchronous>, transform_indices = @transform_8, window_bounds = array<i64: 2, 4, 256>}, {pipeline_mode = #tpu.pipeline_mode<synchronous>, transform_indices = @transform_9, window_bounds = array<i64: 4, 128>}, {pipeline_mode = #tpu.pipeline_mode<synchronous>, transform_indices = @transform_10, window_bounds = array<i64: 1, 1>}]} {
    %c0 = arith.constant 0 : index
    %c0_0 = arith.constant 0 : index
    %c0_1 = arith.constant 0 : index
    %0 = vector.load %arg1[%c0, %c0_0, %c0_1] : memref<2x3x256xf32, #tpu.memory_space<vmem>>, vector<2x3x256xf32>
    %cst = arith.constant 5.000000e-01 : f32
    %1 = vector.broadcast %cst : f32 to vector<2x3x256xf32>
    %2 = arith.subf %0, %1 : vector<2x3x256xf32>
    %cst_2 = arith.constant 2.000000e+00 : f32
    %3 = vector.broadcast %cst_2 : f32 to vector<2x3x256xf32>
    %4 = arith.mulf %3, %2 : vector<2x3x256xf32>
    %cst_3 = arith.constant -1.000000e+00 : f32
    %cst_4 = arith.constant 1.000000e+00 : f32
    %5 = vector.broadcast %cst_3 : f32 to vector<2x3x256xf32>
    %6 = arith.maximumf %5, %4 : vector<2x3x256xf32>
    %7 = vector.broadcast %cst_4 : f32 to vector<2x3x256xf32>
    %8 = arith.minimumf %7, %6 : vector<2x3x256xf32>
    %c0_5 = arith.constant 0 : index
    %c0_6 = arith.constant 0 : index
    %c0_7 = arith.constant 0 : index
    %9 = vector.load %arg2[%c0_5, %c0_6, %c0_7] : memref<2x3x256xf32, #tpu.memory_space<vmem>>, vector<2x3x256xf32>
    %cst_8 = arith.constant 5.000000e-01 : f32
    %10 = vector.broadcast %cst_8 : f32 to vector<2x3x256xf32>
    %11 = arith.subf %9, %10 : vector<2x3x256xf32>
    %cst_9 = arith.constant 2.000000e+00 : f32
    %12 = vector.broadcast %cst_9 : f32 to vector<2x3x256xf32>
    %13 = arith.mulf %12, %11 : vector<2x3x256xf32>
    %cst_10 = arith.constant -1.000000e+00 : f32
    %cst_11 = arith.constant 1.000000e+00 : f32
    %14 = vector.broadcast %cst_10 : f32 to vector<2x3x256xf32>
    %15 = arith.maximumf %14, %13 : vector<2x3x256xf32>
    %16 = vector.broadcast %cst_11 : f32 to vector<2x3x256xf32>
    %17 = arith.minimumf %16, %15 : vector<2x3x256xf32>
    %c0_12 = arith.constant 0 : index
    %c0_13 = arith.constant 0 : index
    %c0_14 = arith.constant 0 : index
    %18 = vector.load %arg3[%c0_12, %c0_13, %c0_14] : memref<2x3x256xf32, #tpu.memory_space<vmem>>, vector<2x3x256xf32>
    %cst_15 = arith.constant 5.000000e-01 : f32
    %19 = vector.broadcast %cst_15 : f32 to vector<2x3x256xf32>
    %20 = arith.subf %18, %19 : vector<2x3x256xf32>
    %cst_16 = arith.constant 2.000000e+00 : f32
    %21 = vector.broadcast %cst_16 : f32 to vector<2x3x256xf32>
    %22 = arith.mulf %21, %20 : vector<2x3x256xf32>
    %cst_17 = arith.constant -1.000000e+00 : f32
    %cst_18 = arith.constant 1.000000e+00 : f32
    %23 = vector.broadcast %cst_17 : f32 to vector<2x3x256xf32>
    %24 = arith.maximumf %23, %22 : vector<2x3x256xf32>
    %25 = vector.broadcast %cst_18 : f32 to vector<2x3x256xf32>
    %26 = arith.minimumf %25, %24 : vector<2x3x256xf32>
    %27 = vector.extract_strided_slice %8 {offsets = [0, 0, 0], sizes = [1, 3, 256], strides = [1, 1, 1]} : vector<2x3x256xf32> to vector<1x3x256xf32>
    %28 = vector.shape_cast %27 : vector<1x3x256xf32> to vector<3x256xf32>
    %29 = vector.extract_strided_slice %8 {offsets = [1, 0, 0], sizes = [1, 3, 256], strides = [1, 1, 1]} : vector<2x3x256xf32> to vector<1x3x256xf32>
    %30 = vector.shape_cast %29 : vector<1x3x256xf32> to vector<3x256xf32>
    %31 = tpu.concatenate %28, %30, %28, %30 in 1 : vector<3x256xf32>, vector<3x256xf32>, vector<3x256xf32>, vector<3x256xf32> -> vector<3x1024xf32>
    %32 = vector.extract_strided_slice %17 {offsets = [0, 0, 0], sizes = [1, 3, 256], strides = [1, 1, 1]} : vector<2x3x256xf32> to vector<1x3x256xf32>
    %33 = vector.shape_cast %32 : vector<1x3x256xf32> to vector<3x256xf32>
    %34 = vector.extract_strided_slice %17 {offsets = [1, 0, 0], sizes = [1, 3, 256], strides = [1, 1, 1]} : vector<2x3x256xf32> to vector<1x3x256xf32>
    %35 = vector.shape_cast %34 : vector<1x3x256xf32> to vector<3x256xf32>
    %36 = vector.extract_strided_slice %26 {offsets = [0, 0, 0], sizes = [1, 3, 256], strides = [1, 1, 1]} : vector<2x3x256xf32> to vector<1x3x256xf32>
    %37 = vector.shape_cast %36 : vector<1x3x256xf32> to vector<3x256xf32>
    %38 = vector.extract_strided_slice %26 {offsets = [1, 0, 0], sizes = [1, 3, 256], strides = [1, 1, 1]} : vector<2x3x256xf32> to vector<1x3x256xf32>
    %39 = vector.shape_cast %38 : vector<1x3x256xf32> to vector<3x256xf32>
    %40 = tpu.concatenate %33, %35, %37, %39 in 1 : vector<3x256xf32>, vector<3x256xf32>, vector<3x256xf32>, vector<3x256xf32> -> vector<3x1024xf32>
    %cst_19 = arith.constant 0.000000e+00 : f32
    %41 = vector.broadcast %cst_19 : f32 to vector<2x1024xf32>
    %42 = tpu.concatenate %31, %40, %41 in 0 : vector<3x1024xf32>, vector<3x1024xf32>, vector<2x1024xf32> -> vector<8x1024xf32>
    %c0_20 = arith.constant 0 : index
    %c0_21 = arith.constant 0 : index
    %43 = vector.load %arg5[%c0_20, %c0_21] : memref<32x1xf32, #tpu.memory_space<vmem>>, vector<32x1xf32>
    %44 = vector.shape_cast %43 : vector<32x1xf32> to vector<32x1xf32>
    %45 = vector.broadcast %44 : vector<32x1xf32> to vector<32x1024xf32>
    %c0_22 = arith.constant 0 : index
    %c0_23 = arith.constant 0 : index
    %46 = vector.load %arg7[%c0_22, %c0_23] : memref<2x1xf32, #tpu.memory_space<vmem>>, vector<2x1xf32>
    %47 = vector.shape_cast %46 : vector<2x1xf32> to vector<2x1xf32>
    %48 = vector.broadcast %47 : vector<2x1xf32> to vector<2x1024xf32>
    %c0_24 = arith.constant 0 : index
    %c0_25 = arith.constant 0 : index
    %49 = vector.load %arg4[%c0_24, %c0_25] : memref<32x8xf32, #tpu.memory_space<vmem>>, vector<32x8xf32>
    %cst_26 = arith.constant dense<0.000000e+00> : vector<32x1024xf32>
    %50 = tpu.matmul %49, %42, %cst_26 {dimension_numbers = #tpu.dot_dimension_numbers<[1], [0], [0], [1], [0, 0, 1, 1], [], []>} : vector<32x8xf32>, vector<8x1024xf32>, vector<32x1024xf32> -> vector<32x1024xf32>
    %51 = arith.addf %50, %45 : vector<32x1024xf32>
    %cst_27 = arith.constant 0.000000e+00 : f32
    %52 = vector.broadcast %cst_27 : f32 to vector<32x1024xf32>
    %53 = arith.maximumf %51, %52 : vector<32x1024xf32>
    %c0_28 = arith.constant 0 : index
    %c0_29 = arith.constant 0 : index
    %54 = vector.load %arg6[%c0_28, %c0_29] : memref<2x32xf32, #tpu.memory_space<vmem>>, vector<2x32xf32>
    %cst_30 = arith.constant dense<0.000000e+00> : vector<2x1024xf32>
    %55 = tpu.matmul %54, %53, %cst_30 {dimension_numbers = #tpu.dot_dimension_numbers<[1], [0], [0], [1], [0, 0, 1, 1], [], []>} : vector<2x32xf32>, vector<32x1024xf32>, vector<2x1024xf32> -> vector<2x1024xf32>
    %56 = arith.addf %55, %48 : vector<2x1024xf32>
    %cst_31 = arith.constant 0.000000e+00 : f32
    %57 = vector.broadcast %cst_31 : f32 to vector<1x1xf32>
    %58 = vector.extract_strided_slice %56 {offsets = [0, 0], sizes = [2, 256], strides = [1, 1]} : vector<2x1024xf32> to vector<2x256xf32>
    %59 = vector.extract_strided_slice %56 {offsets = [0, 512], sizes = [2, 256], strides = [1, 1]} : vector<2x1024xf32> to vector<2x256xf32>
    %60 = tpu.concatenate %58, %59 in 0 : vector<2x256xf32>, vector<2x256xf32> -> vector<4x256xf32>
    %c0_32 = arith.constant 0 : index
    %c0_33 = arith.constant 0 : index
    %c0_34 = arith.constant 0 : index
    %61 = vector.load %arg9[%c0_32, %c0_33, %c0_34] : memref<2x4x256xf32, #tpu.memory_space<vmem>>, vector<1x4x256xf32>
    %62 = vector.shape_cast %61 : vector<1x4x256xf32> to vector<4x256xf32>
    %63 = vector.shape_cast %60 : vector<4x256xf32> to vector<1x4x256xf32>
    tpu.vector_store %arg9[%c0_32, %c0_33, %c0_34], %63 {strides = array<i32>} : memref<2x4x256xf32, #tpu.memory_space<vmem>>, vector<1x4x256xf32>,
    %64 = arith.subf %58, %59 : vector<2x256xf32>
    %65 = arith.mulf %64, %64 : vector<2x256xf32>
    %cst_35 = arith.constant dense<0.000000e+00> : vector<256xf32>
    %66 = vector.multi_reduction <add>, %65, %cst_35 [0] : vector<2x256xf32> to vector<256xf32>
    %67 = vector.shape_cast %66 : vector<256xf32> to vector<1x256xf32>
    %cst_36 = arith.constant dense<0.000000e+00> : vector<1xf32>
    %68 = vector.multi_reduction <add>, %67, %cst_36 [1] : vector<1x256xf32> to vector<1xf32>
    %69 = vector.shape_cast %68 : vector<1xf32> to vector<1x1xf32>
    %cst_37 = arith.constant 3.906250e-03 : f32
    %70 = vector.broadcast %cst_37 : f32 to vector<1x1xf32>
    %71 = arith.mulf %69, %70 : vector<1x1xf32>
    %72 = math.sqrt %71 : vector<1x1xf32>
    %73 = arith.addf %57, %72 : vector<1x1xf32>
    %74 = vector.extract_strided_slice %56 {offsets = [0, 256], sizes = [2, 256], strides = [1, 1]} : vector<2x1024xf32> to vector<2x256xf32>
    %75 = vector.extract_strided_slice %56 {offsets = [0, 768], sizes = [2, 256], strides = [1, 1]} : vector<2x1024xf32> to vector<2x256xf32>
    %76 = tpu.concatenate %74, %75 in 0 : vector<2x256xf32>, vector<2x256xf32> -> vector<4x256xf32>
    %c1 = arith.constant 1 : index
    %c0_38 = arith.constant 0 : index
    %c0_39 = arith.constant 0 : index
    %77 = vector.load %arg9[%c1, %c0_38, %c0_39] : memref<2x4x256xf32, #tpu.memory_space<vmem>>, vector<1x4x256xf32>
    %78 = vector.shape_cast %77 : vector<1x4x256xf32> to vector<4x256xf32>
    %79 = vector.shape_cast %76 : vector<4x256xf32> to vector<1x4x256xf32>
    tpu.vector_store %arg9[%c1, %c0_38, %c0_39], %79 {strides = array<i32>} : memref<2x4x256xf32, #tpu.memory_space<vmem>>, vector<1x4x256xf32>,
    %80 = arith.subf %74, %75 : vector<2x256xf32>
    %81 = arith.mulf %80, %80 : vector<2x256xf32>
    %cst_40 = arith.constant dense<0.000000e+00> : vector<256xf32>
    %82 = vector.multi_reduction <add>, %81, %cst_40 [0] : vector<2x256xf32> to vector<256xf32>
    %83 = vector.shape_cast %82 : vector<256xf32> to vector<1x256xf32>
    %cst_41 = arith.constant dense<0.000000e+00> : vector<1xf32>
    %84 = vector.multi_reduction <add>, %83, %cst_41 [1] : vector<1x256xf32> to vector<1xf32>
    %85 = vector.shape_cast %84 : vector<1xf32> to vector<1x1xf32>
    %cst_42 = arith.constant 3.906250e-03 : f32
    %86 = vector.broadcast %cst_42 : f32 to vector<1x1xf32>
    %87 = arith.mulf %85, %86 : vector<1x1xf32>
    %88 = math.sqrt %87 : vector<1x1xf32>
    %89 = arith.addf %73, %88 : vector<1x1xf32>
    %cst_43 = arith.constant 5.000000e-01 : f32
    %90 = vector.broadcast %cst_43 : f32 to vector<1x1xf32>
    %91 = arith.mulf %89, %90 : vector<1x1xf32>
    %c0_44 = arith.constant 0 : index
    %c0_45 = arith.constant 0 : index
    %92 = vector.load %arg11[%c0_44, %c0_45] : memref<1x1xf32, #tpu.memory_space<vmem>>, vector<1x1xf32>
    tpu.vector_store %arg11[%c0_44, %c0_45], %91 {strides = array<i32>} : memref<1x1xf32, #tpu.memory_space<vmem>>, vector<1x1xf32>,
    %c0_46 = arith.constant 0 : index
    %c0_47 = arith.constant 0 : index
    %c0_48 = arith.constant 0 : index
    %93 = vector.load %arg2[%c0_46, %c0_47, %c0_48] : memref<2x3x256xf32, #tpu.memory_space<vmem>>, vector<2x3x256xf32>
    %cst_49 = arith.constant 0.000000e+00 : f32
    %cst_50 = arith.constant 1.000000e+00 : f32
    %94 = vector.broadcast %cst_49 : f32 to vector<2x3x256xf32>
    %95 = arith.maximumf %94, %93 : vector<2x3x256xf32>
    %96 = vector.broadcast %cst_50 : f32 to vector<2x3x256xf32>
    %97 = arith.minimumf %96, %95 : vector<2x3x256xf32>
    %cst_51 = arith.constant 2.550000e+02 : f32
    %98 = vector.broadcast %cst_51 : f32 to vector<2x3x256xf32>
    %99 = arith.mulf %97, %98 : vector<2x3x256xf32>
    %100 = math.floor %99 : vector<2x3x256xf32>
    %c0_52 = arith.constant 0 : index
    %c0_53 = arith.constant 0 : index
    %c0_54 = arith.constant 0 : index
    %101 = vector.load %arg3[%c0_52, %c0_53, %c0_54] : memref<2x3x256xf32, #tpu.memory_space<vmem>>, vector<2x3x256xf32>
    %cst_55 = arith.constant 0.000000e+00 : f32
    %cst_56 = arith.constant 1.000000e+00 : f32
    %102 = vector.broadcast %cst_55 : f32 to vector<2x3x256xf32>
    %103 = arith.maximumf %102, %101 : vector<2x3x256xf32>
    %104 = vector.broadcast %cst_56 : f32 to vector<2x3x256xf32>
    %105 = arith.minimumf %104, %103 : vector<2x3x256xf32>
    %cst_57 = arith.constant 2.550000e+02 : f32
    %106 = vector.broadcast %cst_57 : f32 to vector<2x3x256xf32>
    %107 = arith.mulf %105, %106 : vector<2x3x256xf32>
    %108 = math.floor %107 : vector<2x3x256xf32>
    %109 = vector.extract_strided_slice %100 {offsets = [0, 0, 0], sizes = [1, 1, 256], strides = [1, 1, 1]} : vector<2x3x256xf32> to vector<1x1x256xf32>
    %110 = vector.shape_cast %109 : vector<1x1x256xf32> to vector<1x256xf32>
    %111 = vector.extract_strided_slice %100 {offsets = [0, 1, 0], sizes = [1, 1, 256], strides = [1, 1, 1]} : vector<2x3x256xf32> to vector<1x1x256xf32>
    %112 = vector.shape_cast %111 : vector<1x1x256xf32> to vector<1x256xf32>
    %113 = vector.extract_strided_slice %100 {offsets = [0, 2, 0], sizes = [1, 1, 256], strides = [1, 1, 1]} : vector<2x3x256xf32> to vector<1x1x256xf32>
    %114 = vector.shape_cast %113 : vector<1x1x256xf32> to vector<1x256xf32>
    %115 = tpu.concatenate %110, %112, %114 in 1 : vector<1x256xf32>, vector<1x256xf32>, vector<1x256xf32> -> vector<1x768xf32>
    %116 = vector.extract_strided_slice %100 {offsets = [1, 0, 0], sizes = [1, 1, 256], strides = [1, 1, 1]} : vector<2x3x256xf32> to vector<1x1x256xf32>
    %117 = vector.shape_cast %116 : vector<1x1x256xf32> to vector<1x256xf32>
    %118 = vector.extract_strided_slice %100 {offsets = [1, 1, 0], sizes = [1, 1, 256], strides = [1, 1, 1]} : vector<2x3x256xf32> to vector<1x1x256xf32>
    %119 = vector.shape_cast %118 : vector<1x1x256xf32> to vector<1x256xf32>
    %120 = vector.extract_strided_slice %100 {offsets = [1, 2, 0], sizes = [1, 1, 256], strides = [1, 1, 1]} : vector<2x3x256xf32> to vector<1x1x256xf32>
    %121 = vector.shape_cast %120 : vector<1x1x256xf32> to vector<1x256xf32>
    %122 = tpu.concatenate %117, %119, %121 in 1 : vector<1x256xf32>, vector<1x256xf32>, vector<1x256xf32> -> vector<1x768xf32>
    %123 = vector.extract_strided_slice %108 {offsets = [0, 0, 0], sizes = [1, 1, 256], strides = [1, 1, 1]} : vector<2x3x256xf32> to vector<1x1x256xf32>
    %124 = vector.shape_cast %123 : vector<1x1x256xf32> to vector<1x256xf32>
    %125 = vector.extract_strided_slice %108 {offsets = [0, 1, 0], sizes = [1, 1, 256], strides = [1, 1, 1]} : vector<2x3x256xf32> to vector<1x1x256xf32>
    %126 = vector.shape_cast %125 : vector<1x1x256xf32> to vector<1x256xf32>
    %127 = vector.extract_strided_slice %108 {offsets = [0, 2, 0], sizes = [1, 1, 256], strides = [1, 1, 1]} : vector<2x3x256xf32> to vector<1x1x256xf32>
    %128 = vector.shape_cast %127 : vector<1x1x256xf32> to vector<1x256xf32>
    %129 = tpu.concatenate %124, %126, %128 in 1 : vector<1x256xf32>, vector<1x256xf32>, vector<1x256xf32> -> vector<1x768xf32>
    %130 = vector.extract_strided_slice %108 {offsets = [1, 0, 0], sizes = [1, 1, 256], strides = [1, 1, 1]} : vector<2x3x256xf32> to vector<1x1x256xf32>
    %131 = vector.shape_cast %130 : vector<1x1x256xf32> to vector<1x256xf32>
    %132 = vector.extract_strided_slice %108 {offsets = [1, 1, 0], sizes = [1, 1, 256], strides = [1, 1, 1]} : vector<2x3x256xf32> to vector<1x1x256xf32>
    %133 = vector.shape_cast %132 : vector<1x1x256xf32> to vector<1x256xf32>
    %134 = vector.extract_strided_slice %108 {offsets = [1, 2, 0], sizes = [1, 1, 256], strides = [1, 1, 1]} : vector<2x3x256xf32> to vector<1x1x256xf32>
    %135 = vector.shape_cast %134 : vector<1x1x256xf32> to vector<1x256xf32>
    %136 = tpu.concatenate %131, %133, %135 in 1 : vector<1x256xf32>, vector<1x256xf32>, vector<1x256xf32> -> vector<1x768xf32>
    %137 = tpu.concatenate %115, %122, %129, %136 in 0 : vector<1x768xf32>, vector<1x768xf32>, vector<1x768xf32>, vector<1x768xf32> -> vector<4x768xf32>
    %c0_58 = arith.constant 0 : index
    %c0_59 = arith.constant 0 : index
    %138 = vector.load %arg8[%c0_58, %c0_59] : memref<768x128xf32, #tpu.memory_space<vmem>>, vector<768x128xf32>
    %cst_60 = arith.constant dense<0.000000e+00> : vector<4x128xf32>
    %139 = tpu.matmul %137, %138, %cst_60 {dimension_numbers = #tpu.dot_dimension_numbers<[1], [0], [0], [1], [0, 0, 1, 1], [], []>} : vector<4x768xf32>, vector<768x128xf32>, vector<4x128xf32> -> vector<4x128xf32>
    %c0_61 = arith.constant 0 : index
    %c0_62 = arith.constant 0 : index
    %140 = vector.load %arg10[%c0_61, %c0_62] : memref<4x128xf32, #tpu.memory_space<vmem>>, vector<4x128xf32>
    tpu.vector_store %arg10[%c0_61, %c0_62], %139 {strides = array<i32>} : memref<4x128xf32, #tpu.memory_space<vmem>>, vector<4x128xf32>,
    return
  }
  func.func @transform_0(%arg0: i32) -> (i32, i32, i32) {
    %c0_i32 = arith.constant 0 : i32
    %c0_i32_0 = arith.constant 0 : i32
    %c0_i32_1 = arith.constant 0 : i32
    %c0_i32_2 = arith.constant 0 : i32
    return %c0_i32, %c0_i32_0, %c0_i32_1 : i32, i32, i32
  }
  func.func @transform_1(%arg0: i32) -> (i32, i32, i32) {
    %c0_i32 = arith.constant 0 : i32
    %c0_i32_0 = arith.constant 0 : i32
    %c0_i32_1 = arith.constant 0 : i32
    %c0_i32_2 = arith.constant 0 : i32
    return %c0_i32, %c0_i32_0, %c0_i32_1 : i32, i32, i32
  }
  func.func @transform_2(%arg0: i32) -> (i32, i32, i32) {
    %c0_i32 = arith.constant 0 : i32
    %c0_i32_0 = arith.constant 0 : i32
    %c0_i32_1 = arith.constant 0 : i32
    %c0_i32_2 = arith.constant 0 : i32
    return %c0_i32, %c0_i32_0, %c0_i32_1 : i32, i32, i32
  }
  func.func @transform_3(%arg0: i32) -> (i32, i32) {
    %c0_i32 = arith.constant 0 : i32
    %c0_i32_0 = arith.constant 0 : i32
    %c0_i32_1 = arith.constant 0 : i32
    return %c0_i32, %c0_i32_0 : i32, i32
  }
  func.func @transform_4(%arg0: i32) -> (i32, i32) {
    %c0_i32 = arith.constant 0 : i32
    %c0_i32_0 = arith.constant 0 : i32
    %c0_i32_1 = arith.constant 0 : i32
    return %c0_i32, %c0_i32_0 : i32, i32
  }
  func.func @transform_5(%arg0: i32) -> (i32, i32) {
    %c0_i32 = arith.constant 0 : i32
    %c0_i32_0 = arith.constant 0 : i32
    %c0_i32_1 = arith.constant 0 : i32
    return %c0_i32, %c0_i32_0 : i32, i32
  }
  func.func @transform_6(%arg0: i32) -> (i32, i32) {
    %c0_i32 = arith.constant 0 : i32
    %c0_i32_0 = arith.constant 0 : i32
    %c0_i32_1 = arith.constant 0 : i32
    return %c0_i32, %c0_i32_0 : i32, i32
  }
  func.func @transform_7(%arg0: i32) -> (i32, i32) {
    %c0_i32 = arith.constant 0 : i32
    %c0_i32_0 = arith.constant 0 : i32
    %c0_i32_1 = arith.constant 0 : i32
    return %c0_i32, %c0_i32_0 : i32, i32
  }
  func.func @transform_8(%arg0: i32) -> (i32, i32, i32) {
    %c0_i32 = arith.constant 0 : i32
    %c0_i32_0 = arith.constant 0 : i32
    %c0_i32_1 = arith.constant 0 : i32
    %c0_i32_2 = arith.constant 0 : i32
    return %c0_i32, %c0_i32_0, %c0_i32_1 : i32, i32, i32
  }
  func.func @transform_9(%arg0: i32) -> (i32, i32) {
    %c0_i32 = arith.constant 0 : i32
    %c0_i32_0 = arith.constant 0 : i32
    %c0_i32_1 = arith.constant 0 : i32
    return %c0_i32, %c0_i32_0 : i32, i32
  }
  func.func @transform_10(%arg0: i32) -> (i32, i32) {
    %c0_i32 = arith.constant 0 : i32
    %c0_i32_0 = arith.constant 0 : i32
    %c0_i32_1 = arith.constant 0 : i32
    return %c0_i32, %c0_i32_0 : i32, i32
  }
}

</mosaic_0001>

<bundles_post_ra>
// kernel: custom-call.2
= control target key start
LH: loop header
LB: loop body
LE: loop exit
PB: predicated region body
PF: predicated region fallthrough
CT: control target
= control target key end

     0   :  { %s8421_s0 = inlined_call_operand.vmem [shape: f32[64,64], index: 0, kind: input, shape index: {}]   ;;  %s8422_s1 = inlined_call_operand.vmem [shape: f32[64,64], index: 1, kind: input, shape index: {}]   ;;  %s8423_s2 = inlined_call_operand.vmem [shape: f32[64,64], index: 2, kind: input, shape index: {}]   ;;  %s8424_s3 = inlined_call_operand.vmem [shape: f32[64,64], index: 3, kind: input, shape index: {}]   ;;  %s8425_s4 = inlined_call_operand.vmem [shape: f32[64], index: 4, kind: output, shape index: {0}]   ;;  %s8426_s5 = inlined_call_operand.vmem [shape: f32[64], index: 5, kind: output, shape index: {1}]   ;;  %s8427_s6 = inlined_call_operand.vmem [shape: f32[64,64], index: 6, kind: output, shape index: {2}]   ;;  %s8428_s7 = inlined_call_operand.vmem [shape: f32[64,64], index: 7, kind: output, shape index: {3}]   ;;  %s8429_s8 = inlined_call_operand.vmem [shape: f32[64,64], index: 8, kind: output, shape index: {4}]   ;;  %s8430_s9 = inlined_call_operand.vmem [shape: f32[64,64], index: 9, kind: output, shape index: {5}]  }
   0x1   :  { %8440 = sst [smem:[#allocation30_spill]] %s8425_s4 }
   0x2   :  { %8441 = sst [smem:[#allocation31_spill]] %s8426_s5 }
   0x3   :  { %8442 = sst [smem:[#allocation32_spill]] %s8427_s6 }
   0x4   :  { %8443 = sst [smem:[#allocation33_spill]] %s8428_s7 }
   0x5   :  { %8444 = sst [smem:[#allocation34_spill]] %s8429_s8 }
   0x6   :  { %8445 = sst [smem:[#allocation35_spill]] %s8430_s9 }
   0x7   :  { %s24_s11 = scalar_lea.vmem %s8421_s0, 56 }
   0x8   :  { %p4249_p0 = scmp.gt.s32.totalorder %s8421_s0, %s24_s11 }
   0x9   :  { %s6176_s14 = smov (!%p4249_p0), [#allocation0]   ;;  %s6180_s17 = smov (!%p4249_p0), %s8421_s0  }
   0xa   :  { %4250 = sbr.rel (%p4249_p0) target bundleno = 27 (0x1b), region = 835 }
  0x11 LB: > { %v58_v0 = vld [vmem:[%s6182_s17] sm:$0xff]  ;;  %s60_s17 = scalar_lea.vmem %s6182_s17, 8   ;;  %s6182_s17 = sphi %s6180_s17, %s60_s17   ;;  %s6178_s14 = sphi %s6176_s14, %s61_s14  }
  0x12   : > { %59 = vst [vmem:[%s6178_s14] sm:$0xff] %v58_v0  ;;  %s61_s14 = scalar_lea.vmem %s6178_s14, 8   ;;  %p55_p1 = scmp.gt.s32.totalorder %s60_s17, %s24_s11 }
  0x14   :  { %57 = sbr.rel (!%p55_p1) target bundleno = 17 (0x11), region = 841 }
  0x1b PF:  { %s86_s20 = scalar_lea.vmem %s8422_s1, 56 }
  0x1c   :  { %p4269_p2 = scmp.gt.s32.totalorder %s8422_s1, %s86_s20 }
  0x1d   :  { %s6184_s0 = smov (!%p4269_p2), [#allocation1]   ;;  %s6188_s25 = smov (!%p4269_p2), %s8422_s1  }
  0x1e   :  { %4270 = sbr.rel (%p4269_p2) target bundleno = 47 (0x2f), region = 857 }
  0x25 LB: > { %v120_v1 = vld [vmem:[%s6190_s25] sm:$0xff]  ;;  %s122_s25 = scalar_lea.vmem %s6190_s25, 8   ;;  %s6190_s25 = sphi %s6188_s25, %s122_s25   ;;  %s6186_s0 = sphi %s6184_s0, %s123_s0  }
  0x26   : > { %121 = vst [vmem:[%s6186_s0] sm:$0xff] %v120_v1  ;;  %s123_s0 = scalar_lea.vmem %s6186_s0, 8   ;;  %p117_p3 = scmp.gt.s32.totalorder %s122_s25, %s86_s20 }
  0x28   :  { %119 = sbr.rel (!%p117_p3) target bundleno = 37 (0x25), region = 863 }
  0x2f PF:  { %s148_s28 = scalar_lea.vmem %s8423_s2, 56 }
  0x30   :  { %p4289_p4 = scmp.gt.s32.totalorder %s8423_s2, %s148_s28 }
  0x31   :  { %s6192_s1 = smov (!%p4289_p4), [#allocation2]   ;;  %s6196_s12 = smov (!%p4289_p4), %s8423_s2  }
  0x32   :  { %4290 = sbr.rel (%p4289_p4) target bundleno = 67 (0x43), region = 879 }
  0x39 LB: > { %v182_v2 = vld [vmem:[%s6198_s12] sm:$0xff]  ;;  %s184_s12 = scalar_lea.vmem %s6198_s12, 8   ;;  %s6198_s12 = sphi %s6196_s12, %s184_s12   ;;  %s6194_s1 = sphi %s6192_s1, %s185_s1  }
  0x3a   : > { %183 = vst [vmem:[%s6194_s1] sm:$0xff] %v182_v2  ;;  %s185_s1 = scalar_lea.vmem %s6194_s1, 8   ;;  %p179_p5 = scmp.gt.s32.totalorder %s184_s12, %s148_s28 }
  0x3c   :  { %181 = sbr.rel (!%p179_p5) target bundleno = 57 (0x39), region = 885 }
  0x43 PF:  { %s210_s15 = scalar_lea.vmem %s8424_s3, 56 }
  0x44   :  { %p4309_p6 = scmp.gt.s32.totalorder %s8424_s3, %s210_s15 }
  0x45   :  { %s6200_s2 = smov (!%p4309_p6), [#allocation3]   ;;  %s6204_s20 = smov (!%p4309_p6), %s8424_s3  }
  0x46   :  { %4310 = sbr.rel (%p4309_p6) target bundleno = 87 (0x57), region = 901 }
  0x4d LB: > { %v244_v3 = vld [vmem:[%s6206_s20] sm:$0xff]  ;;  %s246_s20 = scalar_lea.vmem %s6206_s20, 8   ;;  %s6206_s20 = sphi %s6204_s20, %s246_s20   ;;  %s6202_s2 = sphi %s6200_s2, %s247_s2  }
  0x4e   : > { %245 = vst [vmem:[%s6202_s2] sm:$0xff] %v244_v3  ;;  %s247_s2 = scalar_lea.vmem %s6202_s2, 8   ;;  %p241_p7 = scmp.gt.s32.totalorder %s246_s20, %s210_s15 }
  0x50   :  { %243 = sbr.rel (!%p241_p7) target bundleno = 77 (0x4d), region = 907 }
  0x57 PF:  { %s6337_s21 = smov [#allocation12]  ;;  %v260_v4 = vld [vmem:[#allocation0] sm:$0xff]  ;;  %v264_v5 = vld [vmem:[#allocation0 + $0x8] sm:$0xff]  ;;  %v268_v6 = vld [vmem:[#allocation0 + $0x10] sm:$0xff]  ;;  %s6339_s3 = smov [#allocation13]  ;;  %v444_v7 = vlaneseq  ;;  %v6248_v11 = vmov 0.0  }
  0x58   :  { %261 = vst [vmem:[%s6337_s21] sm:$0xff] %v260_v4  ;;  %4754 = vst [vmem:[%s6337_s21 + $0x8] sm:$0xff] %v264_v5  ;;  %v272_v8 = vld [vmem:[#allocation0 + $0x18] sm:$0xff]  ;;  %v276_v9 = vld [vmem:[#allocation0 + $0x20] sm:$0xff]  ;;  %s6354_s22 = smov [#allocation14]  ;;  %s6359_s0 = smov [#allocation15] }
  0x59   :  { %4755 = vst [vmem:[%s6337_s21 + $0x10] sm:$0xff] %v268_v6  ;;  %v280_v10 = vld [vmem:[#allocation0 + $0x28] sm:$0xff]  ;;  %383 = vst [vmem:[#allocation8] sm:$0xff] %v6248_v11  ;;  %v284_v12 = vld [vmem:[#allocation0 + $0x30] sm:$0xff]  ;;  %v6347_v15 = vand.u32 127, %v444_v7  ;;  %v6349_v16 = vshrl.u32 %v444_v7, 7 }
  0x5a   :  { %385 = vst [vmem:[#allocation8 + $0x8] sm:$0xff] %v6248_v11  ;;  %387 = vst [vmem:[#allocation8 + $0x10] sm:$0xff] %v6248_v11  ;;  %v288_v13 = vld [vmem:[#allocation0 + $0x38] sm:$0xff]  ;;  %v291_v14 = vld [vmem:[#allocation1] sm:$0xff]  ;;  %s6404_s23 = smov [#allocation8]  ;;  %s6424_s24 = smov [#allocation11] }
  0x5b   :  { %389 = vst [vmem:[#allocation8 + $0x18] sm:$0xff] %v6248_v11  ;;  %391 = vst [vmem:[#allocation8 + $0x20] sm:$0xff] %v6248_v11  ;;  %v295_v17 = vld [vmem:[#allocation1 + $0x8] sm:$0xff]  ;;  %v299_v18 = vld [vmem:[#allocation1 + $0x10] sm:$0xff]  ;;  %v6362_v15 = vmov %v6347_v15  ;;  %v6365_v16 = vmov %v6349_v16  ;;  %s4327_s25 = smov [#allocation12]  ;;  %s6535_s26 = smov [#allocation13] }
  0x5c   :  { %393 = vst [vmem:[#allocation8 + $0x28] sm:$0xff] %v6248_v11  ;;  %395 = vst [vmem:[#allocation8 + $0x30] sm:$0xff] %v6248_v11  ;;  %v303_v19 = vld [vmem:[#allocation1 + $0x18] sm:$0xff]  ;;  %v307_v20 = vld [vmem:[#allocation1 + $0x20] sm:$0xff]  ;;  %v6368_v15 = vmov %v6347_v15  ;;  %v6371_v16 = vmov %v6349_v16  ;;  %vm453_vm0 = vcmp.eq.s32.totalorder %v6365_v16, %v6362_v15  ;;  %v6379_v26 = vadd.s32 8, %v6365_v16  ;;  %s6587_s27 = smov [#allocation14] }
  0x5d   :  { %397 = vst [vmem:[#allocation8 + $0x38] sm:$0xff] %v6248_v11  ;;  %398 = vst [vmem:[#allocation9] sm:$0xff] %v6248_v11  ;;  %v311_v21 = vld [vmem:[#allocation1 + $0x28] sm:$0xff]  ;;  %v315_v22 = vld [vmem:[#allocation1 + $0x30] sm:$0xff]  ;;  %v6382_v27 = vadd.s32 16, %v6365_v16  ;;  %v6385_v28 = vadd.s32 24, %v6365_v16  ;;  %vm515_vm1 = vcmp.eq.s32.totalorder %v6371_v16, %v6368_v15 }
  0x5e   :  { %400 = vst [vmem:[#allocation9 + $0x8] sm:$0xff] %v6248_v11  ;;  %402 = vst [vmem:[#allocation9 + $0x10] sm:$0xff] %v6248_v11  ;;  %v319_v23 = vld [vmem:[#allocation1 + $0x38] sm:$0xff]  ;;  %v322_v24 = vld [vmem:[#allocation2] sm:$0xff]  ;;  %v6391_v32 = vadd.s32 32, %v6365_v16  ;;  %v6394_v33 = vadd.s32 40, %v6365_v16  ;;  %vm460_vm2 = vcmp.eq.s32.totalorder %v6379_v26, %v6362_v15 }
  0x5f   :  { %404 = vst [vmem:[#allocation9 + $0x18] sm:$0xff] %v6248_v11  ;;  %406 = vst [vmem:[#allocation9 + $0x20] sm:$0xff] %v6248_v11  ;;  %v326_v25 = vld [vmem:[#allocation2 + $0x8] sm:$0xff]  ;;  %v330_v29 = vld [vmem:[#allocation2 + $0x10] sm:$0xff]  ;;  %v6397_v34 = vadd.s32 48, %v6365_v16  ;;  %vm467_vm3 = vcmp.eq.s32.totalorder %v6382_v27, %v6362_v15  ;;  %vm474_vm4 = vcmp.eq.s32.totalorder %v6385_v28, %v6362_v15  ;;  %v6413_v38 = vadd.s32 56, %v6365_v16 }
  0x60   :  { %408 = vst [vmem:[#allocation9 + $0x28] sm:$0xff] %v6248_v11  ;;  %410 = vst [vmem:[#allocation9 + $0x30] sm:$0xff] %v6248_v11  ;;  %v334_v30 = vld [vmem:[#allocation2 + $0x18] sm:$0xff]  ;;  %v338_v31 = vld [vmem:[#allocation2 + $0x20] sm:$0xff]  ;;  %vm481_vm5 = vcmp.eq.s32.totalorder %v6391_v32, %v6362_v15  ;;  %vm488_vm6 = vcmp.eq.s32.totalorder %v6394_v33, %v6362_v15  ;;  %v521_v42 = vadd.s32 8, %v6371_v16  ;;  %v528_v46 = vadd.s32 16, %v6371_v16 }
  0x61   :  { %412 = vst [vmem:[#allocation9 + $0x38] sm:$0xff] %v6248_v11  ;;  %413 = vst [vmem:[#allocation10] sm:$0xff] %v6248_v11  ;;  %v342_v35 = vld [vmem:[#allocation2 + $0x28] sm:$0xff]  ;;  %v346_v36 = vld [vmem:[#allocation2 + $0x30] sm:$0xff]  ;;  %vm495_vm7 = vcmp.eq.s32.totalorder %v6397_v34, %v6362_v15  ;;  %vm502_vm8 = vcmp.eq.s32.totalorder %v6413_v38, %v6362_v15  ;;  %v535_v47 = vadd.s32 24, %v6371_v16  ;;  %v542_v48 = vadd.s32 32, %v6371_v16 }
  0x62   :  { %415 = vst [vmem:[#allocation10 + $0x8] sm:$0xff] %v6248_v11  ;;  %417 = vst [vmem:[#allocation10 + $0x10] sm:$0xff] %v6248_v11  ;;  %v350_v37 = vld [vmem:[#allocation2 + $0x38] sm:$0xff]  ;;  %v353_v39 = vld [vmem:[#allocation3] sm:$0xff]  ;;  %vm522_vm9 = vcmp.eq.s32.totalorder %v521_v42, %v6368_v15  ;;  %v549_v52 = vadd.s32 40, %v6371_v16  ;;  %v556_v53 = vadd.s32 48, %v6371_v16  ;;  %vm529_vm10 = vcmp.eq.s32.totalorder %v528_v46, %v6368_v15 }
  0x63   :  { %419 = vst [vmem:[#allocation10 + $0x18] sm:$0xff] %v6248_v11  ;;  %421 = vst [vmem:[#allocation10 + $0x20] sm:$0xff] %v6248_v11  ;;  %v357_v40 = vld [vmem:[#allocation3 + $0x8] sm:$0xff]  ;;  %v361_v41 = vld [vmem:[#allocation3 + $0x10] sm:$0xff]  ;;  %v563_v54 = vadd.s32 56, %v6371_v16  ;;  %vm536_vm11 = vcmp.eq.s32.totalorder %v535_v47, %v6368_v15  ;;  %vm543_vm12 = vcmp.eq.s32.totalorder %v542_v48, %v6368_v15  ;;  %v4326_v16 = vmov %v6349_v16  ;;  %s6632_s28 = smov [#allocation15] }
  0x64   :  { %423 = vst [vmem:[#allocation10 + $0x28] sm:$0xff] %v6248_v11  ;;  %425 = vst [vmem:[#allocation10 + $0x30] sm:$0xff] %v6248_v11  ;;  %v365_v43 = vld [vmem:[#allocation3 + $0x18] sm:$0xff]  ;;  %v369_v44 = vld [vmem:[#allocation3 + $0x20] sm:$0xff]  ;;  %vm550_vm13 = vcmp.eq.s32.totalorder %v549_v52, %v6368_v15  ;;  %vm557_vm14 = vcmp.eq.s32.totalorder %v556_v53, %v6368_v15 }
  0x65   :  { %427 = vst [vmem:[#allocation10 + $0x38] sm:$0xff] %v6248_v11  ;;  %428 = vst [vmem:[#allocation11] sm:$0xff] %v6248_v11  ;;  %v373_v45 = vld [vmem:[#allocation3 + $0x28] sm:$0xff]  ;;  %v377_v49 = vld [vmem:[#allocation3 + $0x30] sm:$0xff]  ;;  %vm564_vm15 = vcmp.eq.s32.totalorder %v563_v54, %v6368_v15 }
  0x66   :  { %430 = vst [vmem:[#allocation11 + $0x8] sm:$0xff] %v6248_v11  ;;  %432 = vst [vmem:[#allocation11 + $0x10] sm:$0xff] %v6248_v11  ;;  %v381_v50 = vld [vmem:[#allocation3 + $0x38] sm:$0xff]  ;;  %v450_v51 = vld [vmem:[%s6404_s23] sm:$0xff] }
  0x67   :  { %434 = vst [vmem:[#allocation11 + $0x18] sm:$0xff] %v6248_v11  ;;  %436 = vst [vmem:[#allocation11 + $0x20] sm:$0xff] %v6248_v11  ;;  %v454_v55 = vsel %vm453_vm0, 1.0, %v450_v51  ;;  %v4782_v56 = vld [vmem:[%s6404_s23 + $0x8] sm:$0xff]  ;;  %v4784_v57 = vld [vmem:[%s6404_s23 + $0x10] sm:$0xff]  ;;  %vm8433_vm0 = vcmp.lt.s32.totalorder %v6347_v15, 64  ;;  %v4403_v15 = vmov %v6347_v15 }
  0x68   :  { %438 = vst [vmem:[#allocation11 + $0x28] sm:$0xff] %v6248_v11  ;;  %440 = vst [vmem:[#allocation11 + $0x30] sm:$0xff] %v6248_v11  ;;  %v4786_v58 = vld [vmem:[%s6404_s23 + $0x18] sm:$0xff]  ;;  %v461_v59 = vsel %vm460_vm2, 1.0, %v4782_v56  ;;  %v468_v60 = vsel %vm467_vm3, 1.0, %v4784_v57  ;;  %v4788_v62 = vld [vmem:[%s6404_s23 + $0x20] sm:$0xff]  ;;  %v6559_v15 = vmov %v6347_v15 }
  0x69   :  { %442 = vst [vmem:[#allocation11 + $0x38] sm:$0xff] %v6248_v11  ;;  %4756 = vst [vmem:[%s6337_s21 + $0x18] sm:$0xff] %v272_v8  ;;  %v475_v61 = vsel %vm474_vm4, 1.0, %v4786_v58  ;;  %v4790_v63 = vld [vmem:[%s6404_s23 + $0x28] sm:$0xff]  ;;  %v4792_v0 = vld [vmem:[%s6404_s23 + $0x30] sm:$0xff]  ;;  %v482_v1 = vsel %vm481_vm5, 1.0, %v4788_v62 }
  0x6a   :  { %4757 = vst [vmem:[%s6337_s21 + $0x20] sm:$0xff] %v276_v9  ;;  %4758 = vst [vmem:[%s6337_s21 + $0x28] sm:$0xff] %v280_v10  ;;  %v489_v2 = vsel %vm488_vm6, 1.0, %v4790_v63  ;;  %v496_v3 = vsel %vm495_vm7, 1.0, %v4792_v0  ;;  %v4794_v4 = vld [vmem:[%s6404_s23 + $0x38] sm:$0xff] }
  0x6b   :  { %4759 = vst [vmem:[%s6337_s21 + $0x30] sm:$0xff] %v284_v12  ;;  %4760 = vst [vmem:[%s6337_s21 + $0x38] sm:$0xff] %v288_v13  ;;  %v503_v7 = vsel %vm502_vm8, 1.0, %v4794_v4 }
  0x6c   :  { %292 = vst [vmem:[%s6339_s3] sm:$0xff] %v291_v14  ;;  %4761 = vst [vmem:[%s6339_s3 + $0x8] sm:$0xff] %v295_v17 }
  0x6d   :  { %4762 = vst [vmem:[%s6339_s3 + $0x10] sm:$0xff] %v299_v18  ;;  %4763 = vst [vmem:[%s6339_s3 + $0x18] sm:$0xff] %v303_v19 }
  0x6e   :  { %4764 = vst [vmem:[%s6339_s3 + $0x20] sm:$0xff] %v307_v20  ;;  %4765 = vst [vmem:[%s6339_s3 + $0x28] sm:$0xff] %v311_v21 }
  0x6f   :  { %4766 = vst [vmem:[%s6339_s3 + $0x30] sm:$0xff] %v315_v22  ;;  %4767 = vst [vmem:[%s6339_s3 + $0x38] sm:$0xff] %v319_v23 }
  0x70   :  { %323 = vst [vmem:[%s6354_s22] sm:$0xff] %v322_v24  ;;  %4768 = vst [vmem:[%s6354_s22 + $0x8] sm:$0xff] %v326_v25  ;;  %v512_v5 = vld [vmem:[%s6424_s24] sm:$0xff]  ;;  %v4796_v6 = vld [vmem:[%s6424_s24 + $0x8] sm:$0xff] }
  0x71   :  { %4769 = vst [vmem:[%s6354_s22 + $0x10] sm:$0xff] %v330_v29  ;;  %4770 = vst [vmem:[%s6354_s22 + $0x18] sm:$0xff] %v334_v30  ;;  %v516_v8 = vsel %vm515_vm1, 1.0, %v512_v5  ;;  %v523_v9 = vsel %vm522_vm9, 1.0, %v4796_v6  ;;  %v4798_v10 = vld [vmem:[%s6424_s24 + $0x10] sm:$0xff]  ;;  %v4800_v11 = vld [vmem:[%s6424_s24 + $0x18] sm:$0xff]  ;;  %vm4336_vm1 = vcmp.eq.s32.totalorder %v4326_v16, %v6559_v15 }
  0x72   :  { %4771 = vst [vmem:[%s6354_s22 + $0x20] sm:$0xff] %v338_v31  ;;  %4772 = vst [vmem:[%s6354_s22 + $0x28] sm:$0xff] %v342_v35  ;;  %v4802_v12 = vld [vmem:[%s6424_s24 + $0x20] sm:$0xff]  ;;  %v530_v13 = vsel %vm529_vm10, 1.0, %v4798_v10  ;;  %v537_v14 = vsel %vm536_vm11, 1.0, %v4800_v11  ;;  %v4804_v18 = vld [vmem:[%s6424_s24 + $0x28] sm:$0xff] }
  0x73   :  { %4773 = vst [vmem:[%s6354_s22 + $0x30] sm:$0xff] %v346_v36  ;;  %4774 = vst [vmem:[%s6354_s22 + $0x38] sm:$0xff] %v350_v37  ;;  %v544_v17 = vsel %vm543_vm12, 1.0, %v4802_v12  ;;  %v4806_v19 = vld [vmem:[%s6424_s24 + $0x30] sm:$0xff]  ;;  %v4808_v20 = vld [vmem:[%s6424_s24 + $0x38] sm:$0xff]  ;;  %v551_v21 = vsel %vm550_vm13, 1.0, %v4804_v18 }
  0x74   :  { %354 = vst [vmem:[%s6359_s0] sm:$0xff] %v353_v39  ;;  %4775 = vst [vmem:[%s6359_s0 + $0x8] sm:$0xff] %v357_v40  ;;  %v558_v22 = vsel %vm557_vm14, 1.0, %v4806_v19  ;;  %v565_v23 = vsel %vm564_vm15, 1.0, %v4808_v20  ;;  %v4333_v24 = vld [vmem:[%s4327_s25] sm:$0xff]  ;;  %v4810_v25 = vld [vmem:[%s4327_s25 + $0x8] sm:$0xff]  ;;  %v4351_v11 = vadd.s32 16, %v4326_v16 }
  0x75   :  { %4776 = vst [vmem:[%s6359_s0 + $0x10] sm:$0xff] %v361_v41  ;;  %4777 = vst [vmem:[%s6359_s0 + $0x18] sm:$0xff] %v365_v43  ;;  %v4811_v26 = vld [vmem:[%s4327_s25 + $0x10] sm:$0xff]  ;;  %v4334_v27 = vsel %vm8433_vm0, %v4333_v24, 0.0  ;;  %v4340_v28 = vsel %vm8433_vm0, %v4810_v25, 0.0  ;;  %v4812_v30 = vld [vmem:[%s4327_s25 + $0x18] sm:$0xff] }
  0x76   :  { %4778 = vst [vmem:[%s6359_s0 + $0x20] sm:$0xff] %v369_v44  ;;  %4779 = vst [vmem:[%s6359_s0 + $0x28] sm:$0xff] %v373_v45  ;;  %v4349_v29 = vsel %vm8433_vm0, %v4811_v26, 0.0  ;;  %v4813_v31 = vld [vmem:[%s4327_s25 + $0x20] sm:$0xff]  ;;  %v4335_v32 = vmul.f32 %v4334_v27, %v4334_v27  ;;  %v4341_v33 = vmul.f32 %v4340_v28, %v4340_v28  ;;  %v4358_v35 = vsel %vm8433_vm0, %v4812_v30, 0.0  ;;  %v4814_v36 = vld [vmem:[%s4327_s25 + $0x28] sm:$0xff] }
  0x77   :  { %4780 = vst [vmem:[%s6359_s0 + $0x30] sm:$0xff] %v377_v49  ;;  %4781 = vst [vmem:[%s6359_s0 + $0x38] sm:$0xff] %v381_v50  ;;  %v4350_v34 = vmul.f32 %v4349_v29, %v4349_v29  ;;  %v4367_v37 = vsel %vm8433_vm0, %v4813_v31, 0.0  ;;  %v4359_v39 = vmul.f32 %v4358_v35, %v4358_v35  ;;  %v4815_v40 = vld [vmem:[%s4327_s25 + $0x30] sm:$0xff]  ;;  %v4376_v41 = vsel %vm8433_vm0, %v4814_v36, 0.0  ;;  %v4816_v44 = vld [vmem:[%s4327_s25 + $0x38] sm:$0xff] }
  0x78   :  { %455 = vst [vmem:[%s6404_s23] sm:$0xff] %v454_v55  ;;  %4783 = vst [vmem:[%s6404_s23 + $0x8] sm:$0xff] %v461_v59  ;;  %v4346_v38 = vadd.f32 %v4341_v33, %v4335_v32  ;;  %v4368_v43 = vmul.f32 %v4367_v37, %v4367_v37  ;;  %v4385_v45 = vsel %vm8433_vm0, %v4815_v40, 0.0  ;;  %v6539_v47 = vmul.f32 %v4376_v41, %v4376_v41  ;;  %v4413_v48 = vld [vmem:[%s6535_s26] sm:$0xff]  ;;  %v4817_v52 = vld [vmem:[%s6535_s26 + $0x8] sm:$0xff] }
  0x79   :  { %4785 = vst [vmem:[%s6404_s23 + $0x10] sm:$0xff] %v468_v60  ;;  %4787 = vst [vmem:[%s6404_s23 + $0x18] sm:$0xff] %v475_v61  ;;  %v4394_v49 = vsel %vm8433_vm0, %v4816_v44, 0.0  ;;  %v6544_v51 = vmul.f32 %v4385_v45, %v4385_v45  ;;  %v4414_v53 = vsel %vm8433_vm0, %v4413_v48, 0.0  ;;  %v4818_v56 = vld [vmem:[%s6535_s26 + $0x10] sm:$0xff]  ;;  %v4819_v57 = vld [vmem:[%s6535_s26 + $0x18] sm:$0xff]  ;;  %vm4352_vm3 = vcmp.eq.s32.totalorder %v4351_v11, %v6559_v15 }
  0x7a   :  { %4789 = vst [vmem:[%s6404_s23 + $0x20] sm:$0xff] %v482_v1  ;;  %4791 = vst [vmem:[%s6404_s23 + $0x28] sm:$0xff] %v489_v2  ;;  %v4355_v42 = vadd.f32 %v4350_v34, %v4346_v38  ;;  %v6550_v55 = vmul.f32 %v4394_v49, %v4394_v49  ;;  %v4420_v58 = vsel %vm8433_vm0, %v4817_v52, 0.0  ;;  %v4820_v59 = vld [vmem:[%s6535_s26 + $0x20] sm:$0xff]  ;;  %v6562_v61 = vmul.f32 %v4414_v53, %v4414_v53  ;;  %v4821_v0 = vld [vmem:[%s6535_s26 + $0x28] sm:$0xff] }
  0x7b   :  { %4793 = vst [vmem:[%s6404_s23 + $0x30] sm:$0xff] %v496_v3  ;;  %4795 = vst [vmem:[%s6404_s23 + $0x38] sm:$0xff] %v503_v7  ;;  %v4426_v62 = vsel %vm8433_vm0, %v4818_v56, 0.0  ;;  %v4432_v63 = vsel %vm8433_vm0, %v4819_v57, 0.0  ;;  %v4342_v1 = vadd.s32 8, %v4326_v16  ;;  %v6570_v3 = vmul.f32 %v4420_v58, %v4420_v58  ;;  %v4472_v30 = vld [vmem:[%s6587_s27] sm:$0xff] }
  0x7c   :  { %517 = vst [vmem:[%s6424_s24] sm:$0xff] %v516_v8  ;;  %4797 = vst [vmem:[%s6424_s24 + $0x8] sm:$0xff] %v523_v9  ;;  %v4364_v46 = vadd.f32 %v4359_v39, %v4355_v42  ;;  %v4438_v4 = vsel %vm8433_vm0, %v4820_v59, 0.0  ;;  %v6576_v6 = vmul.f32 %v4426_v62, %v4426_v62  ;;  %v6578_v7 = vmul.f32 %v4432_v63, %v4432_v63  ;;  %v4824_v37 = vld [vmem:[%s6587_s27 + $0x8] sm:$0xff]  ;;  %v4826_v49 = vld [vmem:[%s6587_s27 + $0x18] sm:$0xff] }
  0x7d   :  { %4799 = vst [vmem:[%s6424_s24 + $0x10] sm:$0xff] %v530_v13  ;;  %4801 = vst [vmem:[%s6424_s24 + $0x18] sm:$0xff] %v537_v14  ;;  %v4444_v8 = vsel %vm8433_vm0, %v4821_v0, 0.0  ;;  %v6582_v9 = vmul.f32 %v4438_v4, %v4438_v4  ;;  %v4337_v10 = vsel %vm4336_vm1, 0.0, %v4335_v32  ;;  %vm4343_vm2 = vcmp.eq.s32.totalorder %v4342_v1, %v6559_v15  ;;  %v4822_v13 = vld [vmem:[%s6535_s26 + $0x30] sm:$0xff]  ;;  %v4827_v56 = vld [vmem:[%s6587_s27 + $0x20] sm:$0xff] }
  0x7e   :  { %4803 = vst [vmem:[%s6424_s24 + $0x20] sm:$0xff] %v544_v17  ;;  %4805 = vst [vmem:[%s6424_s24 + $0x28] sm:$0xff] %v551_v21  ;;  %v4373_v50 = vadd.f32 %v4368_v43, %v4364_v46  ;;  %v4344_v14 = vsel %vm4343_vm2, 0.0, %v4341_v33  ;;  %v4360_v17 = vadd.s32 24, %v4326_v16  ;;  %v4369_v18 = vadd.s32 32, %v4326_v16  ;;  %v4830_v11 = vld [vmem:[%s6587_s27 + $0x38] sm:$0xff] }
  0x7f   :  { %4807 = vst [vmem:[%s6424_s24 + $0x30] sm:$0xff] %v558_v22  ;;  %4809 = vst [vmem:[%s6424_s24 + $0x38] sm:$0xff] %v565_v23  ;;  %v4345_v19 = vadd.f32 %v4344_v14, %v4337_v10  ;;  %v4378_v20 = vadd.s32 40, %v4326_v16  ;;  %v4387_v21 = vadd.s32 48, %v4326_v16  ;;  %v4823_v23 = vld [vmem:[%s6535_s26 + $0x38] sm:$0xff]  ;;  %v4353_v24 = vsel %vm4352_vm3, 0.0, %v4350_v34 }
  0x80   :  { %v4382_v54 = vadd.f32 %v6539_v47, %v4373_v50  ;;  %vm4361_vm4 = vcmp.eq.s32.totalorder %v4360_v17, %v6559_v15  ;;  %vm4370_vm5 = vcmp.eq.s32.totalorder %v4369_v18, %v6559_v15  ;;  %v4450_v25 = vsel %vm8433_vm0, %v4822_v13, 0.0  ;;  %v4531_v17 = vld [vmem:[%s6632_s28] sm:$0xff] }
  0x81   :  { %v4354_v26 = vadd.f32 %v4353_v24, %v4345_v19  ;;  %v4362_v27 = vsel %vm4361_vm4, 0.0, %v4359_v39  ;;  %vm4379_vm6 = vcmp.eq.s32.totalorder %v4378_v20, %v6559_v15  ;;  %v6598_v29 = vmul.f32 %v4444_v8, %v4444_v8 }
  0x82   :  { %v4391_v60 = vadd.f32 %v6544_v51, %v4382_v54  ;;  %v4371_v31 = vsel %vm4370_vm5, 0.0, %v4368_v43  ;;  %v4396_v32 = vadd.s32 56, %v4326_v16  ;;  %v4456_v33 = vsel %vm8433_vm0, %v4823_v23, 0.0  ;;  %v4825_v43 = vld [vmem:[%s6587_s27 + $0x10] sm:$0xff] }
  0x83   :  { %v4363_v34 = vadd.f32 %v4362_v27, %v4354_v26  ;;  %vm4388_vm7 = vcmp.eq.s32.totalorder %v4387_v21, %v6559_v15  ;;  %v4451_v36 = vmul.f32 %v4450_v25, %v4450_v25  ;;  %v4380_v38 = vsel %vm4379_vm6, 0.0, %v6539_v47  ;;  %v4831_v21 = vld [vmem:[%s6632_s28 + $0x8] sm:$0xff]  ;;  %v4832_v25 = vld [vmem:[%s6632_s28 + $0x10] sm:$0xff] }
  0x84   :  { %v4400_v2 = vadd.f32 %v6550_v55, %v4391_v60  ;;  %v4473_v39 = vsel %vm8433_vm0, %v4472_v30, 0.0  ;;  %vm4397_vm8 = vcmp.eq.s32.totalorder %v4396_v32, %v6559_v15  ;;  %v4457_v42 = vmul.f32 %v4456_v33, %v4456_v33  ;;  %v4828_v60 = vld [vmem:[%s6587_s27 + $0x28] sm:$0xff]  ;;  %v4833_v30 = vld [vmem:[%s6632_s28 + $0x18] sm:$0xff] }
  0x85   :  { %v4372_v40 = vadd.f32 %v4371_v31, %v4363_v34  ;;  %v4389_v44 = vsel %vm4388_vm7, 0.0, %v6544_v51  ;;  %v4479_v45 = vsel %vm8433_vm0, %v4824_v37, 0.0  ;;  %v4474_v47 = vmul.f32 %v4473_v39, %v4473_v39 }
  0x86   :  { %v4417_v5 = vadd.f32 %v6562_v61, %v4400_v2  ;;  %v4398_v50 = vsel %vm4397_vm8, 0.0, %v6550_v55  ;;  %v4485_v52 = vsel %vm8433_vm0, %v4825_v43, 0.0  ;;  %v4406_v16 = vmov %v6349_v16  ;;  %v4829_v2 = vld [vmem:[%s6587_s27 + $0x30] sm:$0xff] }
  0x87   :  { %v4381_v46 = vadd.f32 %v4380_v38, %v4372_v40  ;;  %v4462_v15 = vmov %v6347_v15  ;;  %v4480_v54 = vmul.f32 %v4479_v45, %v4479_v45  ;;  %v4465_v16 = vmov %v6349_v16  ;;  %v4835_v40 = vld [vmem:[%s6632_s28 + $0x28] sm:$0xff]  ;;  %v4836_v45 = vld [vmem:[%s6632_s28 + $0x30] sm:$0xff] }
  0x88   :  { %v4423_v12 = vadd.f32 %v6570_v3, %v4417_v5  ;;  %v4491_v57 = vsel %vm8433_vm0, %v4826_v49, 0.0  ;;  %v4486_v59 = vmul.f32 %v4485_v52, %v4485_v52  ;;  %v4497_v62 = vsel %vm8433_vm0, %v4827_v56, 0.0 }
  0x89   :  { %v4390_v53 = vadd.f32 %v4389_v44, %v4381_v46  ;;  %v4492_v1 = vmul.f32 %v4491_v57, %v4491_v57  ;;  %v4503_v4 = vsel %vm8433_vm0, %v4828_v60, 0.0  ;;  %v4498_v10 = vmul.f32 %v4497_v62, %v4497_v62 }
  0x8a   :  { %v4429_v22 = vadd.f32 %v6576_v6, %v4423_v12  ;;  %v4509_v12 = vsel %vm8433_vm0, %v4829_v2, 0.0  ;;  %v4504_v14 = vmul.f32 %v4503_v4, %v4503_v4  ;;  %v4515_v18 = vsel %vm8433_vm0, %v4830_v11, 0.0 }
  0x8b   :  { %v4399_v58 = vadd.f32 %v4398_v50, %v4390_v53  ;;  %v4540_v26 = vsel %vm8433_vm0, %v4831_v21, 0.0  ;;  %v4549_v31 = vsel %vm8433_vm0, %v4832_v25, 0.0  ;;  %v4837_v50 = vld [vmem:[%s6632_s28 + $0x38] sm:$0xff]  ;;  %v4524_v16 = vmov %v6349_v16 }
  0x8c   :  { %v4435_v28 = vadd.f32 %v6578_v7, %v4429_v22  ;;  %v4532_v22 = vsel %vm8433_vm0, %v4531_v17, 0.0  ;;  %v4541_v34 = vmul.f32 %v4540_v26, %v4540_v26  ;;  %v4550_v39 = vmul.f32 %v4549_v31, %v4549_v31 }
  0x8d   :  { %v4416_v63 = vadd.f32 %v6562_v61, %v4399_v58  ;;  %v4521_v15 = vmov %v6347_v15  ;;  %v4560_v4 = vadd.s32 24, %v4524_v16 }
  0x8e   :  { %v4441_v35 = vadd.f32 %v6582_v9, %v4435_v28  ;;  %vm4534_vm9 = vcmp.eq.s32.totalorder %v4524_v16, %v4521_v15 }
  0x8f   :  { %v4422_v5 = vadd.f32 %v6570_v3, %v4416_v63  ;;  %v4510_v3 = vmul.f32 %v4509_v12, %v4509_v12  ;;  %vm4561_vm12 = vcmp.eq.s32.totalorder %v4560_v4, %v4521_v15 }
  0x90   :  { %v4447_v41 = vadd.f32 %v6598_v29, %v4441_v35  ;;  %v4558_v35 = vsel %vm8433_vm0, %v4833_v30, 0.0 }
  0x91   :  { %v4428_v61 = vadd.f32 %v6576_v6, %v4422_v5  ;;  %v4516_v6 = vmul.f32 %v4515_v18, %v4515_v18  ;;  %v4559_v44 = vmul.f32 %v4558_v35, %v4558_v35 }
  0x92   :  { %v4453_v48 = vadd.f32 %v4451_v36, %v4447_v41 }
  0x93   :  { %v4434_v19 = vadd.f32 %v6578_v7, %v4428_v61  ;;  %v4533_v7 = vmul.f32 %v4532_v22, %v4532_v22  ;;  %v4562_v18 = vsel %vm4561_vm12, 0.0, %v4559_v44 }
  0x94   :  { %v4459_v51 = vadd.f32 %v4457_v42, %v4453_v48 }
  0x95   :  { %v4440_v23 = vadd.f32 %v6582_v9, %v4434_v19  ;;  %v4834_v9 = vld [vmem:[%s6632_s28 + $0x20] sm:$0xff] }
  0x96   :  { %v4476_v55 = vadd.f32 %v4474_v47, %v4459_v51 }
  0x97   :  { %v4446_v27 = vadd.f32 %v6598_v29, %v4440_v23  ;;  %v4567_v29 = vsel %vm8433_vm0, %v4834_v9, 0.0 }
  0x98   :  { %v4482_v0 = vadd.f32 %v4480_v54, %v4476_v55  ;;  %v4568_v49 = vmul.f32 %v4567_v29, %v4567_v29  ;;  %v4542_v55 = vadd.s32 8, %v4524_v16 }
  0x99   :  { %v4452_v32 = vadd.f32 %v4451_v36, %v4446_v27  ;;  %v4576_v36 = vsel %vm8433_vm0, %v4835_v40, 0.0 }
  0x9a   :  { %v4488_v8 = vadd.f32 %v4486_v59, %v4482_v0  ;;  %v4577_v51 = vmul.f32 %v4576_v36, %v4576_v36  ;;  %v4551_v0 = vadd.s32 16, %v4524_v16  ;;  %vm4543_vm10 = vcmp.eq.s32.totalorder %v4542_v55, %v4521_v15 }
  0x9b   :  { %v4458_v37 = vadd.f32 %v4457_v42, %v4452_v32  ;;  %v4585_v42 = vsel %vm8433_vm0, %v4836_v45, 0.0  ;;  %v4544_v12 = vsel %vm4543_vm10, 0.0, %v4541_v34 }
  0x9c   :  { %v4494_v13 = vadd.f32 %v4492_v1, %v4488_v8  ;;  %v4586_v58 = vmul.f32 %v4585_v42, %v4585_v42  ;;  %v4535_v8 = vsel %vm4534_vm9, 0.0, %v4533_v7  ;;  %vm4552_vm11 = vcmp.eq.s32.totalorder %v4551_v0, %v4521_v15 }
  0x9d   :  { %v4475_v41 = vadd.f32 %v4474_v47, %v4458_v37  ;;  %v4594_v47 = vsel %vm8433_vm0, %v4837_v50, 0.0 }
  0x9e   :  { %v4500_v20 = vadd.f32 %v4498_v10, %v4494_v13  ;;  %v4595_v62 = vmul.f32 %v4594_v47, %v4594_v47  ;;  %v4553_v13 = vsel %vm4552_vm11, 0.0, %v4550_v39 }
  0x9f   :  { %v4481_v46 = vadd.f32 %v4480_v54, %v4475_v41 }
  0xa0   :  { %v4506_v24 = vadd.f32 %v4504_v14, %v4500_v20  ;;  %v4596_v20 = vadd.s32 56, %v4524_v16 }
  0xa1   :  { %v4487_v52 = vadd.f32 %v4486_v59, %v4481_v46 }
  0xa2   :  { %v4512_v28 = vadd.f32 %v4510_v3, %v4506_v24  ;;  %vm4597_vm1 = vcmp.eq.s32.totalorder %v4596_v20, %v4521_v15 }
  0xa3   :  { %v4493_v56 = vadd.f32 %v4492_v1, %v4487_v52  ;;  %v4569_v1 = vadd.s32 32, %v4524_v16  ;;  %v4598_v25 = vsel %vm4597_vm1, 0.0, %v4595_v62 }
  0xa4   :  { %v4518_v33 = vadd.f32 %v4516_v6, %v4512_v28 }
  0xa5   :  { %v4499_v54 = vadd.f32 %v4498_v10, %v4493_v56  ;;  %v4578_v10 = vadd.s32 40, %v4524_v16  ;;  %vm4570_vm13 = vcmp.eq.s32.totalorder %v4569_v1, %v4521_v15 }
  0xa6   :  { %v4537_v38 = vadd.f32 %v4533_v7, %v4518_v33 }
  0xa7   :  { %v4505_v63 = vadd.f32 %v4504_v14, %v4499_v54  ;;  %v4587_v14 = vadd.s32 48, %v4524_v16  ;;  %vm4579_vm14 = vcmp.eq.s32.totalorder %v4578_v10, %v4521_v15 }
  0xa8   :  { %v4546_v43 = vadd.f32 %v4541_v34, %v4537_v38  ;;  %v4580_v22 = vsel %vm4579_vm14, 0.0, %v4577_v51 }
  0xa9   :  { %v4511_v2 = vadd.f32 %v4510_v3, %v4505_v63  ;;  %v4571_v3 = vsel %vm4570_vm13, 0.0, %v4568_v49  ;;  %vm4588_vm15 = vcmp.eq.s32.totalorder %v4587_v14, %v4521_v15 }
  0xaa   :  { %v4555_v48 = vadd.f32 %v4550_v39, %v4546_v43  ;;  %v4589_v24 = vsel %vm4588_vm15, 0.0, %v4586_v58 }
  0xab   :  { %v4517_v11 = vadd.f32 %v4516_v6, %v4511_v2 }
  0xac   :  { %v4564_v53 = vadd.f32 %v4559_v44, %v4555_v48 }
  0xad   :  { %v4536_v61 = vadd.f32 %v4535_v8, %v4517_v11 }
  0xae   :  { %v4573_v57 = vadd.f32 %v4568_v49, %v4564_v53 }
  0xaf   :  { %v4545_v17 = vadd.f32 %v4544_v12, %v4536_v61 }
  0xb0   :  { %v4582_v60 = vadd.f32 %v4577_v51, %v4573_v57 }
  0xb1   :  { %v4554_v19 = vadd.f32 %v4553_v13, %v4545_v17 }
  0xb2   :  { %v4591_v59 = vadd.f32 %v4586_v58, %v4582_v60 }
  0xb3   :  { %v4563_v21 = vadd.f32 %v4562_v18, %v4554_v19 }
  0xb4   :  { %v4600_v5 = vadd.f32 %v4595_v62, %v4591_v59 }
  0xb5   :  { %v4572_v23 = vadd.f32 %v4571_v3, %v4563_v21 }
  0xb6   :  { %4601 = vadd.xlane.f32.xlu0 %v4600_v5 }
  0xb7   :  { %v4581_v6 = vadd.f32 %v4580_v22, %v4572_v23 }
  0xb9   :  { %v4590_v26 = vadd.f32 %v4589_v24, %v4581_v6 }
  0xbb   :  { %v4599_v27 = vadd.f32 %v4598_v25, %v4590_v26 }
  0xbd   :  { %4609 = vadd.xlane.f32.xlu0 %v4599_v27 }
 0x143   :  { %v4602_v28 = vpop.xlane.xlu0 %4601 }
 0x144   :  { %v4603_v7 = vrot.slane %v4602_v28, 4 }
 0x146   :  { %v4604_v30 = vadd.f32 %v4603_v7, %v4602_v28 }
 0x148   :  { %v4605_v31 = vrot.slane %v4604_v30, 2 }
 0x14a   :  { %v4610_v32 = vpop.xlane.xlu0 %4609  ;;  %v4606_v9 = vadd.f32 %v4605_v31, %v4604_v30 }
 0x14b   :  { %v4611_v33 = vrot.slane %v4610_v32, 4 }
 0x14c   :  { %v4607_v38 = vrot.slane %v4606_v9, 1 }
 0x14d   :  { %v4612_v34 = vadd.f32 %v4611_v33, %v4610_v32 }
 0x14e   :  { %v4608_v29 = vadd.f32 %v4607_v38, %v4606_v9 }
 0x14f   :  { %v4613_v35 = vrot.slane %v4612_v34, 2 }
 0x151   :  { %v4614_v37 = vadd.f32 %v4613_v35, %v4612_v34 }
 0x153   :  { %v4615_v39 = vrot.slane %v4614_v37, 1 }
 0x155   :  { %v4616_v40 = vadd.f32 %v4615_v39, %v4614_v37 }
 0x157   :  { %5457 = vpush %v4616_v40 }
 0x158   :  { %5459 = vpush %v4608_v29 }
 0x188   :  { %s5458_s29 = spop %5457 }
 0x189   :  { %s5460_s30 = spop %5459 }
 0x18a   :  { %s4619_s1 = smul.f32 1e-10, %s5460_s30 }
 0x18c   :  { %p4620_p8 = scmp.le.f32.partialorder %s5458_s29, %s4619_s1 }
 0x18d   :  { %s6670_s10 = smov (!%p4620_p8), 0  }
 0x18e   :  { %4623 = sbr.rel (%p4620_p8) target bundleno = 1464 (0x5b8), region = 923 }
 0x195 LB: > { %8446 = sst [smem:[#allocation25_spill]] %s6210_s10  ;;  %s6675_s11 = smov 0   ;;  %s6210_s10 = sphi %s6670_s10, %s8545_s10  }
 0x196 LB: >> { %8447 = sst [smem:[#allocation26_spill]] %s6214_s11  ;;  %s6214_s11 = sphi %s6675_s11, %s894_s11  }
 0x197   : >> { %s6680_s12 = smov [#allocation12]  ;;  %v899_v15 = vmov %v6347_v15  ;;  %v902_v16 = vmov %v6349_v16  ;;  %s6693_s13 = smov [#allocation13] }
 0x198   : >> { %v6685_v15 = vmov %v6347_v15  ;;  %v964_v16 = vmov %v6349_v16  ;;  %v903_v41 = vld [vmem:[%s6680_s12] sm:$0xff]  ;;  %vm906_vm2 = vcmp.eq.s32.totalorder %v902_v16, %v899_v15  ;;  %v4838_v43 = vld [vmem:[%s6680_s12 + $0x8] sm:$0xff]  ;;  %v911_v44 = vadd.s32 8, %v902_v16  ;;  %v4839_v48 = vld [vmem:[%s6680_s12 + $0x10] sm:$0xff]  ;;  %s6707_s14 = smov [#allocation15]  ;;  %s896_s15 = smov [#allocation16] }
 0x199   : >> { %v917_v45 = vadd.s32 16, %v902_v16  ;;  %v923_v36 = vadd.s32 24, %v902_v16  ;;  %v907_v46 = vsel %vm906_vm2, %v903_v41, 0.0  ;;  %v929_v49 = vadd.s32 32, %v902_v16  ;;  %v4840_v42 = vld [vmem:[%s6680_s12 + $0x18] sm:$0xff]  ;;  %v4841_v51 = vld [vmem:[%s6680_s12 + $0x20] sm:$0xff] }
 0x19a   : >> { %v935_v50 = vadd.s32 40, %v902_v16  ;;  %vm968_vm3 = vcmp.eq.s32.totalorder %v964_v16, %v6685_v15  ;;  %vm912_vm4 = vcmp.eq.s32.totalorder %v911_v44, %v899_v15  ;;  %v941_v52 = vadd.s32 48, %v902_v16  ;;  %v965_v56 = vld [vmem:[%s6693_s13] sm:$0xff]  ;;  %v4842_v58 = vld [vmem:[%s6680_s12 + $0x28] sm:$0xff]  ;;  %v4843_v63 = vld [vmem:[%s6680_s12 + $0x30] sm:$0xff]  ;;  %s958_s16 = smov [#allocation17] }
 0x19b   : >> { %vm918_vm5 = vcmp.eq.s32.totalorder %v917_v45, %v899_v15  ;;  %vm924_vm6 = vcmp.eq.s32.totalorder %v923_v36, %v899_v15  ;;  %v913_v53 = vsel %vm912_vm4, %v4838_v43, %v907_v46  ;;  %vm930_vm7 = vcmp.eq.s32.totalorder %v929_v49, %v899_v15  ;;  %v4845_v55 = vld [vmem:[%s6693_s13 + $0x8] sm:$0xff]  ;;  %v4846_v0 = vld [vmem:[%s6693_s13 + $0x10] sm:$0xff]  ;;  %v4844_v5 = vld [vmem:[%s6680_s12 + $0x38] sm:$0xff]  ;;  %s1085_s17 = smov [#allocation17]  ;;  %s1020_s2 = smov [#allocation18] }
 0x19c   : >> { %vm936_vm8 = vcmp.eq.s32.totalorder %v935_v50, %v899_v15  ;;  %v947_v47 = vadd.s32 56, %v902_v16  ;;  %v919_v57 = vsel %vm918_vm5, %v4839_v48, %v913_v53  ;;  %vm942_vm9 = vcmp.eq.s32.totalorder %v941_v52, %v899_v15  ;;  %v4847_v8 = vld [vmem:[%s6693_s13 + $0x18] sm:$0xff]  ;;  %v4848_v10 = vld [vmem:[%s6693_s13 + $0x20] sm:$0xff]  ;;  %v4849_v14 = vld [vmem:[%s6693_s13 + $0x28] sm:$0xff]  ;;  %s1083_s18 = smov [#allocation16]  ;;  %s1087_s19 = smov [#allocation18] }
 0x19d   : >> { %v969_v54 = vsel %vm968_vm3, %v965_v56, 0.0  ;;  %v973_v60 = vadd.s32 8, %v964_v16  ;;  %v925_v62 = vsel %vm924_vm6, %v4840_v42, %v919_v57  ;;  %v979_v59 = vadd.s32 16, %v964_v16  ;;  %v4850_v20 = vld [vmem:[%s6693_s13 + $0x30] sm:$0xff]  ;;  %v1027_v22 = vld [vmem:[%s6707_s14] sm:$0xff]  ;;  %v4851_v6 = vld [vmem:[%s6693_s13 + $0x38] sm:$0xff] }
 0x19e   : >> { %vm948_vm10 = vcmp.eq.s32.totalorder %v947_v47, %v899_v15  ;;  %v985_v2 = vadd.s32 24, %v964_v16  ;;  %v931_v4 = vsel %vm930_vm7, %v4841_v51, %v925_v62  ;;  %v991_v11 = vadd.s32 32, %v964_v16  ;;  %v4852_v7 = vld [vmem:[%s6707_s14 + $0x8] sm:$0xff]  ;;  %v4853_v32 = vld [vmem:[%s6707_s14 + $0x10] sm:$0xff]  ;;  %v4854_v38 = vld [vmem:[%s6707_s14 + $0x18] sm:$0xff]  ;;  %s1122_s20 = smov [#allocation19] }
 0x19f   : >> { %vm974_vm11 = vcmp.eq.s32.totalorder %v973_v60, %v6685_v15  ;;  %v997_v1 = vadd.s32 40, %v964_v16  ;;  %v937_v12 = vsel %vm936_vm8, %v4842_v58, %v931_v4  ;;  %vm980_vm12 = vcmp.eq.s32.totalorder %v979_v59, %v6685_v15  ;;  %v4855_v29 = vld [vmem:[%s6707_s14 + $0x20] sm:$0xff]  ;;  %v4856_v45 = vld [vmem:[%s6707_s14 + $0x28] sm:$0xff]  ;;  %v4857_v46 = vld [vmem:[%s6707_s14 + $0x30] sm:$0xff]  ;;  %s1124_s21 = smov [#allocation20]  ;;  %s1081_s3 = smov [#allocation21] }
 0x1a0   : >> { %v975_v61 = vsel %vm974_vm11, %v4845_v55, %v969_v54  ;;  %vm986_vm13 = vcmp.eq.s32.totalorder %v985_v2, %v6685_v15  ;;  %v943_v13 = vsel %vm942_vm9, %v4843_v63, %v937_v12  ;;  %vm992_vm14 = vcmp.eq.s32.totalorder %v991_v11, %v6685_v15  ;;  %v4858_v53 = vld [vmem:[%s6707_s14 + $0x38] sm:$0xff]  ;;  %s1082_s22 = smov [#allocation22]  ;;  %s1126_s3 = smov %s1081_s3 }
 0x1a1   : >> { %v981_v17 = vsel %vm980_vm12, %v4846_v0, %v975_v61  ;;  %vm998_vm15 = vcmp.eq.s32.totalorder %v997_v1, %v6685_v15  ;;  %v949_v18 = vsel %vm948_vm10, %v4844_v5, %v943_v13  ;;  %v1003_v3 = vadd.s32 48, %v964_v16  ;;  %s1128_s22 = smov %s1082_s22  ;;  %s1145_s0 = smov [#allocation21] }
 0x1a2   : >> { %v987_v19 = vsel %vm986_vm13, %v4847_v8, %v981_v17  ;;  %v1009_v21 = vadd.s32 56, %v964_v16  ;;  %v950_v23 = vrot.slane %v949_v18, 4  ;;  %v1023_v15 = vmov %v6347_v15  ;;  %s1130_s23 = smov [#allocation21]  ;;  %s1161_s24 = smov [#allocation21] }
 0x1a3   : >> { %v993_v24 = vsel %vm992_vm14, %v4848_v10, %v987_v19  ;;  %v1026_v16 = vmov %v6349_v16  ;;  %vm1004_vm1 = vcmp.eq.s32.totalorder %v1003_v3, %v6685_v15  ;;  %s1272_s25 = smov [#allocation22]  ;;  %s1177_s26 = smov [#allocation21] }
 0x1a4   : >> { %v999_v25 = vsel %vm998_vm15, %v4849_v14, %v993_v24  ;;  %vm1010_vm2 = vcmp.eq.s32.totalorder %v1009_v21, %v6685_v15  ;;  %vm1030_vm3 = vcmp.eq.s32.totalorder %v1026_v16, %v1023_v15  ;;  %v951_v26 = vadd.f32 %v950_v23, %v949_v18  ;;  %s1288_s27 = smov [#allocation22]  ;;  %s1193_s28 = smov [#allocation21] }
 0x1a5   : >> { %v1005_v27 = vsel %vm1004_vm1, %v4850_v20, %v999_v25  ;;  %v1031_v28 = vsel %vm1030_vm3, %v1027_v22, 0.0  ;;  %v1035_v30 = vadd.s32 8, %v1026_v16  ;;  %v1041_v33 = vadd.s32 16, %v1026_v16  ;;  %s1304_s29 = smov [#allocation22]  ;;  %s1209_s30 = smov [#allocation21] }
 0x1a6   : >> { %v1011_v31 = vsel %vm1010_vm2, %v4851_v6, %v1005_v27  ;;  %v1047_v34 = vadd.s32 24, %v1026_v16  ;;  %v1053_v9 = vadd.s32 32, %v1026_v16  ;;  %v952_v35 = vrot.slane %v951_v26, 2  ;;  %s1320_s1 = smov [#allocation22]  ;;  %s1336_s12 = smov [#allocation22] }
 0x1a7   : >> { %v1012_v37 = vrot.slane %v1011_v31, 4  ;;  %vm1036_vm4 = vcmp.eq.s32.totalorder %v1035_v30, %v1023_v15  ;;  %v1059_v39 = vadd.s32 40, %v1026_v16  ;;  %vm1042_vm5 = vcmp.eq.s32.totalorder %v1041_v33, %v1023_v15  ;;  %s1257_s13 = smov [#allocation22]  ;;  %s1352_s14 = smov [#allocation22] }
 0x1a8   : >> { %v1037_v40 = vsel %vm1036_vm4, %v4852_v7, %v1031_v28  ;;  %vm1048_vm6 = vcmp.eq.s32.totalorder %v1047_v34, %v1023_v15  ;;  %vm1054_vm7 = vcmp.eq.s32.totalorder %v1053_v9, %v1023_v15  ;;  %v953_v41 = vadd.f32 %v952_v35, %v951_v26  ;;  %s7771_s9 = smov [#allocation14]  ;;  %s7777_s8 = smov [#allocation12] }
 0x1a9   : >> { %v1013_v43 = vadd.f32 %v1012_v37, %v1011_v31  ;;  %v1043_v44 = vsel %vm1042_vm5, %v4853_v32, %v1037_v40  ;;  %vm1060_vm8 = vcmp.eq.s32.totalorder %v1059_v39, %v1023_v15  ;;  %v1065_v48 = vadd.s32 48, %v1026_v16  ;;  %s7781_s7 = smov [#allocation13]  ;;  %s7789_s6 = smov [#allocation15] }
 0x1aa   : >> { %v1049_v36 = vsel %vm1048_vm6, %v4854_v38, %v1043_v44  ;;  %v1071_v49 = vadd.s32 56, %v1026_v16  ;;  %v954_v50 = vrot.slane %v953_v41, 1  ;;  %v1152_v16 = vmov %v6349_v16  ;;  %8457 = sst [smem:[#allocation27_spill]] %s7781_s7  ;;  %s7795_s5 = smov [#allocation14] }
 0x1ab   : >> { %v1014_v42 = vrot.slane %v1013_v43, 2  ;;  %v1055_v52 = vsel %vm1054_vm7, %v4855_v29, %v1049_v36  ;;  %vm1066_vm9 = vcmp.eq.s32.totalorder %v1065_v48, %v1023_v15  ;;  %v1168_v16 = vmov %v6349_v16  ;;  %8458 = sst [smem:[#allocation28_spill]] %s7795_s5  ;;  %s7801_s4 = smov [#allocation12] }
 0x1ac   : >> { %v1061_v51 = vsel %vm1060_vm8, %v4856_v45, %v1055_v52  ;;  %vm1072_vm10 = vcmp.eq.s32.totalorder %v1071_v49, %v1023_v15  ;;  %v955_v47 = vadd.f32 %v954_v50, %v953_v41  ;;  %v1279_v16 = vmov %v6349_v16  ;;  %s7805_s10 = smov [#allocation13]  ;;  %s7813_s11 = smov [#allocation15] }
 0x1ad   : >> { %v1015_v56 = vadd.f32 %v1014_v42, %v1013_v43  ;;  %v1067_v57 = vsel %vm1066_vm9, %v4857_v46, %v1061_v51  ;;  %v1153_v35 = vadd.s32 8, %v1152_v16  ;;  %v1149_v15 = vmov %v6347_v15  ;;  %8459 = sst [smem:[#allocation29_spill]] %s7805_s10 }
 0x1ae   : >> { %v1073_v58 = vsel %vm1072_vm10, %v4858_v53, %v1067_v57  ;;  %956 = vst [vmem:[%s896_s15] sm:$0x1] %v955_v47  ;;  %v1134_v15 = vmov %v6347_v15  ;;  %v1137_v16 = vmov %v6349_v16  ;;  %v1169_v37 = vadd.s32 16, %v1168_v16  ;;  %s1225_s15 = smov [#allocation21] }
 0x1af   : >> { %v1016_v54 = vrot.slane %v1015_v56, 1  ;;  %v1074_v55 = vrot.slane %v1073_v58, 4  ;;  %v1165_v15 = vmov %v6347_v15  ;;  %v1280_v38 = vadd.s32 8, %v1279_v16 }
 0x1b0   : >> { %v1276_v15 = vmov %v6347_v15  ;;  %v1184_v16 = vmov %v6349_v16  ;;  %vm1154_vm15 = vcmp.eq.s32.totalorder %v1153_v35, %v1149_v15  ;;  %vm1139_vm1 = vcmp.eq.s32.totalorder %v1137_v16, %v1134_v15 }
 0x1b1   : >> { %v1017_v60 = vadd.f32 %v1016_v54, %v1015_v56  ;;  %v1075_v62 = vadd.f32 %v1074_v55, %v1073_v58  ;;  %v1295_v16 = vmov %v6349_v16  ;;  %vm1170_vm2 = vcmp.eq.s32.totalorder %v1169_v37, %v1165_v15 }
 0x1b2   : >> { %v1181_v15 = vmov %v6347_v15  ;;  %vm1281_vm3 = vcmp.eq.s32.totalorder %v1280_v38, %v1276_v15  ;;  %v1185_v29 = vadd.s32 24, %v1184_v16  ;;  %v1296_v41 = vadd.s32 16, %v1295_v16 }
 0x1b3   : >> { %1018 = vst [vmem:[%s958_s16] sm:$0x1] %v1017_v60  ;;  %v1076_v63 = vrot.slane %v1075_v62, 2  ;;  %v1292_v15 = vmov %v6347_v15  ;;  %v1200_v16 = vmov %v6349_v16  ;;  %s1368_s16 = smov [#allocation22] }
 0x1b4   : >> { %v1311_v16 = vmov %v6349_v16  ;;  %vm1186_vm4 = vcmp.eq.s32.totalorder %v1185_v29, %v1181_v15  ;;  %vm1297_vm5 = vcmp.eq.s32.totalorder %v1296_v41, %v1292_v15  ;;  %v1201_v42 = vadd.s32 32, %v1200_v16 }
 0x1b5   : >> { %v1077_v0 = vadd.f32 %v1076_v63, %v1075_v62  ;;  %v1084_v8 = vld [vmem:[%s1083_s18] sm:$0xff]  ;;  %v1312_v52 = vadd.s32 24, %v1311_v16  ;;  %v1197_v15 = vmov %v6347_v15  ;;  %v1216_v16 = vmov %v6349_v16  ;;  %s1158_s18 = smov [#allocation23] }
 0x1b6   : >> { %v1107_v21 = vand.u32 2147483647, %v1084_v8  ;;  %v1308_v15 = vmov %v6347_v15  ;;  %v1327_v16 = vmov %v6349_v16  ;;  %vm1202_vm6 = vcmp.eq.s32.totalorder %v1201_v42, %v1197_v15 }
 0x1b7   : >> { %v1078_v59 = vrot.slane %v1077_v0, 1  ;;  %vm1313_vm7 = vcmp.eq.s32.totalorder %v1312_v52, %v1308_v15  ;;  %v1217_v57 = vadd.s32 40, %v1216_v16  ;;  %v1328_v58 = vadd.s32 32, %v1327_v16 }
 0x1b8   : >> { %v1213_v15 = vmov %v6347_v15  ;;  %v1343_v16 = vmov %v6349_v16 }
 0x1b9   : >> { %v1079_v2 = vadd.f32 %v1078_v59, %v1077_v0  ;;  %v1324_v15 = vmov %v6347_v15  ;;  %vm1218_vm8 = vcmp.eq.s32.totalorder %v1217_v57, %v1213_v15  ;;  %v1344_v63 = vadd.s32 40, %v1343_v16 }
 0x1ba   : >> { %v1086_v4 = vld [vmem:[%s1085_s17] sm:$0xff]  ;;  %vm1329_vm9 = vcmp.eq.s32.totalorder %v1328_v58, %v1324_v15  ;;  %v1340_v15 = vmov %v6347_v15  ;;  %v1264_v16 = vmov %v6349_v16  ;;  %s1241_s17 = smov [#allocation21] }
 0x1bb   : >> { %1080 = vst [vmem:[%s1020_s2] sm:$0x1] %v1079_v2  ;;  %v1090_v5 = vmul.f32 2.0, %v1086_v4  ;;  %v1108_v25 = vand.u32 2147483647, %v1086_v4  ;;  %v1261_v15 = vmov %v6347_v15  ;;  %v1359_v16 = vmov %v6349_v16  ;;  %s1143_s2 = smov [#allocation23] }
 0x1bc   : >> { %v1232_v16 = vmov %v6349_v16  ;;  %vm1345_vm10 = vcmp.eq.s32.totalorder %v1344_v63, %v1340_v15 }
 0x1bd   : >> { %5936 = vrcp.f32 %v1090_v5  ;;  %v1360_v5 = vadd.s32 48, %v1359_v16 }
 0x1c2   : >> { %v1088_v11 = vld [vmem:[%s1087_s19] sm:$0xff]  ;;  %s1174_s19 = smov [#allocation23] }
 0x1c3   : >> { %v1089_v1 = vsub.f32 %v1088_v11, %v1084_v8  ;;  %v1109_v22 = vand.u32 2147483647, %v1088_v11 }
 0x1c5   : >> { %v1110_v6 = vmin.f32 %v1107_v21, %v1109_v22 }
 0x1c7   : >> { %v5937_v12 = vpop.eup %5936  ;;  %v1111_v26 = vmul.f32 1.1920929e-08, %v1110_v6 }
 0x1c8   : >> { %v1092_v61 = vmul.f32 %v5937_v12, %v1089_v1 }
 0x1c9   : >> { %vm1112_vm14 = vcmp.le.f32.partialorder %v1108_v25, %v1111_v26 }
 0x1ca   : >> { %v1094_v10 = vmul.f32 %v1092_v61, %v1092_v61  ;;  %vm1093_vm13 = vcmp.ge.f32.partialorder %v1092_v61, 0.0 }
 0x1cc   : >> { %v1095_v13 = vadd.f32 1.0, %v1094_v10 }
 0x1ce   : >> { %5938 = vrsqrt.f32 %v1095_v13  ;;  %vm1098_vm11 = vcmp.eq.f32.partialorder %v1095_v13, inf  ;;  %v1101_v14 = vand.u32 2147483648, %v1095_v13  ;;  %vm1100_vm12 = vcmp.eq.f32.partialorder %v1095_v13, 0.0 }
 0x1d8   : >> { %v5939_v17 = vpop.eup %5938 }
 0x1d9   : >> { %v1097_v18 = vmul.f32 %v5939_v17, %v1095_v13 }
 0x1db   : >> { %v1099_v19 = vsel %vm1098_vm11, %v1095_v13, %v1097_v18  ;;  %vm1266_vm11 = vcmp.eq.s32.totalorder %v1264_v16, %v1261_v15  ;;  %v1356_v15 = vmov %v6347_v15 }
 0x1dc   : >> { %v1102_v20 = vsel %vm1100_vm12, %v1101_v14, %v1099_v19  ;;  %v1229_v15 = vmov %v6347_v15  ;;  %vm1361_vm12 = vcmp.eq.s32.totalorder %v1360_v5, %v1356_v15 }
 0x1dd   : >> { %v1103_v3 = vxor.u32 2147483648, %v1102_v20 }
 0x1df   : >> { %v1104_v23 = vsel %vm1093_vm13, %v1102_v20, %v1103_v3 }
 0x1e0   : >> { %v1105_v24 = vadd.f32 %v1104_v23, %v1092_v61 }
 0x1e2   : >> { %5940 = vrcp.f32 %v1105_v24 }
 0x1ec   : >> { %v5941_v27 = vpop.eup %5940 }
 0x1ed   : >> { %v1113_v28 = vsel %vm1112_vm14, 0.0, %v5941_v27 }
 0x1ee   : >> { %v1114_v7 = vmul.f32 %v1113_v28, %v1113_v28  ;;  %v1118_v30 = vmul.f32 %v1113_v28, %v1086_v4 }
 0x1f0   : >> { %v1115_v31 = vadd.f32 1.0, %v1114_v7  ;;  %v1119_v32 = vsub.f32 %v1084_v8, %v1118_v30  ;;  %v1121_v33 = vadd.f32 %v1118_v30, %v1088_v11  ;;  %v1233_v8 = vadd.s32 48, %v1232_v16 }
 0x1f1   : >> { %v1375_v16 = vmov %v6349_v16 }
 0x1f2   : >> { %5942 = vrsqrt.f32 %v1115_v31  ;;  %1123 = vst [vmem:[%s1122_s20] sm:$0xff] %v1119_v32  ;;  %1125 = vst [vmem:[%s1124_s21] sm:$0xff] %v1121_v33  ;;  %v1248_v16 = vmov %v6349_v16  ;;  %vm1234_vm13 = vcmp.eq.s32.totalorder %v1233_v8, %v1229_v15  ;;  %v1376_v10 = vadd.s32 56, %v1375_v16  ;;  %s1190_s20 = smov [#allocation23]  ;;  %s1206_s21 = smov [#allocation23] }
 0x1f3   : >> { %v1249_v13 = vadd.s32 56, %v1248_v16  ;;  %v1372_v15 = vmov %v6347_v15 }
 0x1f4   : >> { %v1245_v15 = vmov %v6347_v15  ;;  %vm1377_vm14 = vcmp.eq.s32.totalorder %v1376_v10, %v1372_v15 }
 0x1fc   : >> { %v5943_v34 = vpop.eup %5942 }
 0x1fd   : >> { %1127 = vst [vmem:[%s1126_s3] sm:$0xff] %v5943_v34  ;;  %v1117_v9 = vmul.f32 %v5943_v34, %v1113_v28  ;;  %s1222_s3 = smov [#allocation23] }
 0x1ff   : >> { %1129 = vst [vmem:[%s1128_s22] sm:$0xff] %v1117_v9  ;;  %s1270_s22 = smov [#allocation24] }
 0x204   : >> { %v1146_v39 = vld [vmem:[%s1145_s0] ss:$0 sm:$0xff]  ;;  %s1285_s0 = smov [#allocation24] }
 0x205   : >> { %v1131_v40 = vld [vmem:[%s1130_s23] ss:$0 sm:$0xff]  ;;  %v1155_v43 = vsel %vm1154_vm15, %v1146_v39, 0.0  ;;  %vm1250_vm15 = vcmp.eq.s32.totalorder %v1249_v13, %v1245_v15  ;;  %s1301_s23 = smov [#allocation24]  ;;  %v7295_v15 = vmov %v6347_v15 }
 0x206   : >> { %v1140_v44 = vsel %vm1139_vm1, %v1131_v40, 0.0  ;;  %v1162_v45 = vld [vmem:[%s1161_s24] ss:$0 sm:$0xff]  ;;  %1156 = vadd.xlane.f32.xlu1 %v1155_v43  ;;  %s1317_s24 = smov [#allocation24]  ;;  %vm8432_vm1 = vcmp.eq.s32.totalorder %v6349_v16, 0  ;;  %v7298_v15 = vmov %v6347_v15 }
 0x207   : >> { %1141 = vadd.xlane.f32.xlu0 %v1140_v44  ;;  %v1273_v36 = vld [vmem:[%s1272_s25] ss:$0 sm:$0xff]  ;;  %v1171_v46 = vsel %vm1170_vm2, %v1162_v45, 0.0  ;;  %s1333_s25 = smov [#allocation24]  ;;  %vm8431_vm2 = vcmp.eq.s32.totalorder %v6349_v16, 7  ;;  %v7288_v16 = vmov %v6349_v16 }
 0x208   : >> { %v1282_v48 = vsel %vm1281_vm3, %v1273_v36, 0.0  ;;  %v1178_v49 = vld [vmem:[%s1177_s26] ss:$0 sm:$0xff]  ;;  %s1238_s26 = smov [#allocation23]  ;;  %vm1886_vm3 = vcmp.eq.s32.totalorder %v7288_v16, %v7295_v15 }
 0x209   : >> { %v1289_v50 = vld [vmem:[%s1288_s27] ss:$0 sm:$0xff]  ;;  %v1187_v53 = vsel %vm1186_vm4, %v1178_v49, 0.0  ;;  %s1349_s27 = smov [#allocation24] }
 0x20a   : >> { %1283 = vadd.xlane.f32.xlu1 %v1282_v48  ;;  %v1298_v51 = vsel %vm1297_vm5, %v1289_v50, 0.0  ;;  %v1194_v47 = vld [vmem:[%s1193_s28] ss:$0 sm:$0xff]  ;;  %s1365_s28 = smov [#allocation24] }
 0x20b   : >> { %1172 = vadd.xlane.f32.xlu0 %v1171_v46  ;;  %v1305_v56 = vld [vmem:[%s1304_s29] ss:$0 sm:$0xff]  ;;  %v1203_v54 = vsel %vm1202_vm6, %v1194_v47, 0.0  ;;  %s1381_s29 = smov [#allocation24] }
 0x20c   : >> { %v1314_v55 = vsel %vm1313_vm7, %v1305_v56, 0.0  ;;  %v1210_v60 = vld [vmem:[%s1209_s30] ss:$0 sm:$0xff]  ;;  %s1254_s30 = smov [#allocation23] }
 0x20d   : >> { %v1321_v62 = vld [vmem:[%s1320_s1] ss:$0 sm:$0xff]  ;;  %v1219_v0 = vsel %vm1218_vm8, %v1210_v60, 0.0  ;;  %s1386_s1 = smov [#allocation24] }
 0x20e   : >> { %1299 = vadd.xlane.f32.xlu1 %v1298_v51  ;;  %v1330_v59 = vsel %vm1329_vm9, %v1321_v62, 0.0  ;;  %v1337_v2 = vld [vmem:[%s1336_s12] ss:$0 sm:$0xff]  ;;  %s6765_s12 = smov [#allocation12] }
 0x20f   : >> { %1188 = vadd.xlane.f32.xlu0 %v1187_v53  ;;  %v1258_v4 = vld [vmem:[%s1257_s13] ss:$0 sm:$0xff]  ;;  %v1346_v11 = vsel %vm1345_vm10, %v1337_v2, 0.0  ;;  %s6767_s13 = smov [#allocation13] }
 0x210   : >> { %v1267_v1 = vsel %vm1266_vm11, %v1258_v4, 0.0  ;;  %v1353_v12 = vld [vmem:[%s1352_s14] ss:$0 sm:$0xff]  ;;  %s6769_s14 = smov [#allocation14] }
 0x211   : >> { %v1226_v61 = vld [vmem:[%s1225_s15] ss:$0 sm:$0xff]  ;;  %v1362_v17 = vsel %vm1361_vm12, %v1353_v12, 0.0  ;;  %s6771_s15 = smov [#allocation15] }
 0x212   : >> { %1315 = vadd.xlane.f32.xlu1 %v1314_v55  ;;  %v1235_v14 = vsel %vm1234_vm13, %v1226_v61, 0.0  ;;  %v1369_v18 = vld [vmem:[%s1368_s16] ss:$0 sm:$0xff]  ;;  %s3010_s16 = smov [#allocation24] }
 0x213   : >> { %1204 = vadd.xlane.f32.xlu0 %v1203_v54  ;;  %v1242_v19 = vld [vmem:[%s1241_s17] ss:$0 sm:$0xff]  ;;  %v1378_v20 = vsel %vm1377_vm14, %v1369_v18, 0.0  ;;  %s6775_s17 = smov [#allocation8] }
 0x214   : >> { %v1251_v3 = vsel %vm1250_vm15, %v1242_v19, 0.0  ;;  %v1392_v35 = vld [vmem:[%s6765_s12] sm:$0xff] }
 0x215   : >> { %v1393_v37 = vld [vmem:[%s6767_s13] sm:$0xff] }
 0x216   : >> { %1331 = vadd.xlane.f32.xlu1 %v1330_v59  ;;  %v1394_v38 = vld [vmem:[%s6769_s14] sm:$0xff] }
 0x217   : >> { %1220 = vadd.xlane.f32.xlu0 %v1219_v0  ;;  %v1395_v39 = vld [vmem:[%s6771_s15] sm:$0xff] }
 0x218   : >> { %v3016_v29 = vld [vmem:[%s6775_s17] sm:$0xff] }
 0x21a   : >> { %1347 = vadd.xlane.f32.xlu1 %v1346_v11 }
 0x21b   : >> { %1268 = vadd.xlane.f32.xlu0 %v1267_v1 }
 0x21e   : >> { %1363 = vadd.xlane.f32.xlu1 %v1362_v17 }
 0x21f   : >> { %1236 = vadd.xlane.f32.xlu0 %v1235_v14 }
 0x222   : >> { %1379 = vadd.xlane.f32.xlu1 %v1378_v20 }
 0x223   : >> { %1252 = vadd.xlane.f32.xlu0 %v1251_v3 }
 0x293   : >> { %v1157_v21 = vpop.xlane.xlu1 %1156 }
 0x294   : >> { %v1142_v22 = vpop.xlane.xlu0 %1141 }
 0x295   : >> { %1144 = vst [vmem:[%s1143_s2] sm:$0xff] %v1142_v22  ;;  %s6777_s2 = smov [#allocation9] }
 0x296   : >> { %4859 = vst [vmem:[%s1158_s18 + $0x8] sm:$0xff] %v1157_v21  ;;  %s6781_s18 = smov [#allocation10]  ;;  %v3017_v41 = vld [vmem:[%s6777_s2] sm:$0xff] }
 0x297   : >> { %v1284_v24 = vpop.xlane.xlu1 %1283  ;;  %v3018_v43 = vld [vmem:[%s6781_s18] sm:$0xff] }
 0x298   : >> { %v1173_v23 = vpop.xlane.xlu0 %1172 }
 0x299   : >> { %4860 = vst [vmem:[%s1174_s19 + $0x10] sm:$0xff] %v1173_v23  ;;  %s6783_s19 = smov [#allocation11] }
 0x29a   : >> { %v3019_v44 = vld [vmem:[%s6783_s19] sm:$0xff] }
 0x29b   : >> { %v1300_v25 = vpop.xlane.xlu1 %1299 }
 0x29c   : >> { %v1189_v6 = vpop.xlane.xlu0 %1188 }
 0x29d   : >> { %4861 = vst [vmem:[%s1190_s20 + $0x18] sm:$0xff] %v1189_v6  ;;  %s1384_s20 = smov [#allocation23] }
 0x29f   : >> { %v1316_v27 = vpop.xlane.xlu1 %1315 }
 0x2a0   : >> { %v1205_v26 = vpop.xlane.xlu0 %1204 }
 0x2a1   : >> { %4862 = vst [vmem:[%s1206_s21 + $0x20] sm:$0xff] %v1205_v26  ;;  %s3008_s21 = smov [#allocation23] }
 0x2a3   : >> { %v1332_v7 = vpop.xlane.xlu1 %1331 }
 0x2a4   : >> { %v1221_v28 = vpop.xlane.xlu0 %1220 }
 0x2a5   : >> { %4863 = vst [vmem:[%s1222_s3 + $0x28] sm:$0xff] %v1221_v28  ;;  %s1415_s3 = smov [#allocation24] }
 0x2a7   : >> { %v1348_v30 = vpop.xlane.xlu1 %1347 }
 0x2a8   : >> { %v1269_v31 = vpop.xlane.xlu0 %1268 }
 0x2a9   : >> { %1271 = vst [vmem:[%s1270_s22] sm:$0xff] %v1269_v31  ;;  %s6793_s22 = smov [#allocation12] }
 0x2aa   : >> { %4866 = vst [vmem:[%s1285_s0 + $0x8] sm:$0xff] %v1284_v24  ;;  %s1412_s0 = smov [#allocation23] }
 0x2ab   : >> { %4867 = vst [vmem:[%s1301_s23 + $0x10] sm:$0xff] %v1300_v25  ;;  %v1364_v32 = vpop.xlane.xlu1 %1363  ;;  %s6799_s23 = smov [#allocation13] }
 0x2ac   : >> { %4868 = vst [vmem:[%s1317_s24 + $0x18] sm:$0xff] %v1316_v27  ;;  %v1237_v33 = vpop.xlane.xlu0 %1236  ;;  %s6801_s24 = smov [#allocation14] }
 0x2ad   : >> { %4869 = vst [vmem:[%s1333_s25 + $0x20] sm:$0xff] %v1332_v7  ;;  %4864 = vst [vmem:[%s1238_s26 + $0x30] sm:$0xff] %v1237_v33  ;;  %s6803_s25 = smov [#allocation15]  ;;  %s3036_s26 = smov [#allocation23] }
 0x2ae   : >> { %4870 = vst [vmem:[%s1349_s27 + $0x28] sm:$0xff] %v1348_v30  ;;  %s6805_s27 = smov [#allocation8] }
 0x2af   : >> { %4871 = vst [vmem:[%s1365_s28 + $0x30] sm:$0xff] %v1364_v32  ;;  %v1380_v34 = vpop.xlane.xlu1 %1379  ;;  %s6807_s28 = smov [#allocation9] }
 0x2b0   : >> { %v1253_v9 = vpop.xlane.xlu0 %1252  ;;  %4872 = vst [vmem:[%s1381_s29 + $0x38] sm:$0xff] %v1380_v34  ;;  %s6809_s29 = smov [#allocation10] }
 0x2b1   : >> { %4865 = vst [vmem:[%s1254_s30 + $0x38] sm:$0xff] %v1253_v9  ;;  %s3039_s30 = smov [#allocation24] }
 0x2b7   : >> { %v1387_v40 = vld [vmem:[%s1386_s1] sm:$0xff]  ;;  %v4874_v12 = vld [vmem:[%s1415_s3 + $0x8] sm:$0xff]  ;;  %s6814_s1 = smov [#allocation11]  ;;  %s6847_s3 = smov [#allocation11] }
 0x2b8   : >> { %v1397_v45 = vmul.f32 %v1394_v38, %v1387_v40  ;;  %v1400_v36 = vmul.f32 %v1395_v39, %v1387_v40  ;;  %v1402_v46 = vmul.f32 %v1392_v35, %v1387_v40  ;;  %v1405_v48 = vmul.f32 %v1393_v37, %v1387_v40  ;;  %v3011_v49 = vld [vmem:[%s3010_s16] sm:$0xff]  ;;  %v4873_v61 = vld [vmem:[%s1412_s0 + $0x8] sm:$0xff]  ;;  %s6831_s16 = smov [#allocation14]  ;;  %s6857_s0 = smov [#allocation12] }
 0x2b9   : >> { %v1385_v50 = vld [vmem:[%s1384_s20] sm:$0xff]  ;;  %v3021_v47 = vmul.f32 %v3018_v43, %v3011_v49  ;;  %v3024_v56 = vmul.f32 %v3019_v44, %v3011_v49  ;;  %v3026_v57 = vmul.f32 %v3016_v29, %v3011_v49  ;;  %v3029_v58 = vmul.f32 %v3017_v41, %v3011_v49  ;;  %v5231_v6 = vld [vmem:[%s3036_s26 + $0x8] sm:$0xff]  ;;  %s6840_s20 = smov [#allocation9]  ;;  %s6866_s26 = smov [#allocation15] }
 0x2ba   : >> { %v1396_v42 = vmul.f32 %v1392_v35, %v1385_v50  ;;  %v1399_v52 = vmul.f32 %v1393_v37, %v1385_v50  ;;  %v1403_v53 = vmul.f32 %v1394_v38, %v1385_v50  ;;  %v1406_v51 = vmul.f32 %v1395_v39, %v1385_v50  ;;  %v3009_v63 = vld [vmem:[%s3008_s21] sm:$0xff]  ;;  %v5232_v7 = vld [vmem:[%s3039_s30 + $0x8] sm:$0xff]  ;;  %s6845_s21 = smov [#allocation10]  ;;  %s6874_s30 = smov [#allocation9] }
 0x2bb   : >> { %v3020_v0 = vmul.f32 %v3016_v29, %v3009_v63  ;;  %v3023_v59 = vmul.f32 %v3017_v41, %v3009_v63  ;;  %v3027_v2 = vmul.f32 %v3018_v43, %v3009_v63  ;;  %v3030_v4 = vmul.f32 %v3019_v44, %v3009_v63 }
 0x2bc   : >> { %v1398_v54 = vsub.f32 %v1396_v42, %v1397_v45  ;;  %v1401_v55 = vsub.f32 %v1399_v52, %v1400_v36  ;;  %v1404_v60 = vadd.f32 %v1403_v53, %v1402_v46  ;;  %v1407_v62 = vadd.f32 %v1406_v51, %v1405_v48 }
 0x2bd   : >> { %v3022_v5 = vsub.f32 %v3020_v0, %v3021_v47  ;;  %v3025_v8 = vsub.f32 %v3023_v59, %v3024_v56  ;;  %v3028_v11 = vadd.f32 %v3027_v2, %v3026_v57  ;;  %v3031_v1 = vadd.f32 %v3030_v4, %v3029_v58 }
 0x2be   : >> { %1408 = vst [vmem:[%s6765_s12] sm:$0xff] %v1398_v54  ;;  %1409 = vst [vmem:[%s6767_s13] sm:$0xff] %v1401_v55  ;;  %s1449_s12 = smov [#allocation24]  ;;  %s6825_s13 = smov [#allocation12] }
 0x2bf   : >> { %1410 = vst [vmem:[%s6769_s14] sm:$0xff] %v1404_v60  ;;  %1411 = vst [vmem:[%s6771_s15] sm:$0xff] %v1407_v62  ;;  %s6827_s14 = smov [#allocation13]  ;;  %s1446_s15 = smov [#allocation23]  ;;  %v4884_v36 = vld [vmem:[%s1449_s12 + $0x10] sm:$0xff] }
 0x2c0   : >> { %3032 = vst [vmem:[%s6775_s17] sm:$0xff] %v3022_v5  ;;  %3033 = vst [vmem:[%s6777_s2] sm:$0xff] %v3025_v8  ;;  %s6833_s17 = smov [#allocation15]  ;;  %s3073_s2 = smov [#allocation24]  ;;  %v4883_v46 = vld [vmem:[%s1446_s15 + $0x10] sm:$0xff] }
 0x2c1   : >> { %3034 = vst [vmem:[%s6781_s18] sm:$0xff] %v3028_v11  ;;  %3035 = vst [vmem:[%s6783_s19] sm:$0xff] %v3031_v1  ;;  %s3070_s18 = smov [#allocation23]  ;;  %s6838_s19 = smov [#allocation8]  ;;  %v5242_v58 = vld [vmem:[%s3073_s2 + $0x10] sm:$0xff] }
 0x2c2   : >> { %v5241_v0 = vld [vmem:[%s3070_s18 + $0x10] sm:$0xff]  ;;  %s6879_s12 = smov [#allocation11]  ;;  %s6891_s15 = smov [#allocation13] }
 0x2c3   : >> { %s6896_s2 = smov [#allocation15]  ;;  %s3141_s18 = smov [#allocation24] }
 0x2c5   : >> { %v4875_v10 = vld [vmem:[%s6793_s22 + $0x8] sm:$0xff] }
 0x2c6   : >> { %v4876_v13 = vld [vmem:[%s6799_s23 + $0x8] sm:$0xff]  ;;  %v1430_v18 = vmul.f32 %v4875_v10, %v4873_v61  ;;  %v1436_v3 = vmul.f32 %v4875_v10, %v4874_v12 }
 0x2c7   : >> { %v4877_v17 = vld [vmem:[%s6801_s24 + $0x8] sm:$0xff]  ;;  %v1433_v20 = vmul.f32 %v4876_v13, %v4873_v61  ;;  %v1439_v23 = vmul.f32 %v4876_v13, %v4874_v12 }
 0x2c8   : >> { %v4878_v14 = vld [vmem:[%s6803_s25 + $0x8] sm:$0xff]  ;;  %v1431_v19 = vmul.f32 %v4877_v17, %v4874_v12  ;;  %v1437_v22 = vmul.f32 %v4877_v17, %v4873_v61 }
 0x2c9   : >> { %v1434_v21 = vmul.f32 %v4878_v14, %v4874_v12  ;;  %v1440_v24 = vmul.f32 %v4878_v14, %v4873_v61  ;;  %v5233_v26 = vld [vmem:[%s6805_s27 + $0x8] sm:$0xff] }
 0x2ca   : >> { %v1432_v25 = vsub.f32 %v1430_v18, %v1431_v19  ;;  %v5234_v27 = vld [vmem:[%s6807_s28 + $0x8] sm:$0xff]  ;;  %v1438_v31 = vadd.f32 %v1437_v22, %v1436_v3  ;;  %v3054_v34 = vmul.f32 %v5233_v26, %v5231_v6  ;;  %v3060_v38 = vmul.f32 %v5233_v26, %v5232_v7 }
 0x2cb   : >> { %v5235_v28 = vld [vmem:[%s6809_s29 + $0x8] sm:$0xff]  ;;  %v1435_v30 = vsub.f32 %v1433_v20, %v1434_v21  ;;  %v1441_v32 = vadd.f32 %v1440_v24, %v1439_v23  ;;  %v3057_v35 = vmul.f32 %v5234_v27, %v5231_v6  ;;  %v3063_v40 = vmul.f32 %v5234_v27, %v5232_v7 }
 0x2cc   : >> { %v5236_v33 = vld [vmem:[%s6814_s1 + $0x8] sm:$0xff]  ;;  %4879 = vst [vmem:[%s6793_s22 + $0x8] sm:$0xff] %v1432_v25  ;;  %v3055_v9 = vmul.f32 %v5235_v28, %v5232_v7  ;;  %4881 = vst [vmem:[%s6801_s24 + $0x8] sm:$0xff] %v1438_v31  ;;  %v3061_v39 = vmul.f32 %v5235_v28, %v5231_v6  ;;  %s1483_s22 = smov [#allocation24]  ;;  %s6859_s24 = smov [#allocation13] }
 0x2cd   : >> { %v3058_v37 = vmul.f32 %v5236_v33, %v5232_v7  ;;  %4880 = vst [vmem:[%s6799_s23 + $0x8] sm:$0xff] %v1435_v30  ;;  %4882 = vst [vmem:[%s6803_s25 + $0x8] sm:$0xff] %v1441_v32  ;;  %v3064_v29 = vmul.f32 %v5236_v33, %v5231_v6  ;;  %s1480_s23 = smov [#allocation23]  ;;  %s6861_s25 = smov [#allocation14]  ;;  %v4894_v21 = vld [vmem:[%s1483_s22 + $0x18] sm:$0xff] }
 0x2ce   : >> { %v3056_v41 = vsub.f32 %v3054_v34, %v3055_v9  ;;  %v3062_v44 = vadd.f32 %v3061_v39, %v3060_v38  ;;  %v4893_v22 = vld [vmem:[%s1480_s23 + $0x18] sm:$0xff]  ;;  %s6911_s22 = smov [#allocation11]  ;;  %s6921_s23 = smov [#allocation12] }
 0x2cf   : >> { %v3059_v43 = vsub.f32 %v3057_v35, %v3058_v37  ;;  %v3065_v45 = vadd.f32 %v3064_v29, %v3063_v40 }
 0x2d0   : >> { %5237 = vst [vmem:[%s6805_s27 + $0x8] sm:$0xff] %v3056_v41  ;;  %5239 = vst [vmem:[%s6809_s29 + $0x8] sm:$0xff] %v3062_v44  ;;  %s3107_s27 = smov [#allocation24]  ;;  %s6869_s29 = smov [#allocation8] }
 0x2d1   : >> { %5238 = vst [vmem:[%s6807_s28 + $0x8] sm:$0xff] %v3059_v43  ;;  %5240 = vst [vmem:[%s6814_s1 + $0x8] sm:$0xff] %v3065_v45  ;;  %s3104_s28 = smov [#allocation23]  ;;  %s6876_s1 = smov [#allocation10]  ;;  %v5252_v34 = vld [vmem:[%s3107_s27 + $0x18] sm:$0xff] }
 0x2d2   : >> { %v5251_v35 = vld [vmem:[%s3104_s28 + $0x18] sm:$0xff]  ;;  %s6930_s27 = smov [#allocation15]  ;;  %s3175_s28 = smov [#allocation24] }
 0x2d3   : >> { %v4885_v48 = vld [vmem:[%s6825_s13 + $0x10] sm:$0xff] }
 0x2d4   : >> { %v4886_v49 = vld [vmem:[%s6827_s14 + $0x10] sm:$0xff]  ;;  %v1464_v52 = vmul.f32 %v4885_v48, %v4883_v46  ;;  %v1470_v53 = vmul.f32 %v4885_v48, %v4884_v36 }
 0x2d5   : >> { %v4887_v50 = vld [vmem:[%s6831_s16 + $0x10] sm:$0xff]  ;;  %v1467_v47 = vmul.f32 %v4886_v49, %v4883_v46  ;;  %v1473_v54 = vmul.f32 %v4886_v49, %v4884_v36 }
 0x2d6   : >> { %v4888_v42 = vld [vmem:[%s6833_s17 + $0x10] sm:$0xff]  ;;  %v1465_v51 = vmul.f32 %v4887_v50, %v4884_v36  ;;  %v1471_v57 = vmul.f32 %v4887_v50, %v4883_v46 }
 0x2d7   : >> { %v1468_v56 = vmul.f32 %v4888_v42, %v4884_v36  ;;  %v1474_v55 = vmul.f32 %v4888_v42, %v4883_v46  ;;  %v5243_v59 = vld [vmem:[%s6838_s19 + $0x10] sm:$0xff] }
 0x2d8   : >> { %v1466_v60 = vsub.f32 %v1464_v52, %v1465_v51  ;;  %v1472_v63 = vadd.f32 %v1471_v57, %v1470_v53  ;;  %v5244_v2 = vld [vmem:[%s6840_s20 + $0x10] sm:$0xff]  ;;  %v3088_v11 = vmul.f32 %v5243_v59, %v5241_v0  ;;  %v3094_v12 = vmul.f32 %v5243_v59, %v5242_v58 }
 0x2d9   : >> { %v1469_v62 = vsub.f32 %v1467_v47, %v1468_v56  ;;  %v1475_v4 = vadd.f32 %v1474_v55, %v1473_v54  ;;  %v5245_v5 = vld [vmem:[%s6845_s21 + $0x10] sm:$0xff]  ;;  %v3091_v1 = vmul.f32 %v5244_v2, %v5241_v0  ;;  %v3097_v17 = vmul.f32 %v5244_v2, %v5242_v58 }
 0x2da   : >> { %v5246_v8 = vld [vmem:[%s6847_s3 + $0x10] sm:$0xff]  ;;  %4889 = vst [vmem:[%s6825_s13 + $0x10] sm:$0xff] %v1466_v60  ;;  %4891 = vst [vmem:[%s6831_s16 + $0x10] sm:$0xff] %v1472_v63  ;;  %v3089_v61 = vmul.f32 %v5245_v5, %v5242_v58  ;;  %v3095_v13 = vmul.f32 %v5245_v5, %v5241_v0  ;;  %s1517_s13 = smov [#allocation24]  ;;  %s1514_s16 = smov [#allocation23] }
 0x2db   : >> { %4890 = vst [vmem:[%s6827_s14 + $0x10] sm:$0xff] %v1469_v62  ;;  %v3092_v10 = vmul.f32 %v5246_v8, %v5242_v58  ;;  %4892 = vst [vmem:[%s6833_s17 + $0x10] sm:$0xff] %v1475_v4  ;;  %v3098_v14 = vmul.f32 %v5246_v8, %v5241_v0  ;;  %s6889_s14 = smov [#allocation12]  ;;  %s6894_s17 = smov [#allocation14]  ;;  %v4904_v56 = vld [vmem:[%s1517_s13 + $0x20] sm:$0xff] }
 0x2dc   : >> { %v3090_v18 = vsub.f32 %v3088_v11, %v3089_v61  ;;  %v3096_v20 = vadd.f32 %v3095_v13, %v3094_v12  ;;  %v4903_v57 = vld [vmem:[%s1514_s16 + $0x20] sm:$0xff]  ;;  %s6943_s13 = smov [#allocation11]  ;;  %s6955_s16 = smov [#allocation13] }
 0x2dd   : >> { %v3093_v19 = vsub.f32 %v3091_v1, %v3092_v10  ;;  %v3099_v3 = vadd.f32 %v3098_v14, %v3097_v17  ;;  %v5262_v11 = vld [vmem:[%s3141_s18 + $0x20] sm:$0xff]  ;;  %s6960_s18 = smov [#allocation15] }
 0x2de   : >> { %5247 = vst [vmem:[%s6838_s19 + $0x10] sm:$0xff] %v3090_v18  ;;  %5249 = vst [vmem:[%s6845_s21 + $0x10] sm:$0xff] %v3096_v20  ;;  %s3138_s19 = smov [#allocation23]  ;;  %s6904_s21 = smov [#allocation9] }
 0x2df   : >> { %5248 = vst [vmem:[%s6840_s20 + $0x10] sm:$0xff] %v3093_v19  ;;  %5250 = vst [vmem:[%s6847_s3 + $0x10] sm:$0xff] %v3099_v3  ;;  %s6902_s20 = smov [#allocation8]  ;;  %s6909_s3 = smov [#allocation10]  ;;  %v5261_v10 = vld [vmem:[%s3138_s19 + $0x20] sm:$0xff] }
 0x2e0   : >> { %s3209_s19 = smov [#allocation24] }
 0x2e1   : >> { %v4895_v23 = vld [vmem:[%s6857_s0 + $0x18] sm:$0xff] }
 0x2e2   : >> { %v4896_v24 = vld [vmem:[%s6859_s24 + $0x18] sm:$0xff]  ;;  %v1498_v26 = vmul.f32 %v4895_v23, %v4893_v22  ;;  %v1504_v7 = vmul.f32 %v4895_v23, %v4894_v21 }
 0x2e3   : >> { %v4897_v6 = vld [vmem:[%s6861_s25 + $0x18] sm:$0xff]  ;;  %v1501_v28 = vmul.f32 %v4896_v24, %v4893_v22  ;;  %v1507_v32 = vmul.f32 %v4896_v24, %v4894_v21 }
 0x2e4   : >> { %v4898_v25 = vld [vmem:[%s6866_s26 + $0x18] sm:$0xff]  ;;  %v1499_v27 = vmul.f32 %v4897_v6, %v4894_v21  ;;  %v1505_v31 = vmul.f32 %v4897_v6, %v4893_v22 }
 0x2e5   : >> { %v1502_v30 = vmul.f32 %v4898_v25, %v4894_v21  ;;  %v1508_v33 = vmul.f32 %v4898_v25, %v4893_v22  ;;  %v5253_v40 = vld [vmem:[%s6869_s29 + $0x18] sm:$0xff] }
 0x2e6   : >> { %v1500_v9 = vsub.f32 %v1498_v26, %v1499_v27  ;;  %v1506_v38 = vadd.f32 %v1505_v31, %v1504_v7  ;;  %v5254_v29 = vld [vmem:[%s6874_s30 + $0x18] sm:$0xff]  ;;  %v3122_v44 = vmul.f32 %v5253_v40, %v5251_v35  ;;  %v3128_v46 = vmul.f32 %v5253_v40, %v5252_v34 }
 0x2e7   : >> { %v1503_v37 = vsub.f32 %v1501_v28, %v1502_v30  ;;  %v1509_v39 = vadd.f32 %v1508_v33, %v1507_v32  ;;  %v5255_v41 = vld [vmem:[%s6876_s1 + $0x18] sm:$0xff]  ;;  %v3125_v36 = vmul.f32 %v5254_v29, %v5251_v35  ;;  %v3131_v50 = vmul.f32 %v5254_v29, %v5252_v34 }
 0x2e8   : >> { %4899 = vst [vmem:[%s6857_s0 + $0x18] sm:$0xff] %v1500_v9  ;;  %v5256_v43 = vld [vmem:[%s6879_s12 + $0x18] sm:$0xff]  ;;  %v3123_v45 = vmul.f32 %v5255_v41, %v5252_v34  ;;  %4901 = vst [vmem:[%s6861_s25 + $0x18] sm:$0xff] %v1506_v38  ;;  %v3129_v49 = vmul.f32 %v5255_v41, %v5251_v35  ;;  %s1551_s0 = smov [#allocation24]  ;;  %s6923_s25 = smov [#allocation13] }
 0x2e9   : >> { %4900 = vst [vmem:[%s6859_s24 + $0x18] sm:$0xff] %v1503_v37  ;;  %4902 = vst [vmem:[%s6866_s26 + $0x18] sm:$0xff] %v1509_v39  ;;  %v3126_v48 = vmul.f32 %v5256_v43, %v5252_v34  ;;  %v3132_v42 = vmul.f32 %v5256_v43, %v5251_v35  ;;  %s1548_s24 = smov [#allocation23]  ;;  %s6925_s26 = smov [#allocation14]  ;;  %v4914_v30 = vld [vmem:[%s1551_s0 + $0x28] sm:$0xff] }
 0x2ea   : >> { %v3124_v52 = vsub.f32 %v3122_v44, %v3123_v45  ;;  %v3130_v51 = vadd.f32 %v3129_v49, %v3128_v46  ;;  %v4913_v31 = vld [vmem:[%s1548_s24 + $0x28] sm:$0xff]  ;;  %s6975_s0 = smov [#allocation11]  ;;  %s6985_s24 = smov [#allocation12] }
 0x2eb   : >> { %v3127_v53 = vsub.f32 %v3125_v36, %v3126_v48  ;;  %v3133_v47 = vadd.f32 %v3132_v42, %v3131_v50  ;;  %v5272_v44 = vld [vmem:[%s3175_s28 + $0x28] sm:$0xff]  ;;  %s6994_s28 = smov [#allocation15] }
 0x2ec   : >> { %5257 = vst [vmem:[%s6869_s29 + $0x18] sm:$0xff] %v3124_v52  ;;  %5259 = vst [vmem:[%s6876_s1 + $0x18] sm:$0xff] %v3130_v51  ;;  %s3172_s29 = smov [#allocation23]  ;;  %s6938_s1 = smov [#allocation9] }
 0x2ed   : >> { %5258 = vst [vmem:[%s6874_s30 + $0x18] sm:$0xff] %v3127_v53  ;;  %5260 = vst [vmem:[%s6879_s12 + $0x18] sm:$0xff] %v3133_v47  ;;  %s6933_s30 = smov [#allocation8]  ;;  %s6940_s12 = smov [#allocation10]  ;;  %v5271_v36 = vld [vmem:[%s3172_s29 + $0x28] sm:$0xff] }
 0x2ee   : >> { %s3243_s29 = smov [#allocation24] }
 0x2ef   : >> { %v4905_v58 = vld [vmem:[%s6889_s14 + $0x20] sm:$0xff] }
 0x2f0   : >> { %v4906_v54 = vld [vmem:[%s6891_s15 + $0x20] sm:$0xff]  ;;  %v1532_v62 = vmul.f32 %v4905_v58, %v4903_v57  ;;  %v1538_v63 = vmul.f32 %v4905_v58, %v4904_v56 }
 0x2f1   : >> { %v4907_v55 = vld [vmem:[%s6894_s17 + $0x20] sm:$0xff]  ;;  %v1535_v59 = vmul.f32 %v4906_v54, %v4903_v57  ;;  %v1541_v5 = vmul.f32 %v4906_v54, %v4904_v56 }
 0x2f2   : >> { %v4908_v60 = vld [vmem:[%s6896_s2 + $0x20] sm:$0xff]  ;;  %v1533_v0 = vmul.f32 %v4907_v55, %v4904_v56  ;;  %v1539_v4 = vmul.f32 %v4907_v55, %v4903_v57 }
 0x2f3   : >> { %v1536_v2 = vmul.f32 %v4908_v60, %v4904_v56  ;;  %v1542_v8 = vmul.f32 %v4908_v60, %v4903_v57  ;;  %v5263_v13 = vld [vmem:[%s6902_s20 + $0x20] sm:$0xff] }
 0x2f4   : >> { %v1534_v1 = vsub.f32 %v1532_v62, %v1533_v0  ;;  %v1540_v61 = vadd.f32 %v1539_v4, %v1538_v63  ;;  %v5264_v14 = vld [vmem:[%s6904_s21 + $0x20] sm:$0xff]  ;;  %v3156_v20 = vmul.f32 %v5263_v13, %v5261_v10  ;;  %v3162_v3 = vmul.f32 %v5263_v13, %v5262_v11 }
 0x2f5   : >> { %v1537_v12 = vsub.f32 %v1535_v59, %v1536_v2  ;;  %v1543_v17 = vadd.f32 %v1542_v8, %v1541_v5  ;;  %v5265_v18 = vld [vmem:[%s6909_s3 + $0x20] sm:$0xff]  ;;  %v3159_v22 = vmul.f32 %v5264_v14, %v5261_v10  ;;  %v3165_v6 = vmul.f32 %v5264_v14, %v5262_v11 }
 0x2f6   : >> { %v5266_v19 = vld [vmem:[%s6911_s22 + $0x20] sm:$0xff]  ;;  %4909 = vst [vmem:[%s6889_s14 + $0x20] sm:$0xff] %v1534_v1  ;;  %4911 = vst [vmem:[%s6894_s17 + $0x20] sm:$0xff] %v1540_v61  ;;  %v3157_v21 = vmul.f32 %v5265_v18, %v5262_v11  ;;  %v3163_v24 = vmul.f32 %v5265_v18, %v5261_v10  ;;  %s1585_s14 = smov [#allocation24]  ;;  %s1582_s17 = smov [#allocation23] }
 0x2f7   : >> { %4910 = vst [vmem:[%s6891_s15 + $0x20] sm:$0xff] %v1537_v12  ;;  %v3160_v23 = vmul.f32 %v5266_v19, %v5262_v11  ;;  %4912 = vst [vmem:[%s6896_s2 + $0x20] sm:$0xff] %v1543_v17  ;;  %v3166_v25 = vmul.f32 %v5266_v19, %v5261_v10  ;;  %s6953_s15 = smov [#allocation12]  ;;  %s6958_s2 = smov [#allocation14]  ;;  %v4924_v2 = vld [vmem:[%s1585_s14 + $0x30] sm:$0xff] }
 0x2f8   : >> { %v3158_v26 = vsub.f32 %v3156_v20, %v3157_v21  ;;  %v3164_v28 = vadd.f32 %v3163_v24, %v3162_v3  ;;  %v4923_v4 = vld [vmem:[%s1582_s17 + $0x30] sm:$0xff]  ;;  %s7007_s14 = smov [#allocation11]  ;;  %s7018_s17 = smov [#allocation12] }
 0x2f9   : >> { %v3161_v27 = vsub.f32 %v3159_v22, %v3160_v23  ;;  %v3167_v7 = vadd.f32 %v3166_v25, %v3165_v6  ;;  %v5282_v20 = vld [vmem:[%s3209_s19 + $0x30] sm:$0xff]  ;;  %s7031_s19 = smov [#allocation15] }
 0x2fa   : >> { %5267 = vst [vmem:[%s6902_s20 + $0x20] sm:$0xff] %v3158_v26  ;;  %5269 = vst [vmem:[%s6909_s3 + $0x20] sm:$0xff] %v3164_v28  ;;  %s3206_s20 = smov [#allocation23]  ;;  %s6968_s3 = smov [#allocation9] }
 0x2fb   : >> { %5268 = vst [vmem:[%s6904_s21 + $0x20] sm:$0xff] %v3161_v27  ;;  %5270 = vst [vmem:[%s6911_s22 + $0x20] sm:$0xff] %v3167_v7  ;;  %s6966_s21 = smov [#allocation8]  ;;  %s6973_s22 = smov [#allocation10]  ;;  %v5281_v23 = vld [vmem:[%s3206_s20 + $0x30] sm:$0xff] }
 0x2fc   : >> { %s7033_s20 = smov [#allocation8] }
 0x2fd   : >> { %v4915_v32 = vld [vmem:[%s6921_s23 + $0x28] sm:$0xff] }
 0x2fe   : >> { %v4916_v33 = vld [vmem:[%s6923_s25 + $0x28] sm:$0xff]  ;;  %v1566_v35 = vmul.f32 %v4915_v32, %v4913_v31  ;;  %v1572_v39 = vmul.f32 %v4915_v32, %v4914_v30 }
 0x2ff   : >> { %v4917_v34 = vld [vmem:[%s6925_s26 + $0x28] sm:$0xff]  ;;  %v1569_v38 = vmul.f32 %v4916_v33, %v4913_v31  ;;  %v1575_v41 = vmul.f32 %v4916_v33, %v4914_v30 }
 0x300   : >> { %v4918_v9 = vld [vmem:[%s6930_s27 + $0x28] sm:$0xff]  ;;  %v1567_v37 = vmul.f32 %v4917_v34, %v4914_v30  ;;  %v1573_v29 = vmul.f32 %v4917_v34, %v4913_v31 }
 0x301   : >> { %v1570_v40 = vmul.f32 %v4918_v9, %v4914_v30  ;;  %v1576_v43 = vmul.f32 %v4918_v9, %v4913_v31  ;;  %v5273_v50 = vld [vmem:[%s6933_s30 + $0x28] sm:$0xff] }
 0x302   : >> { %v1568_v45 = vsub.f32 %v1566_v35, %v1567_v37  ;;  %v1574_v48 = vadd.f32 %v1573_v29, %v1572_v39  ;;  %v5274_v42 = vld [vmem:[%s6938_s1 + $0x28] sm:$0xff]  ;;  %v3190_v51 = vmul.f32 %v5273_v50, %v5271_v36  ;;  %v3196_v57 = vmul.f32 %v5273_v50, %v5272_v44 }
 0x303   : >> { %v1571_v46 = vsub.f32 %v1569_v38, %v1570_v40  ;;  %v1577_v49 = vadd.f32 %v1576_v43, %v1575_v41  ;;  %v5275_v52 = vld [vmem:[%s6940_s12 + $0x28] sm:$0xff]  ;;  %v3193_v56 = vmul.f32 %v5274_v42, %v5271_v36  ;;  %v3199_v55 = vmul.f32 %v5274_v42, %v5272_v44 }
 0x304   : >> { %4919 = vst [vmem:[%s6921_s23 + $0x28] sm:$0xff] %v1568_v45  ;;  %v5276_v53 = vld [vmem:[%s6943_s13 + $0x28] sm:$0xff]  ;;  %v3191_v47 = vmul.f32 %v5275_v52, %v5272_v44  ;;  %4921 = vst [vmem:[%s6925_s26 + $0x28] sm:$0xff] %v1574_v48  ;;  %v3197_v54 = vmul.f32 %v5275_v52, %v5271_v36  ;;  %s1619_s23 = smov [#allocation24]  ;;  %s6987_s26 = smov [#allocation13] }
 0x305   : >> { %4920 = vst [vmem:[%s6923_s25 + $0x28] sm:$0xff] %v1571_v46  ;;  %4922 = vst [vmem:[%s6930_s27 + $0x28] sm:$0xff] %v1577_v49  ;;  %v3194_v58 = vmul.f32 %v5276_v53, %v5272_v44  ;;  %v3200_v60 = vmul.f32 %v5276_v53, %v5271_v36  ;;  %s1616_s25 = smov [#allocation23]  ;;  %s6989_s27 = smov [#allocation14]  ;;  %v4934_v40 = vld [vmem:[%s1619_s23 + $0x38] sm:$0xff] }
 0x306   : >> { %v3192_v62 = vsub.f32 %v3190_v51, %v3191_v47  ;;  %v3198_v0 = vadd.f32 %v3197_v54, %v3196_v57  ;;  %v4933_v29 = vld [vmem:[%s1616_s25 + $0x38] sm:$0xff]  ;;  %s7052_s23 = smov [#allocation13]  ;;  %s7061_s25 = smov [#allocation15] }
 0x307   : >> { %v3195_v63 = vsub.f32 %v3193_v56, %v3194_v58  ;;  %v3201_v59 = vadd.f32 %v3200_v60, %v3199_v55  ;;  %v5292_v51 = vld [vmem:[%s3243_s29 + $0x38] sm:$0xff]  ;;  %s1712_s29 = smov [#allocation15] }
 0x308   : >> { %5277 = vst [vmem:[%s6933_s30 + $0x28] sm:$0xff] %v3192_v62  ;;  %5279 = vst [vmem:[%s6940_s12 + $0x28] sm:$0xff] %v3198_v0  ;;  %s3240_s30 = smov [#allocation23]  ;;  %s7002_s12 = smov [#allocation9] }
 0x309   : >> { %5278 = vst [vmem:[%s6938_s1 + $0x28] sm:$0xff] %v3195_v63  ;;  %5280 = vst [vmem:[%s6943_s13 + $0x28] sm:$0xff] %v3201_v59  ;;  %s6997_s1 = smov [#allocation8]  ;;  %s7004_s13 = smov [#allocation10]  ;;  %v5291_v56 = vld [vmem:[%s3240_s30 + $0x38] sm:$0xff] }
 0x30a   : >> { %s1734_s30 = smov [#allocation12] }
 0x30b   : >> { %v4925_v5 = vld [vmem:[%s6953_s15 + $0x30] sm:$0xff] }
 0x30c   : >> { %v4926_v8 = vld [vmem:[%s6955_s16 + $0x30] sm:$0xff]  ;;  %v1600_v12 = vmul.f32 %v4925_v5, %v4923_v4  ;;  %v1606_v61 = vmul.f32 %v4925_v5, %v4924_v2 }
 0x30d   : >> { %v4927_v11 = vld [vmem:[%s6958_s2 + $0x30] sm:$0xff]  ;;  %v1603_v13 = vmul.f32 %v4926_v8, %v4923_v4  ;;  %v1609_v18 = vmul.f32 %v4926_v8, %v4924_v2 }
 0x30e   : >> { %v4928_v1 = vld [vmem:[%s6960_s18 + $0x30] sm:$0xff]  ;;  %v1601_v10 = vmul.f32 %v4927_v11, %v4924_v2  ;;  %v1607_v14 = vmul.f32 %v4927_v11, %v4923_v4 }
 0x30f   : >> { %v1604_v17 = vmul.f32 %v4928_v1, %v4924_v2  ;;  %v1610_v19 = vmul.f32 %v4928_v1, %v4923_v4  ;;  %v5283_v24 = vld [vmem:[%s6966_s21 + $0x30] sm:$0xff] }
 0x310   : >> { %v1602_v3 = vsub.f32 %v1600_v12, %v1601_v10  ;;  %v1608_v22 = vadd.f32 %v1607_v14, %v1606_v61  ;;  %v5284_v25 = vld [vmem:[%s6968_s3 + $0x30] sm:$0xff]  ;;  %v3224_v28 = vmul.f32 %v5283_v24, %v5281_v23  ;;  %v3230_v7 = vmul.f32 %v5283_v24, %v5282_v20 }
 0x311   : >> { %v1605_v21 = vsub.f32 %v1603_v13, %v1604_v17  ;;  %v1611_v6 = vadd.f32 %v1610_v19, %v1609_v18  ;;  %v5285_v26 = vld [vmem:[%s6973_s22 + $0x30] sm:$0xff]  ;;  %v3227_v31 = vmul.f32 %v5284_v25, %v5281_v23  ;;  %v3233_v34 = vmul.f32 %v5284_v25, %v5282_v20 }
 0x312   : >> { %v5286_v27 = vld [vmem:[%s6975_s0 + $0x30] sm:$0xff]  ;;  %4929 = vst [vmem:[%s6953_s15 + $0x30] sm:$0xff] %v1602_v3  ;;  %4931 = vst [vmem:[%s6958_s2 + $0x30] sm:$0xff] %v1608_v22  ;;  %v3225_v30 = vmul.f32 %v5285_v26, %v5282_v20  ;;  %v3231_v33 = vmul.f32 %v5285_v26, %v5281_v23  ;;  %s1650_s15 = smov [#allocation21]  ;;  %s7020_s2 = smov [#allocation13] }
 0x313   : >> { %4930 = vst [vmem:[%s6955_s16 + $0x30] sm:$0xff] %v1605_v21  ;;  %v3228_v32 = vmul.f32 %v5286_v27, %v5282_v20  ;;  %4932 = vst [vmem:[%s6960_s18 + $0x30] sm:$0xff] %v1611_v6  ;;  %v3234_v9 = vmul.f32 %v5286_v27, %v5281_v23  ;;  %s1652_s16 = smov [#allocation22]  ;;  %v7022_v17 = vld [vmem:[%s1650_s15] ss:$0 sm:$0xff]  ;;  %s7029_s18 = smov [#allocation14] }
 0x314   : >> { %v3226_v35 = vsub.f32 %v3224_v28, %v3225_v30  ;;  %v3232_v38 = vadd.f32 %v3231_v33, %v3230_v7  ;;  %v7024_v14 = vld [vmem:[%s1652_s16] ss:$0 sm:$0xff]  ;;  %s1764_s15 = smov [#allocation13]  ;;  %s1766_s16 = smov [#allocation14] }
 0x315   : >> { %v3229_v37 = vsub.f32 %v3227_v31, %v3228_v32  ;;  %v3235_v39 = vadd.f32 %v3234_v9, %v3233_v34 }
 0x316   : >> { %5287 = vst [vmem:[%s6966_s21 + $0x30] sm:$0xff] %v3226_v35  ;;  %5289 = vst [vmem:[%s6973_s22 + $0x30] sm:$0xff] %v3232_v38  ;;  %s7035_s21 = smov [#allocation10]  ;;  %s7041_s22 = smov [#allocation11] }
 0x317   : >> { %5288 = vst [vmem:[%s6968_s3 + $0x30] sm:$0xff] %v3229_v37  ;;  %5290 = vst [vmem:[%s6975_s0 + $0x30] sm:$0xff] %v3235_v39  ;;  %s7039_s3 = smov [#allocation9]  ;;  %s7050_s0 = smov [#allocation12] }
 0x319   : >> { %v4935_v41 = vld [vmem:[%s6985_s24 + $0x38] sm:$0xff] }
 0x31a   : >> { %v4936_v43 = vld [vmem:[%s6987_s26 + $0x38] sm:$0xff]  ;;  %v1634_v36 = vmul.f32 %v4935_v41, %v4933_v29  ;;  %v1640_v49 = vmul.f32 %v4935_v41, %v4934_v40 }
 0x31b   : >> { %v4937_v44 = vld [vmem:[%s6989_s27 + $0x38] sm:$0xff]  ;;  %v1637_v48 = vmul.f32 %v4936_v43, %v4933_v29  ;;  %v1643_v52 = vmul.f32 %v4936_v43, %v4934_v40 }
 0x31c   : >> { %v4938_v45 = vld [vmem:[%s6994_s28 + $0x38] sm:$0xff]  ;;  %v1635_v46 = vmul.f32 %v4937_v44, %v4934_v40  ;;  %v1641_v42 = vmul.f32 %v4937_v44, %v4933_v29 }
 0x31d   : >> { %v1638_v50 = vmul.f32 %v4938_v45, %v4934_v40  ;;  %v1644_v53 = vmul.f32 %v4938_v45, %v4933_v29  ;;  %v5293_v55 = vld [vmem:[%s6997_s1 + $0x38] sm:$0xff] }
 0x31e   : >> { %v1636_v47 = vsub.f32 %v1634_v36, %v1635_v46  ;;  %v1642_v58 = vadd.f32 %v1641_v42, %v1640_v49  ;;  %v5294_v60 = vld [vmem:[%s7002_s12 + $0x38] sm:$0xff]  ;;  %v3258_v0 = vmul.f32 %v5293_v55, %v5291_v56  ;;  %v3264_v4 = vmul.f32 %v5293_v55, %v5292_v51 }
 0x31f   : >> { %v1639_v57 = vsub.f32 %v1637_v48, %v1638_v50  ;;  %v1645_v54 = vadd.f32 %v1644_v53, %v1643_v52  ;;  %v5295_v62 = vld [vmem:[%s7004_s13 + $0x38] sm:$0xff]  ;;  %v3261_v2 = vmul.f32 %v5294_v60, %v5291_v56  ;;  %v3267_v11 = vmul.f32 %v5294_v60, %v5292_v51 }
 0x320   : >> { %v5296_v63 = vld [vmem:[%s7007_s14 + $0x38] sm:$0xff]  ;;  %v3259_v59 = vmul.f32 %v5295_v62, %v5292_v51  ;;  %4939 = vst [vmem:[%s6985_s24 + $0x38] sm:$0xff] %v1636_v47  ;;  %v3265_v8 = vmul.f32 %v5295_v62, %v5291_v56  ;;  %4941 = vst [vmem:[%s6989_s27 + $0x38] sm:$0xff] %v1642_v58  ;;  %s7059_s24 = smov [#allocation14]  ;;  %s1708_s27 = smov [#allocation13] }
 0x321   : >> { %v3262_v5 = vmul.f32 %v5296_v63, %v5292_v51  ;;  %v3268_v1 = vmul.f32 %v5296_v63, %v5291_v56  ;;  %4940 = vst [vmem:[%s6987_s26 + $0x38] sm:$0xff] %v1639_v57  ;;  %4942 = vst [vmem:[%s6994_s28 + $0x38] sm:$0xff] %v1645_v54  ;;  %s1706_s26 = smov [#allocation12]  ;;  %s1710_s28 = smov [#allocation14] }
 0x322   : >> { %v3260_v12 = vsub.f32 %v3258_v0, %v3259_v59  ;;  %v3266_v10 = vadd.f32 %v3265_v8, %v3264_v4 }
 0x323   : >> { %v3263_v61 = vsub.f32 %v3261_v2, %v3262_v5  ;;  %v3269_v13 = vadd.f32 %v3268_v1, %v3267_v11 }
 0x324   : >> { %5297 = vst [vmem:[%s6997_s1 + $0x38] sm:$0xff] %v3260_v12  ;;  %5299 = vst [vmem:[%s7004_s13 + $0x38] sm:$0xff] %v3266_v10  ;;  %s1736_s1 = smov [#allocation13]  ;;  %s1740_s13 = smov [#allocation15] }
 0x325   : >> { %5298 = vst [vmem:[%s7002_s12 + $0x38] sm:$0xff] %v3263_v61  ;;  %5300 = vst [vmem:[%s7007_s14 + $0x38] sm:$0xff] %v3269_v13  ;;  %s1738_s12 = smov [#allocation14]  ;;  %s1762_s14 = smov [#allocation12] }
 0x327   : >> { %v1658_v18 = vld [vmem:[%s7018_s17] sm:$0xff] }
 0x328   : >> { %v1659_v19 = vld [vmem:[%s7020_s2] sm:$0xff]  ;;  %v1662_v20 = vmul.f32 %v1658_v18, %v7022_v17  ;;  %v1665_v3 = vmul.f32 %v1658_v18, %v7024_v14 }
 0x329   : >> { %v1660_v21 = vld [vmem:[%s7029_s18] sm:$0xff]  ;;  %v1663_v23 = vmul.f32 %v1659_v19, %v7024_v14  ;;  %v1666_v24 = vmul.f32 %v1659_v19, %v7022_v17 }
 0x32a   : >> { %v1661_v22 = vld [vmem:[%s7031_s19] sm:$0xff]  ;;  %v1668_v6 = vmul.f32 %v1660_v21, %v7022_v17  ;;  %v1671_v26 = vmul.f32 %v1660_v21, %v7024_v14 }
 0x32b   : >> { %v1669_v25 = vmul.f32 %v1661_v22, %v7024_v14  ;;  %v1672_v27 = vmul.f32 %v1661_v22, %v7022_v17  ;;  %v3276_v28 = vld [vmem:[%s7033_s20] ss:$0 sm:$0xff]  ;;  %v5302_v30 = vld [vmem:[%s7033_s20 + $0x7] ss:$0 sm:$0xff]  ;;  %v1664_v31 = vsub.f32 %v1662_v20, %v1663_v23  ;;  %v1667_v32 = vadd.f32 %v1666_v24, %v1665_v3  ;;  %v5303_v9 = vld [vmem:[%s7033_s20 + $0x7] sm:$0xfe] }
 0x32c   : >> { %v5301_v7 = vld [vmem:[%s7033_s20 - $0x1] sm:$0xfe]  ;;  %v5304_v35 = vld [vmem:[%s7033_s20 + $0xf] ss:$0 sm:$0xff]  ;;  %v5306_v37 = vld [vmem:[%s7033_s20 + $0xf] sm:$0xfe]  ;;  %v3294_v39 = vsel %vm8432_vm1, %v5302_v30, %v5303_v9 }
 0x32d   : >> { %v1670_v33 = vsub.f32 %v1668_v6, %v1669_v25  ;;  %v3283_v34 = vsel %vm8432_vm1, %v3276_v28, %v5301_v7  ;;  %v1673_v38 = vadd.f32 %v1672_v27, %v1671_v26  ;;  %v3305_v40 = vsel %vm8432_vm1, %v5304_v35, %v5306_v37  ;;  %v5307_v29 = vld [vmem:[%s7033_s20 + $0x17] ss:$0 sm:$0xff]  ;;  %v5309_v41 = vld [vmem:[%s7033_s20 + $0x17] sm:$0xfe]  ;;  %v5310_v43 = vld [vmem:[%s7033_s20 + $0x1f] ss:$0 sm:$0xff]  ;;  %1674 = vst [vmem:[%s7018_s17] sm:$0xff] %v1664_v31 }
 0x32e   : >> { %3286 = vst [vmem:[%s7033_s20] sm:$0xff] %v3283_v34  ;;  %1675 = vst [vmem:[%s7020_s2] sm:$0xff] %v1667_v32  ;;  %v3316_v44 = vsel %vm8432_vm1, %v5307_v29, %v5309_v41  ;;  %v5312_v45 = vld [vmem:[%s7033_s20 + $0x1f] sm:$0xfe]  ;;  %v5313_v36 = vld [vmem:[%s7033_s20 + $0x27] ss:$0 sm:$0xff]  ;;  %s1768_s17 = smov [#allocation15]  ;;  %s1790_s2 = smov [#allocation12] }
 0x32f   : >> { %1676 = vst [vmem:[%s7029_s18] sm:$0xff] %v1670_v33  ;;  %5305 = vst [vmem:[%s7033_s20 + $0x8] sm:$0xff] %v3294_v39  ;;  %v5315_v46 = vld [vmem:[%s7033_s20 + $0x27] sm:$0xfe]  ;;  %v3327_v48 = vsel %vm8432_vm1, %v5310_v43, %v5312_v45  ;;  %v5316_v50 = vld [vmem:[%s7033_s20 + $0x2f] ss:$0 sm:$0xff]  ;;  %s1792_s18 = smov [#allocation13] }
 0x330   : >> { %5308 = vst [vmem:[%s7033_s20 + $0x10] sm:$0xff] %v3305_v40  ;;  %1677 = vst [vmem:[%s7031_s19] sm:$0xff] %v1673_v38  ;;  %v3338_v49 = vsel %vm8432_vm1, %v5313_v36, %v5315_v46  ;;  %v5318_v42 = vld [vmem:[%s7033_s20 + $0x2f] sm:$0xfe]  ;;  %v5319_v52 = vld [vmem:[%s7033_s20 + $0x37] ss:$0 sm:$0xff]  ;;  %s1794_s19 = smov [#allocation14] }
 0x331   : >> { %5311 = vst [vmem:[%s7033_s20 + $0x18] sm:$0xff] %v3316_v44  ;;  %5314 = vst [vmem:[%s7033_s20 + $0x20] sm:$0xff] %v3327_v48  ;;  %v3349_v53 = vsel %vm8432_vm1, %v5316_v50, %v5318_v42  ;;  %v5321_v51 = vld [vmem:[%s7033_s20 + $0x37] sm:$0xfe]  ;;  %v5322_v47 = vld [vmem:[%s7033_s20 + $0x3f] ss:$0 sm:$0xff] }
 0x332   : >> { %5317 = vst [vmem:[%s7033_s20 + $0x28] sm:$0xff] %v3338_v49  ;;  %v3364_v56 = vld [vmem:[%s7035_s21] ss:$0 sm:$0xff]  ;;  %5320 = vst [vmem:[%s7033_s20 + $0x30] sm:$0xff] %v3349_v53  ;;  %v3360_v57 = vsel %vm8432_vm1, %v5319_v52, %v5321_v51  ;;  %v5325_v58 = vld [vmem:[%s7035_s21 + $0x39] sm:$0x7f] }
 0x333   : >> { %5324 = vst [vmem:[%s7033_s20 + $0x1] sm:$0x1] %v3364_v56  ;;  %v5326_v54 = vld [vmem:[%s7035_s21 + $0x38] ss:$0 sm:$0xff]  ;;  %v5328_v55 = vld [vmem:[%s7035_s21 + $0x31] sm:$0x7f]  ;;  %v3373_v60 = vsel %vm8431_vm2, %v5322_v47, %v5325_v58 }
 0x334   : >> { %5323 = vst [vmem:[%s7033_s20 + $0x38] sm:$0xff] %v3360_v57  ;;  %v3382_v62 = vsel %vm8431_vm2, %v5326_v54, %v5328_v55  ;;  %v5329_v63 = vld [vmem:[%s7035_s21 + $0x30] ss:$0 sm:$0xff]  ;;  %v5331_v0 = vld [vmem:[%s7035_s21 + $0x29] sm:$0x7f]  ;;  %5327 = vst [vmem:[%s7035_s21 + $0x38] sm:$0xff] %v3373_v60 }
 0x335   : >> { %v5332_v59 = vld [vmem:[%s7035_s21 + $0x28] ss:$0 sm:$0xff]  ;;  %5330 = vst [vmem:[%s7035_s21 + $0x30] sm:$0xff] %v3382_v62  ;;  %v3391_v2 = vsel %vm8431_vm2, %v5329_v63, %v5331_v0  ;;  %v5334_v4 = vld [vmem:[%s7035_s21 + $0x21] sm:$0x7f]  ;;  %s1796_s20 = smov [#allocation15] }
 0x336   : >> { %v5335_v5 = vld [vmem:[%s7035_s21 + $0x20] ss:$0 sm:$0xff]  ;;  %v5337_v8 = vld [vmem:[%s7035_s21 + $0x19] sm:$0x7f]  ;;  %5333 = vst [vmem:[%s7035_s21 + $0x28] sm:$0xff] %v3391_v2  ;;  %v3400_v11 = vsel %vm8431_vm2, %v5332_v59, %v5334_v4 }
 0x337   : >> { %v3409_v1 = vsel %vm8431_vm2, %v5335_v5, %v5337_v8  ;;  %v5338_v12 = vld [vmem:[%s7035_s21 + $0x18] ss:$0 sm:$0xff]  ;;  %v5340_v61 = vld [vmem:[%s7035_s21 + $0x11] sm:$0x7f]  ;;  %v5341_v10 = vld [vmem:[%s7035_s21 + $0x10] ss:$0 sm:$0xff] }
 0x338   : >> { %5336 = vst [vmem:[%s7035_s21 + $0x20] sm:$0xff] %v3400_v11  ;;  %5339 = vst [vmem:[%s7035_s21 + $0x18] sm:$0xff] %v3409_v1  ;;  %v3418_v13 = vsel %vm8431_vm2, %v5338_v12, %v5340_v61  ;;  %v5343_v18 = vld [vmem:[%s7035_s21 + $0x9] sm:$0x7f]  ;;  %v5344_v19 = vld [vmem:[%s7035_s21 + $0x8] ss:$0 sm:$0xff] }
 0x339   : >> { %v5346_v20 = vld [vmem:[%s7035_s21 + $0x1] sm:$0x7f]  ;;  %5342 = vst [vmem:[%s7035_s21 + $0x10] sm:$0xff] %v3418_v13  ;;  %v3427_v3 = vsel %vm8431_vm2, %v5341_v10, %v5343_v18  ;;  %v3440_v22 = vld [vmem:[%s7039_s3] ss:$0 sm:$0xff]  ;;  %v4943_v11 = vld [vmem:[%s7050_s0 + $0x8] sm:$0xff] }
 0x33a   : >> { %v3435_v21 = vsel %vm8431_vm2, %v5344_v19, %v5346_v20  ;;  %v5347_v23 = vld [vmem:[%s7039_s3 - $0x1] sm:$0xfe]  ;;  %v5348_v24 = vld [vmem:[%s7039_s3 + $0x7] ss:$0 sm:$0xff]  ;;  %5345 = vst [vmem:[%s7035_s21 + $0x8] sm:$0xff] %v3427_v3  ;;  %v4944_v1 = vld [vmem:[%s7052_s23 + $0x8] sm:$0xff]  ;;  %v1690_v61 = vmul.f32 %v4943_v11, %v7022_v17  ;;  %v1693_v13 = vmul.f32 %v4943_v11, %v7024_v14 }
 0x33b   : >> { %3437 = vst [vmem:[%s7035_s21] sm:$0xff] %v3435_v21  ;;  %v3447_v6 = vsel %vm8432_vm1, %v3440_v22, %v5347_v23  ;;  %v5349_v25 = vld [vmem:[%s7039_s3 + $0x7] sm:$0xfe]  ;;  %v5350_v26 = vld [vmem:[%s7039_s3 + $0xf] ss:$0 sm:$0xff]  ;;  %v5352_v27 = vld [vmem:[%s7039_s3 + $0xf] sm:$0xfe]  ;;  %v1691_v10 = vmul.f32 %v4944_v1, %v7024_v14  ;;  %v1694_v18 = vmul.f32 %v4944_v1, %v7022_v17 }
 0x33c   : >> { %3450 = vst [vmem:[%s7039_s3] sm:$0xff] %v3447_v6  ;;  %v3458_v28 = vsel %vm8432_vm1, %v5348_v24, %v5349_v25  ;;  %v3469_v7 = vsel %vm8432_vm1, %v5350_v26, %v5352_v27  ;;  %v5353_v30 = vld [vmem:[%s7039_s3 + $0x17] ss:$0 sm:$0xff]  ;;  %v5355_v31 = vld [vmem:[%s7039_s3 + $0x17] sm:$0xfe]  ;;  %v5356_v32 = vld [vmem:[%s7039_s3 + $0x1f] ss:$0 sm:$0xff] }
 0x33d   : >> { %5351 = vst [vmem:[%s7039_s3 + $0x8] sm:$0xff] %v3458_v28  ;;  %5354 = vst [vmem:[%s7039_s3 + $0x10] sm:$0xff] %v3469_v7  ;;  %v3480_v33 = vsel %vm8432_vm1, %v5353_v30, %v5355_v31  ;;  %v5358_v34 = vld [vmem:[%s7039_s3 + $0x1f] sm:$0xfe]  ;;  %v5359_v9 = vld [vmem:[%s7039_s3 + $0x27] ss:$0 sm:$0xff]  ;;  %v1692_v23 = vsub.f32 %v1690_v61, %v1691_v10  ;;  %v1695_v24 = vadd.f32 %v1694_v18, %v1693_v13 }
 0x33e   : >> { %v5361_v35 = vld [vmem:[%s7039_s3 + $0x27] sm:$0xfe]  ;;  %5357 = vst [vmem:[%s7039_s3 + $0x18] sm:$0xff] %v3480_v33  ;;  %v3491_v37 = vsel %vm8432_vm1, %v5356_v32, %v5358_v34  ;;  %v5362_v39 = vld [vmem:[%s7039_s3 + $0x2f] ss:$0 sm:$0xff]  ;;  %s1818_s21 = smov [#allocation12] }
 0x33f   : >> { %v3502_v38 = vsel %vm8432_vm1, %v5359_v9, %v5361_v35  ;;  %v5364_v40 = vld [vmem:[%s7039_s3 + $0x2f] sm:$0xfe]  ;;  %v5365_v29 = vld [vmem:[%s7039_s3 + $0x37] ss:$0 sm:$0xff]  ;;  %5360 = vst [vmem:[%s7039_s3 + $0x20] sm:$0xff] %v3491_v37  ;;  %v4945_v12 = vld [vmem:[%s7059_s24 + $0x8] sm:$0xff] }
 0x340   : >> { %5363 = vst [vmem:[%s7039_s3 + $0x28] sm:$0xff] %v3502_v38  ;;  %v3513_v41 = vsel %vm8432_vm1, %v5362_v39, %v5364_v40  ;;  %v5367_v43 = vld [vmem:[%s7039_s3 + $0x37] sm:$0xfe]  ;;  %v5368_v44 = vld [vmem:[%s7039_s3 + $0x3f] ss:$0 sm:$0xff]  ;;  %v4946_v19 = vld [vmem:[%s7061_s25 + $0x8] sm:$0xff]  ;;  %v1696_v20 = vmul.f32 %v4945_v12, %v7022_v17  ;;  %v1699_v21 = vmul.f32 %v4945_v12, %v7024_v14 }
 0x341   : >> { %v3528_v45 = vld [vmem:[%s7041_s22] ss:$0 sm:$0xff]  ;;  %5366 = vst [vmem:[%s7039_s3 + $0x30] sm:$0xff] %v3513_v41  ;;  %v3524_v36 = vsel %vm8432_vm1, %v5365_v29, %v5367_v43  ;;  %v5371_v46 = vld [vmem:[%s7041_s22 + $0x39] sm:$0x7f]  ;;  %v1697_v3 = vmul.f32 %v4946_v19, %v7024_v14  ;;  %v1700_v22 = vmul.f32 %v4946_v19, %v7022_v17  ;;  %4947 = vst [vmem:[%s7050_s0 + $0x8] sm:$0xff] %v1692_v23 }
 0x342   : >> { %5370 = vst [vmem:[%s7039_s3 + $0x1] sm:$0x1] %v3528_v45  ;;  %v5372_v48 = vld [vmem:[%s7041_s22 + $0x38] ss:$0 sm:$0xff]  ;;  %v5374_v49 = vld [vmem:[%s7041_s22 + $0x31] sm:$0x7f]  ;;  %v3537_v50 = vsel %vm8431_vm2, %v5368_v44, %v5371_v46 }
 0x343   : >> { %5369 = vst [vmem:[%s7039_s3 + $0x38] sm:$0xff] %v3524_v36  ;;  %v3546_v42 = vsel %vm8431_vm2, %v5372_v48, %v5374_v49  ;;  %v5375_v52 = vld [vmem:[%s7041_s22 + $0x30] ss:$0 sm:$0xff]  ;;  %v5377_v53 = vld [vmem:[%s7041_s22 + $0x29] sm:$0x7f]  ;;  %5373 = vst [vmem:[%s7041_s22 + $0x38] sm:$0xff] %v3537_v50  ;;  %v1698_v6 = vsub.f32 %v1696_v20, %v1697_v3  ;;  %v1701_v25 = vadd.f32 %v1700_v22, %v1699_v21 }
 0x344   : >> { %v5378_v51 = vld [vmem:[%s7041_s22 + $0x28] ss:$0 sm:$0xff]  ;;  %5376 = vst [vmem:[%s7041_s22 + $0x30] sm:$0xff] %v3546_v42  ;;  %v3555_v47 = vsel %vm8431_vm2, %v5375_v52, %v5377_v53  ;;  %v5380_v56 = vld [vmem:[%s7041_s22 + $0x21] sm:$0x7f]  ;;  %4948 = vst [vmem:[%s7052_s23 + $0x8] sm:$0xff] %v1695_v24 }
 0x345   : >> { %v5381_v57 = vld [vmem:[%s7041_s22 + $0x20] ss:$0 sm:$0xff]  ;;  %v5383_v58 = vld [vmem:[%s7041_s22 + $0x19] sm:$0x7f]  ;;  %5379 = vst [vmem:[%s7041_s22 + $0x28] sm:$0xff] %v3555_v47  ;;  %v3564_v54 = vsel %vm8431_vm2, %v5378_v51, %v5380_v56  ;;  %4949 = vst [vmem:[%s7059_s24 + $0x8] sm:$0xff] %v1698_v6 }
 0x346   : >> { %v3573_v55 = vsel %vm8431_vm2, %v5381_v57, %v5383_v58  ;;  %v5384_v60 = vld [vmem:[%s7041_s22 + $0x18] ss:$0 sm:$0xff]  ;;  %v5386_v62 = vld [vmem:[%s7041_s22 + $0x11] sm:$0x7f]  ;;  %v5387_v63 = vld [vmem:[%s7041_s22 + $0x10] ss:$0 sm:$0xff] }
 0x347   : >> { %5382 = vst [vmem:[%s7041_s22 + $0x20] sm:$0xff] %v3564_v54  ;;  %5385 = vst [vmem:[%s7041_s22 + $0x18] sm:$0xff] %v3573_v55  ;;  %v3582_v0 = vsel %vm8431_vm2, %v5384_v60, %v5386_v62  ;;  %v5389_v59 = vld [vmem:[%s7041_s22 + $0x9] sm:$0x7f]  ;;  %v5390_v2 = vld [vmem:[%s7041_s22 + $0x8] ss:$0 sm:$0xff] }
 0x348   : >> { %v5392_v4 = vld [vmem:[%s7041_s22 + $0x1] sm:$0x7f]  ;;  %5388 = vst [vmem:[%s7041_s22 + $0x10] sm:$0xff] %v3582_v0  ;;  %v3591_v5 = vsel %vm8431_vm2, %v5387_v63, %v5389_v59  ;;  %4950 = vst [vmem:[%s7061_s25 + $0x8] sm:$0xff] %v1701_v25  ;;  %v4951_v26 = vld [vmem:[%s1706_s26 + $0x10] sm:$0xff]  ;;  %s1820_s3 = smov [#allocation13] }
 0x349   : >> { %v3599_v8 = vsel %vm8431_vm2, %v5390_v2, %v5392_v4  ;;  %5391 = vst [vmem:[%s7041_s22 + $0x8] sm:$0xff] %v3591_v5  ;;  %v1718_v28 = vmul.f32 %v4951_v26, %v7022_v17  ;;  %v1721_v30 = vmul.f32 %v4951_v26, %v7024_v14  ;;  %s1824_s0 = smov [#allocation15]  ;;  %s7290_s23 = smov [#allocation12] }
 0x34a   : >> { %3601 = vst [vmem:[%s7041_s22] sm:$0xff] %v3599_v8  ;;  %s1822_s22 = smov [#allocation14]  ;;  %s7292_s24 = smov [#allocation13] }
 0x34b   : >> { %v4952_v27 = vld [vmem:[%s1708_s27 + $0x10] sm:$0xff]  ;;  %s7300_s25 = smov [#allocation14] }
 0x34c   : >> { %v1719_v7 = vmul.f32 %v4952_v27, %v7024_v14  ;;  %v1722_v31 = vmul.f32 %v4952_v27, %v7022_v17  ;;  %v4953_v32 = vld [vmem:[%s1710_s28 + $0x10] sm:$0xff] }
 0x34d   : >> { %v1724_v34 = vmul.f32 %v4953_v32, %v7022_v17  ;;  %v1727_v35 = vmul.f32 %v4953_v32, %v7024_v14 }
 0x34e   : >> { %v1720_v38 = vsub.f32 %v1718_v28, %v1719_v7  ;;  %v1723_v39 = vadd.f32 %v1722_v31, %v1721_v30 }
 0x34f   : >> { %v4954_v33 = vld [vmem:[%s1712_s29 + $0x10] sm:$0xff] }
 0x350   : >> { %v1725_v9 = vmul.f32 %v4954_v33, %v7024_v14  ;;  %v1728_v37 = vmul.f32 %v4954_v33, %v7022_v17  ;;  %4955 = vst [vmem:[%s1706_s26 + $0x10] sm:$0xff] %v1720_v38  ;;  %4956 = vst [vmem:[%s1708_s27 + $0x10] sm:$0xff] %v1723_v39  ;;  %s7302_s26 = smov [#allocation15]  ;;  %s1875_s27 = smov [#allocation19] }
 0x352   : >> { %v1726_v40 = vsub.f32 %v1724_v34, %v1725_v9  ;;  %v1729_v29 = vadd.f32 %v1728_v37, %v1727_v35 }
 0x354   : >> { %4957 = vst [vmem:[%s1710_s28 + $0x10] sm:$0xff] %v1726_v40  ;;  %4958 = vst [vmem:[%s1712_s29 + $0x10] sm:$0xff] %v1729_v29  ;;  %s7406_s28 = smov [#allocation13]  ;;  %s7427_s29 = smov [#allocation12] }
 0x357   : >> { %v4959_v41 = vld [vmem:[%s1734_s30 + $0x18] sm:$0xff] }
 0x358   : >> { %v4960_v43 = vld [vmem:[%s1736_s1 + $0x18] sm:$0xff]  ;;  %v1746_v44 = vmul.f32 %v4959_v41, %v7022_v17  ;;  %v1749_v36 = vmul.f32 %v4959_v41, %v7024_v14 }
 0x359   : >> { %v1747_v45 = vmul.f32 %v4960_v43, %v7024_v14  ;;  %v1750_v46 = vmul.f32 %v4960_v43, %v7022_v17 }
 0x35b   : >> { %v4961_v48 = vld [vmem:[%s1738_s12 + $0x18] sm:$0xff]  ;;  %v1748_v51 = vsub.f32 %v1746_v44, %v1747_v45  ;;  %v1751_v47 = vadd.f32 %v1750_v46, %v1749_v36  ;;  %v7305_v36 = vadd.s32 8, %v7288_v16  ;;  %v7308_v46 = vadd.s32 16, %v7288_v16 }
 0x35c   : >> { %v4962_v49 = vld [vmem:[%s1740_s13 + $0x18] sm:$0xff]  ;;  %v1752_v50 = vmul.f32 %v4961_v48, %v7022_v17  ;;  %v1755_v52 = vmul.f32 %v4961_v48, %v7024_v14  ;;  %v7311_v48 = vadd.s32 24, %v7288_v16 }
 0x35d   : >> { %v1753_v42 = vmul.f32 %v4962_v49, %v7024_v14  ;;  %v1756_v53 = vmul.f32 %v4962_v49, %v7022_v17  ;;  %4963 = vst [vmem:[%s1734_s30 + $0x18] sm:$0xff] %v1748_v51  ;;  %4964 = vst [vmem:[%s1736_s1 + $0x18] sm:$0xff] %v1751_v47  ;;  %v7314_v49 = vadd.s32 32, %v7288_v16  ;;  %vm1894_vm4 = vcmp.eq.s32.totalorder %v7305_v36, %v7295_v15  ;;  %s7431_s30 = smov [#allocation20]  ;;  %s7447_s1 = smov [#allocation14] }
 0x35e   : >> { %vm1902_vm5 = vcmp.eq.s32.totalorder %v7308_v46, %v7295_v15  ;;  %vm1910_vm6 = vcmp.eq.s32.totalorder %v7311_v48, %v7295_v15 }
 0x35f   : >> { %v1754_v56 = vsub.f32 %v1752_v50, %v1753_v42  ;;  %v1757_v57 = vadd.f32 %v1756_v53, %v1755_v52  ;;  %v7317_v50 = vadd.s32 40, %v7288_v16  ;;  %v7320_v42 = vadd.s32 48, %v7288_v16 }
 0x360   : >> { %v7323_v16 = vmov %v6349_v16  ;;  %vm1918_vm7 = vcmp.eq.s32.totalorder %v7314_v49, %v7295_v15  ;;  %v7377_v15 = vmov %v6347_v15 }
 0x361   : >> { %4965 = vst [vmem:[%s1738_s12 + $0x18] sm:$0xff] %v1754_v56  ;;  %4966 = vst [vmem:[%s1740_s13 + $0x18] sm:$0xff] %v1757_v57  ;;  %v7328_v16 = vmov %v6349_v16  ;;  %v7398_v15 = vmov %v6347_v15  ;;  %s7524_s12 = smov [#allocation15]  ;;  %s7548_s13 = smov [#allocation13] }
 0x362   : >> { %vm1955_vm11 = vcmp.eq.s32.totalorder %v7328_v16, %v7377_v15 }
 0x364   : >> { %v4967_v58 = vld [vmem:[%s1762_s14 + $0x20] sm:$0xff] }
 0x365   : >> { %v4968_v54 = vld [vmem:[%s1764_s15 + $0x20] sm:$0xff]  ;;  %v1774_v55 = vmul.f32 %v4967_v58, %v7022_v17  ;;  %v1777_v62 = vmul.f32 %v4967_v58, %v7024_v14 }
 0x366   : >> { %v1775_v60 = vmul.f32 %v4968_v54, %v7024_v14  ;;  %v1778_v63 = vmul.f32 %v4968_v54, %v7022_v17 }
 0x368   : >> { %v4969_v0 = vld [vmem:[%s1766_s16 + $0x20] sm:$0xff]  ;;  %v1776_v11 = vsub.f32 %v1774_v55, %v1775_v60  ;;  %v1779_v1 = vadd.f32 %v1778_v63, %v1777_v62 }
 0x369   : >> { %v4970_v59 = vld [vmem:[%s1768_s17 + $0x20] sm:$0xff]  ;;  %v1780_v2 = vmul.f32 %v4969_v0, %v7022_v17  ;;  %v1783_v5 = vmul.f32 %v4969_v0, %v7024_v14  ;;  %v7341_v0 = vadd.s32 56, %v7288_v16 }
 0x36a   : >> { %v1781_v4 = vmul.f32 %v4970_v59, %v7024_v14  ;;  %v1784_v8 = vmul.f32 %v4970_v59, %v7022_v17  ;;  %4971 = vst [vmem:[%s1762_s14 + $0x20] sm:$0xff] %v1776_v11  ;;  %4972 = vst [vmem:[%s1764_s15 + $0x20] sm:$0xff] %v1779_v1  ;;  %v7344_v59 = vadd.s32 8, %v7323_v16  ;;  %v7361_v11 = vadd.s32 32, %v7323_v16  ;;  %s7636_s14 = smov [#allocation12]  ;;  %s6249_s15 = smov 1  }
 0x36b   : >> { %v1961_v1 = vadd.s32 8, %v7328_v16 }
 0x36c   : >> { %v1782_v12 = vsub.f32 %v1780_v2, %v1781_v4  ;;  %v1785_v61 = vadd.f32 %v1784_v8, %v1783_v5  ;;  %v7349_v5 = vadd.s32 16, %v7323_v16  ;;  %v7352_v8 = vadd.s32 24, %v7323_v16 }
 0x36d   : >> { %vm1962_vm12 = vcmp.eq.s32.totalorder %v1961_v1, %v7377_v15 }
 0x36e   : >> { %4973 = vst [vmem:[%s1766_s16 + $0x20] sm:$0xff] %v1782_v12  ;;  %4974 = vst [vmem:[%s1768_s17 + $0x20] sm:$0xff] %v1785_v61  ;;  %v1968_v12 = vadd.s32 16, %v7328_v16  ;;  %v7368_v16 = vmov %v6349_v16  ;;  %v1975_v61 = vadd.s32 24, %v7328_v16  ;;  %s7650_s16 = smov [#allocation12]  ;;  %s7664_s17 = smov [#allocation13] }
 0x36f   : >> { %vm2017_vm8 = vcmp.eq.s32.totalorder %v7368_v16, %v7398_v15 }
 0x370   : >> { %vm1969_vm13 = vcmp.eq.s32.totalorder %v1968_v12, %v7377_v15  ;;  %vm1976_vm1 = vcmp.eq.s32.totalorder %v1975_v61, %v7377_v15 }
 0x371   : >> { %v4975_v10 = vld [vmem:[%s1790_s2 + $0x28] sm:$0xff] }
 0x372   : >> { %v4976_v13 = vld [vmem:[%s1792_s18 + $0x28] sm:$0xff]  ;;  %v1802_v18 = vmul.f32 %v4975_v10, %v7022_v17  ;;  %v1805_v20 = vmul.f32 %v4975_v10, %v7024_v14  ;;  %v1982_v10 = vadd.s32 32, %v7328_v16 }
 0x373   : >> { %v1803_v19 = vmul.f32 %v4976_v13, %v7024_v14  ;;  %v1806_v3 = vmul.f32 %v4976_v13, %v7022_v17  ;;  %v1989_v13 = vadd.s32 40, %v7328_v16 }
 0x374   : >> { %vm1983_vm0 = vcmp.eq.s32.totalorder %v1982_v10, %v7377_v15 }
 0x375   : >> { %v4977_v21 = vld [vmem:[%s1794_s19 + $0x28] sm:$0xff]  ;;  %v1804_v26 = vsub.f32 %v1802_v18, %v1803_v19  ;;  %v1807_v27 = vadd.f32 %v1806_v3, %v1805_v20  ;;  %v7387_v18 = vadd.s32 40, %v7323_v16  ;;  %v7390_v19 = vadd.s32 48, %v7323_v16 }
 0x376   : >> { %v4978_v22 = vld [vmem:[%s1796_s20 + $0x28] sm:$0xff]  ;;  %v1808_v23 = vmul.f32 %v4977_v21, %v7022_v17  ;;  %v1811_v6 = vmul.f32 %v4977_v21, %v7024_v14  ;;  %v1996_v20 = vadd.s32 48, %v7328_v16  ;;  %v2003_v3 = vadd.s32 56, %v7328_v16 }
 0x377   : >> { %v1809_v24 = vmul.f32 %v4978_v22, %v7024_v14  ;;  %v1812_v25 = vmul.f32 %v4978_v22, %v7022_v17  ;;  %4979 = vst [vmem:[%s1790_s2 + $0x28] sm:$0xff] %v1804_v26  ;;  %4980 = vst [vmem:[%s1792_s18 + $0x28] sm:$0xff] %v1807_v27  ;;  %v7395_v21 = vadd.s32 56, %v7323_v16  ;;  %v7401_v22 = vadd.s32 8, %v7368_v16  ;;  %s8435_s2 = smov 127   ;;  %s7668_s18 = smov [#allocation13] }
 0x378   : >> { %vm1990_vm10 = vcmp.eq.s32.totalorder %v1989_v13, %v7377_v15  ;;  %vm1997_vm14 = vcmp.eq.s32.totalorder %v1996_v20, %v7377_v15  ;;  %vm2004_vm9 = vcmp.eq.s32.totalorder %v2003_v3, %v7377_v15  ;;  %v7442_v26 = vadd.s32 40, %v7368_v16 }
 0x379   : >> { %v1810_v28 = vsub.f32 %v1808_v23, %v1809_v24  ;;  %v1813_v7 = vadd.f32 %v1812_v25, %v1811_v6  ;;  %v7404_v23 = vadd.s32 16, %v7368_v16  ;;  %v7413_v24 = vadd.s32 24, %v7368_v16  ;;  %v7429_v25 = vld [vmem:[%s1875_s27] ss:$0 sm:$0xff]  ;;  %s7733_s27 = smov [#allocation13] }
 0x37a   : >> { %v7425_v6 = vadd.s32 32, %v7368_v16  ;;  %vm2024_vm2 = vcmp.eq.s32.totalorder %v7401_v22, %v7398_v15 }
 0x37b   : >> { %4981 = vst [vmem:[%s1794_s19 + $0x28] sm:$0xff] %v1810_v28  ;;  %4982 = vst [vmem:[%s1796_s20 + $0x28] sm:$0xff] %v1813_v7  ;;  %vm2038_vm15 = vcmp.eq.s32.totalorder %v7413_v24, %v7398_v15  ;;  %s7674_s19 = smov [#allocation14]  ;;  %s7680_s20 = smov [#allocation12] }
 0x37e   : >> { %v4983_v30 = vld [vmem:[%s1818_s21 + $0x30] sm:$0xff] }
 0x37f   : >> { %v4984_v31 = vld [vmem:[%s1820_s3 + $0x30] sm:$0xff]  ;;  %v1830_v32 = vmul.f32 %v4983_v30, %v7022_v17  ;;  %v1833_v34 = vmul.f32 %v4983_v30, %v7024_v14  ;;  %v7454_v30 = vadd.s32 48, %v7368_v16 }
 0x380   : >> { %v1831_v33 = vmul.f32 %v4984_v31, %v7024_v14  ;;  %v1834_v9 = vmul.f32 %v4984_v31, %v7022_v17  ;;  %v7457_v31 = vadd.s32 56, %v7368_v16 }
 0x382   : >> { %v4985_v35 = vld [vmem:[%s1822_s22 + $0x30] sm:$0xff]  ;;  %v1832_v41 = vsub.f32 %v1830_v32, %v1831_v33  ;;  %v1835_v43 = vadd.f32 %v1834_v9, %v1833_v34 }
 0x383   : >> { %v4986_v37 = vld [vmem:[%s1824_s0 + $0x30] sm:$0xff]  ;;  %v1836_v38 = vmul.f32 %v4985_v35, %v7022_v17  ;;  %v1839_v40 = vmul.f32 %v4985_v35, %v7024_v14 }
 0x384   : >> { %v1837_v39 = vmul.f32 %v4986_v37, %v7024_v14  ;;  %v1840_v29 = vmul.f32 %v4986_v37, %v7022_v17  ;;  %4987 = vst [vmem:[%s1818_s21 + $0x30] sm:$0xff] %v1832_v41  ;;  %4988 = vst [vmem:[%s1820_s3 + $0x30] sm:$0xff] %v1835_v43  ;;  %s7684_s21 = smov [#allocation14]  ;;  %s7694_s3 = smov [#allocation13] }
 0x386   : >> { %v1838_v44 = vsub.f32 %v1836_v38, %v1837_v39  ;;  %v1841_v45 = vadd.f32 %v1840_v29, %v1839_v40 }
 0x388   : >> { %4989 = vst [vmem:[%s1822_s22 + $0x30] sm:$0xff] %v1838_v44  ;;  %4990 = vst [vmem:[%s1824_s0 + $0x30] sm:$0xff] %v1841_v45  ;;  %s7698_s22 = smov [#allocation15]  ;;  %s7704_s0 = smov [#allocation14] }
 0x38b   : >> { %v4991_v52 = vld [vmem:[%s7290_s23 + $0x38] sm:$0xff] }
 0x38c   : >> { %v4992_v53 = vld [vmem:[%s7292_s24 + $0x38] sm:$0xff]  ;;  %v1861_v47 = vmul.f32 %v4991_v52, %v7024_v14  ;;  %v1858_v57 = vmul.f32 %v4991_v52, %v7022_v17 }
 0x38d   : >> { %v1859_v51 = vmul.f32 %v4992_v53, %v7024_v14  ;;  %v1862_v56 = vmul.f32 %v4992_v53, %v7022_v17 }
 0x38f   : >> { %v4993_v58 = vld [vmem:[%s7300_s25 + $0x38] sm:$0xff]  ;;  %v1863_v2 = vadd.f32 %v1862_v56, %v1861_v47  ;;  %v1860_v4 = vsub.f32 %v1858_v57, %v1859_v51  ;;  %v7502_v56 = vld [vmem:[%s7431_s30] ss:$0 sm:$0xff]  ;;  %s7753_s30 = smov [#allocation12] }
 0x390   : >> { %v4994_v54 = vld [vmem:[%s7302_s26 + $0x38] sm:$0xff]  ;;  %v1864_v55 = vmul.f32 %v4993_v58, %v7022_v17  ;;  %v1867_v62 = vmul.f32 %v4993_v58, %v7024_v14 }
 0x391   : >> { %v1865_v60 = vmul.f32 %v4994_v54, %v7024_v14  ;;  %v1868_v63 = vmul.f32 %v4994_v54, %v7022_v17  ;;  %4996 = vst [vmem:[%s7292_s24 + $0x38] sm:$0xff] %v1863_v2  ;;  %4995 = vst [vmem:[%s7290_s23 + $0x38] sm:$0xff] %v1860_v4  ;;  %s7710_s23 = smov [#allocation12]  ;;  %s7714_s24 = smov [#allocation15] }
 0x393   : >> { %v1866_v14 = vsub.f32 %v1864_v55, %v1865_v60  ;;  %v1869_v17 = vadd.f32 %v1868_v63, %v1867_v62 }
 0x395   : >> { %4997 = vst [vmem:[%s7300_s25 + $0x38] sm:$0xff] %v1866_v14  ;;  %4998 = vst [vmem:[%s7302_s26 + $0x38] sm:$0xff] %v1869_v17  ;;  %s7723_s25 = smov [#allocation14]  ;;  %s7729_s26 = smov [#allocation12] }
 0x398   : >> { %v1952_v27 = vld [vmem:[%s7406_s28] sm:$0xff]  ;;  %v5013_v28 = vld [vmem:[%s7406_s28 + $0x8] sm:$0xff]  ;;  %v5015_v7 = vld [vmem:[%s7406_s28 + $0x10] sm:$0xff] }
 0x399   : >> { %v1956_v32 = vsel %vm1955_vm11, 0.0, %v1952_v27  ;;  %v1963_v33 = vsel %vm1962_vm12, 0.0, %v5013_v28  ;;  %v1970_v34 = vsel %vm1969_vm13, 0.0, %v5015_v7  ;;  %v5017_v9 = vld [vmem:[%s7406_s28 + $0x18] sm:$0xff]  ;;  %v5019_v35 = vld [vmem:[%s7406_s28 + $0x20] sm:$0xff]  ;;  %v5021_v37 = vld [vmem:[%s7406_s28 + $0x28] sm:$0xff]  ;;  %vm2045_vm11 = vcmp.eq.s32.totalorder %v7425_v6, %v7398_v15 }
 0x39a   : >> { %1957 = vst [vmem:[%s7406_s28] sm:$0xff] %v1956_v32  ;;  %5014 = vst [vmem:[%s7406_s28 + $0x8] sm:$0xff] %v1963_v33  ;;  %v1977_v38 = vsel %vm1976_vm1, 0.0, %v5017_v9  ;;  %v1984_v39 = vsel %vm1983_vm0, 0.0, %v5019_v35  ;;  %v1991_v40 = vsel %vm1990_vm10, 0.0, %v5021_v37  ;;  %v5023_v29 = vld [vmem:[%s7406_s28 + $0x30] sm:$0xff]  ;;  %v5025_v41 = vld [vmem:[%s7406_s28 + $0x38] sm:$0xff]  ;;  %vm2052_vm0 = vcmp.eq.s32.totalorder %v7442_v26, %v7398_v15 }
 0x39b   : >> { %5016 = vst [vmem:[%s7406_s28 + $0x10] sm:$0xff] %v1970_v34  ;;  %v1883_v43 = vld [vmem:[%s7427_s29] sm:$0xff]  ;;  %5018 = vst [vmem:[%s7406_s28 + $0x18] sm:$0xff] %v1977_v38  ;;  %v1998_v44 = vsel %vm1997_vm14, 0.0, %v5023_v29  ;;  %v2005_v45 = vsel %vm2004_vm9, 0.0, %v5025_v41  ;;  %v4999_v53 = vld [vmem:[%s7427_s29 + $0x8] sm:$0xff]  ;;  %vm2059_vm1 = vcmp.eq.s32.totalorder %v7454_v30, %v7398_v15  ;;  %vm2129_vm9 = vcmp.eq.s32.totalorder %v7390_v19, %v7298_v15 }
 0x39c   : >> { %5020 = vst [vmem:[%s7406_s28 + $0x20] sm:$0xff] %v1984_v39  ;;  %5022 = vst [vmem:[%s7406_s28 + $0x28] sm:$0xff] %v1991_v40  ;;  %v1887_v52 = vsel %vm1886_vm3, %v7429_v25, %v1883_v43  ;;  %v5001_v51 = vld [vmem:[%s7427_s29 + $0x10] sm:$0xff]  ;;  %v5003_v47 = vld [vmem:[%s7427_s29 + $0x18] sm:$0xff]  ;;  %v1895_v57 = vsel %vm1894_vm4, %v7429_v25, %v4999_v53  ;;  %vm8448_vm3 = vcmp.eq.s32.totalorder %v7317_v50, %v7295_v15 }
 0x39d   : >> { %5024 = vst [vmem:[%s7406_s28 + $0x30] sm:$0xff] %v1998_v44  ;;  %5026 = vst [vmem:[%s7406_s28 + $0x38] sm:$0xff] %v2005_v45  ;;  %v1903_v58 = vsel %vm1902_vm5, %v7429_v25, %v5001_v51  ;;  %v1911_v54 = vsel %vm1910_vm6, %v7429_v25, %v5003_v47  ;;  %v5005_v55 = vld [vmem:[%s7427_s29 + $0x20] sm:$0xff]  ;;  %v5007_v60 = vld [vmem:[%s7427_s29 + $0x28] sm:$0xff]  ;;  %vm8449_vm4 = vcmp.eq.s32.totalorder %v7320_v42, %v7295_v15  ;;  %s7741_s28 = smov [#allocation15] }
 0x39e   : >> { %1888 = vst [vmem:[%s7427_s29] sm:$0xff] %v1887_v52  ;;  %v5009_v62 = vld [vmem:[%s7427_s29 + $0x30] sm:$0xff]  ;;  %5000 = vst [vmem:[%s7427_s29 + $0x8] sm:$0xff] %v1895_v57  ;;  %v1919_v36 = vsel %vm1918_vm7, %v7429_v25, %v5005_v55  ;;  %v1927_v46 = vsel %vm8448_vm3, %v7429_v25, %v5007_v60  ;;  %v5011_v63 = vld [vmem:[%s7427_s29 + $0x38] sm:$0xff]  ;;  %vm2066_vm5 = vcmp.eq.s32.totalorder %v7457_v31, %v7398_v15  ;;  %vm8461_vm3 = vcmp.lt.s32.totalorder %v6347_v15, 64 }
 0x39f   : >> { %5002 = vst [vmem:[%s7427_s29 + $0x10] sm:$0xff] %v1903_v58  ;;  %5004 = vst [vmem:[%s7427_s29 + $0x18] sm:$0xff] %v1911_v54  ;;  %v1935_v48 = vsel %vm8449_vm4, %v7429_v25, %v5009_v62  ;;  %v2014_v2 = vld [vmem:[%s7447_s1] sm:$0xff]  ;;  %v5027_v4 = vld [vmem:[%s7447_s1 + $0x8] sm:$0xff]  ;;  %vm2121_vm6 = vcmp.eq.s32.totalorder %v7387_v18, %v7298_v15  ;;  %vm8450_vm7 = vcmp.eq.s32.totalorder %v7341_v0, %v7295_v15 }
 0x3a0   : >> { %5006 = vst [vmem:[%s7427_s29 + $0x20] sm:$0xff] %v1919_v36  ;;  %5008 = vst [vmem:[%s7427_s29 + $0x28] sm:$0xff] %v1927_v46  ;;  %v1943_v49 = vsel %vm8450_vm7, %v7429_v25, %v5011_v63  ;;  %v2018_v50 = vsel %vm2017_vm8, 0.0, %v2014_v2  ;;  %v2025_v42 = vsel %vm2024_vm2, 0.0, %v5027_v4  ;;  %v5029_v14 = vld [vmem:[%s7447_s1 + $0x10] sm:$0xff]  ;;  %v5031_v17 = vld [vmem:[%s7447_s1 + $0x18] sm:$0xff]  ;;  %vm8451_vm8 = vcmp.eq.s32.totalorder %v7404_v23, %v7398_v15 }
 0x3a1   : >> { %5010 = vst [vmem:[%s7427_s29 + $0x30] sm:$0xff] %v1935_v48  ;;  %v5033_v1 = vld [vmem:[%s7447_s1 + $0x20] sm:$0xff]  ;;  %5012 = vst [vmem:[%s7427_s29 + $0x38] sm:$0xff] %v1943_v49  ;;  %v2032_v0 = vsel %vm8451_vm8, 0.0, %v5029_v14  ;;  %v2039_v12 = vsel %vm2038_vm15, 0.0, %v5031_v17  ;;  %v5035_v10 = vld [vmem:[%s7447_s1 + $0x28] sm:$0xff]  ;;  %vm2137_vm2 = vcmp.eq.s32.totalorder %v7395_v21, %v7298_v15  ;;  %vm8452_vm10 = vcmp.eq.s32.totalorder %v7323_v16, %v7298_v15 }
 0x3a2   : >> { %2019 = vst [vmem:[%s7447_s1] sm:$0xff] %v2018_v50  ;;  %5028 = vst [vmem:[%s7447_s1 + $0x8] sm:$0xff] %v2025_v42  ;;  %v2046_v61 = vsel %vm2045_vm11, 0.0, %v5033_v1  ;;  %v5037_v13 = vld [vmem:[%s7447_s1 + $0x30] sm:$0xff]  ;;  %v5039_v20 = vld [vmem:[%s7447_s1 + $0x38] sm:$0xff]  ;;  %v2053_v3 = vsel %vm2052_vm0, 0.0, %v5035_v10  ;;  %vm8453_vm12 = vcmp.eq.s32.totalorder %v7344_v59, %v7298_v15  ;;  %vm8454_vm13 = vcmp.eq.s32.totalorder %v7349_v5, %v7298_v15  ;;  %s7747_s29 = smov [#allocation14] }
 0x3a3   : >> { %5030 = vst [vmem:[%s7447_s1 + $0x10] sm:$0xff] %v2032_v0  ;;  %5032 = vst [vmem:[%s7447_s1 + $0x18] sm:$0xff] %v2039_v12  ;;  %v2060_v22 = vsel %vm2059_vm1, 0.0, %v5037_v13  ;;  %v2067_v23 = vsel %vm2066_vm5, 0.0, %v5039_v20  ;;  %v2078_v24 = vld [vmem:[%s7524_s12] sm:$0xff]  ;;  %v5041_v6 = vld [vmem:[%s7524_s12 + $0x8] sm:$0xff]  ;;  %vm8455_vm14 = vcmp.eq.s32.totalorder %v7352_v8, %v7298_v15  ;;  %vm8456_vm15 = vcmp.eq.s32.totalorder %v7361_v11, %v7298_v15 }
 0x3a4   : >> { %5034 = vst [vmem:[%s7447_s1 + $0x20] sm:$0xff] %v2046_v61  ;;  %v5043_v25 = vld [vmem:[%s7524_s12 + $0x10] sm:$0xff]  ;;  %5036 = vst [vmem:[%s7447_s1 + $0x28] sm:$0xff] %v2053_v3  ;;  %v5045_v26 = vld [vmem:[%s7524_s12 + $0x18] sm:$0xff]  ;;  %v2082_v7 = vsel %vm8452_vm10, %v7502_v56, %v2078_v24  ;;  %v2090_v30 = vsel %vm8453_vm12, %v7502_v56, %v5041_v6  ;;  %vm2151_vm11 = vcmp.eq.s32.totalorder %v6347_v15, 0  ;;  %vm2155_vm0 = vcmp.eq.s32.totalorder %v6347_v15, 1 }
 0x3a5   : >> { %5038 = vst [vmem:[%s7447_s1 + $0x30] sm:$0xff] %v2060_v22  ;;  %5040 = vst [vmem:[%s7447_s1 + $0x38] sm:$0xff] %v2067_v23  ;;  %v5047_v27 = vld [vmem:[%s7524_s12 + $0x20] sm:$0xff]  ;;  %v5049_v28 = vld [vmem:[%s7524_s12 + $0x28] sm:$0xff]  ;;  %v2098_v31 = vsel %vm8454_vm13, %v7502_v56, %v5043_v25  ;;  %v2106_v34 = vsel %vm8455_vm14, %v7502_v56, %v5045_v26  ;;  %s7757_s1 = smov [#allocation13]  ;;  %vm2168_vm1 = vcmp.eq.s32.totalorder %v6347_v15, 63 }
 0x3a6   : >> { %v5051_v32 = vld [vmem:[%s7524_s12 + $0x30] sm:$0xff]  ;;  %v5053_v33 = vld [vmem:[%s7524_s12 + $0x38] sm:$0xff]  ;;  %v2114_v59 = vsel %vm8456_vm15, %v7502_v56, %v5047_v27  ;;  %v2122_v5 = vsel %vm2121_vm6, %v7502_v56, %v5049_v28  ;;  %2083 = vst [vmem:[%s7524_s12] sm:$0xff] %v2082_v7  ;;  %5042 = vst [vmem:[%s7524_s12 + $0x8] sm:$0xff] %v2090_v30 }
 0x3a7   : >> { %5044 = vst [vmem:[%s7524_s12 + $0x10] sm:$0xff] %v2098_v31  ;;  %v2142_v9 = vld [vmem:[%s7548_s13] sm:$0xff]  ;;  %v2130_v8 = vsel %vm2129_vm9, %v7502_v56, %v5051_v32  ;;  %v2138_v11 = vsel %vm2137_vm2, %v7502_v56, %v5053_v33  ;;  %5046 = vst [vmem:[%s7524_s12 + $0x18] sm:$0xff] %v2106_v34  ;;  %v5059_v21 = vld [vmem:[%s7664_s17 + $0x10] sm:$0xff] }
 0x3a8   : >> { %5048 = vst [vmem:[%s7524_s12 + $0x20] sm:$0xff] %v2114_v59  ;;  %5050 = vst [vmem:[%s7524_s12 + $0x28] sm:$0xff] %v2122_v5  ;;  %2143 = vrot.lane.b32.xlu0 %v2142_v9, %s6249_s15  ;;  %v7655_v18 = vld [vmem:[%s7636_s14] sm:$0xff] }
 0x3a9   : >> { %5052 = vst [vmem:[%s7524_s12 + $0x30] sm:$0xff] %v2130_v8  ;;  %5054 = vst [vmem:[%s7524_s12 + $0x38] sm:$0xff] %v2138_v11  ;;  %2147 = vrot.lane.b32.xlu1 %v7655_v18, %s6249_s15  ;;  %v7660_v19 = vld [vmem:[%s7650_s16 + $0x8] sm:$0xff]  ;;  %s7765_s12 = smov [#allocation15] }
 0x3aa   : >> { %v5055_v35 = vld [vmem:[%s7668_s18 + $0x8] sm:$0xff]  ;;  %v7687_v38 = vld [vmem:[%s7680_s20 + $0x10] sm:$0xff]  ;;  %v5063_v40 = vld [vmem:[%s7694_s3 + $0x18] sm:$0xff] }
 0x3ab   : >> { %v7717_v43 = vld [vmem:[%s7710_s23 + $0x18] sm:$0xff]  ;;  %v7736_v52 = vld [vmem:[%s7729_s26 + $0x20] sm:$0xff]  ;;  %v7760_v56 = vld [vmem:[%s7753_s30 + $0x28] sm:$0xff] }
 0x3ac   : >> { %2179 = vrot.lane.b32.xlu0 %v7660_v19, %s6249_s15  ;;  %v7678_v37 = vld [vmem:[%s7674_s19] sm:$0xff]  ;;  %v7692_v39 = vld [vmem:[%s7684_s21 + $0x8] sm:$0xff]  ;;  %v7708_v41 = vld [vmem:[%s7704_s0 + $0x10] sm:$0xff] }
 0x3ad   : >> { %2164 = vrot.lane.b32.xlu1 %v2142_v9, %s8435_s2  ;;  %v7727_v45 = vld [vmem:[%s7723_s25 + $0x18] sm:$0xff]  ;;  %v5067_v53 = vld [vmem:[%s7733_s27 + $0x20] sm:$0xff]  ;;  %v5071_v57 = vld [vmem:[%s7757_s1 + $0x28] sm:$0xff] }
 0x3ae   : >> { %v7751_v47 = vld [vmem:[%s7747_s29 + $0x20] sm:$0xff]  ;;  %v7775_v54 = vld [vmem:[%s7771_s9 + $0x28] sm:$0xff]  ;;  %v7784_v55 = vld [vmem:[%s7777_s8 + $0x30] sm:$0xff] }
 0x3af   : >> { %v5075_v60 = vld [vmem:[%s7781_s7 + $0x30] sm:$0xff]  ;;  %v7808_v46 = vld [vmem:[%s7801_s4 + $0x38] sm:$0xff]  ;;  %s8460_s7 = smov 127   ;;  %vm8462_vm4 = vmmov %vm8461_vm3 }
 0x3b0   : >> { %2207 = vrot.lane.b32.xlu0 %v5059_v21, %s6249_s15  ;;  %v2433_v29 = vld [vmem:[%s7698_s22] sm:$0xff]  ;;  %v5100_v44 = vld [vmem:[%s7714_s24 + $0x8] sm:$0xff]  ;;  %v5101_v51 = vld [vmem:[%s7741_s28 + $0x10] sm:$0xff] }
 0x3b1   : >> { %2175 = vrot.lane.b32.xlu1 %v5055_v35, %s6249_s15  ;;  %v5105_v58 = vld [vmem:[%s7765_s12 + $0x18] sm:$0xff]  ;;  %v5109_v62 = vld [vmem:[%s7789_s6 + $0x20] sm:$0xff]  ;;  %v7799_v36 = vld [vmem:[%s7795_s5 + $0x30] sm:$0xff]  ;;  %s7824_s5 = smov [#allocation15] }
 0x3b2   : >> { %v5079_v48 = vld [vmem:[%s7805_s10 + $0x38] sm:$0xff]  ;;  %v5113_v63 = vld [vmem:[%s7813_s11 + $0x28] sm:$0xff]  ;;  %s7828_s10 = smov [#allocation14]  ;;  %vm8463_vm5 = vmmov %vm8461_vm3 }
 0x3b3   : >> { %v5121_v4 = vld [vmem:[%s7824_s5 + $0x38] sm:$0xff]  ;;  %vm8464_vm6 = vmmov %vm8461_vm3 }
 0x3b4   : >> { %2228 = vrot.lane.b32.xlu0 %v5059_v21, %s8435_s2  ;;  %v7832_v49 = vld [vmem:[%s7828_s10 + $0x38] sm:$0xff]  ;;  %vm8465_vm7 = vmmov %vm8461_vm3 }
 0x3b5   : >> { %2196 = vrot.lane.b32.xlu1 %v5055_v35, %s8435_s2  ;;  %vm8466_vm9 = vmmov %vm8461_vm3 }
 0x3b6   : >> { %vm8467_vm8 = vmmov %vm8461_vm3 }
 0x3b7   : >> { %vm8468_vm2 = vmmov %vm8461_vm3 }
 0x3b8   : >> { %2417 = vrot.lane.b32.xlu0 %v7678_v37, %s6249_s15  ;;  %vm8469_vm10 = vmmov %vm8468_vm2 }
 0x3b9   : >> { %2211 = vrot.lane.b32.xlu1 %v7687_v38, %s6249_s15  ;;  %vm8470_vm12 = vmmov %vm8468_vm2 }
 0x3ba   : >> { %vm8471_vm13 = vmmov %vm8468_vm2 }
 0x3bb   : >> { %vm8472_vm14 = vmmov %vm8468_vm2 }
 0x3bc   : >> { %2449 = vrot.lane.b32.xlu0 %v7692_v39, %s6249_s15  ;;  %vm8474_vm15 = vmmov %vm8468_vm2 }
 0x3bd   : >> { %2239 = vrot.lane.b32.xlu1 %v5063_v40, %s6249_s15 }
 0x3c0   : >> { %2434 = vrot.lane.b32.xlu0 %v2433_v29, %s8435_s2 }
 0x3c1   : >> { %2413 = vrot.lane.b32.xlu1 %v2433_v29, %s6249_s15 }
 0x3c4   : >> { %2481 = vrot.lane.b32.xlu0 %v7708_v41, %s6249_s15 }
 0x3c5   : >> { %2243 = vrot.lane.b32.xlu1 %v7717_v43, %s6249_s15 }
 0x3c8   : >> { %2466 = vrot.lane.b32.xlu0 %v5100_v44, %s8435_s2 }
 0x3c9   : >> { %2445 = vrot.lane.b32.xlu1 %v5100_v44, %s6249_s15 }
 0x3cc   : >> { %2513 = vrot.lane.b32.xlu0 %v7727_v45, %s6249_s15 }
 0x3cd   : >> { %2275 = vrot.lane.b32.xlu1 %v7736_v52, %s6249_s15 }
 0x3d0   : >> { %2271 = vrot.lane.b32.xlu0 %v5067_v53, %s6249_s15 }
 0x3d1   : >> { %2477 = vrot.lane.b32.xlu1 %v5101_v51, %s6249_s15 }
 0x3d4   : >> { %2498 = vrot.lane.b32.xlu0 %v5101_v51, %s8435_s2 }
 0x3d5   : >> { %2260 = vrot.lane.b32.xlu1 %v5063_v40, %s8435_s2 }
 0x3d8   : >> { %2545 = vrot.lane.b32.xlu0 %v7751_v47, %s6249_s15 }
 0x3d9   : >> { %2307 = vrot.lane.b32.xlu1 %v7760_v56, %s6249_s15 }
 0x3dc   : >> { %2303 = vrot.lane.b32.xlu0 %v5071_v57, %s6249_s15 }
 0x3dd   : >> { %2509 = vrot.lane.b32.xlu1 %v5105_v58, %s6249_s15 }
 0x3e0   : >> { %2530 = vrot.lane.b32.xlu0 %v5105_v58, %s8435_s2 }
 0x3e1   : >> { %2292 = vrot.lane.b32.xlu1 %v5067_v53, %s8435_s2 }
 0x3e4   : >> { %2577 = vrot.lane.b32.xlu0 %v7775_v54, %s6249_s15 }
 0x3e5   : >> { %2339 = vrot.lane.b32.xlu1 %v7784_v55, %s6249_s15 }
 0x3e8   : >> { %2335 = vrot.lane.b32.xlu0 %v5075_v60, %s6249_s15 }
 0x3e9   : >> { %2541 = vrot.lane.b32.xlu1 %v5109_v62, %s6249_s15 }
 0x3ec   : >> { %2562 = vrot.lane.b32.xlu0 %v5109_v62, %s8435_s2 }
 0x3ed   : >> { %2324 = vrot.lane.b32.xlu1 %v5071_v57, %s8435_s2  ;;  %s7816_s2 = smov [#allocation15] }
 0x3ee   : >> { %v5117_v2 = vld [vmem:[%s7816_s2 + $0x30] sm:$0xff] }
 0x3f0   : >> { %2609 = vrot.lane.b32.xlu0 %v7799_v36, %s6249_s15 }
 0x3f1   : >> { %2371 = vrot.lane.b32.xlu1 %v7808_v46, %s6249_s15 }
 0x3f4   : >> { %2367 = vrot.lane.b32.xlu0 %v5079_v48, %s6249_s15 }
 0x3f5   : >> { %2573 = vrot.lane.b32.xlu1 %v5113_v63, %s6249_s15 }
 0x3f8   : >> { %2605 = vrot.lane.b32.xlu0 %v5117_v2, %s6249_s15 }
 0x3f9   : >> { %2356 = vrot.lane.b32.xlu1 %v5075_v60, %s8460_s7 }
 0x3fc   : >> { %2388 = vrot.lane.b32.xlu0 %v5079_v48, %s8460_s7 }
 0x3fd   : >> { %2594 = vrot.lane.b32.xlu1 %v5113_v63, %s8460_s7 }
 0x400   : >> { %2637 = vrot.lane.b32.xlu0 %v5121_v4, %s6249_s15 }
 0x401   : >> { %2641 = vrot.lane.b32.xlu1 %v7832_v49, %s6249_s15 }
 0x405   : >> { %2626 = vrot.lane.b32.xlu1 %v5117_v2, %s8460_s7 }
 0x409   : >> { %2658 = vrot.lane.b32.xlu1 %v5121_v4, %s8460_s7  ;;  %s8473_s7 = sld [smem:[#allocation28_spill]] }
 0x41a   : >> { %v2144_v50 = vpop.permute.xlu0 %2143 }
 0x41b   : >> { %v2148_v42 = vpop.permute.xlu1 %2147 }
 0x41c   : >> { %v2152_v14 = vsel %vm2151_vm11, %v7655_v18, %v2148_v42 }
 0x41d   : >> { %v2156_v1 = vsel %vm2155_vm0, %v2144_v50, %v2152_v14 }
 0x41e   : >> { %v2180_v17 = vpop.permute.xlu0 %2179  ;;  %v2162_v0 = vsel %vm8461_vm3, %v2156_v1, 0.0  ;;  %vm8476_vm3 = vmmov %vm8468_vm2 }
 0x41f   : >> { %v2165_v12 = vpop.permute.xlu1 %2164  ;;  %2394 = vst [vmem:[%s7636_s14] sm:$0xff] %v2162_v0  ;;  %v2184_v13 = vsel %vm2151_vm11, %v7660_v19, %v2180_v17 }
 0x420   : >> { %v2169_v61 = vsel %vm2168_vm1, %v7655_v18, %v2165_v12 }
 0x421   : >> { %2395 = vst [vmem:[%s7548_s13] sm:$0xff] %v2169_v61 }
 0x422   : >> { %v2208_v10 = vpop.permute.xlu0 %2207 }
 0x423   : >> { %v2176_v20 = vpop.permute.xlu1 %2175 }
 0x424   : >> { %v2188_v3 = vsel %vm2155_vm0, %v2176_v20, %v2184_v13 }
 0x425   : >> { %v2194_v23 = vsel %vm8462_vm4, %v2188_v3, 0.0  ;;  %vm8478_vm4 = vmmov %vm8468_vm2 }
 0x426   : >> { %v2229_v22 = vpop.permute.xlu0 %2228  ;;  %5083 = vst [vmem:[%s7650_s16 + $0x8] sm:$0xff] %v2194_v23 }
 0x427   : >> { %v2233_v24 = vsel %vm2168_vm1, %v7687_v38, %v2229_v22  ;;  %v2197_v6 = vpop.permute.xlu1 %2196 }
 0x428   : >> { %v2201_v25 = vsel %vm2168_vm1, %v7660_v19, %v2197_v6 }
 0x429   : >> { %5084 = vst [vmem:[%s7668_s18 + $0x8] sm:$0xff] %v2201_v25 }
 0x42a   : >> { %v2418_v26 = vpop.permute.xlu0 %2417  ;;  %5086 = vst [vmem:[%s7664_s17 + $0x10] sm:$0xff] %v2233_v24 }
 0x42b   : >> { %v2212_v27 = vpop.permute.xlu1 %2211  ;;  %v2422_v59 = vsel %vm2151_vm11, %v7678_v37, %v2418_v26 }
 0x42c   : >> { %v2216_v28 = vsel %vm2151_vm11, %v7687_v38, %v2212_v27 }
 0x42d   : >> { %v2220_v30 = vsel %vm2155_vm0, %v2208_v10, %v2216_v28 }
 0x42e   : >> { %v2450_v7 = vpop.permute.xlu0 %2449  ;;  %v2226_v31 = vsel %vm8463_vm5, %v2220_v30, 0.0  ;;  %vm8479_vm5 = vcmp.eq.s32.totalorder %v6349_v16, 0 }
 0x42f   : >> { %v2240_v32 = vpop.permute.xlu1 %2239  ;;  %5085 = vst [vmem:[%s7680_s20 + $0x10] sm:$0xff] %v2226_v31  ;;  %v2454_v40 = vsel %vm2151_vm11, %v7692_v39, %v2450_v7 }
 0x432   : >> { %v2435_v33 = vpop.permute.xlu0 %2434 }
 0x433   : >> { %v2439_v34 = vsel %vm2168_vm1, %v7678_v37, %v2435_v33  ;;  %v2414_v5 = vpop.permute.xlu1 %2413 }
 0x434   : >> { %2665 = vst [vmem:[%s7698_s22] sm:$0xff] %v2439_v34  ;;  %v2426_v9 = vsel %vm2155_vm0, %v2414_v5, %v2422_v59 }
 0x435   : >> { %v2432_v11 = vsel %vm8464_vm6, %v2426_v9, 0.0  ;;  %vm8480_vm6 = vmmov %vm8479_vm5 }
 0x436   : >> { %v2482_v8 = vpop.permute.xlu0 %2481  ;;  %2664 = vst [vmem:[%s7674_s19] sm:$0xff] %v2432_v11 }
 0x437   : >> { %v2244_v18 = vpop.permute.xlu1 %2243  ;;  %v2486_v48 = vsel %vm2151_vm11, %v7708_v41, %v2482_v8 }
 0x438   : >> { %v2248_v19 = vsel %vm2151_vm11, %v7717_v43, %v2244_v18 }
 0x439   : >> { %v2252_v35 = vsel %vm2155_vm0, %v2240_v32, %v2248_v19 }
 0x43a   : >> { %v2467_v21 = vpop.permute.xlu0 %2466  ;;  %v2258_v38 = vsel %vm8465_vm7, %v2252_v35, 0.0  ;;  %vm8481_vm7 = vmmov %vm8479_vm5 }
 0x43b   : >> { %v2471_v37 = vsel %vm2168_vm1, %v7692_v39, %v2467_v21  ;;  %v2446_v29 = vpop.permute.xlu1 %2445  ;;  %5087 = vst [vmem:[%s7710_s23 + $0x18] sm:$0xff] %v2258_v38 }
 0x43c   : >> { %5126 = vst [vmem:[%s7714_s24 + $0x8] sm:$0xff] %v2471_v37  ;;  %v2458_v44 = vsel %vm2155_vm0, %v2446_v29, %v2454_v40 }
 0x43d   : >> { %v2464_v51 = vsel %vm8466_vm9, %v2458_v44, 0.0  ;;  %vm8482_vm9 = vmmov %vm8479_vm5 }
 0x43e   : >> { %v2514_v53 = vpop.permute.xlu0 %2513  ;;  %5125 = vst [vmem:[%s7684_s21 + $0x8] sm:$0xff] %v2464_v51 }
 0x43f   : >> { %v2276_v57 = vpop.permute.xlu1 %2275 }
 0x440   : >> { %v2280_v58 = vsel %vm2151_vm11, %v7736_v52, %v2276_v57 }
 0x442   : >> { %v2272_v60 = vpop.permute.xlu0 %2271 }
 0x443   : >> { %v2284_v39 = vsel %vm2155_vm0, %v2272_v60, %v2280_v58  ;;  %v2478_v63 = vpop.permute.xlu1 %2477 }
 0x444   : >> { %v2290_v62 = vsel %vm8467_vm8, %v2284_v39, 0.0  ;;  %v2490_v2 = vsel %vm2155_vm0, %v2478_v63, %v2486_v48  ;;  %vm8483_vm8 = vmmov %vm8479_vm5 }
 0x445   : >> { %5089 = vst [vmem:[%s7729_s26 + $0x20] sm:$0xff] %v2290_v62  ;;  %v2496_v50 = vsel %vm8468_vm2, %v2490_v2, 0.0  ;;  %vm8484_vm2 = vmmov %vm8479_vm5 }
 0x446   : >> { %v2499_v4 = vpop.permute.xlu0 %2498  ;;  %5127 = vst [vmem:[%s7704_s0 + $0x10] sm:$0xff] %v2496_v50 }
 0x447   : >> { %v2503_v42 = vsel %vm2168_vm1, %v7708_v41, %v2499_v4  ;;  %v2261_v14 = vpop.permute.xlu1 %2260 }
 0x448   : >> { %5128 = vst [vmem:[%s7741_s28 + $0x10] sm:$0xff] %v2503_v42  ;;  %v2265_v17 = vsel %vm2168_vm1, %v7717_v43, %v2261_v14  ;;  %v2518_v43 = vsel %vm2151_vm11, %v7727_v45, %v2514_v53 }
 0x449   : >> { %5088 = vst [vmem:[%s7694_s3 + $0x18] sm:$0xff] %v2265_v17 }
 0x44a   : >> { %v2546_v1 = vpop.permute.xlu0 %2545 }
 0x44b   : >> { %v2308_v0 = vpop.permute.xlu1 %2307 }
 0x44c   : >> { %v2312_v12 = vsel %vm2151_vm11, %v7760_v56, %v2308_v0 }
 0x44e   : >> { %v2304_v61 = vpop.permute.xlu0 %2303 }
 0x44f   : >> { %v2316_v41 = vsel %vm2155_vm0, %v2304_v61, %v2312_v12  ;;  %v2510_v13 = vpop.permute.xlu1 %2509 }
 0x450   : >> { %v2322_v10 = vsel %vm8469_vm10, %v2316_v41, 0.0  ;;  %v2522_v20 = vsel %vm2155_vm0, %v2510_v13, %v2518_v43  ;;  %vm8485_vm10 = vmmov %vm8484_vm2 }
 0x451   : >> { %5091 = vst [vmem:[%s7753_s30 + $0x28] sm:$0xff] %v2322_v10  ;;  %v2528_v22 = vsel %vm8470_vm12, %v2522_v20, 0.0  ;;  %vm8486_vm12 = vmmov %vm8484_vm2 }
 0x452   : >> { %v2531_v3 = vpop.permute.xlu0 %2530  ;;  %5129 = vst [vmem:[%s7723_s25 + $0x18] sm:$0xff] %v2528_v22 }
 0x453   : >> { %v2535_v23 = vsel %vm2168_vm1, %v7727_v45, %v2531_v3  ;;  %v2293_v24 = vpop.permute.xlu1 %2292 }
 0x454   : >> { %5130 = vst [vmem:[%s7765_s12 + $0x18] sm:$0xff] %v2535_v23  ;;  %v2297_v6 = vsel %vm2168_vm1, %v7736_v52, %v2293_v24  ;;  %v2550_v52 = vsel %vm2151_vm11, %v7751_v47, %v2546_v1 }
 0x455   : >> { %5090 = vst [vmem:[%s7733_s27 + $0x20] sm:$0xff] %v2297_v6 }
 0x456   : >> { %v2578_v25 = vpop.permute.xlu0 %2577 }
 0x457   : >> { %v2340_v26 = vpop.permute.xlu1 %2339 }
 0x458   : >> { %v2344_v27 = vsel %vm2151_vm11, %v7784_v55, %v2340_v26 }
 0x45a   : >> { %v2336_v28 = vpop.permute.xlu0 %2335 }
 0x45b   : >> { %v2348_v45 = vsel %vm2155_vm0, %v2336_v28, %v2344_v27  ;;  %v2542_v30 = vpop.permute.xlu1 %2541 }
 0x45c   : >> { %v2354_v7 = vsel %vm8471_vm13, %v2348_v45, 0.0  ;;  %v2554_v31 = vsel %vm2155_vm0, %v2542_v30, %v2550_v52  ;;  %vm8487_vm13 = vmmov %vm8484_vm2 }
 0x45d   : >> { %5093 = vst [vmem:[%s7777_s8 + $0x30] sm:$0xff] %v2354_v7  ;;  %v2560_v33 = vsel %vm8472_vm14, %v2554_v31, 0.0  ;;  %s8477_s8 = sld [smem:[#allocation29_spill]]  ;;  %vm8488_vm14 = vmmov %vm8484_vm2 }
 0x45e   : >> { %v2563_v32 = vpop.permute.xlu0 %2562  ;;  %5131 = vst [vmem:[%s7747_s29 + $0x20] sm:$0xff] %v2560_v33 }
 0x45f   : >> { %v2567_v34 = vsel %vm2168_vm1, %v7751_v47, %v2563_v32  ;;  %v2325_v59 = vpop.permute.xlu1 %2324 }
 0x460   : >> { %5132 = vst [vmem:[%s7789_s6 + $0x20] sm:$0xff] %v2567_v34  ;;  %v2329_v5 = vsel %vm2168_vm1, %v7760_v56, %v2325_v59  ;;  %s8475_s6 = sld [smem:[#allocation27_spill]]  ;;  %v2582_v56 = vsel %vm2151_vm11, %v7775_v54, %v2578_v25 }
 0x461   : >> { %5092 = vst [vmem:[%s7757_s1 + $0x28] sm:$0xff] %v2329_v5 }
 0x462   : >> { %v2610_v9 = vpop.permute.xlu0 %2609 }
 0x463   : >> { %v2372_v8 = vpop.permute.xlu1 %2371  ;;  %v2614_v35 = vsel %vm2151_vm11, %v7799_v36, %v2610_v9 }
 0x464   : >> { %v2376_v11 = vsel %vm2151_vm11, %v7808_v46, %v2372_v8 }
 0x466   : >> { %v2368_v18 = vpop.permute.xlu0 %2367 }
 0x467   : >> { %v2380_v47 = vsel %vm2155_vm0, %v2368_v18, %v2376_v11  ;;  %v2574_v21 = vpop.permute.xlu1 %2573 }
 0x468   : >> { %v2386_v19 = vsel %vm8474_vm15, %v2380_v47, 0.0  ;;  %v2586_v37 = vsel %vm2155_vm0, %v2574_v21, %v2582_v56  ;;  %vm8490_vm15 = vmmov %vm8484_vm2 }
 0x469   : >> { %5095 = vst [vmem:[%s7801_s4 + $0x38] sm:$0xff] %v2386_v19  ;;  %v2592_v40 = vsel %vm8476_vm3, %v2586_v37, 0.0  ;;  %s8004_s4 = smov [#allocation12] }
 0x46a   : >> { %v2606_v38 = vpop.permute.xlu0 %2605  ;;  %5133 = vst [vmem:[%s7771_s9 + $0x28] sm:$0xff] %v2592_v40  ;;  %s8011_s9 = smov [#allocation13] }
 0x46b   : >> { %v2618_v29 = vsel %vm2155_vm0, %v2606_v38, %v2614_v35  ;;  %v2357_v53 = vpop.permute.xlu1 %2356 }
 0x46c   : >> { %v2624_v44 = vsel %vm8478_vm4, %v2618_v29, 0.0  ;;  %v2361_v51 = vsel %vm2168_vm1, %v7784_v55, %v2357_v53 }
 0x46d   : >> { %5135 = vst [vmem:[%s8473_s7 + $0x30] sm:$0xff] %v2624_v44  ;;  %5094 = vst [vmem:[%s8475_s6 + $0x30] sm:$0xff] %v2361_v51 }
 0x46e   : >> { %v2389_v57 = vpop.permute.xlu0 %2388 }
 0x46f   : >> { %v2393_v58 = vsel %vm2168_vm1, %v7808_v46, %v2389_v57  ;;  %v2595_v4 = vpop.permute.xlu1 %2594 }
 0x470   : >> { %v2682_v60 = vld [vmem:[%s8004_s4] ss:$0 sm:$0xff]  ;;  %v5140_v62 = vld [vmem:[%s8004_s4 + $0x7] ss:$0 sm:$0xff]  ;;  %5096 = vst [vmem:[%s8477_s8 + $0x38] sm:$0xff] %v2393_v58  ;;  %v2599_v1 = vsel %vm2168_vm1, %v7775_v54, %v2595_v4 }
 0x471   : >> { %v5139_v39 = vld [vmem:[%s8004_s4 - $0x1] sm:$0xfe]  ;;  %v5141_v48 = vld [vmem:[%s8004_s4 + $0x7] sm:$0xfe]  ;;  %v5142_v63 = vld [vmem:[%s8004_s4 + $0xf] ss:$0 sm:$0xff] }
 0x472   : >> { %v2689_v55 = vsel %vm8479_vm5, %v2682_v60, %v5139_v39  ;;  %v5144_v2 = vld [vmem:[%s8004_s4 + $0xf] sm:$0xfe]  ;;  %v2700_v46 = vsel %vm8480_vm6, %v5140_v62, %v5141_v48  ;;  %v5145_v42 = vld [vmem:[%s8004_s4 + $0x17] ss:$0 sm:$0xff]  ;;  %v5147_v14 = vld [vmem:[%s8004_s4 + $0x17] sm:$0xfe]  ;;  %v2638_v25 = vpop.permute.xlu0 %2637 }
 0x473   : >> { %v2711_v50 = vsel %vm8481_vm7, %v5142_v63, %v5144_v2  ;;  %v5148_v17 = vld [vmem:[%s8004_s4 + $0x1f] ss:$0 sm:$0xff]  ;;  %2692 = vst [vmem:[%s8004_s4] sm:$0xff] %v2689_v55  ;;  %v2722_v0 = vsel %vm8482_vm9, %v5145_v42, %v5147_v14  ;;  %v5150_v12 = vld [vmem:[%s8004_s4 + $0x1f] sm:$0xfe]  ;;  %v5151_v61 = vld [vmem:[%s8004_s4 + $0x27] ss:$0 sm:$0xff]  ;;  %v2642_v24 = vpop.permute.xlu1 %2641 }
 0x474   : >> { %v5153_v41 = vld [vmem:[%s8004_s4 + $0x27] sm:$0xfe]  ;;  %5143 = vst [vmem:[%s8004_s4 + $0x8] sm:$0xff] %v2700_v46  ;;  %5146 = vst [vmem:[%s8004_s4 + $0x10] sm:$0xff] %v2711_v50  ;;  %v2733_v10 = vsel %vm8483_vm8, %v5148_v17, %v5150_v12  ;;  %v5154_v43 = vld [vmem:[%s8004_s4 + $0x2f] ss:$0 sm:$0xff]  ;;  %v2646_v26 = vsel %vm2151_vm11, %v7832_v49, %v2642_v24 }
 0x475   : >> { %5134 = vst [vmem:[%s7813_s11 + $0x28] sm:$0xff] %v2599_v1  ;;  %v2744_v54 = vsel %vm8484_vm2, %v5151_v61, %v5153_v41  ;;  %v5156_v13 = vld [vmem:[%s8004_s4 + $0x2f] sm:$0xfe]  ;;  %v5157_v20 = vld [vmem:[%s8004_s4 + $0x37] ss:$0 sm:$0xff]  ;;  %5149 = vst [vmem:[%s8004_s4 + $0x18] sm:$0xff] %v2722_v0  ;;  %v2650_v9 = vsel %vm2155_vm0, %v2638_v25, %v2646_v26 }
 0x476   : >> { %v2755_v3 = vsel %vm8485_vm10, %v5154_v43, %v5156_v13  ;;  %v5159_v22 = vld [vmem:[%s8004_s4 + $0x37] sm:$0xfe]  ;;  %5152 = vst [vmem:[%s8004_s4 + $0x20] sm:$0xff] %v2733_v10  ;;  %5155 = vst [vmem:[%s8004_s4 + $0x28] sm:$0xff] %v2744_v54  ;;  %v5160_v23 = vld [vmem:[%s8004_s4 + $0x3f] ss:$0 sm:$0xff] }
 0x477   : >> { %v2766_v6 = vsel %vm8486_vm12, %v5157_v20, %v5159_v22  ;;  %5158 = vst [vmem:[%s8004_s4 + $0x30] sm:$0xff] %v2755_v3  ;;  %v2846_v27 = vld [vmem:[%s8011_s9] ss:$0 sm:$0xff]  ;;  %v5186_v45 = vld [vmem:[%s8011_s9 + $0x7] ss:$0 sm:$0xff]  ;;  %vm8489_vm11 = vmmov %vm8484_vm2  ;;  %v2627_v8 = vpop.permute.xlu1 %2626  ;;  %vm8494_vm5 = vcmp.lt.s32.totalorder %v6347_v15, 64 }
 0x478   : >> { %5161 = vst [vmem:[%s8004_s4 + $0x38] sm:$0xff] %v2766_v6  ;;  %v5185_v28 = vld [vmem:[%s8011_s9 - $0x1] sm:$0xfe]  ;;  %v5187_v52 = vld [vmem:[%s8011_s9 + $0x7] sm:$0xfe]  ;;  %v2631_v56 = vsel %vm2168_vm1, %v7799_v36, %v2627_v8  ;;  %vm8491_vm0 = vmmov %vm8484_vm2  ;;  %v2656_v53 = vsel %vm8494_vm5, %v2650_v9, 0.0 }
 0x479   : >> { %v2853_v7 = vsel %vm8487_vm13, %v2846_v27, %v5185_v28  ;;  %v5188_v30 = vld [vmem:[%s8011_s9 + $0xf] ss:$0 sm:$0xff]  ;;  %v5190_v31 = vld [vmem:[%s8011_s9 + $0xf] sm:$0xfe]  ;;  %v2864_v32 = vsel %vm8488_vm14, %v5186_v45, %v5187_v52  ;;  %v5191_v34 = vld [vmem:[%s8011_s9 + $0x17] ss:$0 sm:$0xff] }
 0x47a   : >> { %2856 = vst [vmem:[%s8011_s9] sm:$0xff] %v2853_v7  ;;  %v2875_v33 = vsel %vm8489_vm11, %v5188_v30, %v5190_v31  ;;  %v5193_v59 = vld [vmem:[%s8011_s9 + $0x17] sm:$0xfe]  ;;  %v5194_v5 = vld [vmem:[%s8011_s9 + $0x1f] ss:$0 sm:$0xff]  ;;  %5189 = vst [vmem:[%s8011_s9 + $0x8] sm:$0xff] %v2864_v32  ;;  %s8119_s11 = smov [#allocation14] }
 0x47b   : >> { %5192 = vst [vmem:[%s8011_s9 + $0x10] sm:$0xff] %v2875_v33  ;;  %v2886_v11 = vsel %vm8490_vm15, %v5191_v34, %v5193_v59  ;;  %v5196_v18 = vld [vmem:[%s8011_s9 + $0x1f] sm:$0xfe]  ;;  %v5197_v47 = vld [vmem:[%s8011_s9 + $0x27] ss:$0 sm:$0xff]  ;;  %vm8492_vm3 = vmmov %vm8491_vm0  ;;  %v2659_v57 = vpop.permute.xlu1 %2658 }
 0x47c   : >> { %v5199_v19 = vld [vmem:[%s8011_s9 + $0x27] sm:$0xfe]  ;;  %5195 = vst [vmem:[%s8011_s9 + $0x18] sm:$0xff] %v2886_v11  ;;  %v2897_v21 = vsel %vm8491_vm0, %v5194_v5, %v5196_v18  ;;  %v5200_v37 = vld [vmem:[%s8011_s9 + $0x2f] ss:$0 sm:$0xff]  ;;  %5136 = vst [vmem:[%s7816_s2 + $0x30] sm:$0xff] %v2631_v56  ;;  %v2663_v58 = vsel %vm2168_vm1, %v7832_v49, %v2659_v57 }
 0x47d   : >> { %v2908_v35 = vsel %vm8492_vm3, %v5197_v47, %v5199_v19  ;;  %v5202_v38 = vld [vmem:[%s8011_s9 + $0x2f] sm:$0xfe]  ;;  %v5203_v40 = vld [vmem:[%s8011_s9 + $0x37] ss:$0 sm:$0xff]  ;;  %5198 = vst [vmem:[%s8011_s9 + $0x20] sm:$0xff] %v2897_v21  ;;  %vm8493_vm4 = vmmov %vm8491_vm0  ;;  %vm8496_vm1 = vcmp.eq.s32.totalorder %v6349_v16, 7 }
 0x47e   : >> { %5201 = vst [vmem:[%s8011_s9 + $0x28] sm:$0xff] %v2908_v35  ;;  %v2919_v29 = vsel %vm8493_vm4, %v5200_v37, %v5202_v38  ;;  %v5205_v36 = vld [vmem:[%s8011_s9 + $0x37] sm:$0xfe]  ;;  %v5206_v44 = vld [vmem:[%s8011_s9 + $0x3f] ss:$0 sm:$0xff]  ;;  %vm8495_vm6 = vmmov %vm8491_vm0 }
 0x47f   : >> { %5204 = vst [vmem:[%s8011_s9 + $0x30] sm:$0xff] %v2919_v29  ;;  %v2930_v51 = vsel %vm8495_vm6, %v5203_v40, %v5205_v36  ;;  %5137 = vst [vmem:[%s7828_s10 + $0x38] sm:$0xff] %v2656_v53  ;;  %s8121_s10 = smov [#allocation15] }
 0x480   : >> { %5207 = vst [vmem:[%s8011_s9 + $0x38] sm:$0xff] %v2930_v51  ;;  %5138 = vst [vmem:[%s7824_s5 + $0x38] sm:$0xff] %v2663_v58  ;;  %s8512_s5 = sld [smem:[#allocation26_spill]] }
 0x481   : >> { %vm8497_vm7 = vmmov %vm8496_vm1 }
 0x482   : >> { %vm8498_vm9 = vmmov %vm8496_vm1 }
 0x483   : >> { %vm8499_vm8 = vmmov %vm8496_vm1 }
 0x484   : >> { %vm8500_vm2 = vmmov %vm8496_vm1 }
 0x485   : >> { %vm8501_vm10 = vmmov %vm8496_vm1 }
 0x486   : >> { %v2770_v60 = vld [vmem:[%s8119_s11] ss:$0 sm:$0xff]  ;;  %v5163_v39 = vld [vmem:[%s8119_s11 + $0x39] sm:$0x7f]  ;;  %v5164_v49 = vld [vmem:[%s8119_s11 + $0x38] ss:$0 sm:$0xff] }
 0x487   : >> { %v5166_v62 = vld [vmem:[%s8119_s11 + $0x31] sm:$0x7f]  ;;  %v5167_v55 = vld [vmem:[%s8119_s11 + $0x30] ss:$0 sm:$0xff]  ;;  %v5169_v48 = vld [vmem:[%s8119_s11 + $0x29] sm:$0x7f]  ;;  %v2779_v63 = vsel %vm8496_vm1, %v5160_v23, %v5163_v39 }
 0x488   : >> { %5162 = vst [vmem:[%s8004_s4 + $0x1] sm:$0x1] %v2770_v60  ;;  %v2788_v2 = vsel %vm8497_vm7, %v5164_v49, %v5166_v62  ;;  %v2797_v4 = vsel %vm8498_vm9, %v5167_v55, %v5169_v48  ;;  %v5170_v46 = vld [vmem:[%s8119_s11 + $0x28] ss:$0 sm:$0xff]  ;;  %v5172_v50 = vld [vmem:[%s8119_s11 + $0x21] sm:$0x7f]  ;;  %vm8502_vm12 = vmmov %vm8496_vm1 }
 0x489   : >> { %v5173_v42 = vld [vmem:[%s8119_s11 + $0x20] ss:$0 sm:$0xff]  ;;  %5165 = vst [vmem:[%s8119_s11 + $0x38] sm:$0xff] %v2779_v63  ;;  %v2806_v14 = vsel %vm8499_vm8, %v5170_v46, %v5172_v50  ;;  %v5175_v17 = vld [vmem:[%s8119_s11 + $0x19] sm:$0x7f]  ;;  %5168 = vst [vmem:[%s8119_s11 + $0x30] sm:$0xff] %v2788_v2 }
 0x48a   : >> { %v5176_v1 = vld [vmem:[%s8119_s11 + $0x18] ss:$0 sm:$0xff]  ;;  %v5178_v0 = vld [vmem:[%s8119_s11 + $0x11] sm:$0x7f]  ;;  %5171 = vst [vmem:[%s8119_s11 + $0x28] sm:$0xff] %v2797_v4  ;;  %v2815_v12 = vsel %vm8500_vm2, %v5173_v42, %v5175_v17  ;;  %5174 = vst [vmem:[%s8119_s11 + $0x20] sm:$0xff] %v2806_v14 }
 0x48b   : >> { %v2824_v61 = vsel %vm8501_vm10, %v5176_v1, %v5178_v0  ;;  %v5179_v41 = vld [vmem:[%s8119_s11 + $0x10] ss:$0 sm:$0xff]  ;;  %v5181_v10 = vld [vmem:[%s8119_s11 + $0x9] sm:$0x7f]  ;;  %v5182_v54 = vld [vmem:[%s8119_s11 + $0x8] ss:$0 sm:$0xff] }
 0x48c   : >> { %v2833_v43 = vsel %vm8502_vm12, %v5179_v41, %v5181_v10  ;;  %v5184_v13 = vld [vmem:[%s8119_s11 + $0x1] sm:$0x7f]  ;;  %5177 = vst [vmem:[%s8119_s11 + $0x18] sm:$0xff] %v2815_v12  ;;  %5180 = vst [vmem:[%s8119_s11 + $0x10] sm:$0xff] %v2824_v61  ;;  %v2934_v20 = vld [vmem:[%s8121_s10] ss:$0 sm:$0xff] }
 0x48d   : >> { %v5209_v3 = vld [vmem:[%s8121_s10 + $0x39] sm:$0x7f]  ;;  %vm8503_vm13 = vmmov %vm8496_vm1  ;;  %5183 = vst [vmem:[%s8119_s11 + $0x8] sm:$0xff] %v2833_v43  ;;  %v5210_v24 = vld [vmem:[%s8121_s10 + $0x38] ss:$0 sm:$0xff] }
 0x48e   : >> { %v2841_v22 = vsel %vm8503_vm13, %v5182_v54, %v5184_v13  ;;  %5208 = vst [vmem:[%s8011_s9 + $0x1] sm:$0x1] %v2934_v20  ;;  %vm8504_vm14 = vmmov %vm8496_vm1  ;;  %v5212_v6 = vld [vmem:[%s8121_s10 + $0x31] sm:$0x7f]  ;;  %v5213_v25 = vld [vmem:[%s8121_s10 + $0x30] ss:$0 sm:$0xff] }
 0x48f   : >> { %v2943_v23 = vsel %vm8504_vm14, %v5206_v44, %v5209_v3  ;;  %2843 = vst [vmem:[%s8119_s11] sm:$0xff] %v2841_v22  ;;  %vm8505_vm11 = vmmov %vm8496_vm1  ;;  %v5215_v27 = vld [vmem:[%s8121_s10 + $0x29] sm:$0x7f]  ;;  %v5216_v28 = vld [vmem:[%s8121_s10 + $0x28] ss:$0 sm:$0xff]  ;;  %s894_s11 = sadd.s32 1, %s8512_s5  }
 0x490   : >> { %5211 = vst [vmem:[%s8121_s10 + $0x38] sm:$0xff] %v2943_v23  ;;  %v2952_v26 = vsel %vm8505_vm11, %v5210_v24, %v5212_v6  ;;  %v5218_v45 = vld [vmem:[%s8121_s10 + $0x21] sm:$0x7f]  ;;  %vm8506_vm15 = vmmov %vm8496_vm1  ;;  %v5219_v30 = vld [vmem:[%s8121_s10 + $0x20] ss:$0 sm:$0xff]  ;;  %p891_p9 = scmp.ge.s32.totalorder %s894_s11, 127  }
 0x491   : >> { %5214 = vst [vmem:[%s8121_s10 + $0x30] sm:$0xff] %v2952_v26  ;;  %v2961_v7 = vsel %vm8506_vm15, %v5213_v25, %v5215_v27  ;;  %vm8507_vm0 = vmmov %vm8496_vm1  ;;  %v5221_v31 = vld [vmem:[%s8121_s10 + $0x19] sm:$0x7f]  ;;  %v5222_v32 = vld [vmem:[%s8121_s10 + $0x18] ss:$0 sm:$0xff]  ;;  %s575_s14 = smov (%p891_p9), [#allocation12]  ;;  %v660_v15 = vmov (%p891_p9), %v6347_v15  ;;  %v663_v16 = vmov (%p891_p9), %v6349_v16 }
 0x492   : >> { %v2970_v52 = vsel %vm8507_vm0, %v5216_v28, %v5218_v45  ;;  %5217 = vst [vmem:[%s8121_s10 + $0x28] sm:$0xff] %v2961_v7  ;;  %vm8508_vm3 = vmmov %vm8507_vm0  ;;  %v5224_v34 = vld [vmem:[%s8121_s10 + $0x11] sm:$0x7f]  ;;  %v5225_v59 = vld [vmem:[%s8121_s10 + $0x10] ss:$0 sm:$0xff]  ;;  %893 = sbr.rel (!%p891_p9) target bundleno = 406 (0x196), region = 918  ;;  %v574_v16 = vmov (%p891_p9), %v6349_v16 }
 0x493   : >> { %5220 = vst [vmem:[%s8121_s10 + $0x20] sm:$0xff] %v2970_v52  ;;  %v2979_v33 = vsel %vm8508_vm3, %v5219_v30, %v5221_v31  ;;  %v5227_v5 = vld [vmem:[%s8121_s10 + $0x9] sm:$0x7f]  ;;  %vm8509_vm4 = vmmov %vm8507_vm0  ;;  %v5228_v11 = vld [vmem:[%s8121_s10 + $0x8] ss:$0 sm:$0xff]  ;;  %vm8514_vm1 = vcmp.lt.s32.totalorder (%p891_p9), %v6347_v15, 64  ;;  %v8247_v15 = vmov (%p891_p9), %v6347_v15 }
 0x494   : >> { %5223 = vst [vmem:[%s8121_s10 + $0x18] sm:$0xff] %v2979_v33  ;;  %v2988_v9 = vsel %vm8509_vm4, %v5222_v32, %v5224_v34  ;;  %vm8510_vm5 = vmmov %vm8507_vm0  ;;  %v5230_v18 = vld [vmem:[%s8121_s10 + $0x1] sm:$0x7f]  ;;  %v5393_v56 = vld [vmem:[%s575_s14 + $0x8] sm:$0xff] (%p891_p9)  ;;  %s8223_s15 = smov (%p891_p9), [#allocation13]  ;;  %v593_v24 = vadd.s32 (%p891_p9), 8, %v574_v16  ;;  %vm586_vm4 = vcmp.eq.s32.totalorder (%p891_p9), %v574_v16, %v8247_v15 }
 0x495   : >> { %v2997_v8 = vsel %vm8510_vm5, %v5225_v59, %v5227_v5  ;;  %5226 = vst [vmem:[%s8121_s10 + $0x10] sm:$0xff] %v2988_v9  ;;  %vm8511_vm6 = vmmov %vm8507_vm0  ;;  %v581_v19 = vld [vmem:[%s575_s14] sm:$0xff] (%p891_p9)  ;;  %v5394_v21 = vld [vmem:[%s575_s14 + $0x10] sm:$0xff] (%p891_p9)  ;;  %v603_v31 = vadd.s32 (%p891_p9), 16, %v574_v16  ;;  %v613_v59 = vadd.s32 (%p891_p9), 24, %v574_v16  ;;  %v623_v5 = vadd.s32 (%p891_p9), 32, %v574_v16 }
 0x496   : >> { %5229 = vst [vmem:[%s8121_s10 + $0x8] sm:$0xff] %v2997_v8  ;;  %v3005_v47 = vsel %vm8511_vm6, %v5228_v11, %v5230_v18  ;;  %v582_v35 = vsel (%p891_p9), %vm8514_vm1, %v581_v19, 0.0  ;;  %vm8515_vm7 = vmmov (%p891_p9), %vm8514_vm1  ;;  %v5395_v40 = vld [vmem:[%s575_s14 + $0x18] sm:$0xff] (%p891_p9)  ;;  %v5396_v29 = vld [vmem:[%s575_s14 + $0x20] sm:$0xff] (%p891_p9)  ;;  %vm594_vm6 = vcmp.eq.s32.totalorder (%p891_p9), %v593_v24, %v8247_v15  ;;  %s8275_s16 = smov (%p891_p9), [#allocation14]  ;;  %v633_v8 = vadd.s32 (%p891_p9), 40, %v574_v16 }
 0x497   : >> { %3007 = vst [vmem:[%s8121_s10] sm:$0xff] %v3005_v47  ;;  %s8513_s10 = sld [smem:[#allocation25_spill]] (%p891_p9)  ;;  %v590_v37 = vsel (%p891_p9), %vm8515_vm7, %v5393_v56, 0.0  ;;  %vm8516_vm9 = vmmov (%p891_p9), %vm8514_vm1  ;;  %v583_v36 = vmul.f32 (%p891_p9), %v582_v35, %v582_v35  ;;  %v5397_v57 = vld [vmem:[%s575_s14 + $0x28] sm:$0xff] (%p891_p9)  ;;  %v5398_v49 = vld [vmem:[%s575_s14 + $0x30] sm:$0xff] (%p891_p9)  ;;  %v643_v11 = vadd.s32 (%p891_p9), 48, %v574_v16  ;;  %vm614_vm7 = vcmp.eq.s32.totalorder (%p891_p9), %v613_v59, %v8247_v15  ;;  %s8319_s17 = smov (%p891_p9), [#allocation15] }
 0x498   : > { %v600_v38 = vsel (%p891_p9), %vm8516_vm9, %v5394_v21, 0.0  ;;  %v591_v44 = vmul.f32 (%p891_p9), %v590_v37, %v590_v37  ;;  %vm8517_vm8 = vmmov (%p891_p9), %vm8514_vm1  ;;  %v5399_v63 = vld [vmem:[%s575_s14 + $0x38] sm:$0xff] (%p891_p9)  ;;  %v670_v50 = vld [vmem:[%s8223_s15] sm:$0xff] (%p891_p9)  ;;  %vm624_vm9 = vcmp.eq.s32.totalorder (%p891_p9), %v623_v5, %v8247_v15 }
 0x499   : > { %v601_v53 = vmul.f32 %v600_v38, %v600_v38  ;;  %v610_v51 = vsel %vm8517_vm8, %v5395_v40, 0.0  ;;  %vm8518_vm2 = vmmov %vm8514_vm1  ;;  %v5400_v1 = vld [vmem:[%s8223_s15 + $0x8] sm:$0xff]  ;;  %v5401_v41 = vld [vmem:[%s8223_s15 + $0x10] sm:$0xff]  ;;  %v587_v30 = vsel %vm586_vm4, 0.0, %v583_v36 }
 0x49a   : > { %v620_v58 = vsel %vm8518_vm2, %v5396_v29, 0.0  ;;  %v597_v60 = vadd.f32 %v591_v44, %v583_v36  ;;  %v611_v39 = vmul.f32 %v610_v51, %v610_v51  ;;  %vm8519_vm10 = vmmov %vm8514_vm1  ;;  %v5402_v10 = vld [vmem:[%s8223_s15 + $0x18] sm:$0xff]  ;;  %v5403_v43 = vld [vmem:[%s8223_s15 + $0x20] sm:$0xff]  ;;  %v595_v34 = vsel %vm594_vm6, 0.0, %v591_v44 }
 0x49b   : > { %v630_v62 = vsel %vm8519_vm10, %v5397_v57, 0.0  ;;  %v621_v48 = vmul.f32 %v620_v58, %v620_v58  ;;  %vm8520_vm12 = vmmov %vm8514_vm1  ;;  %v5404_v23 = vld [vmem:[%s8223_s15 + $0x28] sm:$0xff]  ;;  %v5405_v33 = vld [vmem:[%s8223_s15 + $0x30] sm:$0xff]  ;;  %v596_v9 = vadd.f32 %v595_v34, %v587_v30  ;;  %vm634_vm2 = vcmp.eq.s32.totalorder %v633_v8, %v8247_v15 }
 0x49c   : > { %v607_v55 = vadd.f32 %v601_v53, %v597_v60  ;;  %v640_v2 = vsel %vm8520_vm12, %v5398_v49, 0.0  ;;  %v8227_v46 = vmul.f32 %v630_v62, %v630_v62  ;;  %vm8521_vm13 = vmmov %vm8514_vm1  ;;  %v5406_v47 = vld [vmem:[%s8223_s15 + $0x38] sm:$0xff]  ;;  %v615_v35 = vsel %vm614_vm7, 0.0, %v611_v39  ;;  %v729_v40 = vld [vmem:[%s8275_s16] sm:$0xff] }
 0x49d   : > { %s3602_s13 = sadd.s32 1, %s8513_s10   ;;  %v650_v42 = vsel %vm8521_vm13, %v5399_v63, 0.0  ;;  %v8232_v17 = vmul.f32 %v640_v2, %v640_v2  ;;  %vm8522_vm14 = vmmov %vm8514_vm1  ;;  %v625_v29 = vsel %vm624_vm9, 0.0, %v621_v48  ;;  %v653_v36 = vadd.s32 56, %v574_v16  ;;  %v5407_v58 = vld [vmem:[%s8275_s16 + $0x8] sm:$0xff] }
 0x49e   : > { %v617_v4 = vadd.f32 %v611_v39, %v607_v55  ;;  %v671_v0 = vsel %vm8522_vm14, %v670_v50, 0.0  ;;  %v8238_v61 = vmul.f32 %v650_v42, %v650_v42  ;;  %vm8523_vm11 = vmmov %vm8514_vm1  ;;  %vm644_vm12 = vcmp.eq.s32.totalorder %v643_v11, %v8247_v15  ;;  %v5409_v42 = vld [vmem:[%s8275_s16 + $0x18] sm:$0xff]  ;;  %v788_v59 = vld [vmem:[%s8319_s17] sm:$0xff]  ;;  %p887_p10 = scmp.ge.s32.totalorder %s3602_s13, 15  ;;  %s8545_s10 = smov %s3602_s13 }
 0x49f   : > { %v677_v54 = vsel %vm8523_vm11, %v5400_v1, 0.0  ;;  %v8250_v20 = vmul.f32 %v671_v0, %v671_v0  ;;  %vm8524_vm15 = vmmov %vm8514_vm1  ;;  %v635_v60 = vsel %vm634_vm2, 0.0, %v8227_v46  ;;  %vm654_vm14 = vcmp.eq.s32.totalorder %v653_v36, %v8247_v15  ;;  %v5414_v11 = vld [vmem:[%s8319_s17 + $0x8] sm:$0xff] }
 0x4a0   : > { %v627_v14 = vadd.f32 %v621_v48, %v617_v4  ;;  %v683_v3 = vsel %vm8524_vm15, %v5401_v41, 0.0  ;;  %vm8525_vm0 = vmmov %vm8514_vm1  ;;  %v8258_v25 = vmul.f32 %v677_v54, %v677_v54  ;;  %vm604_vm1 = vcmp.eq.s32.totalorder %v603_v31, %v8247_v15  ;;  %v5408_v48 = vld [vmem:[%s8275_s16 + $0x10] sm:$0xff]  ;;  %v5410_v41 = vld [vmem:[%s8275_s16 + $0x20] sm:$0xff] }
 0x4a1   : > { %v689_v22 = vsel %vm8525_vm0, %v5402_v10, 0.0  ;;  %vm8526_vm3 = vmmov %vm8525_vm0  ;;  %v8264_v28 = vmul.f32 %v683_v3, %v683_v3  ;;  %v605_v19 = vsel %vm604_vm1, 0.0, %v601_v53  ;;  %v645_v63 = vsel %vm644_vm12, 0.0, %v8232_v17  ;;  %v5413_v31 = vld [vmem:[%s8275_s16 + $0x38] sm:$0xff] }
 0x4a2   : > { %v637_v12 = vadd.f32 %v8227_v46, %v627_v14  ;;  %v695_v26 = vsel %vm8526_vm3, %v5403_v43, 0.0  ;;  %v8266_v45 = vmul.f32 %v689_v22, %v689_v22  ;;  %vm8527_vm5 = vmmov %vm8525_vm0  ;;  %v606_v21 = vadd.f32 %v605_v19, %v596_v9 }
 0x4a3   : > { %v701_v7 = vsel %vm8527_vm5, %v5404_v23, 0.0  ;;  %v8270_v52 = vmul.f32 %v695_v26, %v695_v26  ;;  %vm8528_vm8 = vmmov %vm8525_vm0  ;;  %v655_v14 = vsel %vm654_vm14, 0.0, %v8238_v61  ;;  %v719_v15 = vmov %v6347_v15 }
 0x4a4   : > { %v647_v13 = vadd.f32 %v8232_v17, %v637_v12  ;;  %v707_v56 = vsel %vm8528_vm8, %v5405_v33, 0.0  ;;  %v8286_v38 = vmul.f32 %v701_v7, %v701_v7  ;;  %vm8529_vm10 = vmmov %vm8525_vm0  ;;  %v616_v53 = vadd.f32 %v615_v35, %v606_v21 }
 0x4a5   : > { %v713_v44 = vsel %vm8529_vm10, %v5406_v47, 0.0  ;;  %v708_v57 = vmul.f32 %v707_v56, %v707_v56  ;;  %vm8530_vm13 = vmmov %vm8525_vm0  ;;  %v722_v16 = vmov %v6349_v16  ;;  %v748_v10 = vsel %vm8525_vm0, %v5409_v42, 0.0  ;;  %v5415_v56 = vld [vmem:[%s8319_s17 + $0x10] sm:$0xff] }
 0x4a6   : > { %v657_v6 = vadd.f32 %v8238_v61, %v647_v13  ;;  %v730_v39 = vsel %vm8530_vm13, %v729_v40, 0.0  ;;  %v626_v49 = vadd.f32 %v625_v29, %v616_v53  ;;  %v714_v55 = vmul.f32 %v713_v44, %v713_v44  ;;  %vm8531_vm11 = vmmov %vm8525_vm0  ;;  %v5411_v61 = vld [vmem:[%s8275_s16 + $0x28] sm:$0xff]  ;;  %v5416_v40 = vld [vmem:[%s8319_s17 + $0x18] sm:$0xff] }
 0x4a7   : > { %v736_v2 = vsel %vm8531_vm11, %v5407_v58, 0.0  ;;  %v731_v46 = vmul.f32 %v730_v39, %v730_v39  ;;  %vm8532_vm15 = vmmov %vm8525_vm0  ;;  %v749_v24 = vmul.f32 %v748_v10, %v748_v10  ;;  %v781_v16 = vmov %v6349_v16 }
 0x4a8   : > { %v674_v27 = vadd.f32 %v8250_v20, %v657_v6  ;;  %v636_v4 = vadd.f32 %v635_v60, %v626_v49  ;;  %v742_v1 = vsel %vm8532_vm15, %v5408_v48, 0.0  ;;  %v737_v12 = vmul.f32 %v736_v2, %v736_v2  ;;  %vm8533_vm3 = vmmov %vm8525_vm0  ;;  %v5412_v6 = vld [vmem:[%s8275_s16 + $0x30] sm:$0xff]  ;;  %v5418_v49 = vld [vmem:[%s8319_s17 + $0x28] sm:$0xff] }
 0x4a9   : > { %v743_v13 = vmul.f32 %v742_v1, %v742_v1  ;;  %v754_v3 = vsel %vm8533_vm3, %v5410_v41, 0.0  ;;  %vm8534_vm4 = vmmov %vm8525_vm0  ;;  %v5419_v2 = vld [vmem:[%s8319_s17 + $0x30] sm:$0xff]  ;;  %v778_v15 = vmov %v6347_v15 }
 0x4aa   : > { %v680_v32 = vadd.f32 %v8258_v25, %v674_v27  ;;  %v646_v0 = vadd.f32 %v645_v63, %v636_v4  ;;  %v760_v26 = vsel %vm8534_vm4, %v5411_v61, 0.0  ;;  %v755_v30 = vmul.f32 %v754_v3, %v754_v3  ;;  %vm8535_vm5 = vmmov %vm8525_vm0 }
 0x4ab   : > { %v761_v34 = vmul.f32 %v760_v26, %v760_v26  ;;  %vm8536_vm6 = vmmov %vm8525_vm0  ;;  %vm793_vm14 = vcmp.eq.s32.totalorder %v781_v16, %v778_v15  ;;  %v822_v26 = vadd.s32 24, %v781_v16 }
 0x4ac   : > { %v686_v18 = vadd.f32 %v8264_v28, %v680_v32  ;;  %v656_v54 = vadd.f32 %v655_v14, %v646_v0  ;;  %v766_v32 = vsel %vm8535_vm5, %v5412_v6, 0.0  ;;  %v772_v5 = vsel %vm8536_vm6, %v5413_v31, 0.0  ;;  %vm8537_vm1 = vmmov %vm8525_vm0  ;;  %v5420_v14 = vld [vmem:[%s8319_s17 + $0x38] sm:$0xff] }
 0x4ad   : > { %vm8538_vm7 = vmmov %vm8525_vm0 }
 0x4ae   : > { %v692_v37 = vadd.f32 %v8266_v45, %v686_v18  ;;  %v673_v22 = vadd.f32 %v8250_v20, %v656_v54  ;;  %v789_v18 = vsel %vm8537_vm1, %v788_v59, 0.0  ;;  %v799_v21 = vsel %vm8538_vm7, %v5414_v11, 0.0  ;;  %vm8539_vm9 = vmmov %vm8525_vm0 }
 0x4af   : > { %v809_v29 = vsel %vm8539_vm9, %v5415_v56, 0.0  ;;  %v800_v53 = vmul.f32 %v799_v21, %v799_v21  ;;  %vm8540_vm8 = vmmov %vm8525_vm0 }
 0x4b0   : > { %v698_v51 = vadd.f32 %v8270_v52, %v692_v37  ;;  %v679_v27 = vadd.f32 %v8258_v25, %v673_v22  ;;  %v767_v25 = vmul.f32 %v766_v32, %v766_v32  ;;  %v810_v39 = vmul.f32 %v809_v29, %v809_v29  ;;  %vm8541_vm2 = vmmov %vm8525_vm0 }
 0x4b1   : > { %vm8542_vm10 = vmmov %vm8525_vm0 }
 0x4b2   : > { %v704_v62 = vadd.f32 %v8286_v38, %v698_v51  ;;  %v685_v20 = vadd.f32 %v8264_v28, %v679_v27  ;;  %v773_v28 = vmul.f32 %v772_v5, %v772_v5  ;;  %v819_v51 = vsel %vm8540_vm8, %v5416_v40, 0.0  ;;  %vm8543_vm12 = vmmov %vm8525_vm0 }
 0x4b3   : > { %v820_v63 = vmul.f32 %v819_v51, %v819_v51  ;;  %vm8544_vm13 = vmmov %vm8525_vm0  ;;  %vm823_vm0 = vcmp.eq.s32.totalorder %v822_v26, %v778_v15 }
 0x4b4   : > { %v710_v50 = vadd.f32 %v708_v57, %v704_v62  ;;  %v691_v9 = vadd.f32 %v8266_v45, %v685_v20  ;;  %v790_v45 = vmul.f32 %v789_v18, %v789_v18 }
 0x4b5   : > { %v824_v5 = vsel %vm823_vm0, 0.0, %v820_v63 }
 0x4b6   : > { %v716_v17 = vadd.f32 %v714_v55, %v710_v50  ;;  %v697_v47 = vadd.f32 %v8270_v52, %v691_v9  ;;  %v5417_v52 = vld [vmem:[%s8319_s17 + $0x20] sm:$0xff] }
 0x4b8   : > { %v733_v43 = vadd.f32 %v731_v46, %v716_v17  ;;  %v703_v35 = vadd.f32 %v8286_v38, %v697_v47  ;;  %v829_v38 = vsel %vm8541_vm2, %v5417_v52, 0.0 }
 0x4b9   : > { %v830_v42 = vmul.f32 %v829_v38, %v829_v38 }
 0x4ba   : > { %v739_v23 = vadd.f32 %v737_v12, %v733_v43  ;;  %v709_v36 = vadd.f32 %v708_v57, %v703_v35  ;;  %v839_v57 = vsel %vm8542_vm10, %v5418_v49, 0.0  ;;  %v802_v43 = vadd.s32 8, %v781_v16 }
 0x4bb   : > { %v840_v17 = vmul.f32 %v839_v57, %v839_v57 }
 0x4bc   : > { %v745_v7 = vadd.f32 %v743_v13, %v739_v23  ;;  %v715_v58 = vadd.f32 %v714_v55, %v709_v36  ;;  %v849_v55 = vsel %vm8543_vm12, %v5419_v2, 0.0  ;;  %v812_v23 = vadd.s32 16, %v781_v16 }
 0x4bd   : > { %v850_v54 = vmul.f32 %v849_v55, %v849_v55  ;;  %vm803_vm11 = vcmp.eq.s32.totalorder %v802_v43, %v778_v15 }
 0x4be   : > { %v751_v33 = vadd.f32 %v749_v24, %v745_v7  ;;  %v732_v62 = vadd.f32 %v731_v46, %v715_v58  ;;  %v859_v46 = vsel %vm8544_vm13, %v5420_v14, 0.0  ;;  %v794_v7 = vsel %vm793_vm14, 0.0, %v790_v45 }
 0x4bf   : > { %v860_v3 = vmul.f32 %v859_v46, %v859_v46  ;;  %vm813_vm15 = vcmp.eq.s32.totalorder %v812_v23, %v778_v15  ;;  %v804_v32 = vsel %vm803_vm11, 0.0, %v800_v53 }
 0x4c0   : > { %v757_v8 = vadd.f32 %v755_v30, %v751_v33  ;;  %v738_v4 = vadd.f32 %v737_v12, %v732_v62  ;;  %v814_v33 = vsel %vm813_vm15, 0.0, %v810_v39 }
 0x4c2   : > { %v763_v19 = vadd.f32 %v761_v34, %v757_v8  ;;  %v744_v1 = vadd.f32 %v743_v13, %v738_v4  ;;  %v862_v8 = vadd.s32 56, %v781_v16 }
 0x4c4   : > { %v769_v37 = vadd.f32 %v767_v25, %v763_v19  ;;  %v750_v41 = vadd.f32 %v749_v24, %v744_v1  ;;  %v832_v24 = vadd.s32 32, %v781_v16  ;;  %vm863_vm6 = vcmp.eq.s32.totalorder %v862_v8, %v778_v15 }
 0x4c5   : > { %v864_v56 = vsel %vm863_vm6, 0.0, %v860_v3 }
 0x4c6   : > { %v775_v44 = vadd.f32 %v773_v28, %v769_v37  ;;  %v756_v12 = vadd.f32 %v755_v30, %v750_v41  ;;  %v842_v30 = vadd.s32 40, %v781_v16  ;;  %vm833_vm3 = vcmp.eq.s32.totalorder %v832_v24, %v778_v15 }
 0x4c8   : > { %v796_v60 = vadd.f32 %v790_v45, %v775_v44  ;;  %v762_v22 = vadd.f32 %v761_v34, %v756_v12  ;;  %v852_v34 = vadd.s32 48, %v781_v16  ;;  %vm843_vm4 = vcmp.eq.s32.totalorder %v842_v30, %v778_v15 }
 0x4c9   : > { %v844_v18 = vsel %vm843_vm4, 0.0, %v840_v17 }
 0x4ca   : > { %v806_v48 = vadd.f32 %v800_v53, %v796_v60  ;;  %v768_v6 = vadd.f32 %v767_v25, %v762_v22  ;;  %v834_v25 = vsel %vm833_vm3, 0.0, %v830_v42  ;;  %vm853_vm5 = vcmp.eq.s32.totalorder %v852_v34, %v778_v15 }
 0x4cb   : > { %v854_v19 = vsel %vm853_vm5, 0.0, %v850_v54 }
 0x4cc   : > { %v816_v50 = vadd.f32 %v810_v39, %v806_v48  ;;  %v774_v31 = vadd.f32 %v773_v28, %v768_v6 }
 0x4ce   : > { %v826_v0 = vadd.f32 %v820_v63, %v816_v50  ;;  %v795_v20 = vadd.f32 %v794_v7, %v774_v31 }
 0x4d0   : > { %v836_v10 = vadd.f32 %v830_v42, %v826_v0  ;;  %v805_v59 = vadd.f32 %v804_v32, %v795_v20 }
 0x4d2   : > { %v846_v61 = vadd.f32 %v840_v17, %v836_v10  ;;  %v815_v9 = vadd.f32 %v814_v33, %v805_v59 }
 0x4d4   : > { %v856_v13 = vadd.f32 %v850_v54, %v846_v61  ;;  %v825_v11 = vadd.f32 %v824_v5, %v815_v9 }
 0x4d6   : > { %v866_v27 = vadd.f32 %v860_v3, %v856_v13  ;;  %v835_v47 = vadd.f32 %v834_v25, %v825_v11 }
 0x4d8   : > { %867 = vadd.xlane.f32.xlu0 %v866_v27  ;;  %v845_v28 = vadd.f32 %v844_v18, %v835_v47 }
 0x4da   : > { %v855_v21 = vadd.f32 %v854_v19, %v845_v28 }
 0x4dc   : > { %v865_v35 = vadd.f32 %v864_v56, %v855_v21 }
 0x4de   : > { %875 = vadd.xlane.f32.xlu0 %v865_v35 }
 0x565   : > { %v868_v37 = vpop.xlane.xlu0 %867 }
 0x566   : > { %v869_v45 = vrot.slane %v868_v37, 4 }
 0x568   : > { %v870_v40 = vadd.f32 %v869_v45, %v868_v37 }
 0x56a   : > { %v871_v29 = vrot.slane %v870_v40, 2 }
 0x56b   : > { %v876_v36 = vpop.xlane.xlu0 %875 }
 0x56c   : > { %v877_v44 = vrot.slane %v876_v36, 4  ;;  %v872_v52 = vadd.f32 %v871_v29, %v870_v40 }
 0x56e   : > { %v878_v53 = vadd.f32 %v877_v44, %v876_v36  ;;  %v873_v60 = vrot.slane %v872_v52, 1 }
 0x570   : > { %v879_v51 = vrot.slane %v878_v53, 2  ;;  %v874_v38 = vadd.f32 %v873_v60, %v872_v52 }
 0x572   : > { %v880_v58 = vadd.f32 %v879_v51, %v878_v53 }
 0x574   : > { %v881_v39 = vrot.slane %v880_v58, 1 }
 0x576   : > { %v882_v49 = vadd.f32 %v881_v39, %v880_v58 }
 0x578   : > { %5461 = vpush %v882_v49 }
 0x579   : > { %5463 = vpush %v874_v38 }
 0x5a9   : > { %s5462_s2 = spop %5461 }
 0x5aa   : > { %s5464_s18 = spop %5463 }
 0x5ab   : > { %s885_s19 = smul.f32 1e-10, %s5464_s18 }
 0x5ad   : > { %p886_p11 = scmp.le.f32.partialorder %s5462_s2, %s885_s19 }
 0x5af   : > { %p888_p12 = por %p887_p10, %p886_p11 }
 0x5b1   :  { %3604 = sbr.rel (!%p888_p12) target bundleno = 405 (0x195), region = 929 }
 0x5b8 PF:  { %s8363_s20 = smov [#allocation12]  ;;  %v3609_v15 = vmov %v6347_v15  ;;  %v3612_v16 = vmov %v6349_v16  ;;  %s8376_s21 = smov [#allocation15] }
 0x5b9   :  { %v8368_v15 = vmov %v6347_v15  ;;  %v3674_v16 = vmov %v6349_v16  ;;  %v3613_v62 = vld [vmem:[%s8363_s20] sm:$0xff]  ;;  %vm3616_vm1 = vcmp.eq.s32.totalorder %v3612_v16, %v3609_v15  ;;  %v5421_v48 = vld [vmem:[%s8363_s20 + $0x8] sm:$0xff]  ;;  %v3621_v63 = vadd.s32 8, %v3612_v16  ;;  %v5422_v50 = vld [vmem:[%s8363_s20 + $0x10] sm:$0xff]  ;;  %s3606_s3 = smov [#allocation4]  ;;  %s3668_s22 = smov [#allocation6] }
 0x5ba   :  { %v3627_v2 = vadd.s32 16, %v3612_v16  ;;  %v3633_v57 = vadd.s32 24, %v3612_v16  ;;  %v3617_v4 = vsel %vm3616_vm1, %v3613_v62, 0.0  ;;  %v3639_v42 = vadd.s32 32, %v3612_v16  ;;  %v5423_v55 = vld [vmem:[%s8363_s20 + $0x18] sm:$0xff]  ;;  %v5424_v17 = vld [vmem:[%s8363_s20 + $0x20] sm:$0xff] }
 0x5bb   :  { %v3645_v14 = vadd.s32 40, %v3612_v16  ;;  %vm3678_vm7 = vcmp.eq.s32.totalorder %v3674_v16, %v8368_v15  ;;  %vm3622_vm9 = vcmp.eq.s32.totalorder %v3621_v63, %v3609_v15  ;;  %v3651_v1 = vadd.s32 48, %v3612_v16  ;;  %v3675_v41 = vld [vmem:[%s8376_s21] sm:$0xff]  ;;  %v5425_v54 = vld [vmem:[%s8363_s20 + $0x28] sm:$0xff]  ;;  %v5426_v22 = vld [vmem:[%s8363_s20 + $0x30] sm:$0xff]  ;;  %s8546_s24 = sld [smem:[#allocation30_spill]] }
 0x5bc   :  { %vm3628_vm8 = vcmp.eq.s32.totalorder %v3627_v2, %v3609_v15  ;;  %vm3634_vm2 = vcmp.eq.s32.totalorder %v3633_v57, %v3609_v15  ;;  %v3623_v0 = vsel %vm3622_vm9, %v5421_v48, %v3617_v4  ;;  %vm3640_vm10 = vcmp.eq.s32.totalorder %v3639_v42, %v3609_v15  ;;  %v5428_v43 = vld [vmem:[%s8376_s21 + $0x8] sm:$0xff]  ;;  %v5429_v23 = vld [vmem:[%s8376_s21 + $0x10] sm:$0xff]  ;;  %v5427_v27 = vld [vmem:[%s8363_s20 + $0x38] sm:$0xff]  ;;  %s8547_s27 = sld [smem:[#allocation31_spill]]  ;;  %s8548_s30 = sld [smem:[#allocation32_spill]] }
 0x5bd   :  { %vm3646_vm12 = vcmp.eq.s32.totalorder %v3645_v14, %v3609_v15  ;;  %v3657_v46 = vadd.s32 56, %v3612_v16  ;;  %v3629_v10 = vsel %vm3628_vm8, %v5422_v50, %v3623_v0  ;;  %vm3652_vm13 = vcmp.eq.s32.totalorder %v3651_v1, %v3609_v15  ;;  %v5430_v7 = vld [vmem:[%s8376_s21 + $0x18] sm:$0xff]  ;;  %v5431_v30 = vld [vmem:[%s8376_s21 + $0x20] sm:$0xff]  ;;  %v5432_v34 = vld [vmem:[%s8376_s21 + $0x28] sm:$0xff]  ;;  %s6220_s12 = smov [#allocation8]  }
 0x5be   :  { %v3679_v12 = vsel %vm3678_vm7, %v3675_v41, 0.0  ;;  %v3683_v61 = vadd.s32 8, %v3674_v16  ;;  %v3635_v3 = vsel %vm3634_vm2, %v5423_v55, %v3629_v10  ;;  %v3689_v13 = vadd.s32 16, %v3674_v16  ;;  %v5433_v8 = vld [vmem:[%s8376_s21 + $0x30] sm:$0xff]  ;;  %v5434_v19 = vld [vmem:[%s8376_s21 + $0x38] sm:$0xff] }
 0x5bf   :  { %vm3658_vm14 = vcmp.eq.s32.totalorder %v3657_v46, %v3609_v15  ;;  %v3695_v6 = vadd.s32 24, %v3674_v16  ;;  %v3641_v26 = vsel %vm3640_vm10, %v5424_v17, %v3635_v3  ;;  %v3701_v31 = vadd.s32 32, %v3674_v16 }
 0x5c0   :  { %vm3684_vm11 = vcmp.eq.s32.totalorder %v3683_v61, %v8368_v15  ;;  %v3707_v24 = vadd.s32 40, %v3674_v16  ;;  %v3647_v32 = vsel %vm3646_vm12, %v5425_v54, %v3641_v26  ;;  %vm3690_vm15 = vcmp.eq.s32.totalorder %v3689_v13, %v8368_v15 }
 0x5c1   :  { %v3685_v20 = vsel %vm3684_vm11, %v5428_v43, %v3679_v12  ;;  %vm3696_vm0 = vcmp.eq.s32.totalorder %v3695_v6, %v8368_v15  ;;  %v3653_v33 = vsel %vm3652_vm13, %v5426_v22, %v3647_v32  ;;  %vm3702_vm3 = vcmp.eq.s32.totalorder %v3701_v31, %v8368_v15 }
 0x5c2   :  { %v3691_v59 = vsel %vm3690_vm15, %v5429_v23, %v3685_v20  ;;  %vm3708_vm4 = vcmp.eq.s32.totalorder %v3707_v24, %v8368_v15  ;;  %v3659_v5 = vsel %vm3658_vm14, %v5427_v27, %v3653_v33  ;;  %v3713_v25 = vadd.s32 48, %v3674_v16  ;;  %s6216_s1 = smov %s8548_s30  }
 0x5c3   :  { %v3697_v9 = vsel %vm3696_vm0, %v5430_v7, %v3691_v59  ;;  %v3719_v11 = vadd.s32 56, %v3674_v16  ;;  %v3660_v18 = vrot.slane %v3659_v5, 4 }
 0x5c4   :  { %v3703_v47 = vsel %vm3702_vm3, %v5431_v30, %v3697_v9  ;;  %vm3714_vm5 = vcmp.eq.s32.totalorder %v3713_v25, %v8368_v15 }
 0x5c5   :  { %v3709_v28 = vsel %vm3708_vm4, %v5432_v34, %v3703_v47  ;;  %vm3720_vm6 = vcmp.eq.s32.totalorder %v3719_v11, %v8368_v15  ;;  %v3661_v56 = vadd.f32 %v3660_v18, %v3659_v5 }
 0x5c6   :  { %v3715_v21 = vsel %vm3714_vm5, %v5433_v8, %v3709_v28 }
 0x5c7   :  { %v3721_v35 = vsel %vm3720_vm6, %v5434_v19, %v3715_v21  ;;  %v3662_v37 = vrot.slane %v3661_v56, 2 }
 0x5c8   :  { %v3722_v45 = vrot.slane %v3721_v35, 4 }
 0x5c9   :  { %v3663_v40 = vadd.f32 %v3662_v37, %v3661_v56 }
 0x5ca   :  { %v3723_v29 = vadd.f32 %v3722_v45, %v3721_v35 }
 0x5cb   :  { %v3664_v36 = vrot.slane %v3663_v40, 1 }
 0x5cc   :  { %v3724_v44 = vrot.slane %v3723_v29, 2 }
 0x5cd   :  { %v3665_v53 = vadd.f32 %v3664_v36, %v3663_v40 }
 0x5ce   :  { %v3725_v16 = vadd.f32 %v3724_v44, %v3723_v29 }
 0x5cf   :  { %3666 = vst [vmem:[%s3606_s3] sm:$0x1] %v3665_v53 }
 0x5d0   :  { %v3726_v52 = vrot.slane %v3725_v16, 1 }
 0x5d2   :  { %v3727_v51 = vadd.f32 %v3726_v52, %v3725_v16 }
 0x5d4   :  { %3728 = vst [vmem:[%s3668_s22] sm:$0x1] %v3727_v51 }
 0x5d6   :  { %v3732_v58 = vld [vmem:[#allocation4] sm:$0x1] }
 0x5d7   :  { %3734 = vst [vmem:[#allocation5] sm:$0x1] %v3732_v58 }
 0x5db   :  { %v3738_v15 = vld [vmem:[#allocation6] sm:$0x1] }
 0x5dc   :  { %3740 = vst [vmem:[#allocation7] sm:$0x1] %v3738_v15 }
 0x5de   :  { %v3803_v60 = vld [vmem:[#allocation5] sm:$0x1] }
 0x5df   :  { %3804 = vst [vmem:[%s8546_s24] sm:$0x1] %v3803_v60 }
 0x5e3   :  { %v3867_v39 = vld [vmem:[#allocation7] sm:$0x1] }
 0x5e4   :  { %3868 = vst [vmem:[%s8547_s27] sm:$0x1] %v3867_v39 }
 0x5e5 LB: > { %v3916_v49 = vld [vmem:[%s6222_s12] sm:$0xff]  ;;  %s3918_s12 = scalar_lea.vmem %s6222_s12, 8   ;;  %s6222_s12 = sphi %s6220_s12, %s3918_s12   ;;  %s6218_s1 = sphi %s6216_s1, %s3919_s1  }
 0x5e6   : > { %3917 = vst [vmem:[%s6218_s1] sm:$0xff] %v3916_v49  ;;  %s3919_s1 = scalar_lea.vmem %s6218_s1, 8   ;;  %p3913_p13 = scmp.gt.s32.totalorder %s3918_s12, [#allocation8 + $0x38] }
 0x5e7   :  { %s8549_s8 = sld [smem:[#allocation33_spill]] (%p3913_p13)  ;;  %s6228_s9 = smov (%p3913_p13), [#allocation9]  }
 0x5e8   :  { %3915 = sbr.rel (!%p3913_p13) target bundleno = 1509 (0x5e5), region = 995 }
 0x5ed   :  { %s6224_s4 = smov (%p3913_p13), %s8549_s8  }
 0x5ef LB: > { %v3978_v38 = vld [vmem:[%s6230_s9] sm:$0xff]  ;;  %s3980_s9 = scalar_lea.vmem %s6230_s9, 8   ;;  %s6230_s9 = sphi %s6228_s9, %s3980_s9   ;;  %s6226_s4 = sphi %s6224_s4, %s3981_s4  }
 0x5f0   : > { %3979 = vst [vmem:[%s6226_s4] sm:$0xff] %v3978_v38  ;;  %s3981_s4 = scalar_lea.vmem %s6226_s4, 8   ;;  %p3975_p0 = scmp.gt.s32.totalorder %s3980_s9, [#allocation9 + $0x38] }
 0x5f1   :  { %s8550_s5 = sld [smem:[#allocation34_spill]] (%p3975_p0)  ;;  %s6236_s14 = smov (%p3975_p0), [#allocation10]  }
 0x5f2   :  { %3977 = sbr.rel (!%p3975_p0) target bundleno = 1519 (0x5ef), region = 1017 }
 0x5f7   :  { %s6232_s13 = smov (%p3975_p0), %s8550_s5  }
 0x5f9 LB: > { %v4040_v62 = vld [vmem:[%s6238_s14] sm:$0xff]  ;;  %s4042_s14 = scalar_lea.vmem %s6238_s14, 8   ;;  %s6238_s14 = sphi %s6236_s14, %s4042_s14   ;;  %s6234_s13 = sphi %s6232_s13, %s4043_s13  }
 0x5fa   : > { %4041 = vst [vmem:[%s6234_s13] sm:$0xff] %v4040_v62  ;;  %s4043_s13 = scalar_lea.vmem %s6234_s13, 8   ;;  %p4037_p1 = scmp.gt.s32.totalorder %s4042_s14, [#allocation10 + $0x38] }
 0x5fb   :  { %s8551_s17 = sld [smem:[#allocation35_spill]] (%p4037_p1)  ;;  %s6244_s18 = smov (%p4037_p1), [#allocation11]  }
 0x5fc   :  { %4039 = sbr.rel (!%p4037_p1) target bundleno = 1529 (0x5f9), region = 1039 }
 0x601   :  { %s6240_s2 = smov (%p4037_p1), %s8551_s17  }
 0x603 LB: > { %v4102_v48 = vld [vmem:[%s6246_s18] sm:$0xff]  ;;  %s4104_s18 = scalar_lea.vmem %s6246_s18, 8   ;;  %s6246_s18 = sphi %s6244_s18, %s4104_s18   ;;  %s6242_s2 = sphi %s6240_s2, %s4105_s2  }
 0x604   : > { %4103 = vst [vmem:[%s6242_s2] sm:$0xff] %v4102_v48  ;;  %s4105_s2 = scalar_lea.vmem %s6242_s2, 8   ;;  %p4099_p2 = scmp.gt.s32.totalorder %s4104_s18, [#allocation11 + $0x38] }
 0x606   :  { %4101 = sbr.rel (!%p4099_p2) target bundleno = 1539 (0x603), region = 1061 }

// kernel: _forward_impl.1
= control target key start
LH: loop header
LB: loop body
LE: loop exit
PB: predicated region body
PF: predicated region fallthrough
CT: control target
= control target key end

     0   :  { %16 = vsyncpa [#allocation3], 0  ;;  %s2134_s0 = inlined_call_operand.vmem [shape: f32[2,3,256], index: 0, kind: input, shape index: {}]   ;;  %s2135_s1 = inlined_call_operand.vmem [shape: f32[2,3,256], index: 1, kind: input, shape index: {}]   ;;  %s2136_s2 = inlined_call_operand.vmem [shape: f32[2,3,256], index: 2, kind: input, shape index: {}]   ;;  %s2137_s3 = inlined_call_operand.vmem [shape: f32[32,8], index: 3, kind: input, shape index: {}]   ;;  %s2138_s4 = inlined_call_operand.vmem [shape: f32[32,1], index: 4, kind: input, shape index: {}]   ;;  %s2139_s5 = inlined_call_operand.vmem [shape: f32[2,32], index: 5, kind: input, shape index: {}]   ;;  %s2140_s6 = inlined_call_operand.vmem [shape: f32[2,1], index: 6, kind: input, shape index: {}]   ;;  %s2141_s7 = inlined_call_operand.hbm [shape: f32[768,128], index: 7, kind: input, shape index: {}]   ;;  %s2142_s8 = inlined_call_operand.vmem [shape: f32[2,4,256], index: 8, kind: output, shape index: {0}]   ;;  %s2143_s9 = inlined_call_operand.vmem [shape: f32[4,128], index: 9, kind: output, shape index: {1}]   ;;  %s2144_s10 = inlined_call_operand.hbm [shape: f32[1,1], index: 10, kind: output, shape index: {2}]  }
   0x1   :  { %17 = vsyncpa [#allocation4], 0  ;;  %s1785_s13 = smov [#allocation2]   ;;  %s1737_s17 = scalar_lea.hbm %s2141_s7, 12288 }
   0x2   :  { %s37_s14 = sshll.u32 %s1785_s13, 4  ;;  %p1738_p0 = scmp.ne.s32.totalorder %s2141_s7, %s1737_s17  ;;  %s38_s14 = int_to_ptr.vmem [resolvable:$true] %s37_s14 }
   0x3   :  { %p1741_p1 = scmp.lt.u32.totalorder %s1737_s17, %s2141_s7 }
   0x5   :  { %p1743_p2 = pnand %p1741_p1, %p1738_p0 }
   0x7   :  { %1746 = shalt.err (!%p1743_p2)
}
   0x8   :  { %s1747_s22 = scalar_lea.vmem %s38_s14, 12288  ;;  %p1752_p4 = scmp.lt.s32.totalorder %s38_s14, %s38_s14 }
   0x9   :  { %p1748_p3 = scmp.ne.s32.totalorder %s38_s14, %s1747_s22  ;;  %p1753_p5 = scmp.lt.s32.totalorder %s1747_s22, %s1747_s22 }
   0xb   :  { %p1754_p6 = por %p1753_p5, %p1752_p4 }
   0xd   :  { %p1755_p7 = pnand %p1754_p6, %p1748_p3 }
   0xf   :  { %1758 = shalt.err (!%p1755_p7)
}
  0x10   :  { %s1786_s23 = smov 128   ;;  %s1787_s24 = smov 8  }
  0x11   :  { %43 = dma.hbm_to_vmem [thread:$0]  %s2141_s7, 12288, %s38_s14, [#allocation3], %s1786_s23, %s1786_s23, %s1787_s24  }
  0x12   :  { %1781 = dma.done.wait [#allocation3], 12288  }
  0x13   :  { %1782 = vsyncadd [#allocation3], 4294955008  ;;  %v1788_v0 = vmov 0.0   ;;  %v1789_v1 = vmov 0   ;;  %v47_v2 = vld [vmem:[%s2134_s0] sm:$0x77] }
  0x14   :  { %236 = vmatprep.mubr.f32.mxu1 %v1788_v0  ;;  %414 = vmatprep.mubr.f32.mxu0 %v1788_v0  ;;  %v57_v3 = vld [vmem:[%s2135_s1] sm:$0x77]  ;;  %v1451_v4 = vadd.f32 -0.5, %v47_v2  ;;  %v48_v6 = vld [vmem:[%s2134_s0 + $0x8] sm:$0x77]  ;;  %v127_v19 = vld [vmem:[%s2138_s4 + $0x10] sm:$0xff] }
  0x15   :  { %1731 = vset.pattern.permute.xlu0 %v1789_v1  ;;  %1732 = vset.pattern.permute.xlu1 %v1789_v1  ;;  %v1455_v5 = vadd.f32 -0.5, %v57_v3  ;;  %v58_v7 = vld [vmem:[%s2135_s1 + $0x8] sm:$0x77]  ;;  %v1452_v8 = vadd.f32 -0.5, %v48_v6  ;;  %v67_v10 = vld [vmem:[%s2136_s2] sm:$0x77] }
  0x16   :  { %v1456_v9 = vadd.f32 -0.5, %v58_v7  ;;  %v51_v11 = vmul.f32 2.0, %v1451_v4  ;;  %v1459_v13 = vadd.f32 -0.5, %v67_v10  ;;  %v68_v14 = vld [vmem:[%s2136_s2 + $0x8] sm:$0x77]  ;;  %v125_v18 = vld [vmem:[%s2138_s4] sm:$0xff]  ;;  %141 = vperm.xlu1 %1732, %v127_v19  }
  0x17   :  { %v61_v12 = vmul.f32 2.0, %v1455_v5  ;;  %v52_v15 = vmul.f32 2.0, %v1452_v8  ;;  %v1460_v17 = vadd.f32 -0.5, %v68_v14  ;;  %131 = vperm.xlu0 %1731, %v125_v18   ;;  %vm107_vm0 = vcmask 1042432   ;;  %v126_v26 = vld [vmem:[%s2138_s4 + $0x8] sm:$0xff]  ;;  %v128_v27 = vld [vmem:[%s2138_s4 + $0x18] sm:$0xff] }
  0x18   :  { %v62_v16 = vmul.f32 2.0, %v1456_v9  ;;  %v1453_v20 = vclamps-f32 %v51_v11, 1.0  ;;  %v71_v22 = vmul.f32 2.0, %v1459_v13  ;;  %vm116_vm1 = vcmask 1045504   ;;  %v149_v42 = vld [vmem:[%s2140_s6] sm:$0x3] }
  0x19   :  { %v1457_v21 = vclamps-f32 %v61_v12, 1.0  ;;  %v1454_v23 = vclamps-f32 %v52_v15, 1.0  ;;  %v72_v25 = vmul.f32 2.0, %v1460_v17  ;;  %v155_v44 = vld [vmem:[%s2137_s3] sm:$0xff]  ;;  %vm159_vm2 = vcmask 64512   ;;  %v156_v52 = vld [vmem:[%s2137_s3 + $0x8] sm:$0xff] }
  0x1a   :  { %v1458_v24 = vclamps-f32 %v62_v16, 1.0  ;;  %v78_v28 = vcombine.high %v1453_v20, %v1453_v20  ;;  %v1461_v31 = vclamps-f32 %v71_v22, 1.0  ;;  %146 = vperm.xlu1 %1732, %v128_v27   ;;  %v157_v53 = vld [vmem:[%s2137_s3 + $0x10] sm:$0xff]  ;;  %v158_v54 = vld [vmem:[%s2137_s3 + $0x18] sm:$0xff]  ;;  %v940_v57 = vld [vmem:[%s2135_s1] sm:$0x77]  ;;  %v961_v5 = vlaneseq }
  0x1b   :  { %v84_v29 = vcombine.high %v1457_v21, %v1457_v21  ;;  %v91_v30 = vrot.slane %v1457_v21, 5  ;;  %v81_v32 = vcombine.high %v1454_v23, %v1454_v23  ;;  %v1462_v35 = vclamps-f32 %v72_v25, 1.0  ;;  %136 = vperm.xlu0 %1731, %v126_v26   ;;  %v941_v58 = vld [vmem:[%s2135_s1 + $0x8] sm:$0x77]  ;;  %v950_v59 = vld [vmem:[%s2136_s2] sm:$0x77] }
  0x1c   :  { %v86_v33 = vcombine.high %v1458_v24, %v1458_v24  ;;  %v93_v34 = vrot.slane %v1458_v24, 5  ;;  %v88_v37 = vcombine.high %v1461_v31, %v1461_v31  ;;  %v95_v40 = vrot.slane %v1461_v31, 5  ;;  %v951_v60 = vld [vmem:[%s2136_s2 + $0x8] sm:$0x77] }
  0x1d   :  { %v92_v36 = vrot.slane %v84_v29, 5  ;;  %v108_v38 = vsel %vm107_vm0, %v1453_v20, %v91_v30  ;;  %v90_v41 = vcombine.high %v1462_v35, %v1462_v35  ;;  %v97_v55 = vrot.slane %v1462_v35, 5 }
  0x1e   :  { %v94_v39 = vrot.slane %v86_v33, 5  ;;  %v96_v45 = vrot.slane %v88_v37, 5  ;;  %v110_v47 = vsel %vm107_vm0, %v1454_v23, %v93_v34  ;;  %v112_v50 = vsel %vm107_vm0, %v1453_v20, %v95_v40 }
  0x1f   :  { %v109_v43 = vsel %vm107_vm0, %v78_v28, %v92_v36  ;;  %v98_v48 = vrot.slane %v90_v41, 5  ;;  %152 = vperm.xlu0 %1731, %v149_v42   ;;  %v114_v56 = vsel %vm107_vm0, %v1454_v23, %v97_v55  ;;  %v942_v61 = vmax.f32 %v940_v57, 0.0 }
  0x20   :  { %1463 = vmatprep.subr.msk.mxu1 %vm116_vm1, %v109_v43  ;;  %v111_v46 = vsel %vm107_vm0, %v81_v32, %v94_v39  ;;  %v113_v49 = vsel %vm107_vm0, %v78_v28, %v96_v45  ;;  %v943_v62 = vmax.f32 %v941_v58, 0.0  ;;  %v952_v63 = vmax.f32 %v950_v59, 0.0 }
  0x21   :  { %1464 = vmatpush1.msk.msra.mxu1 %vm116_vm1, %v108_v38  ;;  %v115_v51 = vsel %vm107_vm0, %v81_v32, %v98_v48  ;;  %1475 = vmatprep.subr.msk.mxu0 %vm116_vm1, %v113_v49  ;;  %v953_v1 = vmax.f32 %v951_v60, 0.0  ;;  %v944_v2 = vmin.f32 %v942_v61, 1.0  ;;  %v1965_v10 = vshrl.u32 %v961_v5, 7 }
  0x22   :  { %1465 = vmatmul.mubr.msk.f32.vlgmr.msra.gmra.mrb[0].mxu1 %vm159_vm2, %v155_v44  ;;  %1469 = vmatprep.subr.msk.mxu1 %vm116_vm1, %v111_v46  ;;  %v945_v3 = vmin.f32 %v943_v62, 1.0  ;;  %v954_v4 = vmin.f32 %v952_v63, 1.0  ;;  %vm1102_vm3 = vcmask 1040384   ;;  %vm855_vm4 = vcmask 1041408  }
  0x23   :  { %1470 = vmatpush1.msk.msra.mxu1 %vm116_vm1, %v110_v47  ;;  %242 = vmatprep.mubr.f32.mxu1 %v1788_v0  ;;  %v955_v6 = vmin.f32 %v953_v1, 1.0  ;;  %v946_v7 = vmul.f32 255.0, %v944_v2  ;;  %v983_v12 = vsub.s32 2, %v1965_v10  ;;  %v2004_v63 = vsub.s32 4, %v1965_v10 }
  0x24   :  { %1481 = vmatprep.subr.msk.mxu1 %vm116_vm1, %v115_v51  ;;  %1476 = vmatpush1.msk.msra.mxu0 %vm116_vm1, %v112_v50  ;;  %v947_v8 = vmul.f32 255.0, %v945_v3  ;;  %v956_v9 = vmul.f32 255.0, %v954_v4  ;;  %vm561_vm5 = vcmask 261120   ;;  %vm938_vm10 = vcmask 0  }
  0x25   :  { %1477 = vmatmul.mubr.msk.f32.vlgmr.msra.gmra.mrb[0].mxu0 %vm159_vm2, %v155_v44  ;;  %v957_v11 = vmul.f32 255.0, %v955_v6  ;;  %v1968_v13 = vfloor.f32 %v946_v7 }
  0x26   :  { %1466 = vmatmul.mubr.msk.f32.gmra.mrb[2].mxu1 %vm159_vm2, %v156_v52  ;;  %420 = vmatprep.mubr.f32.mxu0 %v1788_v0  ;;  %v1970_v14 = vfloor.f32 %v947_v8  ;;  %v1972_v15 = vfloor.f32 %v956_v9 }
  0x27   :  { %248 = vmatprep.mubr.f32.mxu1 %v1788_v0  ;;  %v1974_v16 = vfloor.f32 %v957_v11  ;;  %v984_v17 = vrot.slane %v1968_v13, %v983_v12 }
  0x28   :  { %v1011_v18 = vrot.slane %v1970_v14, %v983_v12  ;;  %v1036_v19 = vrot.slane %v1972_v15, %v983_v12 }
  0x29   :  { %1478 = vmatmul.mubr.msk.f32.gmra.mrb[2].mxu0 %vm159_vm2, %v156_v52  ;;  %v1061_v20 = vrot.slane %v1974_v16, %v983_v12 }
  0x2a   :  { %1467 = vmatmul.mubr.msk.f32.gmra.mrb[4].mxu1 %vm159_vm2, %v157_v53  ;;  %426 = vmatprep.mubr.f32.mxu0 %v1788_v0  ;;  %v1070_v21 = vrot.slane %v1011_v18, 7  ;;  %v1082_v22 = vrot.slane %v1036_v19, 6 }
  0x2b   :  { %254 = vmatprep.mubr.f32.mxu1 %v1788_v0  ;;  %v1094_v23 = vrot.slane %v1061_v20, 5  ;;  %v999_v20 = vrot.slane %v1970_v14, %v2004_v63 }
  0x2c   :  { %v1107_v24 = vsel %vm1102_vm3, %v984_v17, %v1070_v21 }
  0x2d   :  { %1479 = vmatmul.mubr.msk.f32.gmra.mrb[4].mxu0 %vm159_vm2, %v157_v53  ;;  %v1113_v25 = vsel %vm855_vm4, %v1107_v24, %v1082_v22 }
  0x2e   :  { %1468 = vmatmul.mubr.msk.f32.gmra.mrb[6].mxu1 %vm159_vm2, %v158_v54  ;;  %432 = vmatprep.mubr.f32.mxu0 %v1788_v0  ;;  %v1983_v26 = vsel %vm107_vm0, %v1113_v25, %v1094_v23 }
  0x2f   :  { %325 = vmatprep.mubr.f32.mxu1 %v1788_v0 }
  0x31   :  { %1480 = vmatmul.mubr.msk.f32.gmra.mrb[6].mxu0 %vm159_vm2, %v158_v54 }
  0x32   :  { %1471 = vmatmul.mubr.msk.f32.vlgmr.msra.gmra.mrb[8].mxu1 %vm159_vm2, %v155_v44  ;;  %629 = vmatprep.mubr.f32.mxu0 %v1788_v0 }
  0x33   :  { %1482 = vmatpush1.msk.msra.mxu1 %vm116_vm1, %v114_v56  ;;  %331 = vmatprep.mubr.f32.mxu1 %v1788_v0 }
  0x36   :  { %1472 = vmatmul.mubr.msk.f32.gmra.mrb[10].mxu1 %vm159_vm2, %v156_v52 }
  0x37   :  { %337 = vmatprep.mubr.f32.mxu1 %v1788_v0 }
  0x3a   :  { %1473 = vmatmul.mubr.msk.f32.gmra.mrb[12].mxu1 %vm159_vm2, %v157_v53 }
  0x3b   :  { %343 = vmatprep.mubr.f32.mxu1 %v1788_v0 }
  0x3e   :  { %1474 = vmatmul.mubr.msk.f32.gmra.mrb[14].mxu1 %vm159_vm2, %v158_v54 }
  0x3f   :  { %503 = vmatprep.mubr.f32.mxu1 %v1788_v0 }
  0x42   :  { %1483 = vmatmul.mubr.msk.f32.vlgmr.msra.gmra.mrb[16].mxu1 %vm159_vm2, %v155_v44 }
  0x43   :  { %509 = vmatprep.mubr.f32.mxu1 %v1788_v0 }
  0x46   :  { %1484 = vmatmul.mubr.msk.f32.gmra.mrb[18].mxu1 %vm159_vm2, %v156_v52 }
  0x47   :  { %515 = vmatprep.mubr.f32.mxu1 %v1788_v0 }
  0x4a   :  { %1485 = vmatmul.mubr.msk.f32.gmra.mrb[20].mxu1 %vm159_vm2, %v157_v53 }
  0x4b   :  { %521 = vmatprep.mubr.f32.mxu1 %v1788_v0 }
  0x4e   :  { %1486 = vmatmul.mubr.msk.f32.gmra.mrb[22].mxu1 %vm159_vm2, %v158_v54 }
  0x4f   :  { %700 = vmatprep.mubr.f32.mxu1 %v1788_v0 }
  0x95   :  { %v1990_v32 = vpop.permute.xlu1 %141 }
  0x96   :  { %v1985_v27 = vpop.permute.xlu0 %131 }
  0x99   :  { %v1998_v54 = vpop.permute.xlu1 %146 }
  0x9a   :  { %v1987_v30 = vpop.permute.xlu0 %136 }
  0xf5   :  { %v238_v28 = vpop.f32.mrb[0].mxu1 }
  0xf6   :  { %v240_v29 = vpop.f32.mrb[1].mxu1  ;;  %v239_v31 = vadd.f32 %v238_v28, %v1985_v27 }
  0xf7   :  { %v241_v33 = vadd.f32 %v240_v29, %v1985_v27 }
  0xf8   :  { %v416_v35 = vpop.f32.mrb[0].mxu0  ;;  %v528_v42 = vmax.f32 %v239_v31, 0.0 }
  0xf9   :  { %v244_v34 = vpop.f32.mrb[2].mxu1  ;;  %v417_v38 = vadd.f32 %v416_v35, %v1985_v27  ;;  %v418_v39 = vpop.f32.mrb[1].mxu0  ;;  %v529_v44 = vmax.f32 %v241_v33, 0.0  ;;  %v1024_v35 = vrot.slane %v1972_v15, %v2004_v63 }
  0xfa   :  { %v245_v36 = vadd.f32 %v244_v34, %v1987_v30  ;;  %v246_v37 = vpop.f32.mrb[3].mxu1  ;;  %v419_v41 = vadd.f32 %v418_v39, %v1985_v27  ;;  %v968_v39 = vrot.slane %v1968_v13, %v2004_v63 }
  0xfb   :  { %v247_v40 = vadd.f32 %v246_v37, %v1987_v30  ;;  %v532_v50 = vmax.f32 %v417_v38, 0.0 }
  0xfc   :  { %v536_v43 = vmax.f32 %v245_v36, 0.0  ;;  %v422_v47 = vpop.f32.mrb[2].mxu0  ;;  %v533_v55 = vmax.f32 %v419_v41, 0.0 }
  0xfd   :  { %v537_v45 = vmax.f32 %v247_v40, 0.0  ;;  %v250_v46 = vpop.f32.mrb[4].mxu1  ;;  %v423_v51 = vadd.f32 %v422_v47, %v1987_v30  ;;  %v424_v52 = vpop.f32.mrb[3].mxu0  ;;  %v1067_v40 = vrot.slane %v999_v20, 7  ;;  %v1049_v47 = vrot.slane %v1974_v16, %v2004_v63  ;;  %v1122_v63 = vld [vmem:[#allocation2 + $0x8] sm:$0xff] }
  0xfe   :  { %v1599_v48 = vpack.c.bf16 %v536_v43, %v528_v42  ;;  %v252_v49 = vpop.f32.mrb[5].mxu1  ;;  %v425_v56 = vadd.f32 %v424_v52, %v1987_v30  ;;  %v251_v57 = vadd.f32 %v250_v46, %v1990_v32  ;;  %v1079_v52 = vrot.slane %v1024_v35, 6 }
  0xff   :  { %v1597_v53 = vpack.c.bf16 %v537_v45, %v529_v44  ;;  %v540_v58 = vmax.f32 %v423_v51, 0.0  ;;  %v253_v59 = vadd.f32 %v252_v49, %v1990_v32  ;;  %v2024_v44 = vld [vmem:[%s2139_s5] sm:$0x3]  ;;  %v1138_v51 = vld [vmem:[#allocation2 + $0x88] sm:$0xff] }
 0x100   :  { %v541_v61 = vmax.f32 %v425_v56, 0.0  ;;  %v428_v62 = vpop.f32.mrb[4].mxu0  ;;  %v544_v9 = vmax.f32 %v251_v57, 0.0  ;;  %v1104_v57 = vsel %vm1102_vm3, %v968_v39, %v1067_v40  ;;  %v1143_v40 = vld [vmem:[#allocation2 + $0xb0] sm:$0xff] }
 0x101   :  { %v256_v60 = vpop.f32.mrb[6].mxu1  ;;  %1598 = vmatprep.subr.bf16.mxu0 %v1597_v53  ;;  %v1615_v3 = vpack.c.bf16 %v540_v58, %v532_v50  ;;  %v429_v4 = vadd.f32 %v428_v62, %v1990_v32  ;;  %v430_v5 = vpop.f32.mrb[5].mxu0  ;;  %v545_v12 = vmax.f32 %v253_v59, 0.0  ;;  %v1137_v50 = vld [vmem:[#allocation2 + $0x80] sm:$0xff] }
 0x102   :  { %v257_v1 = vadd.f32 %v256_v60, %v1998_v54  ;;  %v258_v2 = vpop.f32.mrb[7].mxu1  ;;  %1600 = vmatpush1.bf16.msra.mxu0 %v1599_v48  ;;  %v1613_v7 = vpack.c.bf16 %v541_v61, %v533_v55  ;;  %v431_v8 = vadd.f32 %v430_v5, %v1990_v32  ;;  %v1629_v61 = vpack.c.bf16 %v1138_v51, %v1137_v50  ;;  %v1121_v62 = vld [vmem:[#allocation2] sm:$0xff]  ;;  %v1140_v5 = vld [vmem:[#allocation2 + $0x98] sm:$0xff]  ;;  %v1127_v50 = vld [vmem:[#allocation2 + $0x30] sm:$0xff] }
 0x103   :  { %v259_v6 = vadd.f32 %v258_v2, %v1998_v54  ;;  %v548_v23 = vmax.f32 %v429_v4, 0.0  ;;  %v1139_v4 = vld [vmem:[#allocation2 + $0x90] sm:$0xff]  ;;  %v1128_v51 = vld [vmem:[#allocation2 + $0x38] sm:$0xff] }
 0x104   :  { %v552_v11 = vmax.f32 %v257_v1, 0.0  ;;  %v434_v19 = vpop.f32.mrb[6].mxu0  ;;  %v549_v29 = vmax.f32 %v431_v8, 0.0  ;;  %v1091_v1 = vrot.slane %v1049_v47, 5 }
 0x105   :  { %v553_v17 = vmax.f32 %v259_v6, 0.0  ;;  %v327_v18 = vpop.f32.mrb[8].mxu1  ;;  %v435_v24 = vadd.f32 %v434_v19, %v1998_v54  ;;  %v436_v25 = vpop.f32.mrb[7].mxu0  ;;  %v1110_v6 = vsel %vm855_vm4, %v1104_v57, %v1079_v52  ;;  %v1124_v19 = vld [vmem:[#allocation2 + $0x18] sm:$0xff]  ;;  %v2046_v52 = vsub.s32 5, %v1965_v10 }
 0x106   :  { %v1603_v21 = vpack.c.bf16 %v552_v11, %v544_v9  ;;  %v329_v22 = vpop.f32.mrb[9].mxu1  ;;  %v437_v31 = vadd.f32 %v436_v25, %v1998_v54  ;;  %v328_v33 = vadd.f32 %v327_v18, %v1985_v27  ;;  %v1631_v11 = vpack.c.bf16 %v1122_v63, %v1121_v62  ;;  %v1123_v18 = vld [vmem:[#allocation2 + $0x10] sm:$0xff]  ;;  %v1129_v62 = vld [vmem:[#allocation2 + $0x40] sm:$0xff]  ;;  %v1130_v63 = vld [vmem:[#allocation2 + $0x48] sm:$0xff] }
 0x107   :  { %v1601_v28 = vpack.c.bf16 %v553_v17, %v545_v12  ;;  %v556_v34 = vmax.f32 %v435_v24, 0.0  ;;  %v330_v36 = vadd.f32 %v329_v22, %v1985_v27  ;;  %v1633_v17 = vpack.c.bf16 %v1140_v5, %v1139_v4  ;;  %v1142_v24 = vld [vmem:[#allocation2 + $0xa8] sm:$0xff]  ;;  %v1147_v4 = vld [vmem:[#allocation2 + $0xd0] sm:$0xff]  ;;  %v1148_v5 = vld [vmem:[#allocation2 + $0xd8] sm:$0xff] }
 0x108   :  { %v557_v38 = vmax.f32 %v437_v31, 0.0  ;;  %v530_v48 = vmax.f32 %v328_v33, 0.0  ;;  %v1116_v20 = vsel %vm107_vm0, %v1110_v6, %v1091_v1  ;;  %v1007_v6 = vrot.slane %v1970_v14, %v2046_v52 }
 0x109   :  { %v333_v37 = vpop.f32.mrb[10].mxu1  ;;  %1602 = vmatprep.subr.bf16.mxu0 %v1601_v28  ;;  %v1619_v42 = vpack.c.bf16 %v556_v34, %v548_v23  ;;  %v531_v53 = vmax.f32 %v330_v36, 0.0  ;;  %v1141_v23 = vld [vmem:[#allocation2 + $0xa0] sm:$0xff]  ;;  %v1635_v34 = vpack.c.bf16 %v1124_v19, %v1123_v18  ;;  %v1131_v18 = vld [vmem:[#allocation2 + $0x50] sm:$0xff]  ;;  %v1132_v19 = vld [vmem:[#allocation2 + $0x58] sm:$0xff] }
 0x10a   :  { %v334_v41 = vadd.f32 %v333_v37, %v1987_v30  ;;  %v335_v43 = vpop.f32.mrb[11].mxu1  ;;  %1604 = vmatpush1.bf16.msra.mxu0 %v1603_v21  ;;  %v1617_v46 = vpack.c.bf16 %v557_v38, %v549_v29  ;;  %v1637_v36 = vpack.c.bf16 %v1142_v24, %v1141_v23  ;;  %v1125_v37 = vld [vmem:[#allocation2 + $0x20] sm:$0xff]  ;;  %v1126_v38 = vld [vmem:[#allocation2 + $0x28] sm:$0xff] }
 0x10b   :  { %v336_v45 = vadd.f32 %v335_v43, %v1987_v30  ;;  %1614 = vmatprep.subr.bf16.mxu0 %v1613_v7  ;;  %v1639_v47 = vpack.c.bf16 %v1126_v38, %v1125_v37  ;;  %v1150_v23 = vld [vmem:[#allocation2 + $0xe8] sm:$0xff]  ;;  %v1651_v37 = vpack.c.bf16 %v1132_v19, %v1131_v18 }
 0x10c   :  { %v538_v49 = vmax.f32 %v334_v41, 0.0  ;;  %v1144_v41 = vld [vmem:[#allocation2 + $0xb8] sm:$0xff]  ;;  %v1170_v24 = vld [vmem:[#allocation2 + $0x188] sm:$0xff] }
 0x10d   :  { %v539_v55 = vmax.f32 %v336_v45, 0.0  ;;  %v339_v56 = vpop.f32.mrb[12].mxu1  ;;  %1487 = vmatmul.mubr.msk.f32.vlgmr.msra.gmra.mrb[8].mxu0 %vm561_vm5, %v2024_v44  ;;  %v1134_v38 = vld [vmem:[#allocation2 + $0x68] sm:$0xff] }
 0x10e   :  { %v1607_v58 = vpack.c.bf16 %v538_v49, %v530_v48  ;;  %v341_v59 = vpop.f32.mrb[13].mxu1  ;;  %1616 = vmatpush1.bf16.msra.mxu0 %v1615_v3  ;;  %771 = vmatprep.mubr.f32.mxu0 %v1788_v0  ;;  %v340_v2 = vadd.f32 %v339_v56, %v1990_v32  ;;  %v1641_v49 = vpack.c.bf16 %v1144_v41, %v1143_v40  ;;  %v1146_v56 = vld [vmem:[#allocation2 + $0xc8] sm:$0xff] }
 0x10f   :  { %v1605_v60 = vpack.c.bf16 %v539_v55, %v531_v53  ;;  %1618 = vmatprep.subr.bf16.mxu0 %v1617_v46  ;;  %v342_v7 = vadd.f32 %v341_v59, %v1990_v32  ;;  %v1057_v40 = vrot.slane %v1974_v16, %v2046_v52 }
 0x110   :  { %v546_v21 = vmax.f32 %v340_v2, 0.0 }
 0x111   :  { %v345_v8 = vpop.f32.mrb[14].mxu1  ;;  %1606 = vmatprep.subr.bf16.mxu1 %v1605_v60  ;;  %v547_v25 = vmax.f32 %v342_v7, 0.0 }
 0x112   :  { %v346_v3 = vadd.f32 %v345_v8, %v1998_v54  ;;  %v347_v9 = vpop.f32.mrb[15].mxu1  ;;  %1608 = vmatpush1.bf16.msra.mxu1 %v1607_v58  ;;  %1620 = vmatpush1.bf16.msra.mxu0 %v1619_v42  ;;  %v2055_v8 = vsub.s32 0, %v1965_v10 }
 0x113   :  { %v348_v12 = vadd.f32 %v347_v9, %v1998_v54  ;;  %1630 = vmatprep.subr.bf16.mxu0 %v1629_v61  ;;  %v1647_v9 = vpack.c.bf16 %v1130_v63, %v1129_v62  ;;  %v1201_v62 = vld [vmem:[#allocation2 + $0x280] sm:$0xff] }
 0x114   :  { %v554_v22 = vmax.f32 %v346_v3, 0.0  ;;  %v1045_v63 = vrot.slane %v1974_v16, %v2055_v8 }
 0x115   :  { %v555_v28 = vmax.f32 %v348_v12, 0.0  ;;  %v505_v29 = vpop.f32.mrb[16].mxu1  ;;  %1489 = vmatmul.mubr.msk.f32.vlgmr.msra.gmra.mrb[10].mxu0 %vm561_vm5, %v2024_v44 }
 0x116   :  { %v1611_v31 = vpack.c.bf16 %v554_v22, %v546_v21  ;;  %v507_v33 = vpop.f32.mrb[17].mxu1  ;;  %1632 = vmatpush3.bf16.msra.mxu0 %v1631_v11  ;;  %1281 = vmatprep.mubr.f32.mxu0 %v1116_v20  ;;  %v506_v39 = vadd.f32 %v505_v29, %v1985_v27  ;;  %v1149_v20 = vld [vmem:[#allocation2 + $0xe0] sm:$0xff]  ;;  %v1032_v21 = vrot.slane %v1972_v15, %v2046_v52  ;;  %v2065_v29 = vsub.s32 6, %v1965_v10 }
 0x117   :  { %v1609_v35 = vpack.c.bf16 %v555_v28, %v547_v25  ;;  %1634 = vmatprep.subr.bf16.mxu0 %v1633_v17  ;;  %v508_v42 = vadd.f32 %v507_v33, %v1985_v27  ;;  %v1145_v27 = vld [vmem:[#allocation2 + $0xc0] sm:$0xff]  ;;  %v1649_v17 = vpack.c.bf16 %v1148_v5, %v1147_v4  ;;  %v978_v25 = vrot.slane %v1968_v13, %v2046_v52  ;;  %v1202_v4 = vld [vmem:[#allocation2 + $0x288] sm:$0xff] }
 0x118   :  { %v534_v53 = vmax.f32 %v506_v39, 0.0  ;;  %v1645_v2 = vpack.c.bf16 %v1146_v56, %v1145_v27  ;;  %v1069_v28 = vrot.slane %v1007_v6, 7  ;;  %v1151_v39 = vld [vmem:[#allocation2 + $0xf0] sm:$0xff]  ;;  %v964_v52 = vrot.slane %v1968_v13, %v2055_v8  ;;  %v1172_v56 = vld [vmem:[#allocation2 + $0x198] sm:$0xff] }
 0x119   :  { %v511_v43 = vpop.f32.mrb[18].mxu1  ;;  %1610 = vmatprep.subr.bf16.mxu1 %v1609_v35  ;;  %v535_v57 = vmax.f32 %v508_v42, 0.0  ;;  %v1653_v42 = vpack.c.bf16 %v1150_v23, %v1149_v20  ;;  %v1171_v27 = vld [vmem:[#allocation2 + $0x190] sm:$0xff]  ;;  %v1065_v19 = vrot.slane %v1974_v16, %v2065_v29  ;;  %v1693_v20 = vpack.c.bf16 %v1202_v4, %v1201_v62  ;;  %v1186_v23 = vld [vmem:[#allocation2 + $0x208] sm:$0xff] }
 0x11a   :  { %v512_v45 = vadd.f32 %v511_v43, %v1987_v30  ;;  %v513_v46 = vpop.f32.mrb[19].mxu1  ;;  %1612 = vmatpush1.bf16.msra.mxu1 %v1611_v31  ;;  %1636 = vmatpush3.bf16.msra.mxu0 %v1635_v34  ;;  %v995_v34 = vrot.slane %v1970_v14, %v2055_v8  ;;  %v1152_v43 = vld [vmem:[#allocation2 + $0xf8] sm:$0xff]  ;;  %v1665_v6 = vpack.c.bf16 %v1172_v56, %v1171_v27  ;;  %v1190_v27 = vld [vmem:[#allocation2 + $0x228] sm:$0xff]  ;;  %v1179_v62 = vld [vmem:[#allocation2 + $0x1d0] sm:$0xff] }
 0x11b   :  { %v514_v48 = vadd.f32 %v513_v46, %v1987_v30  ;;  %1638 = vmatprep.subr.bf16.mxu0 %v1637_v36  ;;  %v1643_v30 = vpack.c.bf16 %v1128_v51, %v1127_v50  ;;  %v1153_v46 = vld [vmem:[#allocation2 + $0x100] sm:$0xff]  ;;  %v1020_v50 = vrot.slane %v1972_v15, %v2055_v8  ;;  %v1106_v51 = vsel %vm1102_vm3, %v978_v25, %v1069_v28  ;;  %v1174_v8 = vld [vmem:[#allocation2 + $0x1a8] sm:$0xff]  ;;  %v1203_v28 = vld [vmem:[#allocation2 + $0x290] sm:$0xff] }
 0x11c   :  { %v542_v55 = vmax.f32 %v512_v45, 0.0  ;;  %v1191_v4 = vld [vmem:[#allocation2 + $0x230] sm:$0xff] }
 0x11d   :  { %v543_v58 = vmax.f32 %v514_v48, 0.0  ;;  %v517_v59 = vpop.f32.mrb[20].mxu1  ;;  %1488 = vmatmul.mubr.msk.f32.vlgmr.msra.gmra.mrb[24].mxu1 %vm561_vm5, %v2024_v44  ;;  %v1081_v48 = vrot.slane %v1032_v21, 6  ;;  %v1078_v5 = vrot.slane %v1020_v50, 6  ;;  %v1090_v21 = vrot.slane %v1045_v63, 5  ;;  %v1177_v50 = vld [vmem:[#allocation2 + $0x1c0] sm:$0xff] }
 0x11e   :  { %v1623_v60 = vpack.c.bf16 %v542_v55, %v534_v53  ;;  %v519_v61 = vpop.f32.mrb[21].mxu1  ;;  %842 = vmatprep.mubr.f32.mxu1 %v1788_v0  ;;  %1640 = vmatpush3.bf16.msra.mxu0 %v1639_v47  ;;  %v518_v7 = vadd.f32 %v517_v59, %v1990_v32  ;;  %v1154_v47 = vld [vmem:[#allocation2 + $0x108] sm:$0xff]  ;;  %v1015_v53 = vrot.slane %v1970_v14, %v2065_v29  ;;  %v1066_v55 = vrot.slane %v995_v34, 7  ;;  %v1180_v63 = vld [vmem:[#allocation2 + $0x1d8] sm:$0xff] }
 0x11f   :  { %v1621_v1 = vpack.c.bf16 %v543_v58, %v535_v57  ;;  %1642 = vmatprep.subr.bf16.mxu0 %v1641_v49  ;;  %v520_v3 = vadd.f32 %v519_v61, %v1990_v32  ;;  %v1169_v32 = vld [vmem:[#allocation2 + $0x180] sm:$0xff]  ;;  %v1657_v58 = vpack.c.bf16 %v1152_v43, %v1151_v39  ;;  %v1663_v59 = vpack.c.bf16 %v1154_v47, %v1153_v46  ;;  %v1135_v61 = vld [vmem:[#allocation2 + $0x70] sm:$0xff] }
 0x120   :  { %v550_v31 = vmax.f32 %v518_v7, 0.0  ;;  %v1661_v45 = vpack.c.bf16 %v1170_v24, %v1169_v32  ;;  %v1155_v7 = vld [vmem:[#allocation2 + $0x110] sm:$0xff] }
 0x121   :  { %v523_v0 = vpop.f32.mrb[22].mxu1  ;;  %1622 = vmatprep.subr.bf16.mxu1 %v1621_v1  ;;  %v551_v35 = vmax.f32 %v520_v3, 0.0  ;;  %v1112_v1 = vsel %vm855_vm4, %v1106_v51, %v1081_v48  ;;  %v1156_v3 = vld [vmem:[#allocation2 + $0x118] sm:$0xff]  ;;  %v1187_v39 = vld [vmem:[#allocation2 + $0x210] sm:$0xff]  ;;  %v1178_v51 = vld [vmem:[#allocation2 + $0x1c8] sm:$0xff] }
 0x122   :  { %v524_v11 = vadd.f32 %v523_v0, %v1998_v54  ;;  %v525_v12 = vpop.f32.mrb[23].mxu1  ;;  %1624 = vmatpush1.bf16.msra.mxu1 %v1623_v60  ;;  %1644 = vmatpush3.bf16.msra.mxu0 %v1643_v30  ;;  %v1093_v60 = vrot.slane %v1057_v40, 5  ;;  %v1136_v30 = vld [vmem:[#allocation2 + $0x78] sm:$0xff]  ;;  %v988_v0 = vrot.slane %v1968_v13, %v2065_v29  ;;  %v1667_v32 = vpack.c.bf16 %v1156_v3, %v1155_v7  ;;  %v1159_v47 = vld [vmem:[#allocation2 + $0x130] sm:$0xff]  ;;  %v1209_v3 = vld [vmem:[#allocation2 + $0x2c0] sm:$0xff] }
 0x123   :  { %v526_v22 = vadd.f32 %v525_v12, %v1998_v54  ;;  %1646 = vmatprep.subr.bf16.mxu0 %v1645_v2  ;;  %v1133_v54 = vld [vmem:[#allocation2 + $0x60] sm:$0xff]  ;;  %v1040_v2 = vrot.slane %v1972_v15, %v2065_v29  ;;  %v1175_v29 = vld [vmem:[#allocation2 + $0x1b0] sm:$0xff]  ;;  %v1188_v40 = vld [vmem:[#allocation2 + $0x218] sm:$0xff] }
 0x124   :  { %v558_v33 = vmax.f32 %v524_v11, 0.0  ;;  %v1655_v57 = vpack.c.bf16 %v1134_v38, %v1133_v54  ;;  %v1103_v11 = vsel %vm1102_vm3, %v964_v52, %v1066_v55  ;;  %v1173_v12 = vld [vmem:[#allocation2 + $0x1a0] sm:$0xff]  ;;  %v1118_v18 = vsel %vm107_vm0, %v1112_v1, %v1093_v60  ;;  %v1160_v48 = vld [vmem:[#allocation2 + $0x138] sm:$0xff] }
 0x125   :  { %v559_v36 = vmax.f32 %v526_v22, 0.0  ;;  %v1185_v22 = vld [vmem:[#allocation2 + $0x200] sm:$0xff]  ;;  %v1083_v24 = vrot.slane %v1040_v2, 6  ;;  %v1109_v25 = vsel %vm855_vm4, %v1103_v11, %v1078_v5  ;;  %v1095_v54 = vrot.slane %v1065_v19, 5  ;;  %v1192_v5 = vld [vmem:[#allocation2 + $0x238] sm:$0xff] }
 0x126   :  { %v1627_v41 = vpack.c.bf16 %v558_v33, %v550_v31  ;;  %1648 = vmatpush3.bf16.msra.mxu0 %v1647_v9  ;;  %v1071_v9 = vrot.slane %v1015_v53, 7  ;;  %v1157_v31 = vld [vmem:[#allocation2 + $0x120] sm:$0xff]  ;;  %v1158_v33 = vld [vmem:[#allocation2 + $0x128] sm:$0xff]  ;;  %v1115_v38 = vsel %vm107_vm0, %v1109_v25, %v1090_v21  ;;  %v1699_v52 = vpack.c.bf16 %v1188_v40, %v1187_v39  ;;  %v1164_v11 = vld [vmem:[#allocation2 + $0x158] sm:$0xff] }
 0x127   :  { %v1625_v49 = vpack.c.bf16 %v559_v36, %v551_v35  ;;  %1650 = vmatprep.subr.bf16.mxu0 %v1649_v17  ;;  %v1659_v17 = vpack.c.bf16 %v1136_v30, %v1135_v61  ;;  %v1204_v35 = vld [vmem:[#allocation2 + $0x298] sm:$0xff]  ;;  %v1189_v55 = vld [vmem:[#allocation2 + $0x220] sm:$0xff]  ;;  %v1675_v56 = vpack.c.bf16 %v1160_v48, %v1159_v47  ;;  %v1162_v61 = vld [vmem:[#allocation2 + $0x148] sm:$0xff]  ;;  %v973_v1 = vsub.s32 1, %v1965_v10 }
 0x128   :  { %v1108_v34 = vsel %vm1102_vm3, %v988_v0, %v1071_v9  ;;  %v1176_v36 = vld [vmem:[#allocation2 + $0x1b8] sm:$0xff]  ;;  %v1697_v43 = vpack.c.bf16 %v1204_v35, %v1203_v28  ;;  %v1161_v60 = vld [vmem:[#allocation2 + $0x140] sm:$0xff]  ;;  %v1703_v2 = vpack.c.bf16 %v1190_v27, %v1189_v55  ;;  %v1681_v0 = vpack.c.bf16 %v1180_v63, %v1179_v62  ;;  %v1163_v9 = vld [vmem:[#allocation2 + $0x150] sm:$0xff] }
 0x129   :  { %1626 = vmatprep.subr.bf16.mxu1 %v1625_v49  ;;  %v1673_v46 = vpack.c.bf16 %v1176_v36, %v1175_v29  ;;  %v1206_v49 = vld [vmem:[#allocation2 + $0x2a8] sm:$0xff]  ;;  %v1208_v30 = vld [vmem:[#allocation2 + $0x2b8] sm:$0xff]  ;;  %v1707_v10 = vpack.c.bf16 %v1192_v5, %v1191_v4  ;;  %v1193_v19 = vld [vmem:[#allocation2 + $0x240] sm:$0xff]  ;;  %v1683_v21 = vpack.c.bf16 %v1164_v11, %v1163_v9  ;;  %v1028_v28 = vrot.slane %v1972_v15, %v973_v1 }
 0x12a   :  { %1628 = vmatpush1.bf16.msra.mxu1 %v1627_v41  ;;  %1652 = vmatpush3.bf16.msra.mxu0 %v1651_v37  ;;  %v1695_v37 = vpack.c.bf16 %v1186_v23, %v1185_v22  ;;  %v1671_v41 = vpack.c.bf16 %v1158_v33, %v1157_v31  ;;  %v1211_v23 = vld [vmem:[#allocation2 + $0x2d0] sm:$0xff]  ;;  %v1166_v25 = vld [vmem:[#allocation2 + $0x168] sm:$0xff]  ;;  %v1184_v33 = vld [vmem:[#allocation2 + $0x1f8] sm:$0xff] }
 0x12b   :  { %1654 = vmatprep.subr.bf16.mxu0 %v1653_v42  ;;  %1662 = vmatprep.subr.bf16.mxu1 %v1661_v45  ;;  %v1114_v42 = vsel %vm855_vm4, %v1108_v34, %v1083_v24  ;;  %v1205_v45 = vld [vmem:[#allocation2 + $0x2a0] sm:$0xff]  ;;  %v1183_v31 = vld [vmem:[#allocation2 + $0x1f0] sm:$0xff]  ;;  %v1168_v15 = vld [vmem:[#allocation2 + $0x178] sm:$0xff] }
 0x12c   :  { %v1120_v53 = vsel %vm107_vm0, %v1114_v42, %v1095_v54  ;;  %v1165_v24 = vld [vmem:[#allocation2 + $0x160] sm:$0xff]  ;;  %v1195_v29 = vld [vmem:[#allocation2 + $0x250] sm:$0xff]  ;;  %v1689_v39 = vpack.c.bf16 %v1184_v33, %v1183_v31 }
 0x12d   :  { %1490 = vmatmul.mubr.msk.f32.vlgmr.msra.gmra.mrb[26].mxu1 %vm561_vm5, %v2024_v44  ;;  %v1669_v44 = vpack.c.bf16 %v1174_v8, %v1173_v12  ;;  %v1210_v12 = vld [vmem:[#allocation2 + $0x2c8] sm:$0xff]  ;;  %v1181_v8 = vld [vmem:[#allocation2 + $0x1e0] sm:$0xff]  ;;  %v1687_v36 = vpack.c.bf16 %v1166_v25, %v1165_v24  ;;  %v1167_v40 = vld [vmem:[#allocation2 + $0x170] sm:$0xff] }
 0x12e   :  { %1656 = vmatpush3.bf16.msra.mxu0 %v1655_v57  ;;  %1664 = vmatpush3.bf16.msra.mxu1 %v1663_v59  ;;  %v1701_v57 = vpack.c.bf16 %v1206_v49, %v1205_v45  ;;  %v1677_v59 = vpack.c.bf16 %v1178_v51, %v1177_v50  ;;  %v1709_v22 = vpack.c.bf16 %v1210_v12, %v1209_v3  ;;  %v1213_v42 = vld [vmem:[#allocation2 + $0x2e0] sm:$0xff]  ;;  %v1198_v49 = vld [vmem:[#allocation2 + $0x268] sm:$0xff]  ;;  %v1215_v51 = vld [vmem:[#allocation2 + $0x2f0] sm:$0xff] }
 0x12f   :  { %1658 = vmatprep.subr.bf16.mxu0 %v1657_v58  ;;  %1666 = vmatprep.subr.bf16.mxu1 %v1665_v6  ;;  %v1207_v58 = vld [vmem:[#allocation2 + $0x2b0] sm:$0xff]  ;;  %v1679_v6 = vpack.c.bf16 %v1162_v61, %v1161_v60  ;;  %v153_v61 = vpop.permute.xlu0 %152 }
 0x130   :  { %1351 = vmatprep.mubr.f32.mxu1 %v1118_v18  ;;  %v1705_v7 = vpack.c.bf16 %v1208_v30, %v1207_v58  ;;  %v1003_v18 = vrot.slane %v1970_v14, %v973_v1  ;;  %v974_v14 = vrot.slane %v1968_v13, %v973_v1 }
 0x132   :  { %1660 = vmatpush3.bf16.msra.mxu0 %v1659_v17  ;;  %1668 = vmatpush3.bf16.msra.mxu1 %v1667_v32  ;;  %v1182_v17 = vld [vmem:[#allocation2 + $0x1e8] sm:$0xff]  ;;  %v1068_v34 = vrot.slane %v1003_v18, 7 }
 0x133   :  { %1694 = vmatprep.subr.bf16.mxu0 %v1693_v20  ;;  %1670 = vmatprep.subr.bf16.mxu1 %v1669_v44  ;;  %v1194_v20 = vld [vmem:[#allocation2 + $0x248] sm:$0xff]  ;;  %v1685_v32 = vpack.c.bf16 %v1182_v17, %v1181_v8  ;;  %v1212_v44 = vld [vmem:[#allocation2 + $0x2d8] sm:$0xff] }
 0x134   :  { %v1711_v35 = vpack.c.bf16 %v1194_v20, %v1193_v19  ;;  %v1713_v54 = vpack.c.bf16 %v1212_v44, %v1211_v23  ;;  %v1105_v13 = vsel %vm1102_vm3, %v974_v14, %v1068_v34 }
 0x135   :  { %1282 = vmatmul.mubr.f32.vlgmr.msra.gmra.mrb[12].mxu0 %v1115_v38  ;;  %v1196_v38 = vld [vmem:[#allocation2 + $0x258] sm:$0xff] }
 0x136   :  { %1696 = vmatpush3.bf16.msra.mxu0 %v1695_v37  ;;  %1672 = vmatpush3.bf16.msra.mxu1 %v1671_v41  ;;  %v1053_v37 = vrot.slane %v1974_v16, %v973_v1  ;;  %v1080_v41 = vrot.slane %v1028_v28, 6  ;;  %v1715_v45 = vpack.c.bf16 %v1196_v38, %v1195_v29  ;;  %v1197_v16 = vld [vmem:[#allocation2 + $0x260] sm:$0xff] }
 0x137   :  { %1698 = vmatprep.subr.bf16.mxu0 %v1697_v43  ;;  %1674 = vmatprep.subr.bf16.mxu1 %v1673_v46  ;;  %v1214_v43 = vld [vmem:[#allocation2 + $0x2e8] sm:$0xff]  ;;  %v1691_v46 = vpack.c.bf16 %v1168_v15, %v1167_v40 }
 0x138   :  { %1421 = vmatprep.mubr.f32.mxu0 %v1120_v53  ;;  %v1092_v47 = vrot.slane %v1053_v37, 5  ;;  %v1717_v48 = vpack.c.bf16 %v1214_v43, %v1213_v42  ;;  %v1111_v50 = vsel %vm855_vm4, %v1105_v13, %v1080_v41  ;;  %v1216_v53 = vld [vmem:[#allocation2 + $0x2f8] sm:$0xff] }
 0x139   :  { %v1721_v27 = vpack.c.bf16 %v1216_v53, %v1215_v51 }
 0x13a   :  { %1700 = vmatpush3.bf16.msra.mxu0 %v1699_v52  ;;  %1676 = vmatpush3.bf16.msra.mxu1 %v1675_v56  ;;  %v1719_v52 = vpack.c.bf16 %v1198_v49, %v1197_v16  ;;  %v1117_v55 = vsel %vm107_vm0, %v1111_v50, %v1092_v47  ;;  %v1199_v56 = vld [vmem:[#allocation2 + $0x270] sm:$0xff] }
 0x13b   :  { %1702 = vmatprep.subr.bf16.mxu0 %v1701_v57  ;;  %1678 = vmatprep.subr.bf16.mxu1 %v1677_v59  ;;  %v1200_v57 = vld [vmem:[#allocation2 + $0x278] sm:$0xff] }
 0x13c   :  { %v1723_v58 = vpack.c.bf16 %v1200_v57, %v1199_v56 }
 0x13e   :  { %1704 = vmatpush3.bf16.msra.mxu0 %v1703_v2  ;;  %1680 = vmatpush3.bf16.msra.mxu1 %v1679_v6 }
 0x13f   :  { %1706 = vmatprep.subr.bf16.mxu0 %v1705_v7  ;;  %1682 = vmatprep.subr.bf16.mxu1 %v1681_v0 }
 0x142   :  { %1708 = vmatpush3.bf16.msra.mxu0 %v1707_v10  ;;  %1684 = vmatpush3.bf16.msra.mxu1 %v1683_v21 }
 0x143   :  { %1710 = vmatprep.subr.bf16.mxu0 %v1709_v22  ;;  %1686 = vmatprep.subr.bf16.mxu1 %v1685_v32 }
 0x146   :  { %1712 = vmatpush3.bf16.msra.mxu0 %v1711_v35  ;;  %1688 = vmatpush3.bf16.msra.mxu1 %v1687_v36 }
 0x147   :  { %1714 = vmatprep.subr.bf16.mxu0 %v1713_v54  ;;  %1690 = vmatprep.subr.bf16.mxu1 %v1689_v39 }
 0x14a   :  { %1716 = vmatpush3.bf16.msra.mxu0 %v1715_v45  ;;  %1692 = vmatpush3.bf16.msra.mxu1 %v1691_v46 }
 0x14b   :  { %1718 = vmatprep.subr.bf16.mxu0 %v1717_v48 }
 0x14d   :  { %1352 = vmatmul.mubr.f32.vlgmr.msra.gmra.mrb[28].mxu1 %v1117_v55 }
 0x14e   :  { %1720 = vmatpush3.bf16.msra.mxu0 %v1719_v52 }
 0x14f   :  { %1722 = vmatprep.subr.bf16.mxu0 %v1721_v27 }
 0x152   :  { %1724 = vmatpush3.bf16.msra.mxu0 %v1723_v58 }
 0x155   :  { %1422 = vmatmul.mubr.f32.vlgmr.msra.gmra.mrb[14].mxu0 %v1983_v26 }
 0x1e0   :  { %v631_v59 = vpop.f32.mrb[8].mxu0 }
 0x1e1   :  { %v633_v60 = vpop.f32.mrb[9].mxu0  ;;  %v632_v62 = vadd.f32 %v631_v59, %v153_v61 }
 0x1e2   :  { %v634_v2 = vadd.f32 %v633_v60, %v153_v61 }
 0x1e8   :  { %v773_v30 = vpop.f32.mrb[10].mxu0 }
 0x1e9   :  { %v774_v63 = vadd.f32 %v773_v30, %v153_v61  ;;  %v775_v1 = vpop.f32.mrb[11].mxu0 }
 0x1ea   :  { %v776_v4 = vadd.f32 %v775_v1, %v153_v61 }
 0x1eb   :  { %v851_v5 = vrot.slane %v774_v63, 6  ;;  %v863_v6 = vsub.f32 %v632_v62, %v774_v63 }
 0x1ec   :  { %v852_v7 = vrot.slane %v776_v4, 6  ;;  %v864_v3 = vsub.f32 %v634_v2, %v776_v4 }
 0x1ed   :  { %v856_v0 = vsel %vm855_vm4, %v632_v62, %v851_v5  ;;  %v865_v9 = vmul.f32 %v863_v6, %v863_v6 }
 0x1ee   :  { %v857_v11 = vsel %vm855_vm4, %v634_v2, %v852_v7  ;;  %v866_v12 = vmul.f32 %v864_v3, %v864_v3 }
 0x1ef   :  { %v867_v26 = vsel %vm855_vm4, %v865_v9, 0.0  ;;  %v860_v8 = vcombine.low %v856_v0, %v857_v11 }
 0x1f0   :  { %v868_v17 = vrot.slane %v867_v26, 4  ;;  %v874_v18 = vsel %vm855_vm4, %v866_v12, 0.0  ;;  %v702_v10 = vpop.f32.mrb[24].mxu1 }
 0x1f1   :  { %862 = vst [vmem:[%s2142_s8] sm:$0xff] %v860_v8  ;;  %v875_v19 = vrot.slane %v874_v18, 4  ;;  %v704_v20 = vpop.f32.mrb[25].mxu1  ;;  %v703_v35 = vadd.f32 %v702_v10, %v153_v61 }
 0x1f2   :  { %v869_v21 = vadd.f32 %v868_v17, %v867_v26  ;;  %v705_v37 = vadd.f32 %v704_v20, %v153_v61 }
 0x1f3   :  { %v876_v22 = vadd.f32 %v875_v19, %v874_v18 }
 0x1f4   :  { %v870_v23 = vrot.slane %v869_v21, 2 }
 0x1f5   :  { %v877_v32 = vrot.slane %v876_v22, 2 }
 0x1f6   :  { %v871_v24 = vadd.f32 %v870_v23, %v869_v21 }
 0x1f7   :  { %v878_v25 = vadd.f32 %v877_v32, %v876_v22 }
 0x1f8   :  { %v872_v28 = vrot.slane %v871_v24, 1 }
 0x1f9   :  { %v879_v44 = vrot.slane %v878_v25, 1 }
 0x1fa   :  { %v873_v31 = vadd.f32 %v872_v28, %v871_v24 }
 0x1fb   :  { %v880_v33 = vadd.f32 %v879_v44, %v878_v25 }
 0x1fd   :  { %v881_v14 = vadd.f32 %v880_v33, %v873_v31 }
 0x1ff   :  { %882 = vadd.xlane.f32.xlu1 %v881_v14 }
 0x200   :  { %v844_v34 = vpop.f32.mrb[26].mxu1 }
 0x201   :  { %v845_v29 = vadd.f32 %v844_v34, %v153_v61  ;;  %v846_v36 = vpop.f32.mrb[27].mxu1 }
 0x202   :  { %v847_v54 = vadd.f32 %v846_v36, %v153_v61 }
 0x203   :  { %v895_v38 = vrot.slane %v845_v29, 6  ;;  %v907_v39 = vsub.f32 %v703_v35, %v845_v29 }
 0x204   :  { %v896_v40 = vrot.slane %v847_v54, 6  ;;  %v908_v15 = vsub.f32 %v705_v37, %v847_v54 }
 0x205   :  { %v899_v41 = vsel %vm855_vm4, %v703_v35, %v895_v38  ;;  %v909_v42 = vmul.f32 %v907_v39, %v907_v39 }
 0x206   :  { %v900_v43 = vsel %vm855_vm4, %v705_v37, %v896_v40  ;;  %v910_v13 = vmul.f32 %v908_v15, %v908_v15 }
 0x207   :  { %v911_v45 = vsel %vm855_vm4, %v909_v42, 0.0  ;;  %v903_v46 = vcombine.low %v899_v41, %v900_v43 }
 0x208   :  { %v912_v47 = vrot.slane %v911_v45, 4  ;;  %v918_v48 = vsel %vm855_vm4, %v910_v13, 0.0  ;;  %v1524_v27 = vpop.f32.mrb[12].mxu0 }
 0x209   :  { %1491 = vst [vmem:[%s2142_s8 + $0x8] sm:$0xff] %v903_v46  ;;  %v919_v16 = vrot.slane %v918_v48, 4  ;;  %v1525_v57 = vpop.f32.mrb[13].mxu0 }
 0x20a   :  { %v913_v49 = vadd.f32 %v912_v47, %v911_v45  ;;  %v1526_v59 = vadd.f32 %v1525_v57, %v1524_v27 }
 0x20b   :  { %v920_v50 = vadd.f32 %v919_v16, %v918_v48 }
 0x20c   :  { %v914_v51 = vrot.slane %v913_v49, 2 }
 0x20d   :  { %v921_v53 = vrot.slane %v920_v50, 2 }
 0x20e   :  { %v915_v52 = vadd.f32 %v914_v51, %v913_v49 }
 0x20f   :  { %v922_v55 = vadd.f32 %v921_v53, %v920_v50 }
 0x210   :  { %v916_v56 = vrot.slane %v915_v52, 1 }
 0x211   :  { %v923_v58 = vrot.slane %v922_v55, 1 }
 0x212   :  { %v917_v60 = vadd.f32 %v916_v56, %v915_v52 }
 0x213   :  { %v924_v61 = vadd.f32 %v923_v58, %v922_v55 }
 0x215   :  { %v925_v30 = vadd.f32 %v924_v61, %v917_v60 }
 0x217   :  { %926 = vadd.xlane.f32.xlu0 %v925_v30 }
 0x220   :  { %v1559_v62 = vpop.f32.mrb[28].mxu1 }
 0x221   :  { %v1560_v63 = vpop.f32.mrb[29].mxu1 }
 0x222   :  { %v1561_v1 = vadd.f32 %v1560_v63, %v1559_v62 }
 0x224   :  { %v1354_v2 = vadd.f32 %v1561_v1, %v1526_v59 }
 0x228   :  { %v1594_v4 = vpop.f32.mrb[14].mxu0 }
 0x229   :  { %v1595_v5 = vpop.f32.mrb[15].mxu0 }
 0x22a   :  { %v1596_v6 = vadd.f32 %v1595_v5, %v1594_v4 }
 0x22c   :  { %v1424_v7 = vadd.f32 %v1596_v6, %v1354_v2 }
 0x22e   :  { %1427 = vst [vmem:[%s2143_s9] sm:$0xf] %v1424_v7  ;;  %s1790_s9 = smov [#allocation5]  }
 0x22f   :  { %s1438_s22 = sshll.u32 %s1790_s9, 4  ;;  %s1439_s22 = int_to_ptr.vmem [resolvable:$true] %s1438_s22 }
 0x230   :  { %s1759_s23 = scalar_lea.vmem %s1439_s22, 16  ;;  %s1763_s24 = scalar_lea.vmem %s1439_s22, 32 }
 0x231   :  { %p1760_p8 = scmp.ne.s32.totalorder %s1439_s22, %s1759_s23  ;;  %p1764_p9 = scmp.lt.s32.totalorder %s1439_s22, %s1439_s22 }
 0x232   :  { %p1765_p10 = scmp.lt.s32.totalorder %s1763_s24, %s1759_s23 }
 0x234   :  { %p1766_p11 = por %p1765_p10, %p1764_p9 }
 0x236   :  { %p1767_p12 = pnand %p1766_p11, %p1760_p8 }
 0x28c   :  { %v883_v3 = vpop.xlane.xlu1 %882 }
 0x28d   :  { %v884_v0 = vmul.f32 0.00390625, %v883_v3 }
 0x28f   :  { %1733 = vrsqrt.f32 %v884_v0  ;;  %vm887_vm6 = vcmp.eq.f32.partialorder %v884_v0, inf  ;;  %v890_v10 = vand.u32 2147483648, %v884_v0  ;;  %vm889_vm8 = vcmp.eq.f32.partialorder %v884_v0, 0.0 }
 0x299   :  { %v1734_v12 = vpop.eup %1733 }
 0x29a   :  { %v886_v26 = vmul.f32 %v1734_v12, %v884_v0 }
 0x29c   :  { %v888_v17 = vsel %vm887_vm6, %v884_v0, %v886_v26 }
 0x29d   :  { %v891_v21 = vsel %vm889_vm8, %v890_v10, %v888_v17 }
 0x2a4   :  { %v927_v9 = vpop.xlane.xlu0 %926 }
 0x2a5   :  { %v928_v11 = vmul.f32 0.00390625, %v927_v9 }
 0x2a7   :  { %1735 = vrsqrt.f32 %v928_v11  ;;  %vm931_vm7 = vcmp.eq.f32.partialorder %v928_v11, inf  ;;  %v934_v19 = vand.u32 2147483648, %v928_v11  ;;  %vm933_vm9 = vcmp.eq.f32.partialorder %v928_v11, 0.0 }
 0x2b1   :  { %v1736_v8 = vpop.eup %1735 }
 0x2b2   :  { %v930_v18 = vmul.f32 %v1736_v8, %v928_v11 }
 0x2b4   :  { %v932_v20 = vsel %vm931_vm7, %v928_v11, %v930_v18 }
 0x2b5   :  { %v935_v22 = vsel %vm933_vm9, %v934_v19, %v932_v20 }
 0x2b6   :  { %v936_v23 = vadd.f32 %v935_v22, %v891_v21 }
 0x2b8   :  { %v937_v32 = vmul.f32 0.5, %v936_v23 }
 0x2ba   :  { %939 = vst.msk [vmem:[#allocation5] sm:$0x1] %vm938_vm10, %v937_v32 }
 0x2bb   :  { %1770 = shalt.err (!%p1767_p12)
}
 0x2bc   :  { %s1771_s26 = scalar_lea.hbm %s2144_s10, 16 }
 0x2bd   :  { %p1772_p13 = scmp.ne.s32.totalorder %s2144_s10, %s1771_s26  ;;  %p1775_p0 = scmp.lt.u32.totalorder %s1771_s26, %s2144_s10 }
 0x2bf   :  { %p1777_p1 = pnand %p1775_p0, %p1772_p13 }
 0x2c1   :  { %1780 = shalt.err (!%p1777_p1)
}
 0x2c2   :  { %1441 = dma.vmem_to_hbm [thread:$0]  %s1439_s22, 16, %s2144_s10, [#allocation4]  }
 0x2c3   :  { %1783 = dma.done.wait [#allocation4], 16  }
 0x2c4   :  { %1784 = vsyncadd [#allocation4], 4294967280 }
 0x2c5   :  { %1449 = vsyncpa [#allocation3], 1 }
 0x2c6   :  { %1450 = vsyncpa [#allocation4], 1 }

// kernel: custom-call.3
= control target key start
LH: loop header
LB: loop body
LE: loop exit
PB: predicated region body
PF: predicated region fallthrough
CT: control target
= control target key end

     0   :  { %s7906_s0 = inlined_call_operand.vmem [shape: f32[64,64], index: 0, kind: input, shape index: {}]   ;;  %s7907_s1 = inlined_call_operand.vmem [shape: f32[64,64], index: 1, kind: input, shape index: {}]   ;;  %s7908_s2 = inlined_call_operand.vmem [shape: f32[64,64], index: 2, kind: input, shape index: {}]   ;;  %s7909_s3 = inlined_call_operand.vmem [shape: f32[64,64], index: 3, kind: input, shape index: {}]   ;;  %s7910_s4 = inlined_call_operand.vmem [shape: f32[64], index: 4, kind: output, shape index: {0}]   ;;  %s7911_s5 = inlined_call_operand.vmem [shape: f32[64], index: 5, kind: output, shape index: {1}]   ;;  %s7912_s6 = inlined_call_operand.hbm [shape: f32[64,64], index: 6, kind: output, shape index: {2}]   ;;  %s7913_s7 = inlined_call_operand.hbm [shape: f32[64,64], index: 7, kind: output, shape index: {3}]   ;;  %s7914_s8 = inlined_call_operand.hbm [shape: f32[64,64], index: 8, kind: output, shape index: {4}]   ;;  %s7915_s9 = inlined_call_operand.hbm [shape: f32[64,64], index: 9, kind: output, shape index: {5}]  }
   0x1   :  { %7929 = sst [smem:[#allocation36_spill]] %s7910_s4 }
   0x2   :  { %7930 = sst [smem:[#allocation37_spill]] %s7911_s5 }
   0x3   :  { %7931 = sst [smem:[#allocation38_spill]] %s7912_s6 }
   0x4   :  { %7932 = sst [smem:[#allocation39_spill]] %s7913_s7 }
   0x5   :  { %7933 = sst [smem:[#allocation40_spill]] %s7914_s8 }
   0x6   :  { %7934 = sst [smem:[#allocation41_spill]] %s7915_s9 }
   0x7   :  { %11 = vsyncpa [#allocation9], 0 }
   0x8   :  { %12 = vsyncpa [#allocation11], 0 }
   0x9   :  { %13 = vsyncpa [#allocation14], 0  ;;  %s27_s11 = scalar_lea.vmem %s7906_s0, 56 }
   0xa   :  { %p4027_p0 = scmp.gt.s32.totalorder %s7906_s0, %s27_s11 }
   0xb   :  { %s5616_s14 = smov (!%p4027_p0), [#allocation0]   ;;  %s5620_s17 = smov (!%p4027_p0), %s7906_s0  }
   0xc   :  { %4028 = sbr.rel (%p4027_p0) target bundleno = 29 (0x1d), region = 719 }
  0x13 LB: > { %v61_v0 = vld [vmem:[%s5622_s17] sm:$0xff]  ;;  %s63_s17 = scalar_lea.vmem %s5622_s17, 8   ;;  %s5622_s17 = sphi %s5620_s17, %s63_s17   ;;  %s5618_s14 = sphi %s5616_s14, %s64_s14  }
  0x14   : > { %62 = vst [vmem:[%s5618_s14] sm:$0xff] %v61_v0  ;;  %s64_s14 = scalar_lea.vmem %s5618_s14, 8   ;;  %p58_p1 = scmp.gt.s32.totalorder %s63_s17, %s27_s11 }
  0x16   :  { %60 = sbr.rel (!%p58_p1) target bundleno = 19 (0x13), region = 725 }
  0x1d PF:  { %s89_s20 = scalar_lea.vmem %s7907_s1, 56 }
  0x1e   :  { %p4047_p2 = scmp.gt.s32.totalorder %s7907_s1, %s89_s20 }
  0x1f   :  { %s5624_s0 = smov (!%p4047_p2), [#allocation1]   ;;  %s5628_s25 = smov (!%p4047_p2), %s7907_s1  }
  0x20   :  { %4048 = sbr.rel (%p4047_p2) target bundleno = 49 (0x31), region = 741 }
  0x27 LB: > { %v123_v1 = vld [vmem:[%s5630_s25] sm:$0xff]  ;;  %s125_s25 = scalar_lea.vmem %s5630_s25, 8   ;;  %s5630_s25 = sphi %s5628_s25, %s125_s25   ;;  %s5626_s0 = sphi %s5624_s0, %s126_s0  }
  0x28   : > { %124 = vst [vmem:[%s5626_s0] sm:$0xff] %v123_v1  ;;  %s126_s0 = scalar_lea.vmem %s5626_s0, 8   ;;  %p120_p3 = scmp.gt.s32.totalorder %s125_s25, %s89_s20 }
  0x2a   :  { %122 = sbr.rel (!%p120_p3) target bundleno = 39 (0x27), region = 747 }
  0x31 PF:  { %s151_s28 = scalar_lea.vmem %s7908_s2, 56 }
  0x32   :  { %p4067_p4 = scmp.gt.s32.totalorder %s7908_s2, %s151_s28 }
  0x33   :  { %s5632_s1 = smov (!%p4067_p4), [#allocation2]   ;;  %s5636_s12 = smov (!%p4067_p4), %s7908_s2  }
  0x34   :  { %4068 = sbr.rel (%p4067_p4) target bundleno = 69 (0x45), region = 763 }
  0x3b LB: > { %v185_v2 = vld [vmem:[%s5638_s12] sm:$0xff]  ;;  %s187_s12 = scalar_lea.vmem %s5638_s12, 8   ;;  %s5638_s12 = sphi %s5636_s12, %s187_s12   ;;  %s5634_s1 = sphi %s5632_s1, %s188_s1  }
  0x3c   : > { %186 = vst [vmem:[%s5634_s1] sm:$0xff] %v185_v2  ;;  %s188_s1 = scalar_lea.vmem %s5634_s1, 8   ;;  %p182_p5 = scmp.gt.s32.totalorder %s187_s12, %s151_s28 }
  0x3e   :  { %184 = sbr.rel (!%p182_p5) target bundleno = 59 (0x3b), region = 769 }
  0x45 PF:  { %s213_s15 = scalar_lea.vmem %s7909_s3, 56 }
  0x46   :  { %p4087_p6 = scmp.gt.s32.totalorder %s7909_s3, %s213_s15 }
  0x47   :  { %s5640_s2 = smov (!%p4087_p6), [#allocation3]   ;;  %s5644_s20 = smov (!%p4087_p6), %s7909_s3  }
  0x48   :  { %4088 = sbr.rel (%p4087_p6) target bundleno = 89 (0x59), region = 785 }
  0x4f LB: > { %v247_v3 = vld [vmem:[%s5646_s20] sm:$0xff]  ;;  %s249_s20 = scalar_lea.vmem %s5646_s20, 8   ;;  %s5646_s20 = sphi %s5644_s20, %s249_s20   ;;  %s5642_s2 = sphi %s5640_s2, %s250_s2  }
  0x50   : > { %248 = vst [vmem:[%s5642_s2] sm:$0xff] %v247_v3  ;;  %s250_s2 = scalar_lea.vmem %s5642_s2, 8   ;;  %p244_p7 = scmp.gt.s32.totalorder %s249_s20, %s213_s15 }
  0x52   :  { %246 = sbr.rel (!%p244_p7) target bundleno = 79 (0x4f), region = 791 }
  0x59 PF:  { %s5749_s21 = smov [#allocation15]  ;;  %v263_v4 = vld [vmem:[#allocation0] sm:$0xff]  ;;  %v267_v5 = vld [vmem:[#allocation0 + $0x8] sm:$0xff]  ;;  %v271_v6 = vld [vmem:[#allocation0 + $0x10] sm:$0xff]  ;;  %s5751_s3 = smov [#allocation16]  ;;  %v447_v7 = vlaneseq  ;;  %v5656_v11 = vmov 0.0  }
  0x5a   :  { %264 = vst [vmem:[%s5749_s21] sm:$0xff] %v263_v4  ;;  %4452 = vst [vmem:[%s5749_s21 + $0x8] sm:$0xff] %v267_v5  ;;  %v275_v8 = vld [vmem:[#allocation0 + $0x18] sm:$0xff]  ;;  %v279_v9 = vld [vmem:[#allocation0 + $0x20] sm:$0xff]  ;;  %s5766_s22 = smov [#allocation17]  ;;  %s5771_s0 = smov [#allocation18] }
  0x5b   :  { %4453 = vst [vmem:[%s5749_s21 + $0x10] sm:$0xff] %v271_v6  ;;  %v283_v10 = vld [vmem:[#allocation0 + $0x28] sm:$0xff]  ;;  %386 = vst [vmem:[#allocation8] sm:$0xff] %v5656_v11  ;;  %v287_v12 = vld [vmem:[#allocation0 + $0x30] sm:$0xff]  ;;  %v5759_v15 = vand.u32 127, %v447_v7  ;;  %v5761_v16 = vshrl.u32 %v447_v7, 7 }
  0x5c   :  { %388 = vst [vmem:[#allocation8 + $0x8] sm:$0xff] %v5656_v11  ;;  %390 = vst [vmem:[#allocation8 + $0x10] sm:$0xff] %v5656_v11  ;;  %v291_v13 = vld [vmem:[#allocation0 + $0x38] sm:$0xff]  ;;  %v294_v14 = vld [vmem:[#allocation1] sm:$0xff]  ;;  %s5816_s23 = smov [#allocation8]  ;;  %s5836_s24 = smov [#allocation13] }
  0x5d   :  { %392 = vst [vmem:[#allocation8 + $0x18] sm:$0xff] %v5656_v11  ;;  %394 = vst [vmem:[#allocation8 + $0x20] sm:$0xff] %v5656_v11  ;;  %v298_v17 = vld [vmem:[#allocation1 + $0x8] sm:$0xff]  ;;  %v302_v18 = vld [vmem:[#allocation1 + $0x10] sm:$0xff]  ;;  %v5774_v15 = vmov %v5759_v15  ;;  %v5777_v16 = vmov %v5761_v16  ;;  %s4105_s25 = smov [#allocation15]  ;;  %s5947_s26 = smov [#allocation16] }
  0x5e   :  { %396 = vst [vmem:[#allocation8 + $0x28] sm:$0xff] %v5656_v11  ;;  %398 = vst [vmem:[#allocation8 + $0x30] sm:$0xff] %v5656_v11  ;;  %v306_v19 = vld [vmem:[#allocation1 + $0x18] sm:$0xff]  ;;  %v310_v20 = vld [vmem:[#allocation1 + $0x20] sm:$0xff]  ;;  %v5780_v15 = vmov %v5759_v15  ;;  %v5783_v16 = vmov %v5761_v16  ;;  %vm456_vm0 = vcmp.eq.s32.totalorder %v5777_v16, %v5774_v15  ;;  %v5791_v26 = vadd.s32 8, %v5777_v16  ;;  %s5999_s27 = smov [#allocation17] }
  0x5f   :  { %400 = vst [vmem:[#allocation8 + $0x38] sm:$0xff] %v5656_v11  ;;  %401 = vst [vmem:[#allocation10] sm:$0xff] %v5656_v11  ;;  %v314_v21 = vld [vmem:[#allocation1 + $0x28] sm:$0xff]  ;;  %v318_v22 = vld [vmem:[#allocation1 + $0x30] sm:$0xff]  ;;  %v5794_v27 = vadd.s32 16, %v5777_v16  ;;  %v5797_v28 = vadd.s32 24, %v5777_v16  ;;  %vm518_vm1 = vcmp.eq.s32.totalorder %v5783_v16, %v5780_v15 }
  0x60   :  { %403 = vst [vmem:[#allocation10 + $0x8] sm:$0xff] %v5656_v11  ;;  %405 = vst [vmem:[#allocation10 + $0x10] sm:$0xff] %v5656_v11  ;;  %v322_v23 = vld [vmem:[#allocation1 + $0x38] sm:$0xff]  ;;  %v325_v24 = vld [vmem:[#allocation2] sm:$0xff]  ;;  %v5803_v32 = vadd.s32 32, %v5777_v16  ;;  %v5806_v33 = vadd.s32 40, %v5777_v16  ;;  %vm463_vm2 = vcmp.eq.s32.totalorder %v5791_v26, %v5774_v15 }
  0x61   :  { %407 = vst [vmem:[#allocation10 + $0x18] sm:$0xff] %v5656_v11  ;;  %409 = vst [vmem:[#allocation10 + $0x20] sm:$0xff] %v5656_v11  ;;  %v329_v25 = vld [vmem:[#allocation2 + $0x8] sm:$0xff]  ;;  %v333_v29 = vld [vmem:[#allocation2 + $0x10] sm:$0xff]  ;;  %v5809_v34 = vadd.s32 48, %v5777_v16  ;;  %vm470_vm3 = vcmp.eq.s32.totalorder %v5794_v27, %v5774_v15  ;;  %vm477_vm4 = vcmp.eq.s32.totalorder %v5797_v28, %v5774_v15  ;;  %v5825_v38 = vadd.s32 56, %v5777_v16 }
  0x62   :  { %411 = vst [vmem:[#allocation10 + $0x28] sm:$0xff] %v5656_v11  ;;  %413 = vst [vmem:[#allocation10 + $0x30] sm:$0xff] %v5656_v11  ;;  %v337_v30 = vld [vmem:[#allocation2 + $0x18] sm:$0xff]  ;;  %v341_v31 = vld [vmem:[#allocation2 + $0x20] sm:$0xff]  ;;  %vm484_vm5 = vcmp.eq.s32.totalorder %v5803_v32, %v5774_v15  ;;  %vm491_vm6 = vcmp.eq.s32.totalorder %v5806_v33, %v5774_v15  ;;  %v524_v42 = vadd.s32 8, %v5783_v16  ;;  %v531_v46 = vadd.s32 16, %v5783_v16 }
  0x63   :  { %415 = vst [vmem:[#allocation10 + $0x38] sm:$0xff] %v5656_v11  ;;  %416 = vst [vmem:[#allocation12] sm:$0xff] %v5656_v11  ;;  %v345_v35 = vld [vmem:[#allocation2 + $0x28] sm:$0xff]  ;;  %v349_v36 = vld [vmem:[#allocation2 + $0x30] sm:$0xff]  ;;  %vm498_vm7 = vcmp.eq.s32.totalorder %v5809_v34, %v5774_v15  ;;  %vm505_vm8 = vcmp.eq.s32.totalorder %v5825_v38, %v5774_v15  ;;  %v538_v47 = vadd.s32 24, %v5783_v16  ;;  %v545_v48 = vadd.s32 32, %v5783_v16 }
  0x64   :  { %418 = vst [vmem:[#allocation12 + $0x8] sm:$0xff] %v5656_v11  ;;  %420 = vst [vmem:[#allocation12 + $0x10] sm:$0xff] %v5656_v11  ;;  %v353_v37 = vld [vmem:[#allocation2 + $0x38] sm:$0xff]  ;;  %v356_v39 = vld [vmem:[#allocation3] sm:$0xff]  ;;  %vm525_vm9 = vcmp.eq.s32.totalorder %v524_v42, %v5780_v15  ;;  %v552_v52 = vadd.s32 40, %v5783_v16  ;;  %v559_v53 = vadd.s32 48, %v5783_v16  ;;  %vm532_vm10 = vcmp.eq.s32.totalorder %v531_v46, %v5780_v15 }
  0x65   :  { %422 = vst [vmem:[#allocation12 + $0x18] sm:$0xff] %v5656_v11  ;;  %424 = vst [vmem:[#allocation12 + $0x20] sm:$0xff] %v5656_v11  ;;  %v360_v40 = vld [vmem:[#allocation3 + $0x8] sm:$0xff]  ;;  %v364_v41 = vld [vmem:[#allocation3 + $0x10] sm:$0xff]  ;;  %v566_v54 = vadd.s32 56, %v5783_v16  ;;  %vm539_vm11 = vcmp.eq.s32.totalorder %v538_v47, %v5780_v15  ;;  %vm546_vm12 = vcmp.eq.s32.totalorder %v545_v48, %v5780_v15  ;;  %v4104_v16 = vmov %v5761_v16  ;;  %s6044_s28 = smov [#allocation18] }
  0x66   :  { %426 = vst [vmem:[#allocation12 + $0x28] sm:$0xff] %v5656_v11  ;;  %428 = vst [vmem:[#allocation12 + $0x30] sm:$0xff] %v5656_v11  ;;  %v368_v43 = vld [vmem:[#allocation3 + $0x18] sm:$0xff]  ;;  %v372_v44 = vld [vmem:[#allocation3 + $0x20] sm:$0xff]  ;;  %vm553_vm13 = vcmp.eq.s32.totalorder %v552_v52, %v5780_v15  ;;  %vm560_vm14 = vcmp.eq.s32.totalorder %v559_v53, %v5780_v15 }
  0x67   :  { %430 = vst [vmem:[#allocation12 + $0x38] sm:$0xff] %v5656_v11  ;;  %431 = vst [vmem:[#allocation13] sm:$0xff] %v5656_v11  ;;  %v376_v45 = vld [vmem:[#allocation3 + $0x28] sm:$0xff]  ;;  %v380_v49 = vld [vmem:[#allocation3 + $0x30] sm:$0xff]  ;;  %vm567_vm15 = vcmp.eq.s32.totalorder %v566_v54, %v5780_v15 }
  0x68   :  { %433 = vst [vmem:[#allocation13 + $0x8] sm:$0xff] %v5656_v11  ;;  %435 = vst [vmem:[#allocation13 + $0x10] sm:$0xff] %v5656_v11  ;;  %v384_v50 = vld [vmem:[#allocation3 + $0x38] sm:$0xff]  ;;  %v453_v51 = vld [vmem:[%s5816_s23] sm:$0xff] }
  0x69   :  { %437 = vst [vmem:[#allocation13 + $0x18] sm:$0xff] %v5656_v11  ;;  %439 = vst [vmem:[#allocation13 + $0x20] sm:$0xff] %v5656_v11  ;;  %v457_v55 = vsel %vm456_vm0, 1.0, %v453_v51  ;;  %v4480_v56 = vld [vmem:[%s5816_s23 + $0x8] sm:$0xff]  ;;  %v4482_v57 = vld [vmem:[%s5816_s23 + $0x10] sm:$0xff]  ;;  %vm7918_vm0 = vcmp.lt.s32.totalorder %v5759_v15, 64  ;;  %v4181_v15 = vmov %v5759_v15 }
  0x6a   :  { %441 = vst [vmem:[#allocation13 + $0x28] sm:$0xff] %v5656_v11  ;;  %443 = vst [vmem:[#allocation13 + $0x30] sm:$0xff] %v5656_v11  ;;  %v4484_v58 = vld [vmem:[%s5816_s23 + $0x18] sm:$0xff]  ;;  %v464_v59 = vsel %vm463_vm2, 1.0, %v4480_v56  ;;  %v471_v60 = vsel %vm470_vm3, 1.0, %v4482_v57  ;;  %v4486_v62 = vld [vmem:[%s5816_s23 + $0x20] sm:$0xff]  ;;  %v5971_v15 = vmov %v5759_v15 }
  0x6b   :  { %445 = vst [vmem:[#allocation13 + $0x38] sm:$0xff] %v5656_v11  ;;  %4454 = vst [vmem:[%s5749_s21 + $0x18] sm:$0xff] %v275_v8  ;;  %v478_v61 = vsel %vm477_vm4, 1.0, %v4484_v58  ;;  %v4488_v63 = vld [vmem:[%s5816_s23 + $0x28] sm:$0xff]  ;;  %v4490_v0 = vld [vmem:[%s5816_s23 + $0x30] sm:$0xff]  ;;  %v485_v1 = vsel %vm484_vm5, 1.0, %v4486_v62 }
  0x6c   :  { %4455 = vst [vmem:[%s5749_s21 + $0x20] sm:$0xff] %v279_v9  ;;  %4456 = vst [vmem:[%s5749_s21 + $0x28] sm:$0xff] %v283_v10  ;;  %v492_v2 = vsel %vm491_vm6, 1.0, %v4488_v63  ;;  %v499_v3 = vsel %vm498_vm7, 1.0, %v4490_v0  ;;  %v4492_v4 = vld [vmem:[%s5816_s23 + $0x38] sm:$0xff] }
  0x6d   :  { %4457 = vst [vmem:[%s5749_s21 + $0x30] sm:$0xff] %v287_v12  ;;  %4458 = vst [vmem:[%s5749_s21 + $0x38] sm:$0xff] %v291_v13  ;;  %v506_v7 = vsel %vm505_vm8, 1.0, %v4492_v4 }
  0x6e   :  { %295 = vst [vmem:[%s5751_s3] sm:$0xff] %v294_v14  ;;  %4459 = vst [vmem:[%s5751_s3 + $0x8] sm:$0xff] %v298_v17 }
  0x6f   :  { %4460 = vst [vmem:[%s5751_s3 + $0x10] sm:$0xff] %v302_v18  ;;  %4461 = vst [vmem:[%s5751_s3 + $0x18] sm:$0xff] %v306_v19 }
  0x70   :  { %4462 = vst [vmem:[%s5751_s3 + $0x20] sm:$0xff] %v310_v20  ;;  %4463 = vst [vmem:[%s5751_s3 + $0x28] sm:$0xff] %v314_v21 }
  0x71   :  { %4464 = vst [vmem:[%s5751_s3 + $0x30] sm:$0xff] %v318_v22  ;;  %4465 = vst [vmem:[%s5751_s3 + $0x38] sm:$0xff] %v322_v23 }
  0x72   :  { %326 = vst [vmem:[%s5766_s22] sm:$0xff] %v325_v24  ;;  %4466 = vst [vmem:[%s5766_s22 + $0x8] sm:$0xff] %v329_v25  ;;  %v515_v5 = vld [vmem:[%s5836_s24] sm:$0xff]  ;;  %v4494_v6 = vld [vmem:[%s5836_s24 + $0x8] sm:$0xff] }
  0x73   :  { %4467 = vst [vmem:[%s5766_s22 + $0x10] sm:$0xff] %v333_v29  ;;  %4468 = vst [vmem:[%s5766_s22 + $0x18] sm:$0xff] %v337_v30  ;;  %v519_v8 = vsel %vm518_vm1, 1.0, %v515_v5  ;;  %v526_v9 = vsel %vm525_vm9, 1.0, %v4494_v6  ;;  %v4496_v10 = vld [vmem:[%s5836_s24 + $0x10] sm:$0xff]  ;;  %v4498_v11 = vld [vmem:[%s5836_s24 + $0x18] sm:$0xff]  ;;  %vm4114_vm1 = vcmp.eq.s32.totalorder %v4104_v16, %v5971_v15 }
  0x74   :  { %4469 = vst [vmem:[%s5766_s22 + $0x20] sm:$0xff] %v341_v31  ;;  %4470 = vst [vmem:[%s5766_s22 + $0x28] sm:$0xff] %v345_v35  ;;  %v4500_v12 = vld [vmem:[%s5836_s24 + $0x20] sm:$0xff]  ;;  %v533_v13 = vsel %vm532_vm10, 1.0, %v4496_v10  ;;  %v540_v14 = vsel %vm539_vm11, 1.0, %v4498_v11  ;;  %v4502_v18 = vld [vmem:[%s5836_s24 + $0x28] sm:$0xff] }
  0x75   :  { %4471 = vst [vmem:[%s5766_s22 + $0x30] sm:$0xff] %v349_v36  ;;  %4472 = vst [vmem:[%s5766_s22 + $0x38] sm:$0xff] %v353_v37  ;;  %v547_v17 = vsel %vm546_vm12, 1.0, %v4500_v12  ;;  %v4504_v19 = vld [vmem:[%s5836_s24 + $0x30] sm:$0xff]  ;;  %v4506_v20 = vld [vmem:[%s5836_s24 + $0x38] sm:$0xff]  ;;  %v554_v21 = vsel %vm553_vm13, 1.0, %v4502_v18 }
  0x76   :  { %357 = vst [vmem:[%s5771_s0] sm:$0xff] %v356_v39  ;;  %4473 = vst [vmem:[%s5771_s0 + $0x8] sm:$0xff] %v360_v40  ;;  %v561_v22 = vsel %vm560_vm14, 1.0, %v4504_v19  ;;  %v568_v23 = vsel %vm567_vm15, 1.0, %v4506_v20  ;;  %v4111_v24 = vld [vmem:[%s4105_s25] sm:$0xff]  ;;  %v4508_v25 = vld [vmem:[%s4105_s25 + $0x8] sm:$0xff]  ;;  %v4129_v11 = vadd.s32 16, %v4104_v16 }
  0x77   :  { %4474 = vst [vmem:[%s5771_s0 + $0x10] sm:$0xff] %v364_v41  ;;  %4475 = vst [vmem:[%s5771_s0 + $0x18] sm:$0xff] %v368_v43  ;;  %v4509_v26 = vld [vmem:[%s4105_s25 + $0x10] sm:$0xff]  ;;  %v4112_v27 = vsel %vm7918_vm0, %v4111_v24, 0.0  ;;  %v4118_v28 = vsel %vm7918_vm0, %v4508_v25, 0.0  ;;  %v4510_v30 = vld [vmem:[%s4105_s25 + $0x18] sm:$0xff] }
  0x78   :  { %4476 = vst [vmem:[%s5771_s0 + $0x20] sm:$0xff] %v372_v44  ;;  %4477 = vst [vmem:[%s5771_s0 + $0x28] sm:$0xff] %v376_v45  ;;  %v4127_v29 = vsel %vm7918_vm0, %v4509_v26, 0.0  ;;  %v4511_v31 = vld [vmem:[%s4105_s25 + $0x20] sm:$0xff]  ;;  %v4113_v32 = vmul.f32 %v4112_v27, %v4112_v27  ;;  %v4119_v33 = vmul.f32 %v4118_v28, %v4118_v28  ;;  %v4136_v35 = vsel %vm7918_vm0, %v4510_v30, 0.0  ;;  %v4512_v36 = vld [vmem:[%s4105_s25 + $0x28] sm:$0xff] }
  0x79   :  { %4478 = vst [vmem:[%s5771_s0 + $0x30] sm:$0xff] %v380_v49  ;;  %4479 = vst [vmem:[%s5771_s0 + $0x38] sm:$0xff] %v384_v50  ;;  %v4128_v34 = vmul.f32 %v4127_v29, %v4127_v29  ;;  %v4145_v37 = vsel %vm7918_vm0, %v4511_v31, 0.0  ;;  %v4137_v39 = vmul.f32 %v4136_v35, %v4136_v35  ;;  %v4513_v40 = vld [vmem:[%s4105_s25 + $0x30] sm:$0xff]  ;;  %v4154_v41 = vsel %vm7918_vm0, %v4512_v36, 0.0  ;;  %v4514_v44 = vld [vmem:[%s4105_s25 + $0x38] sm:$0xff] }
  0x7a   :  { %458 = vst [vmem:[%s5816_s23] sm:$0xff] %v457_v55  ;;  %4481 = vst [vmem:[%s5816_s23 + $0x8] sm:$0xff] %v464_v59  ;;  %v4124_v38 = vadd.f32 %v4119_v33, %v4113_v32  ;;  %v4146_v43 = vmul.f32 %v4145_v37, %v4145_v37  ;;  %v4163_v45 = vsel %vm7918_vm0, %v4513_v40, 0.0  ;;  %v5951_v47 = vmul.f32 %v4154_v41, %v4154_v41  ;;  %v4191_v48 = vld [vmem:[%s5947_s26] sm:$0xff]  ;;  %v4515_v52 = vld [vmem:[%s5947_s26 + $0x8] sm:$0xff] }
  0x7b   :  { %4483 = vst [vmem:[%s5816_s23 + $0x10] sm:$0xff] %v471_v60  ;;  %4485 = vst [vmem:[%s5816_s23 + $0x18] sm:$0xff] %v478_v61  ;;  %v4172_v49 = vsel %vm7918_vm0, %v4514_v44, 0.0  ;;  %v5956_v51 = vmul.f32 %v4163_v45, %v4163_v45  ;;  %v4192_v53 = vsel %vm7918_vm0, %v4191_v48, 0.0  ;;  %v4516_v56 = vld [vmem:[%s5947_s26 + $0x10] sm:$0xff]  ;;  %v4517_v57 = vld [vmem:[%s5947_s26 + $0x18] sm:$0xff]  ;;  %vm4130_vm3 = vcmp.eq.s32.totalorder %v4129_v11, %v5971_v15 }
  0x7c   :  { %4487 = vst [vmem:[%s5816_s23 + $0x20] sm:$0xff] %v485_v1  ;;  %4489 = vst [vmem:[%s5816_s23 + $0x28] sm:$0xff] %v492_v2  ;;  %v4133_v42 = vadd.f32 %v4128_v34, %v4124_v38  ;;  %v5962_v55 = vmul.f32 %v4172_v49, %v4172_v49  ;;  %v4198_v58 = vsel %vm7918_vm0, %v4515_v52, 0.0  ;;  %v4518_v59 = vld [vmem:[%s5947_s26 + $0x20] sm:$0xff]  ;;  %v5974_v61 = vmul.f32 %v4192_v53, %v4192_v53  ;;  %v4519_v0 = vld [vmem:[%s5947_s26 + $0x28] sm:$0xff] }
  0x7d   :  { %4491 = vst [vmem:[%s5816_s23 + $0x30] sm:$0xff] %v499_v3  ;;  %4493 = vst [vmem:[%s5816_s23 + $0x38] sm:$0xff] %v506_v7  ;;  %v4204_v62 = vsel %vm7918_vm0, %v4516_v56, 0.0  ;;  %v4210_v63 = vsel %vm7918_vm0, %v4517_v57, 0.0  ;;  %v4120_v1 = vadd.s32 8, %v4104_v16  ;;  %v5982_v3 = vmul.f32 %v4198_v58, %v4198_v58  ;;  %v4250_v30 = vld [vmem:[%s5999_s27] sm:$0xff] }
  0x7e   :  { %520 = vst [vmem:[%s5836_s24] sm:$0xff] %v519_v8  ;;  %4495 = vst [vmem:[%s5836_s24 + $0x8] sm:$0xff] %v526_v9  ;;  %v4142_v46 = vadd.f32 %v4137_v39, %v4133_v42  ;;  %v4216_v4 = vsel %vm7918_vm0, %v4518_v59, 0.0  ;;  %v5988_v6 = vmul.f32 %v4204_v62, %v4204_v62  ;;  %v5990_v7 = vmul.f32 %v4210_v63, %v4210_v63  ;;  %v4522_v37 = vld [vmem:[%s5999_s27 + $0x8] sm:$0xff]  ;;  %v4524_v49 = vld [vmem:[%s5999_s27 + $0x18] sm:$0xff] }
  0x7f   :  { %4497 = vst [vmem:[%s5836_s24 + $0x10] sm:$0xff] %v533_v13  ;;  %4499 = vst [vmem:[%s5836_s24 + $0x18] sm:$0xff] %v540_v14  ;;  %v4222_v8 = vsel %vm7918_vm0, %v4519_v0, 0.0  ;;  %v5994_v9 = vmul.f32 %v4216_v4, %v4216_v4  ;;  %v4115_v10 = vsel %vm4114_vm1, 0.0, %v4113_v32  ;;  %vm4121_vm2 = vcmp.eq.s32.totalorder %v4120_v1, %v5971_v15  ;;  %v4520_v13 = vld [vmem:[%s5947_s26 + $0x30] sm:$0xff]  ;;  %v4525_v56 = vld [vmem:[%s5999_s27 + $0x20] sm:$0xff] }
  0x80   :  { %4501 = vst [vmem:[%s5836_s24 + $0x20] sm:$0xff] %v547_v17  ;;  %4503 = vst [vmem:[%s5836_s24 + $0x28] sm:$0xff] %v554_v21  ;;  %v4151_v50 = vadd.f32 %v4146_v43, %v4142_v46  ;;  %v4122_v14 = vsel %vm4121_vm2, 0.0, %v4119_v33  ;;  %v4138_v17 = vadd.s32 24, %v4104_v16  ;;  %v4147_v18 = vadd.s32 32, %v4104_v16  ;;  %v4528_v11 = vld [vmem:[%s5999_s27 + $0x38] sm:$0xff] }
  0x81   :  { %4505 = vst [vmem:[%s5836_s24 + $0x30] sm:$0xff] %v561_v22  ;;  %4507 = vst [vmem:[%s5836_s24 + $0x38] sm:$0xff] %v568_v23  ;;  %v4123_v19 = vadd.f32 %v4122_v14, %v4115_v10  ;;  %v4156_v20 = vadd.s32 40, %v4104_v16  ;;  %v4165_v21 = vadd.s32 48, %v4104_v16  ;;  %v4521_v23 = vld [vmem:[%s5947_s26 + $0x38] sm:$0xff]  ;;  %v4131_v24 = vsel %vm4130_vm3, 0.0, %v4128_v34 }
  0x82   :  { %v4160_v54 = vadd.f32 %v5951_v47, %v4151_v50  ;;  %vm4139_vm4 = vcmp.eq.s32.totalorder %v4138_v17, %v5971_v15  ;;  %vm4148_vm5 = vcmp.eq.s32.totalorder %v4147_v18, %v5971_v15  ;;  %v4228_v25 = vsel %vm7918_vm0, %v4520_v13, 0.0  ;;  %v4309_v17 = vld [vmem:[%s6044_s28] sm:$0xff] }
  0x83   :  { %v4132_v26 = vadd.f32 %v4131_v24, %v4123_v19  ;;  %v4140_v27 = vsel %vm4139_vm4, 0.0, %v4137_v39  ;;  %vm4157_vm6 = vcmp.eq.s32.totalorder %v4156_v20, %v5971_v15  ;;  %v6010_v29 = vmul.f32 %v4222_v8, %v4222_v8 }
  0x84   :  { %v4169_v60 = vadd.f32 %v5956_v51, %v4160_v54  ;;  %v4149_v31 = vsel %vm4148_vm5, 0.0, %v4146_v43  ;;  %v4174_v32 = vadd.s32 56, %v4104_v16  ;;  %v4234_v33 = vsel %vm7918_vm0, %v4521_v23, 0.0  ;;  %v4523_v43 = vld [vmem:[%s5999_s27 + $0x10] sm:$0xff] }
  0x85   :  { %v4141_v34 = vadd.f32 %v4140_v27, %v4132_v26  ;;  %vm4166_vm7 = vcmp.eq.s32.totalorder %v4165_v21, %v5971_v15  ;;  %v4229_v36 = vmul.f32 %v4228_v25, %v4228_v25  ;;  %v4158_v38 = vsel %vm4157_vm6, 0.0, %v5951_v47  ;;  %v4529_v21 = vld [vmem:[%s6044_s28 + $0x8] sm:$0xff]  ;;  %v4530_v25 = vld [vmem:[%s6044_s28 + $0x10] sm:$0xff] }
  0x86   :  { %v4178_v2 = vadd.f32 %v5962_v55, %v4169_v60  ;;  %v4251_v39 = vsel %vm7918_vm0, %v4250_v30, 0.0  ;;  %vm4175_vm8 = vcmp.eq.s32.totalorder %v4174_v32, %v5971_v15  ;;  %v4235_v42 = vmul.f32 %v4234_v33, %v4234_v33  ;;  %v4526_v60 = vld [vmem:[%s5999_s27 + $0x28] sm:$0xff]  ;;  %v4531_v30 = vld [vmem:[%s6044_s28 + $0x18] sm:$0xff] }
  0x87   :  { %v4150_v40 = vadd.f32 %v4149_v31, %v4141_v34  ;;  %v4167_v44 = vsel %vm4166_vm7, 0.0, %v5956_v51  ;;  %v4257_v45 = vsel %vm7918_vm0, %v4522_v37, 0.0  ;;  %v4252_v47 = vmul.f32 %v4251_v39, %v4251_v39 }
  0x88   :  { %v4195_v5 = vadd.f32 %v5974_v61, %v4178_v2  ;;  %v4176_v50 = vsel %vm4175_vm8, 0.0, %v5962_v55  ;;  %v4263_v52 = vsel %vm7918_vm0, %v4523_v43, 0.0  ;;  %v4184_v16 = vmov %v5761_v16  ;;  %v4527_v2 = vld [vmem:[%s5999_s27 + $0x30] sm:$0xff] }
  0x89   :  { %v4159_v46 = vadd.f32 %v4158_v38, %v4150_v40  ;;  %v4240_v15 = vmov %v5759_v15  ;;  %v4258_v54 = vmul.f32 %v4257_v45, %v4257_v45  ;;  %v4243_v16 = vmov %v5761_v16  ;;  %v4533_v40 = vld [vmem:[%s6044_s28 + $0x28] sm:$0xff]  ;;  %v4534_v45 = vld [vmem:[%s6044_s28 + $0x30] sm:$0xff] }
  0x8a   :  { %v4201_v12 = vadd.f32 %v5982_v3, %v4195_v5  ;;  %v4269_v57 = vsel %vm7918_vm0, %v4524_v49, 0.0  ;;  %v4264_v59 = vmul.f32 %v4263_v52, %v4263_v52  ;;  %v4275_v62 = vsel %vm7918_vm0, %v4525_v56, 0.0 }
  0x8b   :  { %v4168_v53 = vadd.f32 %v4167_v44, %v4159_v46  ;;  %v4270_v1 = vmul.f32 %v4269_v57, %v4269_v57  ;;  %v4281_v4 = vsel %vm7918_vm0, %v4526_v60, 0.0  ;;  %v4276_v10 = vmul.f32 %v4275_v62, %v4275_v62 }
  0x8c   :  { %v4207_v22 = vadd.f32 %v5988_v6, %v4201_v12  ;;  %v4287_v12 = vsel %vm7918_vm0, %v4527_v2, 0.0  ;;  %v4282_v14 = vmul.f32 %v4281_v4, %v4281_v4  ;;  %v4293_v18 = vsel %vm7918_vm0, %v4528_v11, 0.0 }
  0x8d   :  { %v4177_v58 = vadd.f32 %v4176_v50, %v4168_v53  ;;  %v4318_v26 = vsel %vm7918_vm0, %v4529_v21, 0.0  ;;  %v4327_v31 = vsel %vm7918_vm0, %v4530_v25, 0.0  ;;  %v4535_v50 = vld [vmem:[%s6044_s28 + $0x38] sm:$0xff]  ;;  %v4302_v16 = vmov %v5761_v16 }
  0x8e   :  { %v4213_v28 = vadd.f32 %v5990_v7, %v4207_v22  ;;  %v4310_v22 = vsel %vm7918_vm0, %v4309_v17, 0.0  ;;  %v4319_v34 = vmul.f32 %v4318_v26, %v4318_v26  ;;  %v4328_v39 = vmul.f32 %v4327_v31, %v4327_v31 }
  0x8f   :  { %v4194_v63 = vadd.f32 %v5974_v61, %v4177_v58  ;;  %v4299_v15 = vmov %v5759_v15  ;;  %v4338_v4 = vadd.s32 24, %v4302_v16 }
  0x90   :  { %v4219_v35 = vadd.f32 %v5994_v9, %v4213_v28  ;;  %vm4312_vm9 = vcmp.eq.s32.totalorder %v4302_v16, %v4299_v15 }
  0x91   :  { %v4200_v5 = vadd.f32 %v5982_v3, %v4194_v63  ;;  %v4288_v3 = vmul.f32 %v4287_v12, %v4287_v12  ;;  %vm4339_vm12 = vcmp.eq.s32.totalorder %v4338_v4, %v4299_v15 }
  0x92   :  { %v4225_v41 = vadd.f32 %v6010_v29, %v4219_v35  ;;  %v4336_v35 = vsel %vm7918_vm0, %v4531_v30, 0.0 }
  0x93   :  { %v4206_v61 = vadd.f32 %v5988_v6, %v4200_v5  ;;  %v4294_v6 = vmul.f32 %v4293_v18, %v4293_v18  ;;  %v4337_v44 = vmul.f32 %v4336_v35, %v4336_v35 }
  0x94   :  { %v4231_v48 = vadd.f32 %v4229_v36, %v4225_v41 }
  0x95   :  { %v4212_v19 = vadd.f32 %v5990_v7, %v4206_v61  ;;  %v4311_v7 = vmul.f32 %v4310_v22, %v4310_v22  ;;  %v4340_v18 = vsel %vm4339_vm12, 0.0, %v4337_v44 }
  0x96   :  { %v4237_v51 = vadd.f32 %v4235_v42, %v4231_v48 }
  0x97   :  { %v4218_v23 = vadd.f32 %v5994_v9, %v4212_v19  ;;  %v4532_v9 = vld [vmem:[%s6044_s28 + $0x20] sm:$0xff] }
  0x98   :  { %v4254_v55 = vadd.f32 %v4252_v47, %v4237_v51 }
  0x99   :  { %v4224_v27 = vadd.f32 %v6010_v29, %v4218_v23  ;;  %v4345_v29 = vsel %vm7918_vm0, %v4532_v9, 0.0 }
  0x9a   :  { %v4260_v0 = vadd.f32 %v4258_v54, %v4254_v55  ;;  %v4346_v49 = vmul.f32 %v4345_v29, %v4345_v29  ;;  %v4320_v55 = vadd.s32 8, %v4302_v16 }
  0x9b   :  { %v4230_v32 = vadd.f32 %v4229_v36, %v4224_v27  ;;  %v4354_v36 = vsel %vm7918_vm0, %v4533_v40, 0.0 }
  0x9c   :  { %v4266_v8 = vadd.f32 %v4264_v59, %v4260_v0  ;;  %v4355_v51 = vmul.f32 %v4354_v36, %v4354_v36  ;;  %v4329_v0 = vadd.s32 16, %v4302_v16  ;;  %vm4321_vm10 = vcmp.eq.s32.totalorder %v4320_v55, %v4299_v15 }
  0x9d   :  { %v4236_v37 = vadd.f32 %v4235_v42, %v4230_v32  ;;  %v4363_v42 = vsel %vm7918_vm0, %v4534_v45, 0.0  ;;  %v4322_v12 = vsel %vm4321_vm10, 0.0, %v4319_v34 }
  0x9e   :  { %v4272_v13 = vadd.f32 %v4270_v1, %v4266_v8  ;;  %v4364_v58 = vmul.f32 %v4363_v42, %v4363_v42  ;;  %v4313_v8 = vsel %vm4312_vm9, 0.0, %v4311_v7  ;;  %vm4330_vm11 = vcmp.eq.s32.totalorder %v4329_v0, %v4299_v15 }
  0x9f   :  { %v4253_v41 = vadd.f32 %v4252_v47, %v4236_v37  ;;  %v4372_v47 = vsel %vm7918_vm0, %v4535_v50, 0.0 }
  0xa0   :  { %v4278_v20 = vadd.f32 %v4276_v10, %v4272_v13  ;;  %v4373_v62 = vmul.f32 %v4372_v47, %v4372_v47  ;;  %v4331_v13 = vsel %vm4330_vm11, 0.0, %v4328_v39 }
  0xa1   :  { %v4259_v46 = vadd.f32 %v4258_v54, %v4253_v41 }
  0xa2   :  { %v4284_v24 = vadd.f32 %v4282_v14, %v4278_v20  ;;  %v4374_v20 = vadd.s32 56, %v4302_v16 }
  0xa3   :  { %v4265_v52 = vadd.f32 %v4264_v59, %v4259_v46 }
  0xa4   :  { %v4290_v28 = vadd.f32 %v4288_v3, %v4284_v24  ;;  %vm4375_vm1 = vcmp.eq.s32.totalorder %v4374_v20, %v4299_v15 }
  0xa5   :  { %v4271_v56 = vadd.f32 %v4270_v1, %v4265_v52  ;;  %v4347_v1 = vadd.s32 32, %v4302_v16  ;;  %v4376_v25 = vsel %vm4375_vm1, 0.0, %v4373_v62 }
  0xa6   :  { %v4296_v33 = vadd.f32 %v4294_v6, %v4290_v28 }
  0xa7   :  { %v4277_v54 = vadd.f32 %v4276_v10, %v4271_v56  ;;  %v4356_v10 = vadd.s32 40, %v4302_v16  ;;  %vm4348_vm13 = vcmp.eq.s32.totalorder %v4347_v1, %v4299_v15 }
  0xa8   :  { %v4315_v38 = vadd.f32 %v4311_v7, %v4296_v33 }
  0xa9   :  { %v4283_v63 = vadd.f32 %v4282_v14, %v4277_v54  ;;  %v4365_v14 = vadd.s32 48, %v4302_v16  ;;  %vm4357_vm14 = vcmp.eq.s32.totalorder %v4356_v10, %v4299_v15 }
  0xaa   :  { %v4324_v43 = vadd.f32 %v4319_v34, %v4315_v38  ;;  %v4358_v22 = vsel %vm4357_vm14, 0.0, %v4355_v51 }
  0xab   :  { %v4289_v2 = vadd.f32 %v4288_v3, %v4283_v63  ;;  %v4349_v3 = vsel %vm4348_vm13, 0.0, %v4346_v49  ;;  %vm4366_vm15 = vcmp.eq.s32.totalorder %v4365_v14, %v4299_v15 }
  0xac   :  { %v4333_v48 = vadd.f32 %v4328_v39, %v4324_v43  ;;  %v4367_v24 = vsel %vm4366_vm15, 0.0, %v4364_v58 }
  0xad   :  { %v4295_v11 = vadd.f32 %v4294_v6, %v4289_v2 }
  0xae   :  { %v4342_v53 = vadd.f32 %v4337_v44, %v4333_v48 }
  0xaf   :  { %v4314_v61 = vadd.f32 %v4313_v8, %v4295_v11 }
  0xb0   :  { %v4351_v57 = vadd.f32 %v4346_v49, %v4342_v53 }
  0xb1   :  { %v4323_v17 = vadd.f32 %v4322_v12, %v4314_v61 }
  0xb2   :  { %v4360_v60 = vadd.f32 %v4355_v51, %v4351_v57 }
  0xb3   :  { %v4332_v19 = vadd.f32 %v4331_v13, %v4323_v17 }
  0xb4   :  { %v4369_v59 = vadd.f32 %v4364_v58, %v4360_v60 }
  0xb5   :  { %v4341_v21 = vadd.f32 %v4340_v18, %v4332_v19 }
  0xb6   :  { %v4378_v5 = vadd.f32 %v4373_v62, %v4369_v59 }
  0xb7   :  { %v4350_v23 = vadd.f32 %v4349_v3, %v4341_v21 }
  0xb8   :  { %4379 = vadd.xlane.f32.xlu0 %v4378_v5 }
  0xb9   :  { %v4359_v6 = vadd.f32 %v4358_v22, %v4350_v23 }
  0xbb   :  { %v4368_v26 = vadd.f32 %v4367_v24, %v4359_v6 }
  0xbd   :  { %v4377_v27 = vadd.f32 %v4376_v25, %v4368_v26 }
  0xbf   :  { %4387 = vadd.xlane.f32.xlu0 %v4377_v27 }
 0x145   :  { %v4380_v28 = vpop.xlane.xlu0 %4379 }
 0x146   :  { %v4381_v7 = vrot.slane %v4380_v28, 4 }
 0x148   :  { %v4382_v30 = vadd.f32 %v4381_v7, %v4380_v28 }
 0x14a   :  { %v4383_v31 = vrot.slane %v4382_v30, 2 }
 0x14c   :  { %v4388_v32 = vpop.xlane.xlu0 %4387  ;;  %v4384_v9 = vadd.f32 %v4383_v31, %v4382_v30 }
 0x14d   :  { %v4389_v33 = vrot.slane %v4388_v32, 4 }
 0x14e   :  { %v4385_v38 = vrot.slane %v4384_v9, 1 }
 0x14f   :  { %v4390_v34 = vadd.f32 %v4389_v33, %v4388_v32 }
 0x150   :  { %v4386_v29 = vadd.f32 %v4385_v38, %v4384_v9 }
 0x151   :  { %v4391_v35 = vrot.slane %v4390_v34, 2 }
 0x153   :  { %v4392_v37 = vadd.f32 %v4391_v35, %v4390_v34 }
 0x155   :  { %v4393_v39 = vrot.slane %v4392_v37, 1 }
 0x157   :  { %v4394_v40 = vadd.f32 %v4393_v39, %v4392_v37 }
 0x159   :  { %5139 = vpush %v4394_v40 }
 0x15a   :  { %5141 = vpush %v4386_v29 }
 0x18a   :  { %s5140_s29 = spop %5139 }
 0x18b   :  { %s5142_s30 = spop %5141 }
 0x18c   :  { %s4397_s1 = smul.f32 1e-10, %s5142_s30 }
 0x18e   :  { %p4398_p8 = scmp.le.f32.partialorder %s5140_s29, %s4397_s1 }
 0x18f   :  { %s6082_s10 = smov (!%p4398_p8), 0  }
 0x190   :  { %4401 = sbr.rel (%p4398_p8) target bundleno = 1466 (0x5ba), region = 807 }
 0x197 LB: > { %7935 = sst [smem:[#allocation31_spill]] %s5650_s10  ;;  %s6087_s11 = smov 0   ;;  %s5650_s10 = sphi %s6082_s10, %s8034_s10  }
 0x198 LB: >> { %7936 = sst [smem:[#allocation32_spill]] %s5654_s11  ;;  %s5654_s11 = sphi %s6087_s11, %s897_s11  }
 0x199   : >> { %s6092_s12 = smov [#allocation15]  ;;  %v902_v15 = vmov %v5759_v15  ;;  %v905_v16 = vmov %v5761_v16  ;;  %s6105_s13 = smov [#allocation16] }
 0x19a   : >> { %v6097_v15 = vmov %v5759_v15  ;;  %v967_v16 = vmov %v5761_v16  ;;  %v906_v41 = vld [vmem:[%s6092_s12] sm:$0xff]  ;;  %vm909_vm2 = vcmp.eq.s32.totalorder %v905_v16, %v902_v15  ;;  %v4536_v43 = vld [vmem:[%s6092_s12 + $0x8] sm:$0xff]  ;;  %v914_v44 = vadd.s32 8, %v905_v16  ;;  %v4537_v48 = vld [vmem:[%s6092_s12 + $0x10] sm:$0xff]  ;;  %s6119_s14 = smov [#allocation18]  ;;  %s899_s15 = smov [#allocation19] }
 0x19b   : >> { %v920_v45 = vadd.s32 16, %v905_v16  ;;  %v926_v36 = vadd.s32 24, %v905_v16  ;;  %v910_v46 = vsel %vm909_vm2, %v906_v41, 0.0  ;;  %v932_v49 = vadd.s32 32, %v905_v16  ;;  %v4538_v42 = vld [vmem:[%s6092_s12 + $0x18] sm:$0xff]  ;;  %v4539_v51 = vld [vmem:[%s6092_s12 + $0x20] sm:$0xff] }
 0x19c   : >> { %v938_v50 = vadd.s32 40, %v905_v16  ;;  %vm971_vm3 = vcmp.eq.s32.totalorder %v967_v16, %v6097_v15  ;;  %vm915_vm4 = vcmp.eq.s32.totalorder %v914_v44, %v902_v15  ;;  %v944_v52 = vadd.s32 48, %v905_v16  ;;  %v968_v56 = vld [vmem:[%s6105_s13] sm:$0xff]  ;;  %v4540_v58 = vld [vmem:[%s6092_s12 + $0x28] sm:$0xff]  ;;  %v4541_v63 = vld [vmem:[%s6092_s12 + $0x30] sm:$0xff]  ;;  %s961_s16 = smov [#allocation20] }
 0x19d   : >> { %vm921_vm5 = vcmp.eq.s32.totalorder %v920_v45, %v902_v15  ;;  %vm927_vm6 = vcmp.eq.s32.totalorder %v926_v36, %v902_v15  ;;  %v916_v53 = vsel %vm915_vm4, %v4536_v43, %v910_v46  ;;  %vm933_vm7 = vcmp.eq.s32.totalorder %v932_v49, %v902_v15  ;;  %v4543_v55 = vld [vmem:[%s6105_s13 + $0x8] sm:$0xff]  ;;  %v4544_v0 = vld [vmem:[%s6105_s13 + $0x10] sm:$0xff]  ;;  %v4542_v5 = vld [vmem:[%s6092_s12 + $0x38] sm:$0xff]  ;;  %s1088_s17 = smov [#allocation20]  ;;  %s1023_s2 = smov [#allocation21] }
 0x19e   : >> { %vm939_vm8 = vcmp.eq.s32.totalorder %v938_v50, %v902_v15  ;;  %v950_v47 = vadd.s32 56, %v905_v16  ;;  %v922_v57 = vsel %vm921_vm5, %v4537_v48, %v916_v53  ;;  %vm945_vm9 = vcmp.eq.s32.totalorder %v944_v52, %v902_v15  ;;  %v4545_v8 = vld [vmem:[%s6105_s13 + $0x18] sm:$0xff]  ;;  %v4546_v10 = vld [vmem:[%s6105_s13 + $0x20] sm:$0xff]  ;;  %v4547_v14 = vld [vmem:[%s6105_s13 + $0x28] sm:$0xff]  ;;  %s1086_s18 = smov [#allocation19]  ;;  %s1090_s19 = smov [#allocation21] }
 0x19f   : >> { %v972_v54 = vsel %vm971_vm3, %v968_v56, 0.0  ;;  %v976_v60 = vadd.s32 8, %v967_v16  ;;  %v928_v62 = vsel %vm927_vm6, %v4538_v42, %v922_v57  ;;  %v982_v59 = vadd.s32 16, %v967_v16  ;;  %v4548_v20 = vld [vmem:[%s6105_s13 + $0x30] sm:$0xff]  ;;  %v1030_v22 = vld [vmem:[%s6119_s14] sm:$0xff]  ;;  %v4549_v6 = vld [vmem:[%s6105_s13 + $0x38] sm:$0xff] }
 0x1a0   : >> { %vm951_vm10 = vcmp.eq.s32.totalorder %v950_v47, %v902_v15  ;;  %v988_v2 = vadd.s32 24, %v967_v16  ;;  %v934_v4 = vsel %vm933_vm7, %v4539_v51, %v928_v62  ;;  %v994_v11 = vadd.s32 32, %v967_v16  ;;  %v4550_v7 = vld [vmem:[%s6119_s14 + $0x8] sm:$0xff]  ;;  %v4551_v32 = vld [vmem:[%s6119_s14 + $0x10] sm:$0xff]  ;;  %v4552_v38 = vld [vmem:[%s6119_s14 + $0x18] sm:$0xff]  ;;  %s1125_s20 = smov [#allocation22] }
 0x1a1   : >> { %vm977_vm11 = vcmp.eq.s32.totalorder %v976_v60, %v6097_v15  ;;  %v1000_v1 = vadd.s32 40, %v967_v16  ;;  %v940_v12 = vsel %vm939_vm8, %v4540_v58, %v934_v4  ;;  %vm983_vm12 = vcmp.eq.s32.totalorder %v982_v59, %v6097_v15  ;;  %v4553_v29 = vld [vmem:[%s6119_s14 + $0x20] sm:$0xff]  ;;  %v4554_v45 = vld [vmem:[%s6119_s14 + $0x28] sm:$0xff]  ;;  %v4555_v46 = vld [vmem:[%s6119_s14 + $0x30] sm:$0xff]  ;;  %s1127_s21 = smov [#allocation23]  ;;  %s1084_s3 = smov [#allocation24] }
 0x1a2   : >> { %v978_v61 = vsel %vm977_vm11, %v4543_v55, %v972_v54  ;;  %vm989_vm13 = vcmp.eq.s32.totalorder %v988_v2, %v6097_v15  ;;  %v946_v13 = vsel %vm945_vm9, %v4541_v63, %v940_v12  ;;  %vm995_vm14 = vcmp.eq.s32.totalorder %v994_v11, %v6097_v15  ;;  %v4556_v53 = vld [vmem:[%s6119_s14 + $0x38] sm:$0xff]  ;;  %s1085_s22 = smov [#allocation25]  ;;  %s1129_s3 = smov %s1084_s3 }
 0x1a3   : >> { %v984_v17 = vsel %vm983_vm12, %v4544_v0, %v978_v61  ;;  %vm1001_vm15 = vcmp.eq.s32.totalorder %v1000_v1, %v6097_v15  ;;  %v952_v18 = vsel %vm951_vm10, %v4542_v5, %v946_v13  ;;  %v1006_v3 = vadd.s32 48, %v967_v16  ;;  %s1131_s22 = smov %s1085_s22  ;;  %s1148_s0 = smov [#allocation24] }
 0x1a4   : >> { %v990_v19 = vsel %vm989_vm13, %v4545_v8, %v984_v17  ;;  %v1012_v21 = vadd.s32 56, %v967_v16  ;;  %v953_v23 = vrot.slane %v952_v18, 4  ;;  %v1026_v15 = vmov %v5759_v15  ;;  %s1133_s23 = smov [#allocation24]  ;;  %s1164_s24 = smov [#allocation24] }
 0x1a5   : >> { %v996_v24 = vsel %vm995_vm14, %v4546_v10, %v990_v19  ;;  %v1029_v16 = vmov %v5761_v16  ;;  %vm1007_vm1 = vcmp.eq.s32.totalorder %v1006_v3, %v6097_v15  ;;  %s1275_s25 = smov [#allocation25]  ;;  %s1180_s26 = smov [#allocation24] }
 0x1a6   : >> { %v1002_v25 = vsel %vm1001_vm15, %v4547_v14, %v996_v24  ;;  %vm1013_vm2 = vcmp.eq.s32.totalorder %v1012_v21, %v6097_v15  ;;  %vm1033_vm3 = vcmp.eq.s32.totalorder %v1029_v16, %v1026_v15  ;;  %v954_v26 = vadd.f32 %v953_v23, %v952_v18  ;;  %s1291_s27 = smov [#allocation25]  ;;  %s1196_s28 = smov [#allocation24] }
 0x1a7   : >> { %v1008_v27 = vsel %vm1007_vm1, %v4548_v20, %v1002_v25  ;;  %v1034_v28 = vsel %vm1033_vm3, %v1030_v22, 0.0  ;;  %v1038_v30 = vadd.s32 8, %v1029_v16  ;;  %v1044_v33 = vadd.s32 16, %v1029_v16  ;;  %s1307_s29 = smov [#allocation25]  ;;  %s1212_s30 = smov [#allocation24] }
 0x1a8   : >> { %v1014_v31 = vsel %vm1013_vm2, %v4549_v6, %v1008_v27  ;;  %v1050_v34 = vadd.s32 24, %v1029_v16  ;;  %v1056_v9 = vadd.s32 32, %v1029_v16  ;;  %v955_v35 = vrot.slane %v954_v26, 2  ;;  %s1323_s1 = smov [#allocation25]  ;;  %s1339_s12 = smov [#allocation25] }
 0x1a9   : >> { %v1015_v37 = vrot.slane %v1014_v31, 4  ;;  %vm1039_vm4 = vcmp.eq.s32.totalorder %v1038_v30, %v1026_v15  ;;  %v1062_v39 = vadd.s32 40, %v1029_v16  ;;  %vm1045_vm5 = vcmp.eq.s32.totalorder %v1044_v33, %v1026_v15  ;;  %s1260_s13 = smov [#allocation25]  ;;  %s1355_s14 = smov [#allocation25] }
 0x1aa   : >> { %v1040_v40 = vsel %vm1039_vm4, %v4550_v7, %v1034_v28  ;;  %vm1051_vm6 = vcmp.eq.s32.totalorder %v1050_v34, %v1026_v15  ;;  %vm1057_vm7 = vcmp.eq.s32.totalorder %v1056_v9, %v1026_v15  ;;  %v956_v41 = vadd.f32 %v955_v35, %v954_v26  ;;  %s7183_s5 = smov [#allocation17]  ;;  %s7189_s4 = smov [#allocation15] }
 0x1ab   : >> { %v1016_v43 = vadd.f32 %v1015_v37, %v1014_v31  ;;  %v1046_v44 = vsel %vm1045_vm5, %v4551_v32, %v1040_v40  ;;  %vm1063_vm8 = vcmp.eq.s32.totalorder %v1062_v39, %v1026_v15  ;;  %v1068_v48 = vadd.s32 48, %v1029_v16  ;;  %s7193_s9 = smov [#allocation16]  ;;  %s7201_s8 = smov [#allocation18] }
 0x1ac   : >> { %v1052_v36 = vsel %vm1051_vm6, %v4552_v38, %v1046_v44  ;;  %v1074_v49 = vadd.s32 56, %v1029_v16  ;;  %v957_v50 = vrot.slane %v956_v41, 1  ;;  %v1155_v16 = vmov %v5761_v16  ;;  %7946 = sst [smem:[#allocation33_spill]] %s7193_s9  ;;  %s7207_s6 = smov [#allocation17] }
 0x1ad   : >> { %v1017_v42 = vrot.slane %v1016_v43, 2  ;;  %v1058_v52 = vsel %vm1057_vm7, %v4553_v29, %v1052_v36  ;;  %vm1069_vm9 = vcmp.eq.s32.totalorder %v1068_v48, %v1026_v15  ;;  %v1171_v16 = vmov %v5761_v16  ;;  %7947 = sst [smem:[#allocation34_spill]] %s7207_s6  ;;  %s7213_s7 = smov [#allocation15] }
 0x1ae   : >> { %v1064_v51 = vsel %vm1063_vm8, %v4554_v45, %v1058_v52  ;;  %vm1075_vm10 = vcmp.eq.s32.totalorder %v1074_v49, %v1026_v15  ;;  %v958_v47 = vadd.f32 %v957_v50, %v956_v41  ;;  %v1282_v16 = vmov %v5761_v16  ;;  %s7217_s10 = smov [#allocation16]  ;;  %s7225_s11 = smov [#allocation18] }
 0x1af   : >> { %v1018_v56 = vadd.f32 %v1017_v42, %v1016_v43  ;;  %v1070_v57 = vsel %vm1069_vm9, %v4555_v46, %v1064_v51  ;;  %v1156_v35 = vadd.s32 8, %v1155_v16  ;;  %v1152_v15 = vmov %v5759_v15  ;;  %7948 = sst [smem:[#allocation35_spill]] %s7217_s10 }
 0x1b0   : >> { %v1076_v58 = vsel %vm1075_vm10, %v4556_v53, %v1070_v57  ;;  %959 = vst [vmem:[%s899_s15] sm:$0x1] %v958_v47  ;;  %v1137_v15 = vmov %v5759_v15  ;;  %v1140_v16 = vmov %v5761_v16  ;;  %v1172_v37 = vadd.s32 16, %v1171_v16  ;;  %s1228_s15 = smov [#allocation24] }
 0x1b1   : >> { %v1019_v54 = vrot.slane %v1018_v56, 1  ;;  %v1077_v55 = vrot.slane %v1076_v58, 4  ;;  %v1168_v15 = vmov %v5759_v15  ;;  %v1283_v38 = vadd.s32 8, %v1282_v16 }
 0x1b2   : >> { %v1279_v15 = vmov %v5759_v15  ;;  %v1187_v16 = vmov %v5761_v16  ;;  %vm1157_vm15 = vcmp.eq.s32.totalorder %v1156_v35, %v1152_v15  ;;  %vm1142_vm1 = vcmp.eq.s32.totalorder %v1140_v16, %v1137_v15 }
 0x1b3   : >> { %v1020_v60 = vadd.f32 %v1019_v54, %v1018_v56  ;;  %v1078_v62 = vadd.f32 %v1077_v55, %v1076_v58  ;;  %v1298_v16 = vmov %v5761_v16  ;;  %vm1173_vm2 = vcmp.eq.s32.totalorder %v1172_v37, %v1168_v15 }
 0x1b4   : >> { %v1184_v15 = vmov %v5759_v15  ;;  %vm1284_vm3 = vcmp.eq.s32.totalorder %v1283_v38, %v1279_v15  ;;  %v1188_v29 = vadd.s32 24, %v1187_v16  ;;  %v1299_v41 = vadd.s32 16, %v1298_v16 }
 0x1b5   : >> { %1021 = vst [vmem:[%s961_s16] sm:$0x1] %v1020_v60  ;;  %v1079_v63 = vrot.slane %v1078_v62, 2  ;;  %v1295_v15 = vmov %v5759_v15  ;;  %v1203_v16 = vmov %v5761_v16  ;;  %s1371_s16 = smov [#allocation25] }
 0x1b6   : >> { %v1314_v16 = vmov %v5761_v16  ;;  %vm1189_vm4 = vcmp.eq.s32.totalorder %v1188_v29, %v1184_v15  ;;  %vm1300_vm5 = vcmp.eq.s32.totalorder %v1299_v41, %v1295_v15  ;;  %v1204_v42 = vadd.s32 32, %v1203_v16 }
 0x1b7   : >> { %v1080_v0 = vadd.f32 %v1079_v63, %v1078_v62  ;;  %v1087_v8 = vld [vmem:[%s1086_s18] sm:$0xff]  ;;  %v1315_v52 = vadd.s32 24, %v1314_v16  ;;  %v1200_v15 = vmov %v5759_v15  ;;  %v1219_v16 = vmov %v5761_v16  ;;  %s1161_s18 = smov [#allocation26] }
 0x1b8   : >> { %v1110_v21 = vand.u32 2147483647, %v1087_v8  ;;  %v1311_v15 = vmov %v5759_v15  ;;  %v1330_v16 = vmov %v5761_v16  ;;  %vm1205_vm6 = vcmp.eq.s32.totalorder %v1204_v42, %v1200_v15 }
 0x1b9   : >> { %v1081_v59 = vrot.slane %v1080_v0, 1  ;;  %vm1316_vm7 = vcmp.eq.s32.totalorder %v1315_v52, %v1311_v15  ;;  %v1220_v57 = vadd.s32 40, %v1219_v16  ;;  %v1331_v58 = vadd.s32 32, %v1330_v16 }
 0x1ba   : >> { %v1216_v15 = vmov %v5759_v15  ;;  %v1346_v16 = vmov %v5761_v16 }
 0x1bb   : >> { %v1082_v2 = vadd.f32 %v1081_v59, %v1080_v0  ;;  %v1327_v15 = vmov %v5759_v15  ;;  %vm1221_vm8 = vcmp.eq.s32.totalorder %v1220_v57, %v1216_v15  ;;  %v1347_v63 = vadd.s32 40, %v1346_v16 }
 0x1bc   : >> { %v1089_v4 = vld [vmem:[%s1088_s17] sm:$0xff]  ;;  %vm1332_vm9 = vcmp.eq.s32.totalorder %v1331_v58, %v1327_v15  ;;  %v1343_v15 = vmov %v5759_v15  ;;  %v1267_v16 = vmov %v5761_v16  ;;  %s1244_s17 = smov [#allocation24] }
 0x1bd   : >> { %1083 = vst [vmem:[%s1023_s2] sm:$0x1] %v1082_v2  ;;  %v1093_v5 = vmul.f32 2.0, %v1089_v4  ;;  %v1111_v25 = vand.u32 2147483647, %v1089_v4  ;;  %v1264_v15 = vmov %v5759_v15  ;;  %v1362_v16 = vmov %v5761_v16  ;;  %s1146_s2 = smov [#allocation26] }
 0x1be   : >> { %v1235_v16 = vmov %v5761_v16  ;;  %vm1348_vm10 = vcmp.eq.s32.totalorder %v1347_v63, %v1343_v15 }
 0x1bf   : >> { %5394 = vrcp.f32 %v1093_v5  ;;  %v1363_v5 = vadd.s32 48, %v1362_v16 }
 0x1c4   : >> { %v1091_v11 = vld [vmem:[%s1090_s19] sm:$0xff]  ;;  %s1177_s19 = smov [#allocation26] }
 0x1c5   : >> { %v1092_v1 = vsub.f32 %v1091_v11, %v1087_v8  ;;  %v1112_v22 = vand.u32 2147483647, %v1091_v11 }
 0x1c7   : >> { %v1113_v6 = vmin.f32 %v1110_v21, %v1112_v22 }
 0x1c9   : >> { %v5395_v12 = vpop.eup %5394  ;;  %v1114_v26 = vmul.f32 1.1920929e-08, %v1113_v6 }
 0x1ca   : >> { %v1095_v61 = vmul.f32 %v5395_v12, %v1092_v1 }
 0x1cb   : >> { %vm1115_vm14 = vcmp.le.f32.partialorder %v1111_v25, %v1114_v26 }
 0x1cc   : >> { %v1097_v10 = vmul.f32 %v1095_v61, %v1095_v61  ;;  %vm1096_vm13 = vcmp.ge.f32.partialorder %v1095_v61, 0.0 }
 0x1ce   : >> { %v1098_v13 = vadd.f32 1.0, %v1097_v10 }
 0x1d0   : >> { %5396 = vrsqrt.f32 %v1098_v13  ;;  %vm1101_vm11 = vcmp.eq.f32.partialorder %v1098_v13, inf  ;;  %v1104_v14 = vand.u32 2147483648, %v1098_v13  ;;  %vm1103_vm12 = vcmp.eq.f32.partialorder %v1098_v13, 0.0 }
 0x1da   : >> { %v5397_v17 = vpop.eup %5396 }
 0x1db   : >> { %v1100_v18 = vmul.f32 %v5397_v17, %v1098_v13 }
 0x1dd   : >> { %v1102_v19 = vsel %vm1101_vm11, %v1098_v13, %v1100_v18  ;;  %vm1269_vm11 = vcmp.eq.s32.totalorder %v1267_v16, %v1264_v15  ;;  %v1359_v15 = vmov %v5759_v15 }
 0x1de   : >> { %v1105_v20 = vsel %vm1103_vm12, %v1104_v14, %v1102_v19  ;;  %v1232_v15 = vmov %v5759_v15  ;;  %vm1364_vm12 = vcmp.eq.s32.totalorder %v1363_v5, %v1359_v15 }
 0x1df   : >> { %v1106_v3 = vxor.u32 2147483648, %v1105_v20 }
 0x1e1   : >> { %v1107_v23 = vsel %vm1096_vm13, %v1105_v20, %v1106_v3 }
 0x1e2   : >> { %v1108_v24 = vadd.f32 %v1107_v23, %v1095_v61 }
 0x1e4   : >> { %5398 = vrcp.f32 %v1108_v24 }
 0x1ee   : >> { %v5399_v27 = vpop.eup %5398 }
 0x1ef   : >> { %v1116_v28 = vsel %vm1115_vm14, 0.0, %v5399_v27 }
 0x1f0   : >> { %v1117_v7 = vmul.f32 %v1116_v28, %v1116_v28  ;;  %v1121_v30 = vmul.f32 %v1116_v28, %v1089_v4 }
 0x1f2   : >> { %v1118_v31 = vadd.f32 1.0, %v1117_v7  ;;  %v1122_v32 = vsub.f32 %v1087_v8, %v1121_v30  ;;  %v1124_v33 = vadd.f32 %v1121_v30, %v1091_v11  ;;  %v1236_v8 = vadd.s32 48, %v1235_v16 }
 0x1f3   : >> { %v1378_v16 = vmov %v5761_v16 }
 0x1f4   : >> { %5400 = vrsqrt.f32 %v1118_v31  ;;  %1126 = vst [vmem:[%s1125_s20] sm:$0xff] %v1122_v32  ;;  %1128 = vst [vmem:[%s1127_s21] sm:$0xff] %v1124_v33  ;;  %v1251_v16 = vmov %v5761_v16  ;;  %vm1237_vm13 = vcmp.eq.s32.totalorder %v1236_v8, %v1232_v15  ;;  %v1379_v10 = vadd.s32 56, %v1378_v16  ;;  %s1193_s20 = smov [#allocation26]  ;;  %s1209_s21 = smov [#allocation26] }
 0x1f5   : >> { %v1252_v13 = vadd.s32 56, %v1251_v16  ;;  %v1375_v15 = vmov %v5759_v15 }
 0x1f6   : >> { %v1248_v15 = vmov %v5759_v15  ;;  %vm1380_vm14 = vcmp.eq.s32.totalorder %v1379_v10, %v1375_v15 }
 0x1fe   : >> { %v5401_v34 = vpop.eup %5400 }
 0x1ff   : >> { %1130 = vst [vmem:[%s1129_s3] sm:$0xff] %v5401_v34  ;;  %v1120_v9 = vmul.f32 %v5401_v34, %v1116_v28  ;;  %s1225_s3 = smov [#allocation26] }
 0x201   : >> { %1132 = vst [vmem:[%s1131_s22] sm:$0xff] %v1120_v9  ;;  %s1273_s22 = smov [#allocation27] }
 0x206   : >> { %v1149_v39 = vld [vmem:[%s1148_s0] ss:$0 sm:$0xff]  ;;  %s1288_s0 = smov [#allocation27] }
 0x207   : >> { %v1134_v40 = vld [vmem:[%s1133_s23] ss:$0 sm:$0xff]  ;;  %v1158_v43 = vsel %vm1157_vm15, %v1149_v39, 0.0  ;;  %vm1253_vm15 = vcmp.eq.s32.totalorder %v1252_v13, %v1248_v15  ;;  %s1304_s23 = smov [#allocation27]  ;;  %v6707_v15 = vmov %v5759_v15 }
 0x208   : >> { %v1143_v44 = vsel %vm1142_vm1, %v1134_v40, 0.0  ;;  %v1165_v45 = vld [vmem:[%s1164_s24] ss:$0 sm:$0xff]  ;;  %1159 = vadd.xlane.f32.xlu1 %v1158_v43  ;;  %s1320_s24 = smov [#allocation27]  ;;  %vm7917_vm1 = vcmp.eq.s32.totalorder %v5761_v16, 0  ;;  %v6710_v15 = vmov %v5759_v15 }
 0x209   : >> { %1144 = vadd.xlane.f32.xlu0 %v1143_v44  ;;  %v1276_v36 = vld [vmem:[%s1275_s25] ss:$0 sm:$0xff]  ;;  %v1174_v46 = vsel %vm1173_vm2, %v1165_v45, 0.0  ;;  %s1336_s25 = smov [#allocation27]  ;;  %vm7916_vm2 = vcmp.eq.s32.totalorder %v5761_v16, 7  ;;  %v6700_v16 = vmov %v5761_v16 }
 0x20a   : >> { %v1285_v48 = vsel %vm1284_vm3, %v1276_v36, 0.0  ;;  %v1181_v49 = vld [vmem:[%s1180_s26] ss:$0 sm:$0xff]  ;;  %s1241_s26 = smov [#allocation26]  ;;  %vm1889_vm3 = vcmp.eq.s32.totalorder %v6700_v16, %v6707_v15 }
 0x20b   : >> { %v1292_v50 = vld [vmem:[%s1291_s27] ss:$0 sm:$0xff]  ;;  %v1190_v53 = vsel %vm1189_vm4, %v1181_v49, 0.0  ;;  %s1352_s27 = smov [#allocation27] }
 0x20c   : >> { %1286 = vadd.xlane.f32.xlu1 %v1285_v48  ;;  %v1301_v51 = vsel %vm1300_vm5, %v1292_v50, 0.0  ;;  %v1197_v47 = vld [vmem:[%s1196_s28] ss:$0 sm:$0xff]  ;;  %s1368_s28 = smov [#allocation27] }
 0x20d   : >> { %1175 = vadd.xlane.f32.xlu0 %v1174_v46  ;;  %v1308_v56 = vld [vmem:[%s1307_s29] ss:$0 sm:$0xff]  ;;  %v1206_v54 = vsel %vm1205_vm6, %v1197_v47, 0.0  ;;  %s1384_s29 = smov [#allocation27] }
 0x20e   : >> { %v1317_v55 = vsel %vm1316_vm7, %v1308_v56, 0.0  ;;  %v1213_v60 = vld [vmem:[%s1212_s30] ss:$0 sm:$0xff]  ;;  %s1257_s30 = smov [#allocation26] }
 0x20f   : >> { %v1324_v62 = vld [vmem:[%s1323_s1] ss:$0 sm:$0xff]  ;;  %v1222_v0 = vsel %vm1221_vm8, %v1213_v60, 0.0  ;;  %s1389_s1 = smov [#allocation27] }
 0x210   : >> { %1302 = vadd.xlane.f32.xlu1 %v1301_v51  ;;  %v1333_v59 = vsel %vm1332_vm9, %v1324_v62, 0.0  ;;  %v1340_v2 = vld [vmem:[%s1339_s12] ss:$0 sm:$0xff]  ;;  %s6177_s12 = smov [#allocation15] }
 0x211   : >> { %1191 = vadd.xlane.f32.xlu0 %v1190_v53  ;;  %v1261_v4 = vld [vmem:[%s1260_s13] ss:$0 sm:$0xff]  ;;  %v1349_v11 = vsel %vm1348_vm10, %v1340_v2, 0.0  ;;  %s6179_s13 = smov [#allocation16] }
 0x212   : >> { %v1270_v1 = vsel %vm1269_vm11, %v1261_v4, 0.0  ;;  %v1356_v12 = vld [vmem:[%s1355_s14] ss:$0 sm:$0xff]  ;;  %s6181_s14 = smov [#allocation17] }
 0x213   : >> { %v1229_v61 = vld [vmem:[%s1228_s15] ss:$0 sm:$0xff]  ;;  %v1365_v17 = vsel %vm1364_vm12, %v1356_v12, 0.0  ;;  %s6183_s15 = smov [#allocation18] }
 0x214   : >> { %1318 = vadd.xlane.f32.xlu1 %v1317_v55  ;;  %v1238_v14 = vsel %vm1237_vm13, %v1229_v61, 0.0  ;;  %v1372_v18 = vld [vmem:[%s1371_s16] ss:$0 sm:$0xff]  ;;  %s3013_s16 = smov [#allocation27] }
 0x215   : >> { %1207 = vadd.xlane.f32.xlu0 %v1206_v54  ;;  %v1245_v19 = vld [vmem:[%s1244_s17] ss:$0 sm:$0xff]  ;;  %v1381_v20 = vsel %vm1380_vm14, %v1372_v18, 0.0  ;;  %s6187_s17 = smov [#allocation8] }
 0x216   : >> { %v1254_v3 = vsel %vm1253_vm15, %v1245_v19, 0.0  ;;  %v1395_v35 = vld [vmem:[%s6177_s12] sm:$0xff] }
 0x217   : >> { %v1396_v37 = vld [vmem:[%s6179_s13] sm:$0xff] }
 0x218   : >> { %1334 = vadd.xlane.f32.xlu1 %v1333_v59  ;;  %v1397_v38 = vld [vmem:[%s6181_s14] sm:$0xff] }
 0x219   : >> { %1223 = vadd.xlane.f32.xlu0 %v1222_v0  ;;  %v1398_v39 = vld [vmem:[%s6183_s15] sm:$0xff] }
 0x21a   : >> { %v3019_v29 = vld [vmem:[%s6187_s17] sm:$0xff] }
 0x21c   : >> { %1350 = vadd.xlane.f32.xlu1 %v1349_v11 }
 0x21d   : >> { %1271 = vadd.xlane.f32.xlu0 %v1270_v1 }
 0x220   : >> { %1366 = vadd.xlane.f32.xlu1 %v1365_v17 }
 0x221   : >> { %1239 = vadd.xlane.f32.xlu0 %v1238_v14 }
 0x224   : >> { %1382 = vadd.xlane.f32.xlu1 %v1381_v20 }
 0x225   : >> { %1255 = vadd.xlane.f32.xlu0 %v1254_v3 }
 0x295   : >> { %v1160_v21 = vpop.xlane.xlu1 %1159 }
 0x296   : >> { %v1145_v22 = vpop.xlane.xlu0 %1144 }
 0x297   : >> { %1147 = vst [vmem:[%s1146_s2] sm:$0xff] %v1145_v22  ;;  %s6189_s2 = smov [#allocation10] }
 0x298   : >> { %4557 = vst [vmem:[%s1161_s18 + $0x8] sm:$0xff] %v1160_v21  ;;  %s6193_s18 = smov [#allocation12]  ;;  %v3020_v41 = vld [vmem:[%s6189_s2] sm:$0xff] }
 0x299   : >> { %v1287_v24 = vpop.xlane.xlu1 %1286  ;;  %v3021_v43 = vld [vmem:[%s6193_s18] sm:$0xff] }
 0x29a   : >> { %v1176_v23 = vpop.xlane.xlu0 %1175 }
 0x29b   : >> { %4558 = vst [vmem:[%s1177_s19 + $0x10] sm:$0xff] %v1176_v23  ;;  %s6195_s19 = smov [#allocation13] }
 0x29c   : >> { %v3022_v44 = vld [vmem:[%s6195_s19] sm:$0xff] }
 0x29d   : >> { %v1303_v25 = vpop.xlane.xlu1 %1302 }
 0x29e   : >> { %v1192_v6 = vpop.xlane.xlu0 %1191 }
 0x29f   : >> { %4559 = vst [vmem:[%s1193_s20 + $0x18] sm:$0xff] %v1192_v6  ;;  %s1387_s20 = smov [#allocation26] }
 0x2a1   : >> { %v1319_v27 = vpop.xlane.xlu1 %1318 }
 0x2a2   : >> { %v1208_v26 = vpop.xlane.xlu0 %1207 }
 0x2a3   : >> { %4560 = vst [vmem:[%s1209_s21 + $0x20] sm:$0xff] %v1208_v26  ;;  %s3011_s21 = smov [#allocation26] }
 0x2a5   : >> { %v1335_v7 = vpop.xlane.xlu1 %1334 }
 0x2a6   : >> { %v1224_v28 = vpop.xlane.xlu0 %1223 }
 0x2a7   : >> { %4561 = vst [vmem:[%s1225_s3 + $0x28] sm:$0xff] %v1224_v28  ;;  %s1418_s3 = smov [#allocation27] }
 0x2a9   : >> { %v1351_v30 = vpop.xlane.xlu1 %1350 }
 0x2aa   : >> { %v1272_v31 = vpop.xlane.xlu0 %1271 }
 0x2ab   : >> { %1274 = vst [vmem:[%s1273_s22] sm:$0xff] %v1272_v31  ;;  %s6205_s22 = smov [#allocation15] }
 0x2ac   : >> { %4564 = vst [vmem:[%s1288_s0 + $0x8] sm:$0xff] %v1287_v24  ;;  %s1415_s0 = smov [#allocation26] }
 0x2ad   : >> { %4565 = vst [vmem:[%s1304_s23 + $0x10] sm:$0xff] %v1303_v25  ;;  %v1367_v32 = vpop.xlane.xlu1 %1366  ;;  %s6211_s23 = smov [#allocation16] }
 0x2ae   : >> { %4566 = vst [vmem:[%s1320_s24 + $0x18] sm:$0xff] %v1319_v27  ;;  %v1240_v33 = vpop.xlane.xlu0 %1239  ;;  %s6213_s24 = smov [#allocation17] }
 0x2af   : >> { %4567 = vst [vmem:[%s1336_s25 + $0x20] sm:$0xff] %v1335_v7  ;;  %4562 = vst [vmem:[%s1241_s26 + $0x30] sm:$0xff] %v1240_v33  ;;  %s6215_s25 = smov [#allocation18]  ;;  %s3039_s26 = smov [#allocation26] }
 0x2b0   : >> { %4568 = vst [vmem:[%s1352_s27 + $0x28] sm:$0xff] %v1351_v30  ;;  %s6217_s27 = smov [#allocation8] }
 0x2b1   : >> { %4569 = vst [vmem:[%s1368_s28 + $0x30] sm:$0xff] %v1367_v32  ;;  %v1383_v34 = vpop.xlane.xlu1 %1382  ;;  %s6219_s28 = smov [#allocation10] }
 0x2b2   : >> { %v1256_v9 = vpop.xlane.xlu0 %1255  ;;  %4570 = vst [vmem:[%s1384_s29 + $0x38] sm:$0xff] %v1383_v34  ;;  %s6221_s29 = smov [#allocation12] }
 0x2b3   : >> { %4563 = vst [vmem:[%s1257_s30 + $0x38] sm:$0xff] %v1256_v9  ;;  %s3042_s30 = smov [#allocation27] }
 0x2b9   : >> { %v1390_v40 = vld [vmem:[%s1389_s1] sm:$0xff]  ;;  %v4572_v12 = vld [vmem:[%s1418_s3 + $0x8] sm:$0xff]  ;;  %s6226_s1 = smov [#allocation13]  ;;  %s6259_s3 = smov [#allocation13] }
 0x2ba   : >> { %v1400_v45 = vmul.f32 %v1397_v38, %v1390_v40  ;;  %v1403_v36 = vmul.f32 %v1398_v39, %v1390_v40  ;;  %v1405_v46 = vmul.f32 %v1395_v35, %v1390_v40  ;;  %v1408_v48 = vmul.f32 %v1396_v37, %v1390_v40  ;;  %v3014_v49 = vld [vmem:[%s3013_s16] sm:$0xff]  ;;  %v4571_v61 = vld [vmem:[%s1415_s0 + $0x8] sm:$0xff]  ;;  %s6243_s16 = smov [#allocation17]  ;;  %s6269_s0 = smov [#allocation15] }
 0x2bb   : >> { %v1388_v50 = vld [vmem:[%s1387_s20] sm:$0xff]  ;;  %v3024_v47 = vmul.f32 %v3021_v43, %v3014_v49  ;;  %v3027_v56 = vmul.f32 %v3022_v44, %v3014_v49  ;;  %v3029_v57 = vmul.f32 %v3019_v29, %v3014_v49  ;;  %v3032_v58 = vmul.f32 %v3020_v41, %v3014_v49  ;;  %v4929_v6 = vld [vmem:[%s3039_s26 + $0x8] sm:$0xff]  ;;  %s6252_s20 = smov [#allocation10]  ;;  %s6278_s26 = smov [#allocation18] }
 0x2bc   : >> { %v1399_v42 = vmul.f32 %v1395_v35, %v1388_v50  ;;  %v1402_v52 = vmul.f32 %v1396_v37, %v1388_v50  ;;  %v1406_v53 = vmul.f32 %v1397_v38, %v1388_v50  ;;  %v1409_v51 = vmul.f32 %v1398_v39, %v1388_v50  ;;  %v3012_v63 = vld [vmem:[%s3011_s21] sm:$0xff]  ;;  %v4930_v7 = vld [vmem:[%s3042_s30 + $0x8] sm:$0xff]  ;;  %s6257_s21 = smov [#allocation12]  ;;  %s6286_s30 = smov [#allocation10] }
 0x2bd   : >> { %v3023_v0 = vmul.f32 %v3019_v29, %v3012_v63  ;;  %v3026_v59 = vmul.f32 %v3020_v41, %v3012_v63  ;;  %v3030_v2 = vmul.f32 %v3021_v43, %v3012_v63  ;;  %v3033_v4 = vmul.f32 %v3022_v44, %v3012_v63 }
 0x2be   : >> { %v1401_v54 = vsub.f32 %v1399_v42, %v1400_v45  ;;  %v1404_v55 = vsub.f32 %v1402_v52, %v1403_v36  ;;  %v1407_v60 = vadd.f32 %v1406_v53, %v1405_v46  ;;  %v1410_v62 = vadd.f32 %v1409_v51, %v1408_v48 }
 0x2bf   : >> { %v3025_v5 = vsub.f32 %v3023_v0, %v3024_v47  ;;  %v3028_v8 = vsub.f32 %v3026_v59, %v3027_v56  ;;  %v3031_v11 = vadd.f32 %v3030_v2, %v3029_v57  ;;  %v3034_v1 = vadd.f32 %v3033_v4, %v3032_v58 }
 0x2c0   : >> { %1411 = vst [vmem:[%s6177_s12] sm:$0xff] %v1401_v54  ;;  %1412 = vst [vmem:[%s6179_s13] sm:$0xff] %v1404_v55  ;;  %s1452_s12 = smov [#allocation27]  ;;  %s6237_s13 = smov [#allocation15] }
 0x2c1   : >> { %1413 = vst [vmem:[%s6181_s14] sm:$0xff] %v1407_v60  ;;  %1414 = vst [vmem:[%s6183_s15] sm:$0xff] %v1410_v62  ;;  %s6239_s14 = smov [#allocation16]  ;;  %s1449_s15 = smov [#allocation26]  ;;  %v4582_v36 = vld [vmem:[%s1452_s12 + $0x10] sm:$0xff] }
 0x2c2   : >> { %3035 = vst [vmem:[%s6187_s17] sm:$0xff] %v3025_v5  ;;  %3036 = vst [vmem:[%s6189_s2] sm:$0xff] %v3028_v8  ;;  %s6245_s17 = smov [#allocation18]  ;;  %s3076_s2 = smov [#allocation27]  ;;  %v4581_v46 = vld [vmem:[%s1449_s15 + $0x10] sm:$0xff] }
 0x2c3   : >> { %3037 = vst [vmem:[%s6193_s18] sm:$0xff] %v3031_v11  ;;  %3038 = vst [vmem:[%s6195_s19] sm:$0xff] %v3034_v1  ;;  %s3073_s18 = smov [#allocation26]  ;;  %s6250_s19 = smov [#allocation8]  ;;  %v4940_v58 = vld [vmem:[%s3076_s2 + $0x10] sm:$0xff] }
 0x2c4   : >> { %v4939_v0 = vld [vmem:[%s3073_s18 + $0x10] sm:$0xff]  ;;  %s6291_s12 = smov [#allocation13]  ;;  %s6303_s15 = smov [#allocation16] }
 0x2c5   : >> { %s6308_s2 = smov [#allocation18]  ;;  %s3144_s18 = smov [#allocation27] }
 0x2c7   : >> { %v4573_v10 = vld [vmem:[%s6205_s22 + $0x8] sm:$0xff] }
 0x2c8   : >> { %v4574_v13 = vld [vmem:[%s6211_s23 + $0x8] sm:$0xff]  ;;  %v1433_v18 = vmul.f32 %v4573_v10, %v4571_v61  ;;  %v1439_v3 = vmul.f32 %v4573_v10, %v4572_v12 }
 0x2c9   : >> { %v4575_v17 = vld [vmem:[%s6213_s24 + $0x8] sm:$0xff]  ;;  %v1436_v20 = vmul.f32 %v4574_v13, %v4571_v61  ;;  %v1442_v23 = vmul.f32 %v4574_v13, %v4572_v12 }
 0x2ca   : >> { %v4576_v14 = vld [vmem:[%s6215_s25 + $0x8] sm:$0xff]  ;;  %v1434_v19 = vmul.f32 %v4575_v17, %v4572_v12  ;;  %v1440_v22 = vmul.f32 %v4575_v17, %v4571_v61 }
 0x2cb   : >> { %v1437_v21 = vmul.f32 %v4576_v14, %v4572_v12  ;;  %v1443_v24 = vmul.f32 %v4576_v14, %v4571_v61  ;;  %v4931_v26 = vld [vmem:[%s6217_s27 + $0x8] sm:$0xff] }
 0x2cc   : >> { %v1435_v25 = vsub.f32 %v1433_v18, %v1434_v19  ;;  %v4932_v27 = vld [vmem:[%s6219_s28 + $0x8] sm:$0xff]  ;;  %v1441_v31 = vadd.f32 %v1440_v22, %v1439_v3  ;;  %v3057_v34 = vmul.f32 %v4931_v26, %v4929_v6  ;;  %v3063_v38 = vmul.f32 %v4931_v26, %v4930_v7 }
 0x2cd   : >> { %v4933_v28 = vld [vmem:[%s6221_s29 + $0x8] sm:$0xff]  ;;  %v1438_v30 = vsub.f32 %v1436_v20, %v1437_v21  ;;  %v1444_v32 = vadd.f32 %v1443_v24, %v1442_v23  ;;  %v3060_v35 = vmul.f32 %v4932_v27, %v4929_v6  ;;  %v3066_v40 = vmul.f32 %v4932_v27, %v4930_v7 }
 0x2ce   : >> { %v4934_v33 = vld [vmem:[%s6226_s1 + $0x8] sm:$0xff]  ;;  %4577 = vst [vmem:[%s6205_s22 + $0x8] sm:$0xff] %v1435_v25  ;;  %v3058_v9 = vmul.f32 %v4933_v28, %v4930_v7  ;;  %4579 = vst [vmem:[%s6213_s24 + $0x8] sm:$0xff] %v1441_v31  ;;  %v3064_v39 = vmul.f32 %v4933_v28, %v4929_v6  ;;  %s1486_s22 = smov [#allocation27]  ;;  %s6271_s24 = smov [#allocation16] }
 0x2cf   : >> { %v3061_v37 = vmul.f32 %v4934_v33, %v4930_v7  ;;  %4578 = vst [vmem:[%s6211_s23 + $0x8] sm:$0xff] %v1438_v30  ;;  %4580 = vst [vmem:[%s6215_s25 + $0x8] sm:$0xff] %v1444_v32  ;;  %v3067_v29 = vmul.f32 %v4934_v33, %v4929_v6  ;;  %s1483_s23 = smov [#allocation26]  ;;  %s6273_s25 = smov [#allocation17]  ;;  %v4592_v21 = vld [vmem:[%s1486_s22 + $0x18] sm:$0xff] }
 0x2d0   : >> { %v3059_v41 = vsub.f32 %v3057_v34, %v3058_v9  ;;  %v3065_v44 = vadd.f32 %v3064_v39, %v3063_v38  ;;  %v4591_v22 = vld [vmem:[%s1483_s23 + $0x18] sm:$0xff]  ;;  %s6323_s22 = smov [#allocation13]  ;;  %s6333_s23 = smov [#allocation15] }
 0x2d1   : >> { %v3062_v43 = vsub.f32 %v3060_v35, %v3061_v37  ;;  %v3068_v45 = vadd.f32 %v3067_v29, %v3066_v40 }
 0x2d2   : >> { %4935 = vst [vmem:[%s6217_s27 + $0x8] sm:$0xff] %v3059_v41  ;;  %4937 = vst [vmem:[%s6221_s29 + $0x8] sm:$0xff] %v3065_v44  ;;  %s3110_s27 = smov [#allocation27]  ;;  %s6281_s29 = smov [#allocation8] }
 0x2d3   : >> { %4936 = vst [vmem:[%s6219_s28 + $0x8] sm:$0xff] %v3062_v43  ;;  %4938 = vst [vmem:[%s6226_s1 + $0x8] sm:$0xff] %v3068_v45  ;;  %s3107_s28 = smov [#allocation26]  ;;  %s6288_s1 = smov [#allocation12]  ;;  %v4950_v34 = vld [vmem:[%s3110_s27 + $0x18] sm:$0xff] }
 0x2d4   : >> { %v4949_v35 = vld [vmem:[%s3107_s28 + $0x18] sm:$0xff]  ;;  %s6342_s27 = smov [#allocation18]  ;;  %s3178_s28 = smov [#allocation27] }
 0x2d5   : >> { %v4583_v48 = vld [vmem:[%s6237_s13 + $0x10] sm:$0xff] }
 0x2d6   : >> { %v4584_v49 = vld [vmem:[%s6239_s14 + $0x10] sm:$0xff]  ;;  %v1467_v52 = vmul.f32 %v4583_v48, %v4581_v46  ;;  %v1473_v53 = vmul.f32 %v4583_v48, %v4582_v36 }
 0x2d7   : >> { %v4585_v50 = vld [vmem:[%s6243_s16 + $0x10] sm:$0xff]  ;;  %v1470_v47 = vmul.f32 %v4584_v49, %v4581_v46  ;;  %v1476_v54 = vmul.f32 %v4584_v49, %v4582_v36 }
 0x2d8   : >> { %v4586_v42 = vld [vmem:[%s6245_s17 + $0x10] sm:$0xff]  ;;  %v1468_v51 = vmul.f32 %v4585_v50, %v4582_v36  ;;  %v1474_v57 = vmul.f32 %v4585_v50, %v4581_v46 }
 0x2d9   : >> { %v1471_v56 = vmul.f32 %v4586_v42, %v4582_v36  ;;  %v1477_v55 = vmul.f32 %v4586_v42, %v4581_v46  ;;  %v4941_v59 = vld [vmem:[%s6250_s19 + $0x10] sm:$0xff] }
 0x2da   : >> { %v1469_v60 = vsub.f32 %v1467_v52, %v1468_v51  ;;  %v1475_v63 = vadd.f32 %v1474_v57, %v1473_v53  ;;  %v4942_v2 = vld [vmem:[%s6252_s20 + $0x10] sm:$0xff]  ;;  %v3091_v11 = vmul.f32 %v4941_v59, %v4939_v0  ;;  %v3097_v12 = vmul.f32 %v4941_v59, %v4940_v58 }
 0x2db   : >> { %v1472_v62 = vsub.f32 %v1470_v47, %v1471_v56  ;;  %v1478_v4 = vadd.f32 %v1477_v55, %v1476_v54  ;;  %v4943_v5 = vld [vmem:[%s6257_s21 + $0x10] sm:$0xff]  ;;  %v3094_v1 = vmul.f32 %v4942_v2, %v4939_v0  ;;  %v3100_v17 = vmul.f32 %v4942_v2, %v4940_v58 }
 0x2dc   : >> { %v4944_v8 = vld [vmem:[%s6259_s3 + $0x10] sm:$0xff]  ;;  %4587 = vst [vmem:[%s6237_s13 + $0x10] sm:$0xff] %v1469_v60  ;;  %4589 = vst [vmem:[%s6243_s16 + $0x10] sm:$0xff] %v1475_v63  ;;  %v3092_v61 = vmul.f32 %v4943_v5, %v4940_v58  ;;  %v3098_v13 = vmul.f32 %v4943_v5, %v4939_v0  ;;  %s1520_s13 = smov [#allocation27]  ;;  %s1517_s16 = smov [#allocation26] }
 0x2dd   : >> { %4588 = vst [vmem:[%s6239_s14 + $0x10] sm:$0xff] %v1472_v62  ;;  %v3095_v10 = vmul.f32 %v4944_v8, %v4940_v58  ;;  %4590 = vst [vmem:[%s6245_s17 + $0x10] sm:$0xff] %v1478_v4  ;;  %v3101_v14 = vmul.f32 %v4944_v8, %v4939_v0  ;;  %s6301_s14 = smov [#allocation15]  ;;  %s6306_s17 = smov [#allocation17]  ;;  %v4602_v56 = vld [vmem:[%s1520_s13 + $0x20] sm:$0xff] }
 0x2de   : >> { %v3093_v18 = vsub.f32 %v3091_v11, %v3092_v61  ;;  %v3099_v20 = vadd.f32 %v3098_v13, %v3097_v12  ;;  %v4601_v57 = vld [vmem:[%s1517_s16 + $0x20] sm:$0xff]  ;;  %s6355_s13 = smov [#allocation13]  ;;  %s6367_s16 = smov [#allocation16] }
 0x2df   : >> { %v3096_v19 = vsub.f32 %v3094_v1, %v3095_v10  ;;  %v3102_v3 = vadd.f32 %v3101_v14, %v3100_v17  ;;  %v4960_v11 = vld [vmem:[%s3144_s18 + $0x20] sm:$0xff]  ;;  %s6372_s18 = smov [#allocation18] }
 0x2e0   : >> { %4945 = vst [vmem:[%s6250_s19 + $0x10] sm:$0xff] %v3093_v18  ;;  %4947 = vst [vmem:[%s6257_s21 + $0x10] sm:$0xff] %v3099_v20  ;;  %s3141_s19 = smov [#allocation26]  ;;  %s6316_s21 = smov [#allocation10] }
 0x2e1   : >> { %4946 = vst [vmem:[%s6252_s20 + $0x10] sm:$0xff] %v3096_v19  ;;  %4948 = vst [vmem:[%s6259_s3 + $0x10] sm:$0xff] %v3102_v3  ;;  %s6314_s20 = smov [#allocation8]  ;;  %s6321_s3 = smov [#allocation12]  ;;  %v4959_v10 = vld [vmem:[%s3141_s19 + $0x20] sm:$0xff] }
 0x2e2   : >> { %s3212_s19 = smov [#allocation27] }
 0x2e3   : >> { %v4593_v23 = vld [vmem:[%s6269_s0 + $0x18] sm:$0xff] }
 0x2e4   : >> { %v4594_v24 = vld [vmem:[%s6271_s24 + $0x18] sm:$0xff]  ;;  %v1501_v26 = vmul.f32 %v4593_v23, %v4591_v22  ;;  %v1507_v7 = vmul.f32 %v4593_v23, %v4592_v21 }
 0x2e5   : >> { %v4595_v6 = vld [vmem:[%s6273_s25 + $0x18] sm:$0xff]  ;;  %v1504_v28 = vmul.f32 %v4594_v24, %v4591_v22  ;;  %v1510_v32 = vmul.f32 %v4594_v24, %v4592_v21 }
 0x2e6   : >> { %v4596_v25 = vld [vmem:[%s6278_s26 + $0x18] sm:$0xff]  ;;  %v1502_v27 = vmul.f32 %v4595_v6, %v4592_v21  ;;  %v1508_v31 = vmul.f32 %v4595_v6, %v4591_v22 }
 0x2e7   : >> { %v1505_v30 = vmul.f32 %v4596_v25, %v4592_v21  ;;  %v1511_v33 = vmul.f32 %v4596_v25, %v4591_v22  ;;  %v4951_v40 = vld [vmem:[%s6281_s29 + $0x18] sm:$0xff] }
 0x2e8   : >> { %v1503_v9 = vsub.f32 %v1501_v26, %v1502_v27  ;;  %v1509_v38 = vadd.f32 %v1508_v31, %v1507_v7  ;;  %v4952_v29 = vld [vmem:[%s6286_s30 + $0x18] sm:$0xff]  ;;  %v3125_v44 = vmul.f32 %v4951_v40, %v4949_v35  ;;  %v3131_v46 = vmul.f32 %v4951_v40, %v4950_v34 }
 0x2e9   : >> { %v1506_v37 = vsub.f32 %v1504_v28, %v1505_v30  ;;  %v1512_v39 = vadd.f32 %v1511_v33, %v1510_v32  ;;  %v4953_v41 = vld [vmem:[%s6288_s1 + $0x18] sm:$0xff]  ;;  %v3128_v36 = vmul.f32 %v4952_v29, %v4949_v35  ;;  %v3134_v50 = vmul.f32 %v4952_v29, %v4950_v34 }
 0x2ea   : >> { %4597 = vst [vmem:[%s6269_s0 + $0x18] sm:$0xff] %v1503_v9  ;;  %v4954_v43 = vld [vmem:[%s6291_s12 + $0x18] sm:$0xff]  ;;  %v3126_v45 = vmul.f32 %v4953_v41, %v4950_v34  ;;  %4599 = vst [vmem:[%s6273_s25 + $0x18] sm:$0xff] %v1509_v38  ;;  %v3132_v49 = vmul.f32 %v4953_v41, %v4949_v35  ;;  %s1554_s0 = smov [#allocation27]  ;;  %s6335_s25 = smov [#allocation16] }
 0x2eb   : >> { %4598 = vst [vmem:[%s6271_s24 + $0x18] sm:$0xff] %v1506_v37  ;;  %4600 = vst [vmem:[%s6278_s26 + $0x18] sm:$0xff] %v1512_v39  ;;  %v3129_v48 = vmul.f32 %v4954_v43, %v4950_v34  ;;  %v3135_v42 = vmul.f32 %v4954_v43, %v4949_v35  ;;  %s1551_s24 = smov [#allocation26]  ;;  %s6337_s26 = smov [#allocation17]  ;;  %v4612_v30 = vld [vmem:[%s1554_s0 + $0x28] sm:$0xff] }
 0x2ec   : >> { %v3127_v52 = vsub.f32 %v3125_v44, %v3126_v45  ;;  %v3133_v51 = vadd.f32 %v3132_v49, %v3131_v46  ;;  %v4611_v31 = vld [vmem:[%s1551_s24 + $0x28] sm:$0xff]  ;;  %s6387_s0 = smov [#allocation13]  ;;  %s6397_s24 = smov [#allocation15] }
 0x2ed   : >> { %v3130_v53 = vsub.f32 %v3128_v36, %v3129_v48  ;;  %v3136_v47 = vadd.f32 %v3135_v42, %v3134_v50  ;;  %v4970_v44 = vld [vmem:[%s3178_s28 + $0x28] sm:$0xff]  ;;  %s6406_s28 = smov [#allocation18] }
 0x2ee   : >> { %4955 = vst [vmem:[%s6281_s29 + $0x18] sm:$0xff] %v3127_v52  ;;  %4957 = vst [vmem:[%s6288_s1 + $0x18] sm:$0xff] %v3133_v51  ;;  %s3175_s29 = smov [#allocation26]  ;;  %s6350_s1 = smov [#allocation10] }
 0x2ef   : >> { %4956 = vst [vmem:[%s6286_s30 + $0x18] sm:$0xff] %v3130_v53  ;;  %4958 = vst [vmem:[%s6291_s12 + $0x18] sm:$0xff] %v3136_v47  ;;  %s6345_s30 = smov [#allocation8]  ;;  %s6352_s12 = smov [#allocation12]  ;;  %v4969_v36 = vld [vmem:[%s3175_s29 + $0x28] sm:$0xff] }
 0x2f0   : >> { %s3246_s29 = smov [#allocation27] }
 0x2f1   : >> { %v4603_v58 = vld [vmem:[%s6301_s14 + $0x20] sm:$0xff] }
 0x2f2   : >> { %v4604_v54 = vld [vmem:[%s6303_s15 + $0x20] sm:$0xff]  ;;  %v1535_v62 = vmul.f32 %v4603_v58, %v4601_v57  ;;  %v1541_v63 = vmul.f32 %v4603_v58, %v4602_v56 }
 0x2f3   : >> { %v4605_v55 = vld [vmem:[%s6306_s17 + $0x20] sm:$0xff]  ;;  %v1538_v59 = vmul.f32 %v4604_v54, %v4601_v57  ;;  %v1544_v5 = vmul.f32 %v4604_v54, %v4602_v56 }
 0x2f4   : >> { %v4606_v60 = vld [vmem:[%s6308_s2 + $0x20] sm:$0xff]  ;;  %v1536_v0 = vmul.f32 %v4605_v55, %v4602_v56  ;;  %v1542_v4 = vmul.f32 %v4605_v55, %v4601_v57 }
 0x2f5   : >> { %v1539_v2 = vmul.f32 %v4606_v60, %v4602_v56  ;;  %v1545_v8 = vmul.f32 %v4606_v60, %v4601_v57  ;;  %v4961_v13 = vld [vmem:[%s6314_s20 + $0x20] sm:$0xff] }
 0x2f6   : >> { %v1537_v1 = vsub.f32 %v1535_v62, %v1536_v0  ;;  %v1543_v61 = vadd.f32 %v1542_v4, %v1541_v63  ;;  %v4962_v14 = vld [vmem:[%s6316_s21 + $0x20] sm:$0xff]  ;;  %v3159_v20 = vmul.f32 %v4961_v13, %v4959_v10  ;;  %v3165_v3 = vmul.f32 %v4961_v13, %v4960_v11 }
 0x2f7   : >> { %v1540_v12 = vsub.f32 %v1538_v59, %v1539_v2  ;;  %v1546_v17 = vadd.f32 %v1545_v8, %v1544_v5  ;;  %v4963_v18 = vld [vmem:[%s6321_s3 + $0x20] sm:$0xff]  ;;  %v3162_v22 = vmul.f32 %v4962_v14, %v4959_v10  ;;  %v3168_v6 = vmul.f32 %v4962_v14, %v4960_v11 }
 0x2f8   : >> { %v4964_v19 = vld [vmem:[%s6323_s22 + $0x20] sm:$0xff]  ;;  %4607 = vst [vmem:[%s6301_s14 + $0x20] sm:$0xff] %v1537_v1  ;;  %4609 = vst [vmem:[%s6306_s17 + $0x20] sm:$0xff] %v1543_v61  ;;  %v3160_v21 = vmul.f32 %v4963_v18, %v4960_v11  ;;  %v3166_v24 = vmul.f32 %v4963_v18, %v4959_v10  ;;  %s1588_s14 = smov [#allocation27]  ;;  %s1585_s17 = smov [#allocation26] }
 0x2f9   : >> { %4608 = vst [vmem:[%s6303_s15 + $0x20] sm:$0xff] %v1540_v12  ;;  %v3163_v23 = vmul.f32 %v4964_v19, %v4960_v11  ;;  %4610 = vst [vmem:[%s6308_s2 + $0x20] sm:$0xff] %v1546_v17  ;;  %v3169_v25 = vmul.f32 %v4964_v19, %v4959_v10  ;;  %s6365_s15 = smov [#allocation15]  ;;  %s6370_s2 = smov [#allocation17]  ;;  %v4622_v2 = vld [vmem:[%s1588_s14 + $0x30] sm:$0xff] }
 0x2fa   : >> { %v3161_v26 = vsub.f32 %v3159_v20, %v3160_v21  ;;  %v3167_v28 = vadd.f32 %v3166_v24, %v3165_v3  ;;  %v4621_v4 = vld [vmem:[%s1585_s17 + $0x30] sm:$0xff]  ;;  %s6419_s14 = smov [#allocation13]  ;;  %s6430_s17 = smov [#allocation15] }
 0x2fb   : >> { %v3164_v27 = vsub.f32 %v3162_v22, %v3163_v23  ;;  %v3170_v7 = vadd.f32 %v3169_v25, %v3168_v6  ;;  %v4980_v20 = vld [vmem:[%s3212_s19 + $0x30] sm:$0xff]  ;;  %s6443_s19 = smov [#allocation18] }
 0x2fc   : >> { %4965 = vst [vmem:[%s6314_s20 + $0x20] sm:$0xff] %v3161_v26  ;;  %4967 = vst [vmem:[%s6321_s3 + $0x20] sm:$0xff] %v3167_v28  ;;  %s3209_s20 = smov [#allocation26]  ;;  %s6380_s3 = smov [#allocation10] }
 0x2fd   : >> { %4966 = vst [vmem:[%s6316_s21 + $0x20] sm:$0xff] %v3164_v27  ;;  %4968 = vst [vmem:[%s6323_s22 + $0x20] sm:$0xff] %v3170_v7  ;;  %s6378_s21 = smov [#allocation8]  ;;  %s6385_s22 = smov [#allocation12]  ;;  %v4979_v23 = vld [vmem:[%s3209_s20 + $0x30] sm:$0xff] }
 0x2fe   : >> { %s6445_s20 = smov [#allocation8] }
 0x2ff   : >> { %v4613_v32 = vld [vmem:[%s6333_s23 + $0x28] sm:$0xff] }
 0x300   : >> { %v4614_v33 = vld [vmem:[%s6335_s25 + $0x28] sm:$0xff]  ;;  %v1569_v35 = vmul.f32 %v4613_v32, %v4611_v31  ;;  %v1575_v39 = vmul.f32 %v4613_v32, %v4612_v30 }
 0x301   : >> { %v4615_v34 = vld [vmem:[%s6337_s26 + $0x28] sm:$0xff]  ;;  %v1572_v38 = vmul.f32 %v4614_v33, %v4611_v31  ;;  %v1578_v41 = vmul.f32 %v4614_v33, %v4612_v30 }
 0x302   : >> { %v4616_v9 = vld [vmem:[%s6342_s27 + $0x28] sm:$0xff]  ;;  %v1570_v37 = vmul.f32 %v4615_v34, %v4612_v30  ;;  %v1576_v29 = vmul.f32 %v4615_v34, %v4611_v31 }
 0x303   : >> { %v1573_v40 = vmul.f32 %v4616_v9, %v4612_v30  ;;  %v1579_v43 = vmul.f32 %v4616_v9, %v4611_v31  ;;  %v4971_v50 = vld [vmem:[%s6345_s30 + $0x28] sm:$0xff] }
 0x304   : >> { %v1571_v45 = vsub.f32 %v1569_v35, %v1570_v37  ;;  %v1577_v48 = vadd.f32 %v1576_v29, %v1575_v39  ;;  %v4972_v42 = vld [vmem:[%s6350_s1 + $0x28] sm:$0xff]  ;;  %v3193_v51 = vmul.f32 %v4971_v50, %v4969_v36  ;;  %v3199_v57 = vmul.f32 %v4971_v50, %v4970_v44 }
 0x305   : >> { %v1574_v46 = vsub.f32 %v1572_v38, %v1573_v40  ;;  %v1580_v49 = vadd.f32 %v1579_v43, %v1578_v41  ;;  %v4973_v52 = vld [vmem:[%s6352_s12 + $0x28] sm:$0xff]  ;;  %v3196_v56 = vmul.f32 %v4972_v42, %v4969_v36  ;;  %v3202_v55 = vmul.f32 %v4972_v42, %v4970_v44 }
 0x306   : >> { %4617 = vst [vmem:[%s6333_s23 + $0x28] sm:$0xff] %v1571_v45  ;;  %v4974_v53 = vld [vmem:[%s6355_s13 + $0x28] sm:$0xff]  ;;  %v3194_v47 = vmul.f32 %v4973_v52, %v4970_v44  ;;  %4619 = vst [vmem:[%s6337_s26 + $0x28] sm:$0xff] %v1577_v48  ;;  %v3200_v54 = vmul.f32 %v4973_v52, %v4969_v36  ;;  %s1622_s23 = smov [#allocation27]  ;;  %s6399_s26 = smov [#allocation16] }
 0x307   : >> { %4618 = vst [vmem:[%s6335_s25 + $0x28] sm:$0xff] %v1574_v46  ;;  %4620 = vst [vmem:[%s6342_s27 + $0x28] sm:$0xff] %v1580_v49  ;;  %v3197_v58 = vmul.f32 %v4974_v53, %v4970_v44  ;;  %v3203_v60 = vmul.f32 %v4974_v53, %v4969_v36  ;;  %s1619_s25 = smov [#allocation26]  ;;  %s6401_s27 = smov [#allocation17]  ;;  %v4632_v40 = vld [vmem:[%s1622_s23 + $0x38] sm:$0xff] }
 0x308   : >> { %v3195_v62 = vsub.f32 %v3193_v51, %v3194_v47  ;;  %v3201_v0 = vadd.f32 %v3200_v54, %v3199_v57  ;;  %v4631_v29 = vld [vmem:[%s1619_s25 + $0x38] sm:$0xff]  ;;  %s6464_s23 = smov [#allocation16]  ;;  %s6473_s25 = smov [#allocation18] }
 0x309   : >> { %v3198_v63 = vsub.f32 %v3196_v56, %v3197_v58  ;;  %v3204_v59 = vadd.f32 %v3203_v60, %v3202_v55  ;;  %v4990_v51 = vld [vmem:[%s3246_s29 + $0x38] sm:$0xff]  ;;  %s1715_s29 = smov [#allocation18] }
 0x30a   : >> { %4975 = vst [vmem:[%s6345_s30 + $0x28] sm:$0xff] %v3195_v62  ;;  %4977 = vst [vmem:[%s6352_s12 + $0x28] sm:$0xff] %v3201_v0  ;;  %s3243_s30 = smov [#allocation26]  ;;  %s6414_s12 = smov [#allocation10] }
 0x30b   : >> { %4976 = vst [vmem:[%s6350_s1 + $0x28] sm:$0xff] %v3198_v63  ;;  %4978 = vst [vmem:[%s6355_s13 + $0x28] sm:$0xff] %v3204_v59  ;;  %s6409_s1 = smov [#allocation8]  ;;  %s6416_s13 = smov [#allocation12]  ;;  %v4989_v56 = vld [vmem:[%s3243_s30 + $0x38] sm:$0xff] }
 0x30c   : >> { %s1737_s30 = smov [#allocation15] }
 0x30d   : >> { %v4623_v5 = vld [vmem:[%s6365_s15 + $0x30] sm:$0xff] }
 0x30e   : >> { %v4624_v8 = vld [vmem:[%s6367_s16 + $0x30] sm:$0xff]  ;;  %v1603_v12 = vmul.f32 %v4623_v5, %v4621_v4  ;;  %v1609_v61 = vmul.f32 %v4623_v5, %v4622_v2 }
 0x30f   : >> { %v4625_v11 = vld [vmem:[%s6370_s2 + $0x30] sm:$0xff]  ;;  %v1606_v13 = vmul.f32 %v4624_v8, %v4621_v4  ;;  %v1612_v18 = vmul.f32 %v4624_v8, %v4622_v2 }
 0x310   : >> { %v4626_v1 = vld [vmem:[%s6372_s18 + $0x30] sm:$0xff]  ;;  %v1604_v10 = vmul.f32 %v4625_v11, %v4622_v2  ;;  %v1610_v14 = vmul.f32 %v4625_v11, %v4621_v4 }
 0x311   : >> { %v1607_v17 = vmul.f32 %v4626_v1, %v4622_v2  ;;  %v1613_v19 = vmul.f32 %v4626_v1, %v4621_v4  ;;  %v4981_v24 = vld [vmem:[%s6378_s21 + $0x30] sm:$0xff] }
 0x312   : >> { %v1605_v3 = vsub.f32 %v1603_v12, %v1604_v10  ;;  %v1611_v22 = vadd.f32 %v1610_v14, %v1609_v61  ;;  %v4982_v25 = vld [vmem:[%s6380_s3 + $0x30] sm:$0xff]  ;;  %v3227_v28 = vmul.f32 %v4981_v24, %v4979_v23  ;;  %v3233_v7 = vmul.f32 %v4981_v24, %v4980_v20 }
 0x313   : >> { %v1608_v21 = vsub.f32 %v1606_v13, %v1607_v17  ;;  %v1614_v6 = vadd.f32 %v1613_v19, %v1612_v18  ;;  %v4983_v26 = vld [vmem:[%s6385_s22 + $0x30] sm:$0xff]  ;;  %v3230_v31 = vmul.f32 %v4982_v25, %v4979_v23  ;;  %v3236_v34 = vmul.f32 %v4982_v25, %v4980_v20 }
 0x314   : >> { %v4984_v27 = vld [vmem:[%s6387_s0 + $0x30] sm:$0xff]  ;;  %4627 = vst [vmem:[%s6365_s15 + $0x30] sm:$0xff] %v1605_v3  ;;  %4629 = vst [vmem:[%s6370_s2 + $0x30] sm:$0xff] %v1611_v22  ;;  %v3228_v30 = vmul.f32 %v4983_v26, %v4980_v20  ;;  %v3234_v33 = vmul.f32 %v4983_v26, %v4979_v23  ;;  %s1653_s15 = smov [#allocation24]  ;;  %s6432_s2 = smov [#allocation16] }
 0x315   : >> { %4628 = vst [vmem:[%s6367_s16 + $0x30] sm:$0xff] %v1608_v21  ;;  %v3231_v32 = vmul.f32 %v4984_v27, %v4980_v20  ;;  %4630 = vst [vmem:[%s6372_s18 + $0x30] sm:$0xff] %v1614_v6  ;;  %v3237_v9 = vmul.f32 %v4984_v27, %v4979_v23  ;;  %s1655_s16 = smov [#allocation25]  ;;  %v6434_v17 = vld [vmem:[%s1653_s15] ss:$0 sm:$0xff]  ;;  %s6441_s18 = smov [#allocation17] }
 0x316   : >> { %v3229_v35 = vsub.f32 %v3227_v28, %v3228_v30  ;;  %v3235_v38 = vadd.f32 %v3234_v33, %v3233_v7  ;;  %v6436_v14 = vld [vmem:[%s1655_s16] ss:$0 sm:$0xff]  ;;  %s1767_s15 = smov [#allocation16]  ;;  %s1769_s16 = smov [#allocation17] }
 0x317   : >> { %v3232_v37 = vsub.f32 %v3230_v31, %v3231_v32  ;;  %v3238_v39 = vadd.f32 %v3237_v9, %v3236_v34 }
 0x318   : >> { %4985 = vst [vmem:[%s6378_s21 + $0x30] sm:$0xff] %v3229_v35  ;;  %4987 = vst [vmem:[%s6385_s22 + $0x30] sm:$0xff] %v3235_v38  ;;  %s6447_s21 = smov [#allocation12]  ;;  %s6453_s22 = smov [#allocation13] }
 0x319   : >> { %4986 = vst [vmem:[%s6380_s3 + $0x30] sm:$0xff] %v3232_v37  ;;  %4988 = vst [vmem:[%s6387_s0 + $0x30] sm:$0xff] %v3238_v39  ;;  %s6451_s3 = smov [#allocation10]  ;;  %s6462_s0 = smov [#allocation15] }
 0x31b   : >> { %v4633_v41 = vld [vmem:[%s6397_s24 + $0x38] sm:$0xff] }
 0x31c   : >> { %v4634_v43 = vld [vmem:[%s6399_s26 + $0x38] sm:$0xff]  ;;  %v1637_v36 = vmul.f32 %v4633_v41, %v4631_v29  ;;  %v1643_v49 = vmul.f32 %v4633_v41, %v4632_v40 }
 0x31d   : >> { %v4635_v44 = vld [vmem:[%s6401_s27 + $0x38] sm:$0xff]  ;;  %v1640_v48 = vmul.f32 %v4634_v43, %v4631_v29  ;;  %v1646_v52 = vmul.f32 %v4634_v43, %v4632_v40 }
 0x31e   : >> { %v4636_v45 = vld [vmem:[%s6406_s28 + $0x38] sm:$0xff]  ;;  %v1638_v46 = vmul.f32 %v4635_v44, %v4632_v40  ;;  %v1644_v42 = vmul.f32 %v4635_v44, %v4631_v29 }
 0x31f   : >> { %v1641_v50 = vmul.f32 %v4636_v45, %v4632_v40  ;;  %v1647_v53 = vmul.f32 %v4636_v45, %v4631_v29  ;;  %v4991_v55 = vld [vmem:[%s6409_s1 + $0x38] sm:$0xff] }
 0x320   : >> { %v1639_v47 = vsub.f32 %v1637_v36, %v1638_v46  ;;  %v1645_v58 = vadd.f32 %v1644_v42, %v1643_v49  ;;  %v4992_v60 = vld [vmem:[%s6414_s12 + $0x38] sm:$0xff]  ;;  %v3261_v0 = vmul.f32 %v4991_v55, %v4989_v56  ;;  %v3267_v4 = vmul.f32 %v4991_v55, %v4990_v51 }
 0x321   : >> { %v1642_v57 = vsub.f32 %v1640_v48, %v1641_v50  ;;  %v1648_v54 = vadd.f32 %v1647_v53, %v1646_v52  ;;  %v4993_v62 = vld [vmem:[%s6416_s13 + $0x38] sm:$0xff]  ;;  %v3264_v2 = vmul.f32 %v4992_v60, %v4989_v56  ;;  %v3270_v11 = vmul.f32 %v4992_v60, %v4990_v51 }
 0x322   : >> { %v4994_v63 = vld [vmem:[%s6419_s14 + $0x38] sm:$0xff]  ;;  %v3262_v59 = vmul.f32 %v4993_v62, %v4990_v51  ;;  %4637 = vst [vmem:[%s6397_s24 + $0x38] sm:$0xff] %v1639_v47  ;;  %v3268_v8 = vmul.f32 %v4993_v62, %v4989_v56  ;;  %4639 = vst [vmem:[%s6401_s27 + $0x38] sm:$0xff] %v1645_v58  ;;  %s6471_s24 = smov [#allocation17]  ;;  %s1711_s27 = smov [#allocation16] }
 0x323   : >> { %v3265_v5 = vmul.f32 %v4994_v63, %v4990_v51  ;;  %v3271_v1 = vmul.f32 %v4994_v63, %v4989_v56  ;;  %4638 = vst [vmem:[%s6399_s26 + $0x38] sm:$0xff] %v1642_v57  ;;  %4640 = vst [vmem:[%s6406_s28 + $0x38] sm:$0xff] %v1648_v54  ;;  %s1709_s26 = smov [#allocation15]  ;;  %s1713_s28 = smov [#allocation17] }
 0x324   : >> { %v3263_v12 = vsub.f32 %v3261_v0, %v3262_v59  ;;  %v3269_v10 = vadd.f32 %v3268_v8, %v3267_v4 }
 0x325   : >> { %v3266_v61 = vsub.f32 %v3264_v2, %v3265_v5  ;;  %v3272_v13 = vadd.f32 %v3271_v1, %v3270_v11 }
 0x326   : >> { %4995 = vst [vmem:[%s6409_s1 + $0x38] sm:$0xff] %v3263_v12  ;;  %4997 = vst [vmem:[%s6416_s13 + $0x38] sm:$0xff] %v3269_v10  ;;  %s1739_s1 = smov [#allocation16]  ;;  %s1743_s13 = smov [#allocation18] }
 0x327   : >> { %4996 = vst [vmem:[%s6414_s12 + $0x38] sm:$0xff] %v3266_v61  ;;  %4998 = vst [vmem:[%s6419_s14 + $0x38] sm:$0xff] %v3272_v13  ;;  %s1741_s12 = smov [#allocation17]  ;;  %s1765_s14 = smov [#allocation15] }
 0x329   : >> { %v1661_v18 = vld [vmem:[%s6430_s17] sm:$0xff] }
 0x32a   : >> { %v1662_v19 = vld [vmem:[%s6432_s2] sm:$0xff]  ;;  %v1665_v20 = vmul.f32 %v1661_v18, %v6434_v17  ;;  %v1668_v3 = vmul.f32 %v1661_v18, %v6436_v14 }
 0x32b   : >> { %v1663_v21 = vld [vmem:[%s6441_s18] sm:$0xff]  ;;  %v1666_v23 = vmul.f32 %v1662_v19, %v6436_v14  ;;  %v1669_v24 = vmul.f32 %v1662_v19, %v6434_v17 }
 0x32c   : >> { %v1664_v22 = vld [vmem:[%s6443_s19] sm:$0xff]  ;;  %v1671_v6 = vmul.f32 %v1663_v21, %v6434_v17  ;;  %v1674_v26 = vmul.f32 %v1663_v21, %v6436_v14 }
 0x32d   : >> { %v1672_v25 = vmul.f32 %v1664_v22, %v6436_v14  ;;  %v1675_v27 = vmul.f32 %v1664_v22, %v6434_v17  ;;  %v3279_v28 = vld [vmem:[%s6445_s20] ss:$0 sm:$0xff]  ;;  %v5000_v30 = vld [vmem:[%s6445_s20 + $0x7] ss:$0 sm:$0xff]  ;;  %v1667_v31 = vsub.f32 %v1665_v20, %v1666_v23  ;;  %v1670_v32 = vadd.f32 %v1669_v24, %v1668_v3  ;;  %v5001_v9 = vld [vmem:[%s6445_s20 + $0x7] sm:$0xfe] }
 0x32e   : >> { %v4999_v7 = vld [vmem:[%s6445_s20 - $0x1] sm:$0xfe]  ;;  %v5002_v35 = vld [vmem:[%s6445_s20 + $0xf] ss:$0 sm:$0xff]  ;;  %v5004_v37 = vld [vmem:[%s6445_s20 + $0xf] sm:$0xfe]  ;;  %v3297_v39 = vsel %vm7917_vm1, %v5000_v30, %v5001_v9 }
 0x32f   : >> { %v1673_v33 = vsub.f32 %v1671_v6, %v1672_v25  ;;  %v3286_v34 = vsel %vm7917_vm1, %v3279_v28, %v4999_v7  ;;  %v1676_v38 = vadd.f32 %v1675_v27, %v1674_v26  ;;  %v3308_v40 = vsel %vm7917_vm1, %v5002_v35, %v5004_v37  ;;  %v5005_v29 = vld [vmem:[%s6445_s20 + $0x17] ss:$0 sm:$0xff]  ;;  %v5007_v41 = vld [vmem:[%s6445_s20 + $0x17] sm:$0xfe]  ;;  %v5008_v43 = vld [vmem:[%s6445_s20 + $0x1f] ss:$0 sm:$0xff]  ;;  %1677 = vst [vmem:[%s6430_s17] sm:$0xff] %v1667_v31 }
 0x330   : >> { %3289 = vst [vmem:[%s6445_s20] sm:$0xff] %v3286_v34  ;;  %1678 = vst [vmem:[%s6432_s2] sm:$0xff] %v1670_v32  ;;  %v3319_v44 = vsel %vm7917_vm1, %v5005_v29, %v5007_v41  ;;  %v5010_v45 = vld [vmem:[%s6445_s20 + $0x1f] sm:$0xfe]  ;;  %v5011_v36 = vld [vmem:[%s6445_s20 + $0x27] ss:$0 sm:$0xff]  ;;  %s1771_s17 = smov [#allocation18]  ;;  %s1793_s2 = smov [#allocation15] }
 0x331   : >> { %1679 = vst [vmem:[%s6441_s18] sm:$0xff] %v1673_v33  ;;  %5003 = vst [vmem:[%s6445_s20 + $0x8] sm:$0xff] %v3297_v39  ;;  %v5013_v46 = vld [vmem:[%s6445_s20 + $0x27] sm:$0xfe]  ;;  %v3330_v48 = vsel %vm7917_vm1, %v5008_v43, %v5010_v45  ;;  %v5014_v50 = vld [vmem:[%s6445_s20 + $0x2f] ss:$0 sm:$0xff]  ;;  %s1795_s18 = smov [#allocation16] }
 0x332   : >> { %5006 = vst [vmem:[%s6445_s20 + $0x10] sm:$0xff] %v3308_v40  ;;  %1680 = vst [vmem:[%s6443_s19] sm:$0xff] %v1676_v38  ;;  %v3341_v49 = vsel %vm7917_vm1, %v5011_v36, %v5013_v46  ;;  %v5016_v42 = vld [vmem:[%s6445_s20 + $0x2f] sm:$0xfe]  ;;  %v5017_v52 = vld [vmem:[%s6445_s20 + $0x37] ss:$0 sm:$0xff]  ;;  %s1797_s19 = smov [#allocation17] }
 0x333   : >> { %5009 = vst [vmem:[%s6445_s20 + $0x18] sm:$0xff] %v3319_v44  ;;  %5012 = vst [vmem:[%s6445_s20 + $0x20] sm:$0xff] %v3330_v48  ;;  %v3352_v53 = vsel %vm7917_vm1, %v5014_v50, %v5016_v42  ;;  %v5019_v51 = vld [vmem:[%s6445_s20 + $0x37] sm:$0xfe]  ;;  %v5020_v47 = vld [vmem:[%s6445_s20 + $0x3f] ss:$0 sm:$0xff] }
 0x334   : >> { %5015 = vst [vmem:[%s6445_s20 + $0x28] sm:$0xff] %v3341_v49  ;;  %v3367_v56 = vld [vmem:[%s6447_s21] ss:$0 sm:$0xff]  ;;  %5018 = vst [vmem:[%s6445_s20 + $0x30] sm:$0xff] %v3352_v53  ;;  %v3363_v57 = vsel %vm7917_vm1, %v5017_v52, %v5019_v51  ;;  %v5023_v58 = vld [vmem:[%s6447_s21 + $0x39] sm:$0x7f] }
 0x335   : >> { %5022 = vst [vmem:[%s6445_s20 + $0x1] sm:$0x1] %v3367_v56  ;;  %v5024_v54 = vld [vmem:[%s6447_s21 + $0x38] ss:$0 sm:$0xff]  ;;  %v5026_v55 = vld [vmem:[%s6447_s21 + $0x31] sm:$0x7f]  ;;  %v3376_v60 = vsel %vm7916_vm2, %v5020_v47, %v5023_v58 }
 0x336   : >> { %5021 = vst [vmem:[%s6445_s20 + $0x38] sm:$0xff] %v3363_v57  ;;  %v3385_v62 = vsel %vm7916_vm2, %v5024_v54, %v5026_v55  ;;  %v5027_v63 = vld [vmem:[%s6447_s21 + $0x30] ss:$0 sm:$0xff]  ;;  %v5029_v0 = vld [vmem:[%s6447_s21 + $0x29] sm:$0x7f]  ;;  %5025 = vst [vmem:[%s6447_s21 + $0x38] sm:$0xff] %v3376_v60 }
 0x337   : >> { %v5030_v59 = vld [vmem:[%s6447_s21 + $0x28] ss:$0 sm:$0xff]  ;;  %5028 = vst [vmem:[%s6447_s21 + $0x30] sm:$0xff] %v3385_v62  ;;  %v3394_v2 = vsel %vm7916_vm2, %v5027_v63, %v5029_v0  ;;  %v5032_v4 = vld [vmem:[%s6447_s21 + $0x21] sm:$0x7f]  ;;  %s1799_s20 = smov [#allocation18] }
 0x338   : >> { %v5033_v5 = vld [vmem:[%s6447_s21 + $0x20] ss:$0 sm:$0xff]  ;;  %v5035_v8 = vld [vmem:[%s6447_s21 + $0x19] sm:$0x7f]  ;;  %5031 = vst [vmem:[%s6447_s21 + $0x28] sm:$0xff] %v3394_v2  ;;  %v3403_v11 = vsel %vm7916_vm2, %v5030_v59, %v5032_v4 }
 0x339   : >> { %v3412_v1 = vsel %vm7916_vm2, %v5033_v5, %v5035_v8  ;;  %v5036_v12 = vld [vmem:[%s6447_s21 + $0x18] ss:$0 sm:$0xff]  ;;  %v5038_v61 = vld [vmem:[%s6447_s21 + $0x11] sm:$0x7f]  ;;  %v5039_v10 = vld [vmem:[%s6447_s21 + $0x10] ss:$0 sm:$0xff] }
 0x33a   : >> { %5034 = vst [vmem:[%s6447_s21 + $0x20] sm:$0xff] %v3403_v11  ;;  %5037 = vst [vmem:[%s6447_s21 + $0x18] sm:$0xff] %v3412_v1  ;;  %v3421_v13 = vsel %vm7916_vm2, %v5036_v12, %v5038_v61  ;;  %v5041_v18 = vld [vmem:[%s6447_s21 + $0x9] sm:$0x7f]  ;;  %v5042_v19 = vld [vmem:[%s6447_s21 + $0x8] ss:$0 sm:$0xff] }
 0x33b   : >> { %v5044_v20 = vld [vmem:[%s6447_s21 + $0x1] sm:$0x7f]  ;;  %5040 = vst [vmem:[%s6447_s21 + $0x10] sm:$0xff] %v3421_v13  ;;  %v3430_v3 = vsel %vm7916_vm2, %v5039_v10, %v5041_v18  ;;  %v3443_v22 = vld [vmem:[%s6451_s3] ss:$0 sm:$0xff]  ;;  %v4641_v11 = vld [vmem:[%s6462_s0 + $0x8] sm:$0xff] }
 0x33c   : >> { %v3438_v21 = vsel %vm7916_vm2, %v5042_v19, %v5044_v20  ;;  %v5045_v23 = vld [vmem:[%s6451_s3 - $0x1] sm:$0xfe]  ;;  %v5046_v24 = vld [vmem:[%s6451_s3 + $0x7] ss:$0 sm:$0xff]  ;;  %5043 = vst [vmem:[%s6447_s21 + $0x8] sm:$0xff] %v3430_v3  ;;  %v4642_v1 = vld [vmem:[%s6464_s23 + $0x8] sm:$0xff]  ;;  %v1693_v61 = vmul.f32 %v4641_v11, %v6434_v17  ;;  %v1696_v13 = vmul.f32 %v4641_v11, %v6436_v14 }
 0x33d   : >> { %3440 = vst [vmem:[%s6447_s21] sm:$0xff] %v3438_v21  ;;  %v3450_v6 = vsel %vm7917_vm1, %v3443_v22, %v5045_v23  ;;  %v5047_v25 = vld [vmem:[%s6451_s3 + $0x7] sm:$0xfe]  ;;  %v5048_v26 = vld [vmem:[%s6451_s3 + $0xf] ss:$0 sm:$0xff]  ;;  %v5050_v27 = vld [vmem:[%s6451_s3 + $0xf] sm:$0xfe]  ;;  %v1694_v10 = vmul.f32 %v4642_v1, %v6436_v14  ;;  %v1697_v18 = vmul.f32 %v4642_v1, %v6434_v17 }
 0x33e   : >> { %3453 = vst [vmem:[%s6451_s3] sm:$0xff] %v3450_v6  ;;  %v3461_v28 = vsel %vm7917_vm1, %v5046_v24, %v5047_v25  ;;  %v3472_v7 = vsel %vm7917_vm1, %v5048_v26, %v5050_v27  ;;  %v5051_v30 = vld [vmem:[%s6451_s3 + $0x17] ss:$0 sm:$0xff]  ;;  %v5053_v31 = vld [vmem:[%s6451_s3 + $0x17] sm:$0xfe]  ;;  %v5054_v32 = vld [vmem:[%s6451_s3 + $0x1f] ss:$0 sm:$0xff] }
 0x33f   : >> { %5049 = vst [vmem:[%s6451_s3 + $0x8] sm:$0xff] %v3461_v28  ;;  %5052 = vst [vmem:[%s6451_s3 + $0x10] sm:$0xff] %v3472_v7  ;;  %v3483_v33 = vsel %vm7917_vm1, %v5051_v30, %v5053_v31  ;;  %v5056_v34 = vld [vmem:[%s6451_s3 + $0x1f] sm:$0xfe]  ;;  %v5057_v9 = vld [vmem:[%s6451_s3 + $0x27] ss:$0 sm:$0xff]  ;;  %v1695_v23 = vsub.f32 %v1693_v61, %v1694_v10  ;;  %v1698_v24 = vadd.f32 %v1697_v18, %v1696_v13 }
 0x340   : >> { %v5059_v35 = vld [vmem:[%s6451_s3 + $0x27] sm:$0xfe]  ;;  %5055 = vst [vmem:[%s6451_s3 + $0x18] sm:$0xff] %v3483_v33  ;;  %v3494_v37 = vsel %vm7917_vm1, %v5054_v32, %v5056_v34  ;;  %v5060_v39 = vld [vmem:[%s6451_s3 + $0x2f] ss:$0 sm:$0xff]  ;;  %s1821_s21 = smov [#allocation15] }
 0x341   : >> { %v3505_v38 = vsel %vm7917_vm1, %v5057_v9, %v5059_v35  ;;  %v5062_v40 = vld [vmem:[%s6451_s3 + $0x2f] sm:$0xfe]  ;;  %v5063_v29 = vld [vmem:[%s6451_s3 + $0x37] ss:$0 sm:$0xff]  ;;  %5058 = vst [vmem:[%s6451_s3 + $0x20] sm:$0xff] %v3494_v37  ;;  %v4643_v12 = vld [vmem:[%s6471_s24 + $0x8] sm:$0xff] }
 0x342   : >> { %5061 = vst [vmem:[%s6451_s3 + $0x28] sm:$0xff] %v3505_v38  ;;  %v3516_v41 = vsel %vm7917_vm1, %v5060_v39, %v5062_v40  ;;  %v5065_v43 = vld [vmem:[%s6451_s3 + $0x37] sm:$0xfe]  ;;  %v5066_v44 = vld [vmem:[%s6451_s3 + $0x3f] ss:$0 sm:$0xff]  ;;  %v4644_v19 = vld [vmem:[%s6473_s25 + $0x8] sm:$0xff]  ;;  %v1699_v20 = vmul.f32 %v4643_v12, %v6434_v17  ;;  %v1702_v21 = vmul.f32 %v4643_v12, %v6436_v14 }
 0x343   : >> { %v3531_v45 = vld [vmem:[%s6453_s22] ss:$0 sm:$0xff]  ;;  %5064 = vst [vmem:[%s6451_s3 + $0x30] sm:$0xff] %v3516_v41  ;;  %v3527_v36 = vsel %vm7917_vm1, %v5063_v29, %v5065_v43  ;;  %v5069_v46 = vld [vmem:[%s6453_s22 + $0x39] sm:$0x7f]  ;;  %v1700_v3 = vmul.f32 %v4644_v19, %v6436_v14  ;;  %v1703_v22 = vmul.f32 %v4644_v19, %v6434_v17  ;;  %4645 = vst [vmem:[%s6462_s0 + $0x8] sm:$0xff] %v1695_v23 }
 0x344   : >> { %5068 = vst [vmem:[%s6451_s3 + $0x1] sm:$0x1] %v3531_v45  ;;  %v5070_v48 = vld [vmem:[%s6453_s22 + $0x38] ss:$0 sm:$0xff]  ;;  %v5072_v49 = vld [vmem:[%s6453_s22 + $0x31] sm:$0x7f]  ;;  %v3540_v50 = vsel %vm7916_vm2, %v5066_v44, %v5069_v46 }
 0x345   : >> { %5067 = vst [vmem:[%s6451_s3 + $0x38] sm:$0xff] %v3527_v36  ;;  %v3549_v42 = vsel %vm7916_vm2, %v5070_v48, %v5072_v49  ;;  %v5073_v52 = vld [vmem:[%s6453_s22 + $0x30] ss:$0 sm:$0xff]  ;;  %v5075_v53 = vld [vmem:[%s6453_s22 + $0x29] sm:$0x7f]  ;;  %5071 = vst [vmem:[%s6453_s22 + $0x38] sm:$0xff] %v3540_v50  ;;  %v1701_v6 = vsub.f32 %v1699_v20, %v1700_v3  ;;  %v1704_v25 = vadd.f32 %v1703_v22, %v1702_v21 }
 0x346   : >> { %v5076_v51 = vld [vmem:[%s6453_s22 + $0x28] ss:$0 sm:$0xff]  ;;  %5074 = vst [vmem:[%s6453_s22 + $0x30] sm:$0xff] %v3549_v42  ;;  %v3558_v47 = vsel %vm7916_vm2, %v5073_v52, %v5075_v53  ;;  %v5078_v56 = vld [vmem:[%s6453_s22 + $0x21] sm:$0x7f]  ;;  %4646 = vst [vmem:[%s6464_s23 + $0x8] sm:$0xff] %v1698_v24 }
 0x347   : >> { %v5079_v57 = vld [vmem:[%s6453_s22 + $0x20] ss:$0 sm:$0xff]  ;;  %v5081_v58 = vld [vmem:[%s6453_s22 + $0x19] sm:$0x7f]  ;;  %5077 = vst [vmem:[%s6453_s22 + $0x28] sm:$0xff] %v3558_v47  ;;  %v3567_v54 = vsel %vm7916_vm2, %v5076_v51, %v5078_v56  ;;  %4647 = vst [vmem:[%s6471_s24 + $0x8] sm:$0xff] %v1701_v6 }
 0x348   : >> { %v3576_v55 = vsel %vm7916_vm2, %v5079_v57, %v5081_v58  ;;  %v5082_v60 = vld [vmem:[%s6453_s22 + $0x18] ss:$0 sm:$0xff]  ;;  %v5084_v62 = vld [vmem:[%s6453_s22 + $0x11] sm:$0x7f]  ;;  %v5085_v63 = vld [vmem:[%s6453_s22 + $0x10] ss:$0 sm:$0xff] }
 0x349   : >> { %5080 = vst [vmem:[%s6453_s22 + $0x20] sm:$0xff] %v3567_v54  ;;  %5083 = vst [vmem:[%s6453_s22 + $0x18] sm:$0xff] %v3576_v55  ;;  %v3585_v0 = vsel %vm7916_vm2, %v5082_v60, %v5084_v62  ;;  %v5087_v59 = vld [vmem:[%s6453_s22 + $0x9] sm:$0x7f]  ;;  %v5088_v2 = vld [vmem:[%s6453_s22 + $0x8] ss:$0 sm:$0xff] }
 0x34a   : >> { %v5090_v4 = vld [vmem:[%s6453_s22 + $0x1] sm:$0x7f]  ;;  %5086 = vst [vmem:[%s6453_s22 + $0x10] sm:$0xff] %v3585_v0  ;;  %v3594_v5 = vsel %vm7916_vm2, %v5085_v63, %v5087_v59  ;;  %4648 = vst [vmem:[%s6473_s25 + $0x8] sm:$0xff] %v1704_v25  ;;  %v4649_v26 = vld [vmem:[%s1709_s26 + $0x10] sm:$0xff]  ;;  %s1823_s3 = smov [#allocation16] }
 0x34b   : >> { %v3602_v8 = vsel %vm7916_vm2, %v5088_v2, %v5090_v4  ;;  %5089 = vst [vmem:[%s6453_s22 + $0x8] sm:$0xff] %v3594_v5  ;;  %v1721_v28 = vmul.f32 %v4649_v26, %v6434_v17  ;;  %v1724_v30 = vmul.f32 %v4649_v26, %v6436_v14  ;;  %s1827_s0 = smov [#allocation18]  ;;  %s6702_s23 = smov [#allocation15] }
 0x34c   : >> { %3604 = vst [vmem:[%s6453_s22] sm:$0xff] %v3602_v8  ;;  %s1825_s22 = smov [#allocation17]  ;;  %s6704_s24 = smov [#allocation16] }
 0x34d   : >> { %v4650_v27 = vld [vmem:[%s1711_s27 + $0x10] sm:$0xff]  ;;  %s6712_s25 = smov [#allocation17] }
 0x34e   : >> { %v1722_v7 = vmul.f32 %v4650_v27, %v6436_v14  ;;  %v1725_v31 = vmul.f32 %v4650_v27, %v6434_v17  ;;  %v4651_v32 = vld [vmem:[%s1713_s28 + $0x10] sm:$0xff] }
 0x34f   : >> { %v1727_v34 = vmul.f32 %v4651_v32, %v6434_v17  ;;  %v1730_v35 = vmul.f32 %v4651_v32, %v6436_v14 }
 0x350   : >> { %v1723_v38 = vsub.f32 %v1721_v28, %v1722_v7  ;;  %v1726_v39 = vadd.f32 %v1725_v31, %v1724_v30 }
 0x351   : >> { %v4652_v33 = vld [vmem:[%s1715_s29 + $0x10] sm:$0xff] }
 0x352   : >> { %v1728_v9 = vmul.f32 %v4652_v33, %v6436_v14  ;;  %v1731_v37 = vmul.f32 %v4652_v33, %v6434_v17  ;;  %4653 = vst [vmem:[%s1709_s26 + $0x10] sm:$0xff] %v1723_v38  ;;  %4654 = vst [vmem:[%s1711_s27 + $0x10] sm:$0xff] %v1726_v39  ;;  %s6714_s26 = smov [#allocation18]  ;;  %s1878_s27 = smov [#allocation22] }
 0x354   : >> { %v1729_v40 = vsub.f32 %v1727_v34, %v1728_v9  ;;  %v1732_v29 = vadd.f32 %v1731_v37, %v1730_v35 }
 0x356   : >> { %4655 = vst [vmem:[%s1713_s28 + $0x10] sm:$0xff] %v1729_v40  ;;  %4656 = vst [vmem:[%s1715_s29 + $0x10] sm:$0xff] %v1732_v29  ;;  %s6818_s28 = smov [#allocation16]  ;;  %s6839_s29 = smov [#allocation15] }
 0x359   : >> { %v4657_v41 = vld [vmem:[%s1737_s30 + $0x18] sm:$0xff] }
 0x35a   : >> { %v4658_v43 = vld [vmem:[%s1739_s1 + $0x18] sm:$0xff]  ;;  %v1749_v44 = vmul.f32 %v4657_v41, %v6434_v17  ;;  %v1752_v36 = vmul.f32 %v4657_v41, %v6436_v14 }
 0x35b   : >> { %v1750_v45 = vmul.f32 %v4658_v43, %v6436_v14  ;;  %v1753_v46 = vmul.f32 %v4658_v43, %v6434_v17 }
 0x35d   : >> { %v4659_v48 = vld [vmem:[%s1741_s12 + $0x18] sm:$0xff]  ;;  %v1751_v51 = vsub.f32 %v1749_v44, %v1750_v45  ;;  %v1754_v47 = vadd.f32 %v1753_v46, %v1752_v36  ;;  %v6717_v36 = vadd.s32 8, %v6700_v16  ;;  %v6720_v46 = vadd.s32 16, %v6700_v16 }
 0x35e   : >> { %v4660_v49 = vld [vmem:[%s1743_s13 + $0x18] sm:$0xff]  ;;  %v1755_v50 = vmul.f32 %v4659_v48, %v6434_v17  ;;  %v1758_v52 = vmul.f32 %v4659_v48, %v6436_v14  ;;  %v6723_v48 = vadd.s32 24, %v6700_v16 }
 0x35f   : >> { %v1756_v42 = vmul.f32 %v4660_v49, %v6436_v14  ;;  %v1759_v53 = vmul.f32 %v4660_v49, %v6434_v17  ;;  %4661 = vst [vmem:[%s1737_s30 + $0x18] sm:$0xff] %v1751_v51  ;;  %4662 = vst [vmem:[%s1739_s1 + $0x18] sm:$0xff] %v1754_v47  ;;  %v6726_v49 = vadd.s32 32, %v6700_v16  ;;  %vm1897_vm4 = vcmp.eq.s32.totalorder %v6717_v36, %v6707_v15  ;;  %s6843_s30 = smov [#allocation23]  ;;  %s6859_s1 = smov [#allocation17] }
 0x360   : >> { %vm1905_vm5 = vcmp.eq.s32.totalorder %v6720_v46, %v6707_v15  ;;  %vm1913_vm6 = vcmp.eq.s32.totalorder %v6723_v48, %v6707_v15 }
 0x361   : >> { %v1757_v56 = vsub.f32 %v1755_v50, %v1756_v42  ;;  %v1760_v57 = vadd.f32 %v1759_v53, %v1758_v52  ;;  %v6729_v50 = vadd.s32 40, %v6700_v16  ;;  %v6732_v42 = vadd.s32 48, %v6700_v16 }
 0x362   : >> { %v6735_v16 = vmov %v5761_v16  ;;  %vm1921_vm7 = vcmp.eq.s32.totalorder %v6726_v49, %v6707_v15  ;;  %v6789_v15 = vmov %v5759_v15 }
 0x363   : >> { %4663 = vst [vmem:[%s1741_s12 + $0x18] sm:$0xff] %v1757_v56  ;;  %4664 = vst [vmem:[%s1743_s13 + $0x18] sm:$0xff] %v1760_v57  ;;  %v6740_v16 = vmov %v5761_v16  ;;  %v6810_v15 = vmov %v5759_v15  ;;  %s6936_s12 = smov [#allocation18]  ;;  %s6960_s13 = smov [#allocation16] }
 0x364   : >> { %vm1958_vm11 = vcmp.eq.s32.totalorder %v6740_v16, %v6789_v15 }
 0x366   : >> { %v4665_v58 = vld [vmem:[%s1765_s14 + $0x20] sm:$0xff] }
 0x367   : >> { %v4666_v54 = vld [vmem:[%s1767_s15 + $0x20] sm:$0xff]  ;;  %v1777_v55 = vmul.f32 %v4665_v58, %v6434_v17  ;;  %v1780_v62 = vmul.f32 %v4665_v58, %v6436_v14 }
 0x368   : >> { %v1778_v60 = vmul.f32 %v4666_v54, %v6436_v14  ;;  %v1781_v63 = vmul.f32 %v4666_v54, %v6434_v17 }
 0x36a   : >> { %v4667_v0 = vld [vmem:[%s1769_s16 + $0x20] sm:$0xff]  ;;  %v1779_v11 = vsub.f32 %v1777_v55, %v1778_v60  ;;  %v1782_v1 = vadd.f32 %v1781_v63, %v1780_v62 }
 0x36b   : >> { %v4668_v59 = vld [vmem:[%s1771_s17 + $0x20] sm:$0xff]  ;;  %v1783_v2 = vmul.f32 %v4667_v0, %v6434_v17  ;;  %v1786_v5 = vmul.f32 %v4667_v0, %v6436_v14  ;;  %v6753_v0 = vadd.s32 56, %v6700_v16 }
 0x36c   : >> { %v1784_v4 = vmul.f32 %v4668_v59, %v6436_v14  ;;  %v1787_v8 = vmul.f32 %v4668_v59, %v6434_v17  ;;  %4669 = vst [vmem:[%s1765_s14 + $0x20] sm:$0xff] %v1779_v11  ;;  %4670 = vst [vmem:[%s1767_s15 + $0x20] sm:$0xff] %v1782_v1  ;;  %v6756_v59 = vadd.s32 8, %v6735_v16  ;;  %v6773_v11 = vadd.s32 32, %v6735_v16  ;;  %s7048_s14 = smov [#allocation15]  ;;  %s5657_s15 = smov 1  }
 0x36d   : >> { %v1964_v1 = vadd.s32 8, %v6740_v16 }
 0x36e   : >> { %v1785_v12 = vsub.f32 %v1783_v2, %v1784_v4  ;;  %v1788_v61 = vadd.f32 %v1787_v8, %v1786_v5  ;;  %v6761_v5 = vadd.s32 16, %v6735_v16  ;;  %v6764_v8 = vadd.s32 24, %v6735_v16 }
 0x36f   : >> { %vm1965_vm12 = vcmp.eq.s32.totalorder %v1964_v1, %v6789_v15 }
 0x370   : >> { %4671 = vst [vmem:[%s1769_s16 + $0x20] sm:$0xff] %v1785_v12  ;;  %4672 = vst [vmem:[%s1771_s17 + $0x20] sm:$0xff] %v1788_v61  ;;  %v1971_v12 = vadd.s32 16, %v6740_v16  ;;  %v6780_v16 = vmov %v5761_v16  ;;  %v1978_v61 = vadd.s32 24, %v6740_v16  ;;  %s7062_s16 = smov [#allocation15]  ;;  %s7076_s17 = smov [#allocation16] }
 0x371   : >> { %vm2020_vm8 = vcmp.eq.s32.totalorder %v6780_v16, %v6810_v15 }
 0x372   : >> { %vm1972_vm13 = vcmp.eq.s32.totalorder %v1971_v12, %v6789_v15  ;;  %vm1979_vm1 = vcmp.eq.s32.totalorder %v1978_v61, %v6789_v15 }
 0x373   : >> { %v4673_v10 = vld [vmem:[%s1793_s2 + $0x28] sm:$0xff] }
 0x374   : >> { %v4674_v13 = vld [vmem:[%s1795_s18 + $0x28] sm:$0xff]  ;;  %v1805_v18 = vmul.f32 %v4673_v10, %v6434_v17  ;;  %v1808_v20 = vmul.f32 %v4673_v10, %v6436_v14  ;;  %v1985_v10 = vadd.s32 32, %v6740_v16 }
 0x375   : >> { %v1806_v19 = vmul.f32 %v4674_v13, %v6436_v14  ;;  %v1809_v3 = vmul.f32 %v4674_v13, %v6434_v17  ;;  %v1992_v13 = vadd.s32 40, %v6740_v16 }
 0x376   : >> { %vm1986_vm0 = vcmp.eq.s32.totalorder %v1985_v10, %v6789_v15 }
 0x377   : >> { %v4675_v21 = vld [vmem:[%s1797_s19 + $0x28] sm:$0xff]  ;;  %v1807_v26 = vsub.f32 %v1805_v18, %v1806_v19  ;;  %v1810_v27 = vadd.f32 %v1809_v3, %v1808_v20  ;;  %v6799_v18 = vadd.s32 40, %v6735_v16  ;;  %v6802_v19 = vadd.s32 48, %v6735_v16 }
 0x378   : >> { %v4676_v22 = vld [vmem:[%s1799_s20 + $0x28] sm:$0xff]  ;;  %v1811_v23 = vmul.f32 %v4675_v21, %v6434_v17  ;;  %v1814_v6 = vmul.f32 %v4675_v21, %v6436_v14  ;;  %v1999_v20 = vadd.s32 48, %v6740_v16  ;;  %v2006_v3 = vadd.s32 56, %v6740_v16 }
 0x379   : >> { %v1812_v24 = vmul.f32 %v4676_v22, %v6436_v14  ;;  %v1815_v25 = vmul.f32 %v4676_v22, %v6434_v17  ;;  %4677 = vst [vmem:[%s1793_s2 + $0x28] sm:$0xff] %v1807_v26  ;;  %4678 = vst [vmem:[%s1795_s18 + $0x28] sm:$0xff] %v1810_v27  ;;  %v6807_v21 = vadd.s32 56, %v6735_v16  ;;  %v6813_v22 = vadd.s32 8, %v6780_v16  ;;  %s7924_s2 = smov 127   ;;  %s7080_s18 = smov [#allocation16] }
 0x37a   : >> { %vm1993_vm10 = vcmp.eq.s32.totalorder %v1992_v13, %v6789_v15  ;;  %vm2000_vm14 = vcmp.eq.s32.totalorder %v1999_v20, %v6789_v15  ;;  %vm2007_vm9 = vcmp.eq.s32.totalorder %v2006_v3, %v6789_v15  ;;  %v6854_v26 = vadd.s32 40, %v6780_v16 }
 0x37b   : >> { %v1813_v28 = vsub.f32 %v1811_v23, %v1812_v24  ;;  %v1816_v7 = vadd.f32 %v1815_v25, %v1814_v6  ;;  %v6816_v23 = vadd.s32 16, %v6780_v16  ;;  %v6825_v24 = vadd.s32 24, %v6780_v16  ;;  %v6841_v25 = vld [vmem:[%s1878_s27] ss:$0 sm:$0xff]  ;;  %s7145_s27 = smov [#allocation16] }
 0x37c   : >> { %v6837_v6 = vadd.s32 32, %v6780_v16  ;;  %vm2027_vm2 = vcmp.eq.s32.totalorder %v6813_v22, %v6810_v15 }
 0x37d   : >> { %4679 = vst [vmem:[%s1797_s19 + $0x28] sm:$0xff] %v1813_v28  ;;  %4680 = vst [vmem:[%s1799_s20 + $0x28] sm:$0xff] %v1816_v7  ;;  %vm2041_vm15 = vcmp.eq.s32.totalorder %v6825_v24, %v6810_v15  ;;  %s7086_s19 = smov [#allocation17]  ;;  %s7092_s20 = smov [#allocation15] }
 0x380   : >> { %v4681_v30 = vld [vmem:[%s1821_s21 + $0x30] sm:$0xff] }
 0x381   : >> { %v4682_v31 = vld [vmem:[%s1823_s3 + $0x30] sm:$0xff]  ;;  %v1833_v32 = vmul.f32 %v4681_v30, %v6434_v17  ;;  %v1836_v34 = vmul.f32 %v4681_v30, %v6436_v14  ;;  %v6866_v30 = vadd.s32 48, %v6780_v16 }
 0x382   : >> { %v1834_v33 = vmul.f32 %v4682_v31, %v6436_v14  ;;  %v1837_v9 = vmul.f32 %v4682_v31, %v6434_v17  ;;  %v6869_v31 = vadd.s32 56, %v6780_v16 }
 0x384   : >> { %v4683_v35 = vld [vmem:[%s1825_s22 + $0x30] sm:$0xff]  ;;  %v1835_v41 = vsub.f32 %v1833_v32, %v1834_v33  ;;  %v1838_v43 = vadd.f32 %v1837_v9, %v1836_v34 }
 0x385   : >> { %v4684_v37 = vld [vmem:[%s1827_s0 + $0x30] sm:$0xff]  ;;  %v1839_v38 = vmul.f32 %v4683_v35, %v6434_v17  ;;  %v1842_v40 = vmul.f32 %v4683_v35, %v6436_v14 }
 0x386   : >> { %v1840_v39 = vmul.f32 %v4684_v37, %v6436_v14  ;;  %v1843_v29 = vmul.f32 %v4684_v37, %v6434_v17  ;;  %4685 = vst [vmem:[%s1821_s21 + $0x30] sm:$0xff] %v1835_v41  ;;  %4686 = vst [vmem:[%s1823_s3 + $0x30] sm:$0xff] %v1838_v43  ;;  %s7096_s21 = smov [#allocation17]  ;;  %s7106_s3 = smov [#allocation16] }
 0x388   : >> { %v1841_v44 = vsub.f32 %v1839_v38, %v1840_v39  ;;  %v1844_v45 = vadd.f32 %v1843_v29, %v1842_v40 }
 0x38a   : >> { %4687 = vst [vmem:[%s1825_s22 + $0x30] sm:$0xff] %v1841_v44  ;;  %4688 = vst [vmem:[%s1827_s0 + $0x30] sm:$0xff] %v1844_v45  ;;  %s7110_s22 = smov [#allocation18]  ;;  %s7116_s0 = smov [#allocation17] }
 0x38d   : >> { %v4689_v52 = vld [vmem:[%s6702_s23 + $0x38] sm:$0xff] }
 0x38e   : >> { %v4690_v53 = vld [vmem:[%s6704_s24 + $0x38] sm:$0xff]  ;;  %v1864_v47 = vmul.f32 %v4689_v52, %v6436_v14  ;;  %v1861_v57 = vmul.f32 %v4689_v52, %v6434_v17 }
 0x38f   : >> { %v1862_v51 = vmul.f32 %v4690_v53, %v6436_v14  ;;  %v1865_v56 = vmul.f32 %v4690_v53, %v6434_v17 }
 0x391   : >> { %v4691_v58 = vld [vmem:[%s6712_s25 + $0x38] sm:$0xff]  ;;  %v1866_v2 = vadd.f32 %v1865_v56, %v1864_v47  ;;  %v1863_v4 = vsub.f32 %v1861_v57, %v1862_v51  ;;  %v6914_v56 = vld [vmem:[%s6843_s30] ss:$0 sm:$0xff]  ;;  %s7165_s30 = smov [#allocation15] }
 0x392   : >> { %v4692_v54 = vld [vmem:[%s6714_s26 + $0x38] sm:$0xff]  ;;  %v1867_v55 = vmul.f32 %v4691_v58, %v6434_v17  ;;  %v1870_v62 = vmul.f32 %v4691_v58, %v6436_v14 }
 0x393   : >> { %v1868_v60 = vmul.f32 %v4692_v54, %v6436_v14  ;;  %v1871_v63 = vmul.f32 %v4692_v54, %v6434_v17  ;;  %4694 = vst [vmem:[%s6704_s24 + $0x38] sm:$0xff] %v1866_v2  ;;  %4693 = vst [vmem:[%s6702_s23 + $0x38] sm:$0xff] %v1863_v4  ;;  %s7122_s23 = smov [#allocation15]  ;;  %s7126_s24 = smov [#allocation18] }
 0x395   : >> { %v1869_v14 = vsub.f32 %v1867_v55, %v1868_v60  ;;  %v1872_v17 = vadd.f32 %v1871_v63, %v1870_v62 }
 0x397   : >> { %4695 = vst [vmem:[%s6712_s25 + $0x38] sm:$0xff] %v1869_v14  ;;  %4696 = vst [vmem:[%s6714_s26 + $0x38] sm:$0xff] %v1872_v17  ;;  %s7135_s25 = smov [#allocation17]  ;;  %s7141_s26 = smov [#allocation15] }
 0x39a   : >> { %v1955_v27 = vld [vmem:[%s6818_s28] sm:$0xff]  ;;  %v4711_v28 = vld [vmem:[%s6818_s28 + $0x8] sm:$0xff]  ;;  %v4713_v7 = vld [vmem:[%s6818_s28 + $0x10] sm:$0xff] }
 0x39b   : >> { %v1959_v32 = vsel %vm1958_vm11, 0.0, %v1955_v27  ;;  %v1966_v33 = vsel %vm1965_vm12, 0.0, %v4711_v28  ;;  %v1973_v34 = vsel %vm1972_vm13, 0.0, %v4713_v7  ;;  %v4715_v9 = vld [vmem:[%s6818_s28 + $0x18] sm:$0xff]  ;;  %v4717_v35 = vld [vmem:[%s6818_s28 + $0x20] sm:$0xff]  ;;  %v4719_v37 = vld [vmem:[%s6818_s28 + $0x28] sm:$0xff]  ;;  %vm2048_vm11 = vcmp.eq.s32.totalorder %v6837_v6, %v6810_v15 }
 0x39c   : >> { %1960 = vst [vmem:[%s6818_s28] sm:$0xff] %v1959_v32  ;;  %4712 = vst [vmem:[%s6818_s28 + $0x8] sm:$0xff] %v1966_v33  ;;  %v1980_v38 = vsel %vm1979_vm1, 0.0, %v4715_v9  ;;  %v1987_v39 = vsel %vm1986_vm0, 0.0, %v4717_v35  ;;  %v1994_v40 = vsel %vm1993_vm10, 0.0, %v4719_v37  ;;  %v4721_v29 = vld [vmem:[%s6818_s28 + $0x30] sm:$0xff]  ;;  %v4723_v41 = vld [vmem:[%s6818_s28 + $0x38] sm:$0xff]  ;;  %vm2055_vm0 = vcmp.eq.s32.totalorder %v6854_v26, %v6810_v15 }
 0x39d   : >> { %4714 = vst [vmem:[%s6818_s28 + $0x10] sm:$0xff] %v1973_v34  ;;  %v1886_v43 = vld [vmem:[%s6839_s29] sm:$0xff]  ;;  %4716 = vst [vmem:[%s6818_s28 + $0x18] sm:$0xff] %v1980_v38  ;;  %v2001_v44 = vsel %vm2000_vm14, 0.0, %v4721_v29  ;;  %v2008_v45 = vsel %vm2007_vm9, 0.0, %v4723_v41  ;;  %v4697_v53 = vld [vmem:[%s6839_s29 + $0x8] sm:$0xff]  ;;  %vm2062_vm1 = vcmp.eq.s32.totalorder %v6866_v30, %v6810_v15  ;;  %vm2132_vm9 = vcmp.eq.s32.totalorder %v6802_v19, %v6710_v15 }
 0x39e   : >> { %4718 = vst [vmem:[%s6818_s28 + $0x20] sm:$0xff] %v1987_v39  ;;  %4720 = vst [vmem:[%s6818_s28 + $0x28] sm:$0xff] %v1994_v40  ;;  %v1890_v52 = vsel %vm1889_vm3, %v6841_v25, %v1886_v43  ;;  %v4699_v51 = vld [vmem:[%s6839_s29 + $0x10] sm:$0xff]  ;;  %v4701_v47 = vld [vmem:[%s6839_s29 + $0x18] sm:$0xff]  ;;  %v1898_v57 = vsel %vm1897_vm4, %v6841_v25, %v4697_v53  ;;  %vm7937_vm3 = vcmp.eq.s32.totalorder %v6729_v50, %v6707_v15 }
 0x39f   : >> { %4722 = vst [vmem:[%s6818_s28 + $0x30] sm:$0xff] %v2001_v44  ;;  %4724 = vst [vmem:[%s6818_s28 + $0x38] sm:$0xff] %v2008_v45  ;;  %v1906_v58 = vsel %vm1905_vm5, %v6841_v25, %v4699_v51  ;;  %v1914_v54 = vsel %vm1913_vm6, %v6841_v25, %v4701_v47  ;;  %v4703_v55 = vld [vmem:[%s6839_s29 + $0x20] sm:$0xff]  ;;  %v4705_v60 = vld [vmem:[%s6839_s29 + $0x28] sm:$0xff]  ;;  %vm7938_vm4 = vcmp.eq.s32.totalorder %v6732_v42, %v6707_v15  ;;  %s7153_s28 = smov [#allocation18] }
 0x3a0   : >> { %1891 = vst [vmem:[%s6839_s29] sm:$0xff] %v1890_v52  ;;  %v4707_v62 = vld [vmem:[%s6839_s29 + $0x30] sm:$0xff]  ;;  %4698 = vst [vmem:[%s6839_s29 + $0x8] sm:$0xff] %v1898_v57  ;;  %v1922_v36 = vsel %vm1921_vm7, %v6841_v25, %v4703_v55  ;;  %v1930_v46 = vsel %vm7937_vm3, %v6841_v25, %v4705_v60  ;;  %v4709_v63 = vld [vmem:[%s6839_s29 + $0x38] sm:$0xff]  ;;  %vm2069_vm5 = vcmp.eq.s32.totalorder %v6869_v31, %v6810_v15  ;;  %vm7950_vm3 = vcmp.lt.s32.totalorder %v5759_v15, 64 }
 0x3a1   : >> { %4700 = vst [vmem:[%s6839_s29 + $0x10] sm:$0xff] %v1906_v58  ;;  %4702 = vst [vmem:[%s6839_s29 + $0x18] sm:$0xff] %v1914_v54  ;;  %v1938_v48 = vsel %vm7938_vm4, %v6841_v25, %v4707_v62  ;;  %v2017_v2 = vld [vmem:[%s6859_s1] sm:$0xff]  ;;  %v4725_v4 = vld [vmem:[%s6859_s1 + $0x8] sm:$0xff]  ;;  %vm2124_vm6 = vcmp.eq.s32.totalorder %v6799_v18, %v6710_v15  ;;  %vm7939_vm7 = vcmp.eq.s32.totalorder %v6753_v0, %v6707_v15 }
 0x3a2   : >> { %4704 = vst [vmem:[%s6839_s29 + $0x20] sm:$0xff] %v1922_v36  ;;  %4706 = vst [vmem:[%s6839_s29 + $0x28] sm:$0xff] %v1930_v46  ;;  %v1946_v49 = vsel %vm7939_vm7, %v6841_v25, %v4709_v63  ;;  %v2021_v50 = vsel %vm2020_vm8, 0.0, %v2017_v2  ;;  %v2028_v42 = vsel %vm2027_vm2, 0.0, %v4725_v4  ;;  %v4727_v14 = vld [vmem:[%s6859_s1 + $0x10] sm:$0xff]  ;;  %v4729_v17 = vld [vmem:[%s6859_s1 + $0x18] sm:$0xff]  ;;  %vm7940_vm8 = vcmp.eq.s32.totalorder %v6816_v23, %v6810_v15 }
 0x3a3   : >> { %4708 = vst [vmem:[%s6839_s29 + $0x30] sm:$0xff] %v1938_v48  ;;  %v4731_v1 = vld [vmem:[%s6859_s1 + $0x20] sm:$0xff]  ;;  %4710 = vst [vmem:[%s6839_s29 + $0x38] sm:$0xff] %v1946_v49  ;;  %v2035_v0 = vsel %vm7940_vm8, 0.0, %v4727_v14  ;;  %v2042_v12 = vsel %vm2041_vm15, 0.0, %v4729_v17  ;;  %v4733_v10 = vld [vmem:[%s6859_s1 + $0x28] sm:$0xff]  ;;  %vm2140_vm2 = vcmp.eq.s32.totalorder %v6807_v21, %v6710_v15  ;;  %vm7941_vm10 = vcmp.eq.s32.totalorder %v6735_v16, %v6710_v15 }
 0x3a4   : >> { %2022 = vst [vmem:[%s6859_s1] sm:$0xff] %v2021_v50  ;;  %4726 = vst [vmem:[%s6859_s1 + $0x8] sm:$0xff] %v2028_v42  ;;  %v2049_v61 = vsel %vm2048_vm11, 0.0, %v4731_v1  ;;  %v4735_v13 = vld [vmem:[%s6859_s1 + $0x30] sm:$0xff]  ;;  %v4737_v20 = vld [vmem:[%s6859_s1 + $0x38] sm:$0xff]  ;;  %v2056_v3 = vsel %vm2055_vm0, 0.0, %v4733_v10  ;;  %vm7942_vm12 = vcmp.eq.s32.totalorder %v6756_v59, %v6710_v15  ;;  %vm7943_vm13 = vcmp.eq.s32.totalorder %v6761_v5, %v6710_v15  ;;  %s7159_s29 = smov [#allocation17] }
 0x3a5   : >> { %4728 = vst [vmem:[%s6859_s1 + $0x10] sm:$0xff] %v2035_v0  ;;  %4730 = vst [vmem:[%s6859_s1 + $0x18] sm:$0xff] %v2042_v12  ;;  %v2063_v22 = vsel %vm2062_vm1, 0.0, %v4735_v13  ;;  %v2070_v23 = vsel %vm2069_vm5, 0.0, %v4737_v20  ;;  %v2081_v24 = vld [vmem:[%s6936_s12] sm:$0xff]  ;;  %v4739_v6 = vld [vmem:[%s6936_s12 + $0x8] sm:$0xff]  ;;  %vm7944_vm14 = vcmp.eq.s32.totalorder %v6764_v8, %v6710_v15  ;;  %vm7945_vm15 = vcmp.eq.s32.totalorder %v6773_v11, %v6710_v15 }
 0x3a6   : >> { %4732 = vst [vmem:[%s6859_s1 + $0x20] sm:$0xff] %v2049_v61  ;;  %v4741_v25 = vld [vmem:[%s6936_s12 + $0x10] sm:$0xff]  ;;  %4734 = vst [vmem:[%s6859_s1 + $0x28] sm:$0xff] %v2056_v3  ;;  %v4743_v26 = vld [vmem:[%s6936_s12 + $0x18] sm:$0xff]  ;;  %v2085_v7 = vsel %vm7941_vm10, %v6914_v56, %v2081_v24  ;;  %v2093_v30 = vsel %vm7942_vm12, %v6914_v56, %v4739_v6  ;;  %vm2154_vm11 = vcmp.eq.s32.totalorder %v5759_v15, 0  ;;  %vm2158_vm0 = vcmp.eq.s32.totalorder %v5759_v15, 1 }
 0x3a7   : >> { %4736 = vst [vmem:[%s6859_s1 + $0x30] sm:$0xff] %v2063_v22  ;;  %4738 = vst [vmem:[%s6859_s1 + $0x38] sm:$0xff] %v2070_v23  ;;  %v4745_v27 = vld [vmem:[%s6936_s12 + $0x20] sm:$0xff]  ;;  %v4747_v28 = vld [vmem:[%s6936_s12 + $0x28] sm:$0xff]  ;;  %v2101_v31 = vsel %vm7943_vm13, %v6914_v56, %v4741_v25  ;;  %v2109_v34 = vsel %vm7944_vm14, %v6914_v56, %v4743_v26  ;;  %s7169_s1 = smov [#allocation16]  ;;  %vm2171_vm1 = vcmp.eq.s32.totalorder %v5759_v15, 63 }
 0x3a8   : >> { %v4749_v32 = vld [vmem:[%s6936_s12 + $0x30] sm:$0xff]  ;;  %v4751_v33 = vld [vmem:[%s6936_s12 + $0x38] sm:$0xff]  ;;  %v2117_v59 = vsel %vm7945_vm15, %v6914_v56, %v4745_v27  ;;  %v2125_v5 = vsel %vm2124_vm6, %v6914_v56, %v4747_v28  ;;  %2086 = vst [vmem:[%s6936_s12] sm:$0xff] %v2085_v7  ;;  %4740 = vst [vmem:[%s6936_s12 + $0x8] sm:$0xff] %v2093_v30 }
 0x3a9   : >> { %4742 = vst [vmem:[%s6936_s12 + $0x10] sm:$0xff] %v2101_v31  ;;  %v2145_v9 = vld [vmem:[%s6960_s13] sm:$0xff]  ;;  %v2133_v8 = vsel %vm2132_vm9, %v6914_v56, %v4749_v32  ;;  %v2141_v11 = vsel %vm2140_vm2, %v6914_v56, %v4751_v33  ;;  %4744 = vst [vmem:[%s6936_s12 + $0x18] sm:$0xff] %v2109_v34  ;;  %v4757_v21 = vld [vmem:[%s7076_s17 + $0x10] sm:$0xff] }
 0x3aa   : >> { %4746 = vst [vmem:[%s6936_s12 + $0x20] sm:$0xff] %v2117_v59  ;;  %4748 = vst [vmem:[%s6936_s12 + $0x28] sm:$0xff] %v2125_v5  ;;  %2146 = vrot.lane.b32.xlu0 %v2145_v9, %s5657_s15  ;;  %v7067_v18 = vld [vmem:[%s7048_s14] sm:$0xff] }
 0x3ab   : >> { %4750 = vst [vmem:[%s6936_s12 + $0x30] sm:$0xff] %v2133_v8  ;;  %4752 = vst [vmem:[%s6936_s12 + $0x38] sm:$0xff] %v2141_v11  ;;  %2150 = vrot.lane.b32.xlu1 %v7067_v18, %s5657_s15  ;;  %v7072_v19 = vld [vmem:[%s7062_s16 + $0x8] sm:$0xff]  ;;  %s7177_s12 = smov [#allocation18] }
 0x3ac   : >> { %v4753_v35 = vld [vmem:[%s7080_s18 + $0x8] sm:$0xff]  ;;  %v7099_v38 = vld [vmem:[%s7092_s20 + $0x10] sm:$0xff]  ;;  %v4761_v40 = vld [vmem:[%s7106_s3 + $0x18] sm:$0xff] }
 0x3ad   : >> { %v7129_v43 = vld [vmem:[%s7122_s23 + $0x18] sm:$0xff]  ;;  %v7148_v52 = vld [vmem:[%s7141_s26 + $0x20] sm:$0xff]  ;;  %v7172_v56 = vld [vmem:[%s7165_s30 + $0x28] sm:$0xff] }
 0x3ae   : >> { %2182 = vrot.lane.b32.xlu0 %v7072_v19, %s5657_s15  ;;  %v7090_v37 = vld [vmem:[%s7086_s19] sm:$0xff]  ;;  %v7104_v39 = vld [vmem:[%s7096_s21 + $0x8] sm:$0xff]  ;;  %v7120_v41 = vld [vmem:[%s7116_s0 + $0x10] sm:$0xff] }
 0x3af   : >> { %2167 = vrot.lane.b32.xlu1 %v2145_v9, %s7924_s2  ;;  %v7139_v45 = vld [vmem:[%s7135_s25 + $0x18] sm:$0xff]  ;;  %v4765_v53 = vld [vmem:[%s7145_s27 + $0x20] sm:$0xff]  ;;  %v4769_v57 = vld [vmem:[%s7169_s1 + $0x28] sm:$0xff] }
 0x3b0   : >> { %v7163_v47 = vld [vmem:[%s7159_s29 + $0x20] sm:$0xff]  ;;  %v7187_v54 = vld [vmem:[%s7183_s5 + $0x28] sm:$0xff]  ;;  %v7196_v55 = vld [vmem:[%s7189_s4 + $0x30] sm:$0xff] }
 0x3b1   : >> { %v4773_v60 = vld [vmem:[%s7193_s9 + $0x30] sm:$0xff]  ;;  %v7220_v46 = vld [vmem:[%s7213_s7 + $0x38] sm:$0xff]  ;;  %s7949_s9 = smov 127   ;;  %vm7951_vm4 = vmmov %vm7950_vm3 }
 0x3b2   : >> { %2210 = vrot.lane.b32.xlu0 %v4757_v21, %s5657_s15  ;;  %v2436_v29 = vld [vmem:[%s7110_s22] sm:$0xff]  ;;  %v4798_v44 = vld [vmem:[%s7126_s24 + $0x8] sm:$0xff]  ;;  %v4799_v51 = vld [vmem:[%s7153_s28 + $0x10] sm:$0xff] }
 0x3b3   : >> { %2178 = vrot.lane.b32.xlu1 %v4753_v35, %s5657_s15  ;;  %v4803_v58 = vld [vmem:[%s7177_s12 + $0x18] sm:$0xff]  ;;  %v4807_v62 = vld [vmem:[%s7201_s8 + $0x20] sm:$0xff]  ;;  %v7211_v36 = vld [vmem:[%s7207_s6 + $0x30] sm:$0xff]  ;;  %s7236_s6 = smov [#allocation18] }
 0x3b4   : >> { %v4777_v48 = vld [vmem:[%s7217_s10 + $0x38] sm:$0xff]  ;;  %v4811_v63 = vld [vmem:[%s7225_s11 + $0x28] sm:$0xff]  ;;  %s7240_s10 = smov [#allocation17]  ;;  %vm7952_vm5 = vmmov %vm7950_vm3 }
 0x3b5   : >> { %v4819_v4 = vld [vmem:[%s7236_s6 + $0x38] sm:$0xff]  ;;  %vm7953_vm6 = vmmov %vm7950_vm3 }
 0x3b6   : >> { %2231 = vrot.lane.b32.xlu0 %v4757_v21, %s7924_s2  ;;  %v7244_v49 = vld [vmem:[%s7240_s10 + $0x38] sm:$0xff]  ;;  %vm7954_vm7 = vmmov %vm7950_vm3 }
 0x3b7   : >> { %2199 = vrot.lane.b32.xlu1 %v4753_v35, %s7924_s2  ;;  %vm7955_vm9 = vmmov %vm7950_vm3 }
 0x3b8   : >> { %vm7956_vm8 = vmmov %vm7950_vm3 }
 0x3b9   : >> { %vm7957_vm2 = vmmov %vm7950_vm3 }
 0x3ba   : >> { %2420 = vrot.lane.b32.xlu0 %v7090_v37, %s5657_s15  ;;  %vm7958_vm10 = vmmov %vm7957_vm2 }
 0x3bb   : >> { %2214 = vrot.lane.b32.xlu1 %v7099_v38, %s5657_s15  ;;  %vm7959_vm12 = vmmov %vm7957_vm2 }
 0x3bc   : >> { %vm7960_vm13 = vmmov %vm7957_vm2 }
 0x3bd   : >> { %vm7961_vm14 = vmmov %vm7957_vm2 }
 0x3be   : >> { %2452 = vrot.lane.b32.xlu0 %v7104_v39, %s5657_s15  ;;  %vm7963_vm15 = vmmov %vm7957_vm2 }
 0x3bf   : >> { %2242 = vrot.lane.b32.xlu1 %v4761_v40, %s5657_s15 }
 0x3c2   : >> { %2437 = vrot.lane.b32.xlu0 %v2436_v29, %s7924_s2 }
 0x3c3   : >> { %2416 = vrot.lane.b32.xlu1 %v2436_v29, %s5657_s15 }
 0x3c6   : >> { %2484 = vrot.lane.b32.xlu0 %v7120_v41, %s5657_s15 }
 0x3c7   : >> { %2246 = vrot.lane.b32.xlu1 %v7129_v43, %s5657_s15 }
 0x3ca   : >> { %2469 = vrot.lane.b32.xlu0 %v4798_v44, %s7924_s2 }
 0x3cb   : >> { %2448 = vrot.lane.b32.xlu1 %v4798_v44, %s5657_s15 }
 0x3ce   : >> { %2516 = vrot.lane.b32.xlu0 %v7139_v45, %s5657_s15 }
 0x3cf   : >> { %2278 = vrot.lane.b32.xlu1 %v7148_v52, %s5657_s15 }
 0x3d2   : >> { %2274 = vrot.lane.b32.xlu0 %v4765_v53, %s5657_s15 }
 0x3d3   : >> { %2480 = vrot.lane.b32.xlu1 %v4799_v51, %s5657_s15 }
 0x3d6   : >> { %2501 = vrot.lane.b32.xlu0 %v4799_v51, %s7924_s2 }
 0x3d7   : >> { %2263 = vrot.lane.b32.xlu1 %v4761_v40, %s7924_s2 }
 0x3da   : >> { %2548 = vrot.lane.b32.xlu0 %v7163_v47, %s5657_s15 }
 0x3db   : >> { %2310 = vrot.lane.b32.xlu1 %v7172_v56, %s5657_s15 }
 0x3de   : >> { %2306 = vrot.lane.b32.xlu0 %v4769_v57, %s5657_s15 }
 0x3df   : >> { %2512 = vrot.lane.b32.xlu1 %v4803_v58, %s5657_s15 }
 0x3e2   : >> { %2533 = vrot.lane.b32.xlu0 %v4803_v58, %s7924_s2 }
 0x3e3   : >> { %2295 = vrot.lane.b32.xlu1 %v4765_v53, %s7924_s2 }
 0x3e6   : >> { %2580 = vrot.lane.b32.xlu0 %v7187_v54, %s5657_s15 }
 0x3e7   : >> { %2342 = vrot.lane.b32.xlu1 %v7196_v55, %s5657_s15 }
 0x3ea   : >> { %2338 = vrot.lane.b32.xlu0 %v4773_v60, %s5657_s15 }
 0x3eb   : >> { %2544 = vrot.lane.b32.xlu1 %v4807_v62, %s5657_s15 }
 0x3ee   : >> { %2565 = vrot.lane.b32.xlu0 %v4807_v62, %s7924_s2 }
 0x3ef   : >> { %2327 = vrot.lane.b32.xlu1 %v4769_v57, %s7924_s2  ;;  %s7228_s2 = smov [#allocation18] }
 0x3f0   : >> { %v4815_v2 = vld [vmem:[%s7228_s2 + $0x30] sm:$0xff] }
 0x3f2   : >> { %2612 = vrot.lane.b32.xlu0 %v7211_v36, %s5657_s15 }
 0x3f3   : >> { %2374 = vrot.lane.b32.xlu1 %v7220_v46, %s5657_s15 }
 0x3f6   : >> { %2370 = vrot.lane.b32.xlu0 %v4777_v48, %s5657_s15 }
 0x3f7   : >> { %2576 = vrot.lane.b32.xlu1 %v4811_v63, %s5657_s15 }
 0x3fa   : >> { %2608 = vrot.lane.b32.xlu0 %v4815_v2, %s5657_s15 }
 0x3fb   : >> { %2359 = vrot.lane.b32.xlu1 %v4773_v60, %s7949_s9 }
 0x3fe   : >> { %2391 = vrot.lane.b32.xlu0 %v4777_v48, %s7949_s9 }
 0x3ff   : >> { %2597 = vrot.lane.b32.xlu1 %v4811_v63, %s7949_s9 }
 0x402   : >> { %2640 = vrot.lane.b32.xlu0 %v4819_v4, %s5657_s15 }
 0x403   : >> { %2644 = vrot.lane.b32.xlu1 %v7244_v49, %s5657_s15 }
 0x407   : >> { %2629 = vrot.lane.b32.xlu1 %v4815_v2, %s7949_s9 }
 0x40b   : >> { %2661 = vrot.lane.b32.xlu1 %v4819_v4, %s7949_s9  ;;  %s7966_s9 = sld [smem:[#allocation35_spill]] }
 0x41c   : >> { %v2147_v50 = vpop.permute.xlu0 %2146 }
 0x41d   : >> { %v2151_v42 = vpop.permute.xlu1 %2150 }
 0x41e   : >> { %v2155_v14 = vsel %vm2154_vm11, %v7067_v18, %v2151_v42 }
 0x41f   : >> { %v2159_v1 = vsel %vm2158_vm0, %v2147_v50, %v2155_v14 }
 0x420   : >> { %v2183_v17 = vpop.permute.xlu0 %2182  ;;  %v2165_v0 = vsel %vm7950_vm3, %v2159_v1, 0.0  ;;  %vm7965_vm3 = vmmov %vm7957_vm2 }
 0x421   : >> { %v2168_v12 = vpop.permute.xlu1 %2167  ;;  %2397 = vst [vmem:[%s7048_s14] sm:$0xff] %v2165_v0  ;;  %v2187_v13 = vsel %vm2154_vm11, %v7072_v19, %v2183_v17 }
 0x422   : >> { %v2172_v61 = vsel %vm2171_vm1, %v7067_v18, %v2168_v12 }
 0x423   : >> { %2398 = vst [vmem:[%s6960_s13] sm:$0xff] %v2172_v61 }
 0x424   : >> { %v2211_v10 = vpop.permute.xlu0 %2210 }
 0x425   : >> { %v2179_v20 = vpop.permute.xlu1 %2178 }
 0x426   : >> { %v2191_v3 = vsel %vm2158_vm0, %v2179_v20, %v2187_v13 }
 0x427   : >> { %v2197_v23 = vsel %vm7951_vm4, %v2191_v3, 0.0  ;;  %vm7967_vm4 = vmmov %vm7957_vm2 }
 0x428   : >> { %v2232_v22 = vpop.permute.xlu0 %2231  ;;  %4781 = vst [vmem:[%s7062_s16 + $0x8] sm:$0xff] %v2197_v23 }
 0x429   : >> { %v2236_v24 = vsel %vm2171_vm1, %v7099_v38, %v2232_v22  ;;  %v2200_v6 = vpop.permute.xlu1 %2199 }
 0x42a   : >> { %v2204_v25 = vsel %vm2171_vm1, %v7072_v19, %v2200_v6 }
 0x42b   : >> { %4782 = vst [vmem:[%s7080_s18 + $0x8] sm:$0xff] %v2204_v25 }
 0x42c   : >> { %v2421_v26 = vpop.permute.xlu0 %2420  ;;  %4784 = vst [vmem:[%s7076_s17 + $0x10] sm:$0xff] %v2236_v24 }
 0x42d   : >> { %v2215_v27 = vpop.permute.xlu1 %2214  ;;  %v2425_v59 = vsel %vm2154_vm11, %v7090_v37, %v2421_v26 }
 0x42e   : >> { %v2219_v28 = vsel %vm2154_vm11, %v7099_v38, %v2215_v27 }
 0x42f   : >> { %v2223_v30 = vsel %vm2158_vm0, %v2211_v10, %v2219_v28 }
 0x430   : >> { %v2453_v7 = vpop.permute.xlu0 %2452  ;;  %v2229_v31 = vsel %vm7952_vm5, %v2223_v30, 0.0  ;;  %vm7968_vm5 = vcmp.eq.s32.totalorder %v5761_v16, 0 }
 0x431   : >> { %v2243_v32 = vpop.permute.xlu1 %2242  ;;  %4783 = vst [vmem:[%s7092_s20 + $0x10] sm:$0xff] %v2229_v31  ;;  %v2457_v40 = vsel %vm2154_vm11, %v7104_v39, %v2453_v7 }
 0x434   : >> { %v2438_v33 = vpop.permute.xlu0 %2437 }
 0x435   : >> { %v2442_v34 = vsel %vm2171_vm1, %v7090_v37, %v2438_v33  ;;  %v2417_v5 = vpop.permute.xlu1 %2416 }
 0x436   : >> { %2668 = vst [vmem:[%s7110_s22] sm:$0xff] %v2442_v34  ;;  %v2429_v9 = vsel %vm2158_vm0, %v2417_v5, %v2425_v59 }
 0x437   : >> { %v2435_v11 = vsel %vm7953_vm6, %v2429_v9, 0.0  ;;  %vm7969_vm6 = vmmov %vm7968_vm5 }
 0x438   : >> { %v2485_v8 = vpop.permute.xlu0 %2484  ;;  %2667 = vst [vmem:[%s7086_s19] sm:$0xff] %v2435_v11 }
 0x439   : >> { %v2247_v18 = vpop.permute.xlu1 %2246  ;;  %v2489_v48 = vsel %vm2154_vm11, %v7120_v41, %v2485_v8 }
 0x43a   : >> { %v2251_v19 = vsel %vm2154_vm11, %v7129_v43, %v2247_v18 }
 0x43b   : >> { %v2255_v35 = vsel %vm2158_vm0, %v2243_v32, %v2251_v19 }
 0x43c   : >> { %v2470_v21 = vpop.permute.xlu0 %2469  ;;  %v2261_v38 = vsel %vm7954_vm7, %v2255_v35, 0.0  ;;  %vm7970_vm7 = vmmov %vm7968_vm5 }
 0x43d   : >> { %v2474_v37 = vsel %vm2171_vm1, %v7104_v39, %v2470_v21  ;;  %v2449_v29 = vpop.permute.xlu1 %2448  ;;  %4785 = vst [vmem:[%s7122_s23 + $0x18] sm:$0xff] %v2261_v38 }
 0x43e   : >> { %4824 = vst [vmem:[%s7126_s24 + $0x8] sm:$0xff] %v2474_v37  ;;  %v2461_v44 = vsel %vm2158_vm0, %v2449_v29, %v2457_v40 }
 0x43f   : >> { %v2467_v51 = vsel %vm7955_vm9, %v2461_v44, 0.0  ;;  %vm7971_vm9 = vmmov %vm7968_vm5 }
 0x440   : >> { %v2517_v53 = vpop.permute.xlu0 %2516  ;;  %4823 = vst [vmem:[%s7096_s21 + $0x8] sm:$0xff] %v2467_v51 }
 0x441   : >> { %v2279_v57 = vpop.permute.xlu1 %2278 }
 0x442   : >> { %v2283_v58 = vsel %vm2154_vm11, %v7148_v52, %v2279_v57 }
 0x444   : >> { %v2275_v60 = vpop.permute.xlu0 %2274 }
 0x445   : >> { %v2287_v39 = vsel %vm2158_vm0, %v2275_v60, %v2283_v58  ;;  %v2481_v63 = vpop.permute.xlu1 %2480 }
 0x446   : >> { %v2293_v62 = vsel %vm7956_vm8, %v2287_v39, 0.0  ;;  %v2493_v2 = vsel %vm2158_vm0, %v2481_v63, %v2489_v48  ;;  %vm7972_vm8 = vmmov %vm7968_vm5 }
 0x447   : >> { %4787 = vst [vmem:[%s7141_s26 + $0x20] sm:$0xff] %v2293_v62  ;;  %v2499_v50 = vsel %vm7957_vm2, %v2493_v2, 0.0  ;;  %vm7973_vm2 = vmmov %vm7968_vm5 }
 0x448   : >> { %v2502_v4 = vpop.permute.xlu0 %2501  ;;  %4825 = vst [vmem:[%s7116_s0 + $0x10] sm:$0xff] %v2499_v50 }
 0x449   : >> { %v2506_v42 = vsel %vm2171_vm1, %v7120_v41, %v2502_v4  ;;  %v2264_v14 = vpop.permute.xlu1 %2263 }
 0x44a   : >> { %4826 = vst [vmem:[%s7153_s28 + $0x10] sm:$0xff] %v2506_v42  ;;  %v2268_v17 = vsel %vm2171_vm1, %v7129_v43, %v2264_v14  ;;  %v2521_v43 = vsel %vm2154_vm11, %v7139_v45, %v2517_v53 }
 0x44b   : >> { %4786 = vst [vmem:[%s7106_s3 + $0x18] sm:$0xff] %v2268_v17 }
 0x44c   : >> { %v2549_v1 = vpop.permute.xlu0 %2548 }
 0x44d   : >> { %v2311_v0 = vpop.permute.xlu1 %2310 }
 0x44e   : >> { %v2315_v12 = vsel %vm2154_vm11, %v7172_v56, %v2311_v0 }
 0x450   : >> { %v2307_v61 = vpop.permute.xlu0 %2306 }
 0x451   : >> { %v2319_v41 = vsel %vm2158_vm0, %v2307_v61, %v2315_v12  ;;  %v2513_v13 = vpop.permute.xlu1 %2512 }
 0x452   : >> { %v2325_v10 = vsel %vm7958_vm10, %v2319_v41, 0.0  ;;  %v2525_v20 = vsel %vm2158_vm0, %v2513_v13, %v2521_v43  ;;  %vm7974_vm10 = vmmov %vm7973_vm2 }
 0x453   : >> { %4789 = vst [vmem:[%s7165_s30 + $0x28] sm:$0xff] %v2325_v10  ;;  %v2531_v22 = vsel %vm7959_vm12, %v2525_v20, 0.0  ;;  %vm7975_vm12 = vmmov %vm7973_vm2 }
 0x454   : >> { %v2534_v3 = vpop.permute.xlu0 %2533  ;;  %4827 = vst [vmem:[%s7135_s25 + $0x18] sm:$0xff] %v2531_v22 }
 0x455   : >> { %v2538_v23 = vsel %vm2171_vm1, %v7139_v45, %v2534_v3  ;;  %v2296_v24 = vpop.permute.xlu1 %2295 }
 0x456   : >> { %4828 = vst [vmem:[%s7177_s12 + $0x18] sm:$0xff] %v2538_v23  ;;  %v2300_v6 = vsel %vm2171_vm1, %v7148_v52, %v2296_v24  ;;  %v2553_v52 = vsel %vm2154_vm11, %v7163_v47, %v2549_v1 }
 0x457   : >> { %4788 = vst [vmem:[%s7145_s27 + $0x20] sm:$0xff] %v2300_v6 }
 0x458   : >> { %v2581_v25 = vpop.permute.xlu0 %2580 }
 0x459   : >> { %v2343_v26 = vpop.permute.xlu1 %2342 }
 0x45a   : >> { %v2347_v27 = vsel %vm2154_vm11, %v7196_v55, %v2343_v26 }
 0x45c   : >> { %v2339_v28 = vpop.permute.xlu0 %2338 }
 0x45d   : >> { %v2351_v45 = vsel %vm2158_vm0, %v2339_v28, %v2347_v27  ;;  %v2545_v30 = vpop.permute.xlu1 %2544 }
 0x45e   : >> { %v2357_v7 = vsel %vm7960_vm13, %v2351_v45, 0.0  ;;  %v2557_v31 = vsel %vm2158_vm0, %v2545_v30, %v2553_v52  ;;  %vm7976_vm13 = vmmov %vm7973_vm2 }
 0x45f   : >> { %4791 = vst [vmem:[%s7189_s4 + $0x30] sm:$0xff] %v2357_v7  ;;  %v2563_v33 = vsel %vm7961_vm14, %v2557_v31, 0.0  ;;  %s7962_s4 = sld [smem:[#allocation34_spill]]  ;;  %vm7977_vm14 = vmmov %vm7973_vm2 }
 0x460   : >> { %v2566_v32 = vpop.permute.xlu0 %2565  ;;  %4829 = vst [vmem:[%s7159_s29 + $0x20] sm:$0xff] %v2563_v33 }
 0x461   : >> { %v2570_v34 = vsel %vm2171_vm1, %v7163_v47, %v2566_v32  ;;  %v2328_v59 = vpop.permute.xlu1 %2327 }
 0x462   : >> { %4830 = vst [vmem:[%s7201_s8 + $0x20] sm:$0xff] %v2570_v34  ;;  %v2332_v5 = vsel %vm2171_vm1, %v7172_v56, %v2328_v59  ;;  %s7964_s8 = sld [smem:[#allocation33_spill]]  ;;  %v2585_v56 = vsel %vm2154_vm11, %v7187_v54, %v2581_v25 }
 0x463   : >> { %4790 = vst [vmem:[%s7169_s1 + $0x28] sm:$0xff] %v2332_v5 }
 0x464   : >> { %v2613_v9 = vpop.permute.xlu0 %2612 }
 0x465   : >> { %v2375_v8 = vpop.permute.xlu1 %2374  ;;  %v2617_v35 = vsel %vm2154_vm11, %v7211_v36, %v2613_v9 }
 0x466   : >> { %v2379_v11 = vsel %vm2154_vm11, %v7220_v46, %v2375_v8 }
 0x468   : >> { %v2371_v18 = vpop.permute.xlu0 %2370 }
 0x469   : >> { %v2383_v47 = vsel %vm2158_vm0, %v2371_v18, %v2379_v11  ;;  %v2577_v21 = vpop.permute.xlu1 %2576 }
 0x46a   : >> { %v2389_v19 = vsel %vm7963_vm15, %v2383_v47, 0.0  ;;  %v2589_v37 = vsel %vm2158_vm0, %v2577_v21, %v2585_v56  ;;  %vm7979_vm15 = vmmov %vm7973_vm2 }
 0x46b   : >> { %4793 = vst [vmem:[%s7213_s7 + $0x38] sm:$0xff] %v2389_v19  ;;  %v2595_v40 = vsel %vm7965_vm3, %v2589_v37, 0.0  ;;  %s7416_s7 = smov [#allocation15] }
 0x46c   : >> { %v2609_v38 = vpop.permute.xlu0 %2608  ;;  %4831 = vst [vmem:[%s7183_s5 + $0x28] sm:$0xff] %v2595_v40  ;;  %s7423_s5 = smov [#allocation16] }
 0x46d   : >> { %v2621_v29 = vsel %vm2158_vm0, %v2609_v38, %v2617_v35  ;;  %v2360_v53 = vpop.permute.xlu1 %2359 }
 0x46e   : >> { %v2627_v44 = vsel %vm7967_vm4, %v2621_v29, 0.0  ;;  %v2364_v51 = vsel %vm2171_vm1, %v7196_v55, %v2360_v53 }
 0x46f   : >> { %4833 = vst [vmem:[%s7962_s4 + $0x30] sm:$0xff] %v2627_v44  ;;  %4792 = vst [vmem:[%s7964_s8 + $0x30] sm:$0xff] %v2364_v51 }
 0x470   : >> { %v2392_v57 = vpop.permute.xlu0 %2391 }
 0x471   : >> { %v2396_v58 = vsel %vm2171_vm1, %v7220_v46, %v2392_v57  ;;  %v2598_v4 = vpop.permute.xlu1 %2597 }
 0x472   : >> { %v2685_v60 = vld [vmem:[%s7416_s7] ss:$0 sm:$0xff]  ;;  %v4838_v62 = vld [vmem:[%s7416_s7 + $0x7] ss:$0 sm:$0xff]  ;;  %4794 = vst [vmem:[%s7966_s9 + $0x38] sm:$0xff] %v2396_v58  ;;  %v2602_v1 = vsel %vm2171_vm1, %v7187_v54, %v2598_v4 }
 0x473   : >> { %v4837_v39 = vld [vmem:[%s7416_s7 - $0x1] sm:$0xfe]  ;;  %v4839_v48 = vld [vmem:[%s7416_s7 + $0x7] sm:$0xfe]  ;;  %v4840_v63 = vld [vmem:[%s7416_s7 + $0xf] ss:$0 sm:$0xff] }
 0x474   : >> { %v2692_v55 = vsel %vm7968_vm5, %v2685_v60, %v4837_v39  ;;  %v4842_v2 = vld [vmem:[%s7416_s7 + $0xf] sm:$0xfe]  ;;  %v2703_v46 = vsel %vm7969_vm6, %v4838_v62, %v4839_v48  ;;  %v4843_v42 = vld [vmem:[%s7416_s7 + $0x17] ss:$0 sm:$0xff]  ;;  %v4845_v14 = vld [vmem:[%s7416_s7 + $0x17] sm:$0xfe]  ;;  %v2641_v25 = vpop.permute.xlu0 %2640 }
 0x475   : >> { %v2714_v50 = vsel %vm7970_vm7, %v4840_v63, %v4842_v2  ;;  %v4846_v17 = vld [vmem:[%s7416_s7 + $0x1f] ss:$0 sm:$0xff]  ;;  %2695 = vst [vmem:[%s7416_s7] sm:$0xff] %v2692_v55  ;;  %v2725_v0 = vsel %vm7971_vm9, %v4843_v42, %v4845_v14  ;;  %v4848_v12 = vld [vmem:[%s7416_s7 + $0x1f] sm:$0xfe]  ;;  %v4849_v61 = vld [vmem:[%s7416_s7 + $0x27] ss:$0 sm:$0xff]  ;;  %v2645_v24 = vpop.permute.xlu1 %2644 }
 0x476   : >> { %v4851_v41 = vld [vmem:[%s7416_s7 + $0x27] sm:$0xfe]  ;;  %4841 = vst [vmem:[%s7416_s7 + $0x8] sm:$0xff] %v2703_v46  ;;  %4844 = vst [vmem:[%s7416_s7 + $0x10] sm:$0xff] %v2714_v50  ;;  %v2736_v10 = vsel %vm7972_vm8, %v4846_v17, %v4848_v12  ;;  %v4852_v43 = vld [vmem:[%s7416_s7 + $0x2f] ss:$0 sm:$0xff]  ;;  %v2649_v26 = vsel %vm2154_vm11, %v7244_v49, %v2645_v24 }
 0x477   : >> { %4832 = vst [vmem:[%s7225_s11 + $0x28] sm:$0xff] %v2602_v1  ;;  %v2747_v54 = vsel %vm7973_vm2, %v4849_v61, %v4851_v41  ;;  %v4854_v13 = vld [vmem:[%s7416_s7 + $0x2f] sm:$0xfe]  ;;  %v4855_v20 = vld [vmem:[%s7416_s7 + $0x37] ss:$0 sm:$0xff]  ;;  %4847 = vst [vmem:[%s7416_s7 + $0x18] sm:$0xff] %v2725_v0  ;;  %v2653_v9 = vsel %vm2158_vm0, %v2641_v25, %v2649_v26 }
 0x478   : >> { %v2758_v3 = vsel %vm7974_vm10, %v4852_v43, %v4854_v13  ;;  %v4857_v22 = vld [vmem:[%s7416_s7 + $0x37] sm:$0xfe]  ;;  %4850 = vst [vmem:[%s7416_s7 + $0x20] sm:$0xff] %v2736_v10  ;;  %4853 = vst [vmem:[%s7416_s7 + $0x28] sm:$0xff] %v2747_v54  ;;  %v4858_v23 = vld [vmem:[%s7416_s7 + $0x3f] ss:$0 sm:$0xff] }
 0x479   : >> { %v2769_v6 = vsel %vm7975_vm12, %v4855_v20, %v4857_v22  ;;  %4856 = vst [vmem:[%s7416_s7 + $0x30] sm:$0xff] %v2758_v3  ;;  %v2849_v27 = vld [vmem:[%s7423_s5] ss:$0 sm:$0xff]  ;;  %v4884_v45 = vld [vmem:[%s7423_s5 + $0x7] ss:$0 sm:$0xff]  ;;  %vm7978_vm11 = vmmov %vm7973_vm2  ;;  %v2630_v8 = vpop.permute.xlu1 %2629  ;;  %vm7983_vm5 = vcmp.lt.s32.totalorder %v5759_v15, 64 }
 0x47a   : >> { %4859 = vst [vmem:[%s7416_s7 + $0x38] sm:$0xff] %v2769_v6  ;;  %v4883_v28 = vld [vmem:[%s7423_s5 - $0x1] sm:$0xfe]  ;;  %v4885_v52 = vld [vmem:[%s7423_s5 + $0x7] sm:$0xfe]  ;;  %v2634_v56 = vsel %vm2171_vm1, %v7211_v36, %v2630_v8  ;;  %vm7980_vm0 = vmmov %vm7973_vm2  ;;  %v2659_v53 = vsel %vm7983_vm5, %v2653_v9, 0.0 }
 0x47b   : >> { %v2856_v7 = vsel %vm7976_vm13, %v2849_v27, %v4883_v28  ;;  %v4886_v30 = vld [vmem:[%s7423_s5 + $0xf] ss:$0 sm:$0xff]  ;;  %v4888_v31 = vld [vmem:[%s7423_s5 + $0xf] sm:$0xfe]  ;;  %v2867_v32 = vsel %vm7977_vm14, %v4884_v45, %v4885_v52  ;;  %v4889_v34 = vld [vmem:[%s7423_s5 + $0x17] ss:$0 sm:$0xff] }
 0x47c   : >> { %2859 = vst [vmem:[%s7423_s5] sm:$0xff] %v2856_v7  ;;  %v2878_v33 = vsel %vm7978_vm11, %v4886_v30, %v4888_v31  ;;  %v4891_v59 = vld [vmem:[%s7423_s5 + $0x17] sm:$0xfe]  ;;  %v4892_v5 = vld [vmem:[%s7423_s5 + $0x1f] ss:$0 sm:$0xff]  ;;  %4887 = vst [vmem:[%s7423_s5 + $0x8] sm:$0xff] %v2867_v32  ;;  %s7531_s11 = smov [#allocation17] }
 0x47d   : >> { %4890 = vst [vmem:[%s7423_s5 + $0x10] sm:$0xff] %v2878_v33  ;;  %v2889_v11 = vsel %vm7979_vm15, %v4889_v34, %v4891_v59  ;;  %v4894_v18 = vld [vmem:[%s7423_s5 + $0x1f] sm:$0xfe]  ;;  %v4895_v47 = vld [vmem:[%s7423_s5 + $0x27] ss:$0 sm:$0xff]  ;;  %vm7981_vm3 = vmmov %vm7980_vm0  ;;  %v2662_v57 = vpop.permute.xlu1 %2661 }
 0x47e   : >> { %v4897_v19 = vld [vmem:[%s7423_s5 + $0x27] sm:$0xfe]  ;;  %4893 = vst [vmem:[%s7423_s5 + $0x18] sm:$0xff] %v2889_v11  ;;  %v2900_v21 = vsel %vm7980_vm0, %v4892_v5, %v4894_v18  ;;  %v4898_v37 = vld [vmem:[%s7423_s5 + $0x2f] ss:$0 sm:$0xff]  ;;  %4834 = vst [vmem:[%s7228_s2 + $0x30] sm:$0xff] %v2634_v56  ;;  %v2666_v58 = vsel %vm2171_vm1, %v7244_v49, %v2662_v57 }
 0x47f   : >> { %v2911_v35 = vsel %vm7981_vm3, %v4895_v47, %v4897_v19  ;;  %v4900_v38 = vld [vmem:[%s7423_s5 + $0x2f] sm:$0xfe]  ;;  %v4901_v40 = vld [vmem:[%s7423_s5 + $0x37] ss:$0 sm:$0xff]  ;;  %4896 = vst [vmem:[%s7423_s5 + $0x20] sm:$0xff] %v2900_v21  ;;  %vm7982_vm4 = vmmov %vm7980_vm0  ;;  %vm7985_vm1 = vcmp.eq.s32.totalorder %v5761_v16, 7 }
 0x480   : >> { %4899 = vst [vmem:[%s7423_s5 + $0x28] sm:$0xff] %v2911_v35  ;;  %v2922_v29 = vsel %vm7982_vm4, %v4898_v37, %v4900_v38  ;;  %v4903_v36 = vld [vmem:[%s7423_s5 + $0x37] sm:$0xfe]  ;;  %v4904_v44 = vld [vmem:[%s7423_s5 + $0x3f] ss:$0 sm:$0xff]  ;;  %vm7984_vm6 = vmmov %vm7980_vm0 }
 0x481   : >> { %4902 = vst [vmem:[%s7423_s5 + $0x30] sm:$0xff] %v2922_v29  ;;  %v2933_v51 = vsel %vm7984_vm6, %v4901_v40, %v4903_v36  ;;  %4835 = vst [vmem:[%s7240_s10 + $0x38] sm:$0xff] %v2659_v53  ;;  %s7533_s10 = smov [#allocation18] }
 0x482   : >> { %4905 = vst [vmem:[%s7423_s5 + $0x38] sm:$0xff] %v2933_v51  ;;  %4836 = vst [vmem:[%s7236_s6 + $0x38] sm:$0xff] %v2666_v58  ;;  %s8001_s6 = sld [smem:[#allocation32_spill]] }
 0x483   : >> { %vm7986_vm7 = vmmov %vm7985_vm1 }
 0x484   : >> { %vm7987_vm9 = vmmov %vm7985_vm1 }
 0x485   : >> { %vm7988_vm8 = vmmov %vm7985_vm1 }
 0x486   : >> { %vm7989_vm2 = vmmov %vm7985_vm1 }
 0x487   : >> { %vm7990_vm10 = vmmov %vm7985_vm1 }
 0x488   : >> { %v2773_v60 = vld [vmem:[%s7531_s11] ss:$0 sm:$0xff]  ;;  %v4861_v39 = vld [vmem:[%s7531_s11 + $0x39] sm:$0x7f]  ;;  %v4862_v49 = vld [vmem:[%s7531_s11 + $0x38] ss:$0 sm:$0xff] }
 0x489   : >> { %v4864_v62 = vld [vmem:[%s7531_s11 + $0x31] sm:$0x7f]  ;;  %v4865_v55 = vld [vmem:[%s7531_s11 + $0x30] ss:$0 sm:$0xff]  ;;  %v4867_v48 = vld [vmem:[%s7531_s11 + $0x29] sm:$0x7f]  ;;  %v2782_v63 = vsel %vm7985_vm1, %v4858_v23, %v4861_v39 }
 0x48a   : >> { %4860 = vst [vmem:[%s7416_s7 + $0x1] sm:$0x1] %v2773_v60  ;;  %v2791_v2 = vsel %vm7986_vm7, %v4862_v49, %v4864_v62  ;;  %v2800_v4 = vsel %vm7987_vm9, %v4865_v55, %v4867_v48  ;;  %v4868_v46 = vld [vmem:[%s7531_s11 + $0x28] ss:$0 sm:$0xff]  ;;  %v4870_v50 = vld [vmem:[%s7531_s11 + $0x21] sm:$0x7f]  ;;  %vm7991_vm12 = vmmov %vm7985_vm1 }
 0x48b   : >> { %v4871_v42 = vld [vmem:[%s7531_s11 + $0x20] ss:$0 sm:$0xff]  ;;  %4863 = vst [vmem:[%s7531_s11 + $0x38] sm:$0xff] %v2782_v63  ;;  %v2809_v14 = vsel %vm7988_vm8, %v4868_v46, %v4870_v50  ;;  %v4873_v17 = vld [vmem:[%s7531_s11 + $0x19] sm:$0x7f]  ;;  %4866 = vst [vmem:[%s7531_s11 + $0x30] sm:$0xff] %v2791_v2 }
 0x48c   : >> { %v4874_v1 = vld [vmem:[%s7531_s11 + $0x18] ss:$0 sm:$0xff]  ;;  %v4876_v0 = vld [vmem:[%s7531_s11 + $0x11] sm:$0x7f]  ;;  %4869 = vst [vmem:[%s7531_s11 + $0x28] sm:$0xff] %v2800_v4  ;;  %v2818_v12 = vsel %vm7989_vm2, %v4871_v42, %v4873_v17  ;;  %4872 = vst [vmem:[%s7531_s11 + $0x20] sm:$0xff] %v2809_v14 }
 0x48d   : >> { %v2827_v61 = vsel %vm7990_vm10, %v4874_v1, %v4876_v0  ;;  %v4877_v41 = vld [vmem:[%s7531_s11 + $0x10] ss:$0 sm:$0xff]  ;;  %v4879_v10 = vld [vmem:[%s7531_s11 + $0x9] sm:$0x7f]  ;;  %v4880_v54 = vld [vmem:[%s7531_s11 + $0x8] ss:$0 sm:$0xff] }
 0x48e   : >> { %v2836_v43 = vsel %vm7991_vm12, %v4877_v41, %v4879_v10  ;;  %v4882_v13 = vld [vmem:[%s7531_s11 + $0x1] sm:$0x7f]  ;;  %4875 = vst [vmem:[%s7531_s11 + $0x18] sm:$0xff] %v2818_v12  ;;  %4878 = vst [vmem:[%s7531_s11 + $0x10] sm:$0xff] %v2827_v61  ;;  %v2937_v20 = vld [vmem:[%s7533_s10] ss:$0 sm:$0xff] }
 0x48f   : >> { %v4907_v3 = vld [vmem:[%s7533_s10 + $0x39] sm:$0x7f]  ;;  %vm7992_vm13 = vmmov %vm7985_vm1  ;;  %4881 = vst [vmem:[%s7531_s11 + $0x8] sm:$0xff] %v2836_v43  ;;  %v4908_v24 = vld [vmem:[%s7533_s10 + $0x38] ss:$0 sm:$0xff] }
 0x490   : >> { %v2844_v22 = vsel %vm7992_vm13, %v4880_v54, %v4882_v13  ;;  %4906 = vst [vmem:[%s7423_s5 + $0x1] sm:$0x1] %v2937_v20  ;;  %vm7993_vm14 = vmmov %vm7985_vm1  ;;  %v4910_v6 = vld [vmem:[%s7533_s10 + $0x31] sm:$0x7f]  ;;  %v4911_v25 = vld [vmem:[%s7533_s10 + $0x30] ss:$0 sm:$0xff] }
 0x491   : >> { %v2946_v23 = vsel %vm7993_vm14, %v4904_v44, %v4907_v3  ;;  %2846 = vst [vmem:[%s7531_s11] sm:$0xff] %v2844_v22  ;;  %vm7994_vm11 = vmmov %vm7985_vm1  ;;  %v4913_v27 = vld [vmem:[%s7533_s10 + $0x29] sm:$0x7f]  ;;  %v4914_v28 = vld [vmem:[%s7533_s10 + $0x28] ss:$0 sm:$0xff]  ;;  %s897_s11 = sadd.s32 1, %s8001_s6  }
 0x492   : >> { %4909 = vst [vmem:[%s7533_s10 + $0x38] sm:$0xff] %v2946_v23  ;;  %v2955_v26 = vsel %vm7994_vm11, %v4908_v24, %v4910_v6  ;;  %v4916_v45 = vld [vmem:[%s7533_s10 + $0x21] sm:$0x7f]  ;;  %vm7995_vm15 = vmmov %vm7985_vm1  ;;  %v4917_v30 = vld [vmem:[%s7533_s10 + $0x20] ss:$0 sm:$0xff]  ;;  %p894_p9 = scmp.ge.s32.totalorder %s897_s11, 127  }
 0x493   : >> { %4912 = vst [vmem:[%s7533_s10 + $0x30] sm:$0xff] %v2955_v26  ;;  %v2964_v7 = vsel %vm7995_vm15, %v4911_v25, %v4913_v27  ;;  %vm7996_vm0 = vmmov %vm7985_vm1  ;;  %v4919_v31 = vld [vmem:[%s7533_s10 + $0x19] sm:$0x7f]  ;;  %v4920_v32 = vld [vmem:[%s7533_s10 + $0x18] ss:$0 sm:$0xff]  ;;  %s578_s14 = smov (%p894_p9), [#allocation15]  ;;  %v663_v15 = vmov (%p894_p9), %v5759_v15  ;;  %v666_v16 = vmov (%p894_p9), %v5761_v16 }
 0x494   : >> { %v2973_v52 = vsel %vm7996_vm0, %v4914_v28, %v4916_v45  ;;  %4915 = vst [vmem:[%s7533_s10 + $0x28] sm:$0xff] %v2964_v7  ;;  %vm7997_vm3 = vmmov %vm7996_vm0  ;;  %v4922_v34 = vld [vmem:[%s7533_s10 + $0x11] sm:$0x7f]  ;;  %v4923_v59 = vld [vmem:[%s7533_s10 + $0x10] ss:$0 sm:$0xff]  ;;  %896 = sbr.rel (!%p894_p9) target bundleno = 408 (0x198), region = 802  ;;  %v577_v16 = vmov (%p894_p9), %v5761_v16 }
 0x495   : >> { %4918 = vst [vmem:[%s7533_s10 + $0x20] sm:$0xff] %v2973_v52  ;;  %v2982_v33 = vsel %vm7997_vm3, %v4917_v30, %v4919_v31  ;;  %v4925_v5 = vld [vmem:[%s7533_s10 + $0x9] sm:$0x7f]  ;;  %vm7998_vm4 = vmmov %vm7996_vm0  ;;  %v4926_v11 = vld [vmem:[%s7533_s10 + $0x8] ss:$0 sm:$0xff]  ;;  %vm8003_vm1 = vcmp.lt.s32.totalorder (%p894_p9), %v5759_v15, 64  ;;  %v7659_v15 = vmov (%p894_p9), %v5759_v15 }
 0x496   : >> { %4921 = vst [vmem:[%s7533_s10 + $0x18] sm:$0xff] %v2982_v33  ;;  %v2991_v9 = vsel %vm7998_vm4, %v4920_v32, %v4922_v34  ;;  %vm7999_vm5 = vmmov %vm7996_vm0  ;;  %v4928_v18 = vld [vmem:[%s7533_s10 + $0x1] sm:$0x7f]  ;;  %v5091_v56 = vld [vmem:[%s578_s14 + $0x8] sm:$0xff] (%p894_p9)  ;;  %s7635_s15 = smov (%p894_p9), [#allocation16]  ;;  %v596_v24 = vadd.s32 (%p894_p9), 8, %v577_v16  ;;  %vm589_vm4 = vcmp.eq.s32.totalorder (%p894_p9), %v577_v16, %v7659_v15 }
 0x497   : >> { %v3000_v8 = vsel %vm7999_vm5, %v4923_v59, %v4925_v5  ;;  %4924 = vst [vmem:[%s7533_s10 + $0x10] sm:$0xff] %v2991_v9  ;;  %vm8000_vm6 = vmmov %vm7996_vm0  ;;  %v584_v19 = vld [vmem:[%s578_s14] sm:$0xff] (%p894_p9)  ;;  %v5092_v21 = vld [vmem:[%s578_s14 + $0x10] sm:$0xff] (%p894_p9)  ;;  %v606_v31 = vadd.s32 (%p894_p9), 16, %v577_v16  ;;  %v616_v59 = vadd.s32 (%p894_p9), 24, %v577_v16  ;;  %v626_v5 = vadd.s32 (%p894_p9), 32, %v577_v16 }
 0x498   : >> { %4927 = vst [vmem:[%s7533_s10 + $0x8] sm:$0xff] %v3000_v8  ;;  %v3008_v47 = vsel %vm8000_vm6, %v4926_v11, %v4928_v18  ;;  %v585_v35 = vsel (%p894_p9), %vm8003_vm1, %v584_v19, 0.0  ;;  %vm8004_vm7 = vmmov (%p894_p9), %vm8003_vm1  ;;  %v5093_v40 = vld [vmem:[%s578_s14 + $0x18] sm:$0xff] (%p894_p9)  ;;  %v5094_v29 = vld [vmem:[%s578_s14 + $0x20] sm:$0xff] (%p894_p9)  ;;  %vm597_vm6 = vcmp.eq.s32.totalorder (%p894_p9), %v596_v24, %v7659_v15  ;;  %s7687_s16 = smov (%p894_p9), [#allocation17]  ;;  %v636_v8 = vadd.s32 (%p894_p9), 40, %v577_v16 }
 0x499   : >> { %3010 = vst [vmem:[%s7533_s10] sm:$0xff] %v3008_v47  ;;  %s8002_s10 = sld [smem:[#allocation31_spill]] (%p894_p9)  ;;  %v593_v37 = vsel (%p894_p9), %vm8004_vm7, %v5091_v56, 0.0  ;;  %vm8005_vm9 = vmmov (%p894_p9), %vm8003_vm1  ;;  %v586_v36 = vmul.f32 (%p894_p9), %v585_v35, %v585_v35  ;;  %v5095_v57 = vld [vmem:[%s578_s14 + $0x28] sm:$0xff] (%p894_p9)  ;;  %v5096_v49 = vld [vmem:[%s578_s14 + $0x30] sm:$0xff] (%p894_p9)  ;;  %v646_v11 = vadd.s32 (%p894_p9), 48, %v577_v16  ;;  %vm617_vm7 = vcmp.eq.s32.totalorder (%p894_p9), %v616_v59, %v7659_v15  ;;  %s7731_s17 = smov (%p894_p9), [#allocation18] }
 0x49a   : > { %v603_v38 = vsel (%p894_p9), %vm8005_vm9, %v5092_v21, 0.0  ;;  %v594_v44 = vmul.f32 (%p894_p9), %v593_v37, %v593_v37  ;;  %vm8006_vm8 = vmmov (%p894_p9), %vm8003_vm1  ;;  %v5097_v63 = vld [vmem:[%s578_s14 + $0x38] sm:$0xff] (%p894_p9)  ;;  %v673_v50 = vld [vmem:[%s7635_s15] sm:$0xff] (%p894_p9)  ;;  %vm627_vm9 = vcmp.eq.s32.totalorder (%p894_p9), %v626_v5, %v7659_v15 }
 0x49b   : > { %v604_v53 = vmul.f32 %v603_v38, %v603_v38  ;;  %v613_v51 = vsel %vm8006_vm8, %v5093_v40, 0.0  ;;  %vm8007_vm2 = vmmov %vm8003_vm1  ;;  %v5098_v1 = vld [vmem:[%s7635_s15 + $0x8] sm:$0xff]  ;;  %v5099_v41 = vld [vmem:[%s7635_s15 + $0x10] sm:$0xff]  ;;  %v590_v30 = vsel %vm589_vm4, 0.0, %v586_v36 }
 0x49c   : > { %v623_v58 = vsel %vm8007_vm2, %v5094_v29, 0.0  ;;  %v600_v60 = vadd.f32 %v594_v44, %v586_v36  ;;  %v614_v39 = vmul.f32 %v613_v51, %v613_v51  ;;  %vm8008_vm10 = vmmov %vm8003_vm1  ;;  %v5100_v10 = vld [vmem:[%s7635_s15 + $0x18] sm:$0xff]  ;;  %v5101_v43 = vld [vmem:[%s7635_s15 + $0x20] sm:$0xff]  ;;  %v598_v34 = vsel %vm597_vm6, 0.0, %v594_v44 }
 0x49d   : > { %v633_v62 = vsel %vm8008_vm10, %v5095_v57, 0.0  ;;  %v624_v48 = vmul.f32 %v623_v58, %v623_v58  ;;  %vm8009_vm12 = vmmov %vm8003_vm1  ;;  %v5102_v23 = vld [vmem:[%s7635_s15 + $0x28] sm:$0xff]  ;;  %v5103_v33 = vld [vmem:[%s7635_s15 + $0x30] sm:$0xff]  ;;  %v599_v9 = vadd.f32 %v598_v34, %v590_v30  ;;  %vm637_vm2 = vcmp.eq.s32.totalorder %v636_v8, %v7659_v15 }
 0x49e   : > { %v610_v55 = vadd.f32 %v604_v53, %v600_v60  ;;  %v643_v2 = vsel %vm8009_vm12, %v5096_v49, 0.0  ;;  %v7639_v46 = vmul.f32 %v633_v62, %v633_v62  ;;  %vm8010_vm13 = vmmov %vm8003_vm1  ;;  %v5104_v47 = vld [vmem:[%s7635_s15 + $0x38] sm:$0xff]  ;;  %v618_v35 = vsel %vm617_vm7, 0.0, %v614_v39  ;;  %v732_v40 = vld [vmem:[%s7687_s16] sm:$0xff] }
 0x49f   : > { %s3605_s13 = sadd.s32 1, %s8002_s10   ;;  %v653_v42 = vsel %vm8010_vm13, %v5097_v63, 0.0  ;;  %v7644_v17 = vmul.f32 %v643_v2, %v643_v2  ;;  %vm8011_vm14 = vmmov %vm8003_vm1  ;;  %v628_v29 = vsel %vm627_vm9, 0.0, %v624_v48  ;;  %v656_v36 = vadd.s32 56, %v577_v16  ;;  %v5105_v58 = vld [vmem:[%s7687_s16 + $0x8] sm:$0xff] }
 0x4a0   : > { %v620_v4 = vadd.f32 %v614_v39, %v610_v55  ;;  %v674_v0 = vsel %vm8011_vm14, %v673_v50, 0.0  ;;  %v7650_v61 = vmul.f32 %v653_v42, %v653_v42  ;;  %vm8012_vm11 = vmmov %vm8003_vm1  ;;  %vm647_vm12 = vcmp.eq.s32.totalorder %v646_v11, %v7659_v15  ;;  %v5107_v42 = vld [vmem:[%s7687_s16 + $0x18] sm:$0xff]  ;;  %v791_v59 = vld [vmem:[%s7731_s17] sm:$0xff]  ;;  %p890_p10 = scmp.ge.s32.totalorder %s3605_s13, 15  ;;  %s8034_s10 = smov %s3605_s13 }
 0x4a1   : > { %v680_v54 = vsel %vm8012_vm11, %v5098_v1, 0.0  ;;  %v7662_v20 = vmul.f32 %v674_v0, %v674_v0  ;;  %vm8013_vm15 = vmmov %vm8003_vm1  ;;  %v638_v60 = vsel %vm637_vm2, 0.0, %v7639_v46  ;;  %vm657_vm14 = vcmp.eq.s32.totalorder %v656_v36, %v7659_v15  ;;  %v5112_v11 = vld [vmem:[%s7731_s17 + $0x8] sm:$0xff] }
 0x4a2   : > { %v630_v14 = vadd.f32 %v624_v48, %v620_v4  ;;  %v686_v3 = vsel %vm8013_vm15, %v5099_v41, 0.0  ;;  %vm8014_vm0 = vmmov %vm8003_vm1  ;;  %v7670_v25 = vmul.f32 %v680_v54, %v680_v54  ;;  %vm607_vm1 = vcmp.eq.s32.totalorder %v606_v31, %v7659_v15  ;;  %v5106_v48 = vld [vmem:[%s7687_s16 + $0x10] sm:$0xff]  ;;  %v5108_v41 = vld [vmem:[%s7687_s16 + $0x20] sm:$0xff] }
 0x4a3   : > { %v692_v22 = vsel %vm8014_vm0, %v5100_v10, 0.0  ;;  %vm8015_vm3 = vmmov %vm8014_vm0  ;;  %v7676_v28 = vmul.f32 %v686_v3, %v686_v3  ;;  %v608_v19 = vsel %vm607_vm1, 0.0, %v604_v53  ;;  %v648_v63 = vsel %vm647_vm12, 0.0, %v7644_v17  ;;  %v5111_v31 = vld [vmem:[%s7687_s16 + $0x38] sm:$0xff] }
 0x4a4   : > { %v640_v12 = vadd.f32 %v7639_v46, %v630_v14  ;;  %v698_v26 = vsel %vm8015_vm3, %v5101_v43, 0.0  ;;  %v7678_v45 = vmul.f32 %v692_v22, %v692_v22  ;;  %vm8016_vm5 = vmmov %vm8014_vm0  ;;  %v609_v21 = vadd.f32 %v608_v19, %v599_v9 }
 0x4a5   : > { %v704_v7 = vsel %vm8016_vm5, %v5102_v23, 0.0  ;;  %v7682_v52 = vmul.f32 %v698_v26, %v698_v26  ;;  %vm8017_vm8 = vmmov %vm8014_vm0  ;;  %v658_v14 = vsel %vm657_vm14, 0.0, %v7650_v61  ;;  %v722_v15 = vmov %v5759_v15 }
 0x4a6   : > { %v650_v13 = vadd.f32 %v7644_v17, %v640_v12  ;;  %v710_v56 = vsel %vm8017_vm8, %v5103_v33, 0.0  ;;  %v7698_v38 = vmul.f32 %v704_v7, %v704_v7  ;;  %vm8018_vm10 = vmmov %vm8014_vm0  ;;  %v619_v53 = vadd.f32 %v618_v35, %v609_v21 }
 0x4a7   : > { %v716_v44 = vsel %vm8018_vm10, %v5104_v47, 0.0  ;;  %v711_v57 = vmul.f32 %v710_v56, %v710_v56  ;;  %vm8019_vm13 = vmmov %vm8014_vm0  ;;  %v725_v16 = vmov %v5761_v16  ;;  %v751_v10 = vsel %vm8014_vm0, %v5107_v42, 0.0  ;;  %v5113_v56 = vld [vmem:[%s7731_s17 + $0x10] sm:$0xff] }
 0x4a8   : > { %v660_v6 = vadd.f32 %v7650_v61, %v650_v13  ;;  %v733_v39 = vsel %vm8019_vm13, %v732_v40, 0.0  ;;  %v629_v49 = vadd.f32 %v628_v29, %v619_v53  ;;  %v717_v55 = vmul.f32 %v716_v44, %v716_v44  ;;  %vm8020_vm11 = vmmov %vm8014_vm0  ;;  %v5109_v61 = vld [vmem:[%s7687_s16 + $0x28] sm:$0xff]  ;;  %v5114_v40 = vld [vmem:[%s7731_s17 + $0x18] sm:$0xff] }
 0x4a9   : > { %v739_v2 = vsel %vm8020_vm11, %v5105_v58, 0.0  ;;  %v734_v46 = vmul.f32 %v733_v39, %v733_v39  ;;  %vm8021_vm15 = vmmov %vm8014_vm0  ;;  %v752_v24 = vmul.f32 %v751_v10, %v751_v10  ;;  %v784_v16 = vmov %v5761_v16 }
 0x4aa   : > { %v677_v27 = vadd.f32 %v7662_v20, %v660_v6  ;;  %v639_v4 = vadd.f32 %v638_v60, %v629_v49  ;;  %v745_v1 = vsel %vm8021_vm15, %v5106_v48, 0.0  ;;  %v740_v12 = vmul.f32 %v739_v2, %v739_v2  ;;  %vm8022_vm3 = vmmov %vm8014_vm0  ;;  %v5110_v6 = vld [vmem:[%s7687_s16 + $0x30] sm:$0xff]  ;;  %v5116_v49 = vld [vmem:[%s7731_s17 + $0x28] sm:$0xff] }
 0x4ab   : > { %v746_v13 = vmul.f32 %v745_v1, %v745_v1  ;;  %v757_v3 = vsel %vm8022_vm3, %v5108_v41, 0.0  ;;  %vm8023_vm4 = vmmov %vm8014_vm0  ;;  %v5117_v2 = vld [vmem:[%s7731_s17 + $0x30] sm:$0xff]  ;;  %v781_v15 = vmov %v5759_v15 }
 0x4ac   : > { %v683_v32 = vadd.f32 %v7670_v25, %v677_v27  ;;  %v649_v0 = vadd.f32 %v648_v63, %v639_v4  ;;  %v763_v26 = vsel %vm8023_vm4, %v5109_v61, 0.0  ;;  %v758_v30 = vmul.f32 %v757_v3, %v757_v3  ;;  %vm8024_vm5 = vmmov %vm8014_vm0 }
 0x4ad   : > { %v764_v34 = vmul.f32 %v763_v26, %v763_v26  ;;  %vm8025_vm6 = vmmov %vm8014_vm0  ;;  %vm796_vm14 = vcmp.eq.s32.totalorder %v784_v16, %v781_v15  ;;  %v825_v26 = vadd.s32 24, %v784_v16 }
 0x4ae   : > { %v689_v18 = vadd.f32 %v7676_v28, %v683_v32  ;;  %v659_v54 = vadd.f32 %v658_v14, %v649_v0  ;;  %v769_v32 = vsel %vm8024_vm5, %v5110_v6, 0.0  ;;  %v775_v5 = vsel %vm8025_vm6, %v5111_v31, 0.0  ;;  %vm8026_vm1 = vmmov %vm8014_vm0  ;;  %v5118_v14 = vld [vmem:[%s7731_s17 + $0x38] sm:$0xff] }
 0x4af   : > { %vm8027_vm7 = vmmov %vm8014_vm0 }
 0x4b0   : > { %v695_v37 = vadd.f32 %v7678_v45, %v689_v18  ;;  %v676_v22 = vadd.f32 %v7662_v20, %v659_v54  ;;  %v792_v18 = vsel %vm8026_vm1, %v791_v59, 0.0  ;;  %v802_v21 = vsel %vm8027_vm7, %v5112_v11, 0.0  ;;  %vm8028_vm9 = vmmov %vm8014_vm0 }
 0x4b1   : > { %v812_v29 = vsel %vm8028_vm9, %v5113_v56, 0.0  ;;  %v803_v53 = vmul.f32 %v802_v21, %v802_v21  ;;  %vm8029_vm8 = vmmov %vm8014_vm0 }
 0x4b2   : > { %v701_v51 = vadd.f32 %v7682_v52, %v695_v37  ;;  %v682_v27 = vadd.f32 %v7670_v25, %v676_v22  ;;  %v770_v25 = vmul.f32 %v769_v32, %v769_v32  ;;  %v813_v39 = vmul.f32 %v812_v29, %v812_v29  ;;  %vm8030_vm2 = vmmov %vm8014_vm0 }
 0x4b3   : > { %vm8031_vm10 = vmmov %vm8014_vm0 }
 0x4b4   : > { %v707_v62 = vadd.f32 %v7698_v38, %v701_v51  ;;  %v688_v20 = vadd.f32 %v7676_v28, %v682_v27  ;;  %v776_v28 = vmul.f32 %v775_v5, %v775_v5  ;;  %v822_v51 = vsel %vm8029_vm8, %v5114_v40, 0.0  ;;  %vm8032_vm12 = vmmov %vm8014_vm0 }
 0x4b5   : > { %v823_v63 = vmul.f32 %v822_v51, %v822_v51  ;;  %vm8033_vm13 = vmmov %vm8014_vm0  ;;  %vm826_vm0 = vcmp.eq.s32.totalorder %v825_v26, %v781_v15 }
 0x4b6   : > { %v713_v50 = vadd.f32 %v711_v57, %v707_v62  ;;  %v694_v9 = vadd.f32 %v7678_v45, %v688_v20  ;;  %v793_v45 = vmul.f32 %v792_v18, %v792_v18 }
 0x4b7   : > { %v827_v5 = vsel %vm826_vm0, 0.0, %v823_v63 }
 0x4b8   : > { %v719_v17 = vadd.f32 %v717_v55, %v713_v50  ;;  %v700_v47 = vadd.f32 %v7682_v52, %v694_v9  ;;  %v5115_v52 = vld [vmem:[%s7731_s17 + $0x20] sm:$0xff] }
 0x4ba   : > { %v736_v43 = vadd.f32 %v734_v46, %v719_v17  ;;  %v706_v35 = vadd.f32 %v7698_v38, %v700_v47  ;;  %v832_v38 = vsel %vm8030_vm2, %v5115_v52, 0.0 }
 0x4bb   : > { %v833_v42 = vmul.f32 %v832_v38, %v832_v38 }
 0x4bc   : > { %v742_v23 = vadd.f32 %v740_v12, %v736_v43  ;;  %v712_v36 = vadd.f32 %v711_v57, %v706_v35  ;;  %v842_v57 = vsel %vm8031_vm10, %v5116_v49, 0.0  ;;  %v805_v43 = vadd.s32 8, %v784_v16 }
 0x4bd   : > { %v843_v17 = vmul.f32 %v842_v57, %v842_v57 }
 0x4be   : > { %v748_v7 = vadd.f32 %v746_v13, %v742_v23  ;;  %v718_v58 = vadd.f32 %v717_v55, %v712_v36  ;;  %v852_v55 = vsel %vm8032_vm12, %v5117_v2, 0.0  ;;  %v815_v23 = vadd.s32 16, %v784_v16 }
 0x4bf   : > { %v853_v54 = vmul.f32 %v852_v55, %v852_v55  ;;  %vm806_vm11 = vcmp.eq.s32.totalorder %v805_v43, %v781_v15 }
 0x4c0   : > { %v754_v33 = vadd.f32 %v752_v24, %v748_v7  ;;  %v735_v62 = vadd.f32 %v734_v46, %v718_v58  ;;  %v862_v46 = vsel %vm8033_vm13, %v5118_v14, 0.0  ;;  %v797_v7 = vsel %vm796_vm14, 0.0, %v793_v45 }
 0x4c1   : > { %v863_v3 = vmul.f32 %v862_v46, %v862_v46  ;;  %vm816_vm15 = vcmp.eq.s32.totalorder %v815_v23, %v781_v15  ;;  %v807_v32 = vsel %vm806_vm11, 0.0, %v803_v53 }
 0x4c2   : > { %v760_v8 = vadd.f32 %v758_v30, %v754_v33  ;;  %v741_v4 = vadd.f32 %v740_v12, %v735_v62  ;;  %v817_v33 = vsel %vm816_vm15, 0.0, %v813_v39 }
 0x4c4   : > { %v766_v19 = vadd.f32 %v764_v34, %v760_v8  ;;  %v747_v1 = vadd.f32 %v746_v13, %v741_v4  ;;  %v865_v8 = vadd.s32 56, %v784_v16 }
 0x4c6   : > { %v772_v37 = vadd.f32 %v770_v25, %v766_v19  ;;  %v753_v41 = vadd.f32 %v752_v24, %v747_v1  ;;  %v835_v24 = vadd.s32 32, %v784_v16  ;;  %vm866_vm6 = vcmp.eq.s32.totalorder %v865_v8, %v781_v15 }
 0x4c7   : > { %v867_v56 = vsel %vm866_vm6, 0.0, %v863_v3 }
 0x4c8   : > { %v778_v44 = vadd.f32 %v776_v28, %v772_v37  ;;  %v759_v12 = vadd.f32 %v758_v30, %v753_v41  ;;  %v845_v30 = vadd.s32 40, %v784_v16  ;;  %vm836_vm3 = vcmp.eq.s32.totalorder %v835_v24, %v781_v15 }
 0x4ca   : > { %v799_v60 = vadd.f32 %v793_v45, %v778_v44  ;;  %v765_v22 = vadd.f32 %v764_v34, %v759_v12  ;;  %v855_v34 = vadd.s32 48, %v784_v16  ;;  %vm846_vm4 = vcmp.eq.s32.totalorder %v845_v30, %v781_v15 }
 0x4cb   : > { %v847_v18 = vsel %vm846_vm4, 0.0, %v843_v17 }
 0x4cc   : > { %v809_v48 = vadd.f32 %v803_v53, %v799_v60  ;;  %v771_v6 = vadd.f32 %v770_v25, %v765_v22  ;;  %v837_v25 = vsel %vm836_vm3, 0.0, %v833_v42  ;;  %vm856_vm5 = vcmp.eq.s32.totalorder %v855_v34, %v781_v15 }
 0x4cd   : > { %v857_v19 = vsel %vm856_vm5, 0.0, %v853_v54 }
 0x4ce   : > { %v819_v50 = vadd.f32 %v813_v39, %v809_v48  ;;  %v777_v31 = vadd.f32 %v776_v28, %v771_v6 }
 0x4d0   : > { %v829_v0 = vadd.f32 %v823_v63, %v819_v50  ;;  %v798_v20 = vadd.f32 %v797_v7, %v777_v31 }
 0x4d2   : > { %v839_v10 = vadd.f32 %v833_v42, %v829_v0  ;;  %v808_v59 = vadd.f32 %v807_v32, %v798_v20 }
 0x4d4   : > { %v849_v61 = vadd.f32 %v843_v17, %v839_v10  ;;  %v818_v9 = vadd.f32 %v817_v33, %v808_v59 }
 0x4d6   : > { %v859_v13 = vadd.f32 %v853_v54, %v849_v61  ;;  %v828_v11 = vadd.f32 %v827_v5, %v818_v9 }
 0x4d8   : > { %v869_v27 = vadd.f32 %v863_v3, %v859_v13  ;;  %v838_v47 = vadd.f32 %v837_v25, %v828_v11 }
 0x4da   : > { %870 = vadd.xlane.f32.xlu0 %v869_v27  ;;  %v848_v28 = vadd.f32 %v847_v18, %v838_v47 }
 0x4dc   : > { %v858_v21 = vadd.f32 %v857_v19, %v848_v28 }
 0x4de   : > { %v868_v35 = vadd.f32 %v867_v56, %v858_v21 }
 0x4e0   : > { %878 = vadd.xlane.f32.xlu0 %v868_v35 }
 0x567   : > { %v871_v37 = vpop.xlane.xlu0 %870 }
 0x568   : > { %v872_v45 = vrot.slane %v871_v37, 4 }
 0x56a   : > { %v873_v40 = vadd.f32 %v872_v45, %v871_v37 }
 0x56c   : > { %v874_v29 = vrot.slane %v873_v40, 2 }
 0x56d   : > { %v879_v36 = vpop.xlane.xlu0 %878 }
 0x56e   : > { %v880_v44 = vrot.slane %v879_v36, 4  ;;  %v875_v52 = vadd.f32 %v874_v29, %v873_v40 }
 0x570   : > { %v881_v53 = vadd.f32 %v880_v44, %v879_v36  ;;  %v876_v60 = vrot.slane %v875_v52, 1 }
 0x572   : > { %v882_v51 = vrot.slane %v881_v53, 2  ;;  %v877_v38 = vadd.f32 %v876_v60, %v875_v52 }
 0x574   : > { %v883_v58 = vadd.f32 %v882_v51, %v881_v53 }
 0x576   : > { %v884_v39 = vrot.slane %v883_v58, 1 }
 0x578   : > { %v885_v49 = vadd.f32 %v884_v39, %v883_v58 }
 0x57a   : > { %5143 = vpush %v885_v49 }
 0x57b   : > { %5145 = vpush %v877_v38 }
 0x5ab   : > { %s5144_s2 = spop %5143 }
 0x5ac   : > { %s5146_s18 = spop %5145 }
 0x5ad   : > { %s888_s19 = smul.f32 1e-10, %s5146_s18 }
 0x5af   : > { %p889_p11 = scmp.le.f32.partialorder %s5144_s2, %s888_s19 }
 0x5b1   : > { %p891_p12 = por %p890_p10, %p889_p11 }
 0x5b3   :  { %3607 = sbr.rel (!%p891_p12) target bundleno = 407 (0x197), region = 813 }
 0x5ba PF:  { %s7775_s20 = smov [#allocation15]  ;;  %v7778_v15 = vmov %v5759_v15  ;;  %v3615_v16 = vmov %v5761_v16  ;;  %s5659_s21 = smov [#allocation10]  }
 0x5bb   :  { %v7782_v15 = vmov %v5759_v15  ;;  %v7785_v16 = vmov %v5761_v16  ;;  %s3882_s3 = sshll.u32 %s5659_s21, 4  ;;  %v3616_v62 = vld [vmem:[%s7775_s20] sm:$0xff]  ;;  %vm3619_vm1 = vcmp.eq.s32.totalorder %v3615_v16, %v7778_v15  ;;  %v5119_v48 = vld [vmem:[%s7775_s20 + $0x8] sm:$0xff]  ;;  %v3624_v63 = vadd.s32 8, %v3615_v16  ;;  %v5120_v57 = vld [vmem:[%s7775_s20 + $0x10] sm:$0xff]  ;;  %s3883_s3 = int_to_ptr.vmem [resolvable:$true] %s3882_s3 }
 0x5bc   :  { %v3620_v2 = vsel %vm3619_vm1, %v3616_v62, 0.0  ;;  %v3630_v4 = vadd.s32 16, %v3615_v16  ;;  %v3636_v50 = vadd.s32 24, %v3615_v16  ;;  %v3642_v42 = vadd.s32 32, %v3615_v16  ;;  %s5402_s22 = scalar_lea.vmem %s3883_s3, 1024  ;;  %p5407_p0 = scmp.lt.s32.totalorder %s3883_s3, %s3883_s3 }
 0x5bd   :  { %p5403_p13 = scmp.ne.s32.totalorder %s3883_s3, %s5402_s22  ;;  %p5408_p1 = scmp.lt.s32.totalorder %s5402_s22, %s5402_s22 }
 0x5bf   :  { %p5409_p2 = por %p5408_p1, %p5407_p0 }
 0x5c1   :  { %p5410_p3 = pnand %p5409_p2, %p5403_p13 }
 0x5c3   :  { %5413 = shalt.err (!%p5410_p3)
}
 0x5c4   :  { %s8035_s24 = sld [smem:[#allocation39_spill]] }
 0x5ca   :  { %s5414_s25 = scalar_lea.hbm %s8035_s24, 1024 }
 0x5cb   :  { %p5415_p4 = scmp.ne.s32.totalorder %s8035_s24, %s5414_s25  ;;  %p5418_p5 = scmp.lt.u32.totalorder %s5414_s25, %s8035_s24 }
 0x5cd   :  { %p5420_p6 = pnand %p5418_p5, %p5415_p4 }
 0x5cf   :  { %5423 = shalt.err (!%p5420_p6)
}
 0x5d0   :  { %3885 = dma.vmem_to_hbm [thread:$0]  %s3883_s3, 1024, %s8035_s24, [#allocation11]   ;;  %vm3625_vm7 = vcmp.eq.s32.totalorder %v3624_v63, %v7778_v15  ;;  %v5121_v14 = vld [vmem:[%s7775_s20 + $0x18] sm:$0xff]  ;;  %v3648_v55 = vadd.s32 40, %v3615_v16  ;;  %v3654_v1 = vadd.s32 48, %v3615_v16  ;;  %vm3681_vm9 = vcmp.eq.s32.totalorder %v7785_v16, %v7782_v15  ;;  %v5122_v17 = vld [vmem:[%s7775_s20 + $0x20] sm:$0xff] }
 0x5d1   :  { %v3626_v0 = vsel %vm3625_vm7, %v5119_v48, %v3620_v2  ;;  %vm3631_vm8 = vcmp.eq.s32.totalorder %v3630_v4, %v7778_v15  ;;  %vm3637_vm2 = vcmp.eq.s32.totalorder %v3636_v50, %v7778_v15  ;;  %vm3643_vm10 = vcmp.eq.s32.totalorder %v3642_v42, %v7778_v15  ;;  %s7811_s12 = smov [#allocation18]  ;;  %v5123_v41 = vld [vmem:[%s7775_s20 + $0x28] sm:$0xff]  ;;  %v5124_v43 = vld [vmem:[%s7775_s20 + $0x30] sm:$0xff]  ;;  %v5125_v6 = vld [vmem:[%s7775_s20 + $0x38] sm:$0xff]  ;;  %s5660_s4 = smov [#allocation8]  }
 0x5d2   :  { %v3632_v46 = vsel %vm3631_vm8, %v5120_v57, %v3626_v0  ;;  %vm3649_vm12 = vcmp.eq.s32.totalorder %v3648_v55, %v7778_v15  ;;  %vm3655_vm13 = vcmp.eq.s32.totalorder %v3654_v1, %v7778_v15  ;;  %v3660_v10 = vadd.s32 56, %v3615_v16  ;;  %v3678_v54 = vld [vmem:[%s7811_s12] sm:$0xff]  ;;  %v5126_v3 = vld [vmem:[%s7811_s12 + $0x8] sm:$0xff]  ;;  %v5127_v26 = vld [vmem:[%s7811_s12 + $0x10] sm:$0xff]  ;;  %s3875_s8 = sshll.u32 %s5660_s4, 4  ;;  %s5661_s9 = smov [#allocation12]   ;;  %s3876_s8 = int_to_ptr.vmem [resolvable:$true] %s3875_s8 }
 0x5d3   :  { %v3638_v12 = vsel %vm3637_vm2, %v5121_v14, %v3632_v46  ;;  %v3682_v61 = vsel %vm3681_vm9, %v3678_v54, 0.0  ;;  %v3686_v22 = vadd.s32 8, %v7785_v16  ;;  %v3692_v23 = vadd.s32 16, %v7785_v16  ;;  %s3889_s7 = sshll.u32 %s5661_s9, 4  ;;  %v5128_v24 = vld [vmem:[%s7811_s12 + $0x18] sm:$0xff]  ;;  %v5129_v33 = vld [vmem:[%s7811_s12 + $0x20] sm:$0xff]  ;;  %p5429_p8 = scmp.lt.s32.totalorder %s3876_s8, %s3876_s8  ;;  %s7832_s7 = int_to_ptr.vmem [resolvable:$true] %s3889_s7 }
 0x5d4   :  { %v3644_v13 = vsel %vm3643_vm10, %v5122_v17, %v3638_v12  ;;  %vm3661_vm14 = vcmp.eq.s32.totalorder %v3660_v10, %v7778_v15  ;;  %v3698_v27 = vadd.s32 24, %v7785_v16  ;;  %v3704_v7 = vadd.s32 32, %v7785_v16  ;;  %s5424_s5 = scalar_lea.vmem %s3876_s8, 1024 }
 0x5d5   :  { %v3650_v31 = vsel %vm3649_vm12, %v5123_v41, %v3644_v13  ;;  %vm3687_vm11 = vcmp.eq.s32.totalorder %v3686_v22, %v7782_v15  ;;  %vm3693_vm15 = vcmp.eq.s32.totalorder %v3692_v23, %v7782_v15  ;;  %v3710_v32 = vadd.s32 40, %v7785_v16  ;;  %p5425_p7 = scmp.ne.s32.totalorder %s3876_s8, %s5424_s5  ;;  %p5430_p9 = scmp.lt.s32.totalorder %s5424_s5, %s5424_s5 }
 0x5d6   :  { %v3656_v20 = vsel %vm3655_vm13, %v5124_v43, %v3650_v31  ;;  %v3688_v30 = vsel %vm3687_vm11, %v5126_v3, %v3682_v61  ;;  %vm3699_vm0 = vcmp.eq.s32.totalorder %v3698_v27, %v7782_v15  ;;  %vm3705_vm3 = vcmp.eq.s32.totalorder %v3704_v7, %v7782_v15 }
 0x5d7   :  { %p5431_p10 = por %p5430_p9, %p5429_p8 }
 0x5d9   :  { %p5432_p11 = pnand %p5431_p10, %p5425_p7 }
 0x5db   :  { %5435 = shalt.err (!%p5432_p11)
}
 0x5dc   :  { %s8036_s6 = sld [smem:[#allocation38_spill]] }
 0x5e2   :  { %s5436_s13 = scalar_lea.hbm %s8036_s6, 1024 }
 0x5e3   :  { %p5437_p12 = scmp.ne.s32.totalorder %s8036_s6, %s5436_s13  ;;  %p5440_p13 = scmp.lt.u32.totalorder %s5436_s13, %s8036_s6 }
 0x5e5   :  { %p5442_p0 = pnand %p5440_p13, %p5437_p12 }
 0x5e7   :  { %5445 = shalt.err (!%p5442_p0)
}
 0x5e8   :  { %3878 = dma.vmem_to_hbm [thread:$0]  %s3876_s8, 1024, %s8036_s6, [#allocation9]   ;;  %v3662_v59 = vsel %vm3661_vm14, %v5125_v6, %v3656_v20  ;;  %v3694_v34 = vsel %vm3693_vm15, %v5127_v26, %v3688_v30  ;;  %v5130_v5 = vld [vmem:[%s7811_s12 + $0x28] sm:$0xff]  ;;  %vm3711_vm4 = vcmp.eq.s32.totalorder %v3710_v32, %v7782_v15  ;;  %v3716_v9 = vadd.s32 48, %v7785_v16 }
 0x5e9   :  { %s5446_s19 = scalar_lea.vmem %s7832_s7, 1024  ;;  %p5451_p2 = scmp.lt.s32.totalorder %s7832_s7, %s7832_s7 }
 0x5ea   :  { %p5447_p1 = scmp.ne.s32.totalorder %s7832_s7, %s5446_s19  ;;  %p5452_p3 = scmp.lt.s32.totalorder %s5446_s19, %s5446_s19 }
 0x5ec   :  { %p5453_p4 = por %p5452_p3, %p5451_p2 }
 0x5ee   :  { %p5454_p5 = pnand %p5453_p4, %p5447_p1 }
 0x5f0   :  { %5457 = shalt.err (!%p5454_p5)
}
 0x5f1   :  { %s8037_s3 = sld [smem:[#allocation40_spill]] }
 0x5f7   :  { %s5458_s22 = scalar_lea.hbm %s8037_s3, 1024 }
 0x5f8   :  { %p5459_p6 = scmp.ne.s32.totalorder %s8037_s3, %s5458_s22  ;;  %p5462_p7 = scmp.lt.u32.totalorder %s5458_s22, %s8037_s3 }
 0x5fa   :  { %p5464_p8 = pnand %p5462_p7, %p5459_p6 }
 0x5fc   :  { %5467 = shalt.err (!%p5464_p8)
}
 0x5fd   :  { %3892 = dma.vmem_to_hbm [thread:$0]  %s7832_s7, 1024, %s8037_s3, [#allocation11]   ;;  %v3663_v8 = vrot.slane %v3662_v59, 4  ;;  %v3700_v25 = vsel %vm3699_vm0, %v5128_v24, %v3694_v34  ;;  %v5131_v11 = vld [vmem:[%s7811_s12 + $0x30] sm:$0xff]  ;;  %v3722_v18 = vadd.s32 56, %v7785_v16  ;;  %vm3717_vm5 = vcmp.eq.s32.totalorder %v3716_v9, %v7782_v15  ;;  %v5132_v19 = vld [vmem:[%s7811_s12 + $0x38] sm:$0xff] }
 0x5fe   :  { %v3706_v47 = vsel %vm3705_vm3, %v5129_v33, %v3700_v25  ;;  %s5662_s28 = smov [#allocation13]  }
 0x5ff   :  { %s3896_s29 = sshll.u32 %s5662_s28, 4  ;;  %v3664_v28 = vadd.f32 %v3663_v8, %v3662_v59  ;;  %v3712_v56 = vsel %vm3711_vm4, %v5130_v5, %v3706_v47  ;;  %vm3723_vm6 = vcmp.eq.s32.totalorder %v3722_v18, %v7782_v15  ;;  %s3897_s29 = int_to_ptr.vmem [resolvable:$true] %s3896_s29 }
 0x600   :  { %v3718_v21 = vsel %vm3717_vm5, %v5131_v11, %v3712_v56  ;;  %s5468_s30 = scalar_lea.vmem %s3897_s29, 1024  ;;  %p5473_p10 = scmp.lt.s32.totalorder %s3897_s29, %s3897_s29 }
 0x601   :  { %p5469_p9 = scmp.ne.s32.totalorder %s3897_s29, %s5468_s30  ;;  %p5474_p11 = scmp.lt.s32.totalorder %s5468_s30, %s5468_s30 }
 0x603   :  { %p5475_p12 = por %p5474_p11, %p5473_p10 }
 0x605   :  { %p5476_p13 = pnand %p5475_p12, %p5469_p9 }
 0x607   :  { %5479 = shalt.err (!%p5476_p13)
}
 0x608   :  { %s8038_s12 = sld [smem:[#allocation41_spill]] }
 0x60e   :  { %s5480_s8 = scalar_lea.hbm %s8038_s12, 1024 }
 0x60f   :  { %p5481_p0 = scmp.ne.s32.totalorder %s8038_s12, %s5480_s8  ;;  %p5484_p1 = scmp.lt.u32.totalorder %s5480_s8, %s8038_s12 }
 0x611   :  { %p5486_p2 = pnand %p5484_p1, %p5481_p0 }
 0x613   :  { %5489 = shalt.err (!%p5486_p2)
}
 0x614   :  { %3899 = dma.vmem_to_hbm [thread:$0]  %s3897_s29, 1024, %s8038_s12, [#allocation14]   ;;  %v3665_v16 = vrot.slane %v3664_v28, 2  ;;  %v3724_v35 = vsel %vm3723_vm6, %v5132_v19, %v3718_v21 }
 0x615   :  { %v3725_v37 = vrot.slane %v3724_v35, 4  ;;  %s3609_s13 = smov [#allocation4]  ;;  %s3671_s14 = smov [#allocation6] }
 0x616   :  { %v3666_v45 = vadd.f32 %v3665_v16, %v3664_v28  ;;  %s8039_s17 = sld [smem:[#allocation36_spill]]  ;;  %s8040_s19 = sld [smem:[#allocation37_spill]] }
 0x617   :  { %v3726_v40 = vadd.f32 %v3725_v37, %v3724_v35 }
 0x618   :  { %v3667_v29 = vrot.slane %v3666_v45, 1 }
 0x619   :  { %v3727_v36 = vrot.slane %v3726_v40, 2 }
 0x61a   :  { %v3668_v44 = vadd.f32 %v3667_v29, %v3666_v45 }
 0x61b   :  { %v3728_v53 = vadd.f32 %v3727_v36, %v3726_v40 }
 0x61c   :  { %3669 = vst [vmem:[%s3609_s13] sm:$0x1] %v3668_v44 }
 0x61d   :  { %v3729_v52 = vrot.slane %v3728_v53, 1 }
 0x61f   :  { %v3730_v51 = vadd.f32 %v3729_v52, %v3728_v53 }
 0x621   :  { %3731 = vst [vmem:[%s3671_s14] sm:$0x1] %v3730_v51 }
 0x623   :  { %v3735_v58 = vld [vmem:[#allocation4] sm:$0x1] }
 0x624   :  { %3737 = vst [vmem:[#allocation5] sm:$0x1] %v3735_v58 }
 0x628   :  { %v3741_v60 = vld [vmem:[#allocation6] sm:$0x1] }
 0x629   :  { %3743 = vst [vmem:[#allocation7] sm:$0x1] %v3741_v60 }
 0x62b   :  { %v3806_v39 = vld [vmem:[#allocation5] sm:$0x1] }
 0x62c   :  { %3807 = vst [vmem:[%s8039_s17] sm:$0x1] %v3806_v39 }
 0x630   :  { %v3870_v15 = vld [vmem:[#allocation7] sm:$0x1] }
 0x631   :  { %3871 = vst [vmem:[%s8040_s19] sm:$0x1] %v3870_v15 }
 0x632   :  { %5610 = dma.done.wait [#allocation9], 1024  }
 0x633   :  { %5611 = vsyncadd [#allocation9], 4294966272 }
 0x634   :  { %5612 = dma.done.wait [#allocation11], 2048  }
 0x635   :  { %5613 = vsyncadd [#allocation11], 4294965248 }
 0x636   :  { %5614 = dma.done.wait [#allocation14], 1024  }
 0x637   :  { %5615 = vsyncadd [#allocation14], 4294966272 }
 0x638   :  { %3908 = vsyncpa [#allocation9], 1 }
 0x639   :  { %3909 = vsyncpa [#allocation11], 1 }
 0x63a   :  { %3910 = vsyncpa [#allocation14], 1 }

</bundles_post_ra>
